<compile_context>
chip_gen: v5e
topology: v5e:2x2
jax: 0.10.0
libtpu: 0.0.40
codegen_flags: <defaults>
</compile_context>

<pallas_src>
import functools

import jax
import jax.numpy as jnp
from jax.experimental import pallas as pl
from jax.experimental.pallas import tpu as pltpu

LANE = 128                      # channel dims padded to a multiple of the lane width
MXU_DTYPE = jnp.bfloat16        # MXU operand / intermediate dtype (acc stays f32)


def _vmem_limit_bytes():
    try:
        cap = int(pltpu.get_tpu_info().vmem_capacity_bytes)
    except Exception:
        cap = 64 * 1024 * 1024
    return int(min(cap * 3 // 4, 96 * 1024 * 1024))


_VMEM_LIMIT = _vmem_limit_bytes()


def _round_up(x, m):
    return (x + m - 1) // m * m


def _pad_last(x, target):
    pad = target - x.shape[-1]
    if pad == 0:
        return x
    return jnp.pad(x, [(0, 0)] * (x.ndim - 1) + [(0, pad)])


# ----------------------------------------------------------------------------
# Kernel 1: 3x3 / stride-1 / pad-1 conv + bias + ReLU (+ BN partial stats),
# with optional fused input affine (previous BN scale/shift + time embedding)
# and in-VMEM zero padding.  One batch element per grid step.
# ----------------------------------------------------------------------------
def _conv3x3_kernel(*refs, with_affine):
    if with_affine:
        x_ref, w_ref, b_ref, sc_ref, off_ref, o_ref, st_ref, xp = refs
    else:
        x_ref, w_ref, b_ref, o_ref, st_ref, xp = refs
    _, h, w, cin = x_ref.shape
    cout = o_ref.shape[-1]

    # Build the spatially padded (halo = 0) input in VMEM.  Re-zeroed every
    # step so correctness does not depend on how the grid is core-split.
    xp[...] = jnp.zeros(xp.shape, xp.dtype)
    xin = x_ref[0]
    if with_affine:
        xin = xin.astype(jnp.float32) * sc_ref[0] + off_ref[0]
    xp[1:h + 1, 1:w + 1, :] = xin.astype(xp.dtype)

    bias = b_ref[...].astype(jnp.float32)                       # (1, cout), hoisted
    acc = jnp.zeros((h * w, cout), jnp.float32)
    # One dx-shifted flattened view per kx; dy taps are contiguous row slices.
    for kx in range(3):
        xs = xp[:, kx:kx + w, :].reshape((h + 2) * w, cin)
        for ky in range(3):
            a = xs[ky * w:(ky + h) * w, :]
            acc = acc + jnp.dot(a, w_ref[ky * 3 + kx],
                                preferred_element_type=jnp.float32)
    acc = jnp.maximum(acc + bias, 0.0)

    # Partial BatchNorm statistics for this batch element, one (2, C) write.
    st_ref[0] = jnp.concatenate(
        [jnp.sum(acc, axis=0, keepdims=True),
         jnp.sum(acc * acc, axis=0, keepdims=True)], axis=0)
    o_ref[0] = acc.astype(o_ref.dtype)


def conv3x3_relu_stats(x_nhwc, w_taps, bias, scale=None, offset=None):
    """x_nhwc: (N,H,W,Cin) bf16.  Optional fused input affine: per-channel
    `scale` (Cin,) and per-batch `offset` (N,Cin), applied before the in-VMEM
    zero padding (so the halo stays exactly 0).  Returns bf16 (N, H*W, Cout)
    and f32 per-batch-block [sum, sum^2] stats (N, 2, Cout)."""
    n, h, w, cin = x_nhwc.shape
    cout = w_taps.shape[-1]
    with_affine = scale is not None

    in_specs = [
        pl.BlockSpec((1, h, w, cin), lambda i: (i, 0, 0, 0)),
        pl.BlockSpec((9, cin, cout), lambda i: (0, 0, 0)),     # grid-invariant
        pl.BlockSpec((1, cout), lambda i: (0, 0)),             # grid-invariant
    ]
    args = [x_nhwc, w_taps, bias.reshape(1, cout)]
    if with_affine:
        in_specs += [pl.BlockSpec((1, 1, cin), lambda i: (0, 0, 0)),
                     pl.BlockSpec((1, 1, cin), lambda i: (i, 0, 0))]
        args += [scale.reshape(1, 1, cin), offset.reshape(n, 1, cin)]

    return pl.pallas_call(
        functools.partial(_conv3x3_kernel, with_affine=with_affine),
        out_shape=(jax.ShapeDtypeStruct((n, h * w, cout), MXU_DTYPE),
                   jax.ShapeDtypeStruct((n, 2, cout), jnp.float32)),
        grid=(n,),
        in_specs=in_specs,
        out_specs=(pl.BlockSpec((1, h * w, cout), lambda i: (i, 0, 0)),
                   pl.BlockSpec((1, 2, cout), lambda i: (i, 0, 0))),
        scratch_shapes=[pltpu.VMEM((h + 2, w + 2, cin), MXU_DTYPE)],
        compiler_params=pltpu.CompilerParams(
            dimension_semantics=("parallel",),
            vmem_limit_bytes=_VMEM_LIMIT),
    )(*args)


# ----------------------------------------------------------------------------
# Kernel 2: Conv2d(k=4, s=2, p=1) downsample.  The padded activation arrives
# in a column-paired / row-split layout (a pure reshape), so every tap is a
# contiguous slice and every matmul has K = 2*Cin (256) -- no strided loads,
# no HBM phase transpose.
# ----------------------------------------------------------------------------
def _conv4x4_s2_kernel(x_ref, w_ref, b_ref, o_ref):
    _, hop, _, wop, k2 = x_ref.shape          # (1, ho+1, 2, wo+1, 2*Cin)
    ho, wo = hop - 1, wop - 1
    cout = o_ref.shape[-1]

    bias = b_ref[...].astype(jnp.float32)
    acc = jnp.zeros((ho * wo, cout), jnp.float32)
    for ky in range(4):
        for q in range(2):                    # kx = 2*q + px, px folded into K
            a = x_ref[0, ky // 2:ky // 2 + ho, ky % 2, q:q + wo, :]
            acc = acc + jnp.dot(a.reshape(ho * wo, k2), w_ref[ky * 2 + q],
                                preferred_element_type=jnp.float32)
    o_ref[0] = (acc + bias).reshape(ho, wo, cout).astype(o_ref.dtype)


def conv4x4_s2(h2_nhwc, scale, shift, w_pairs, bias):
    """h2_nhwc: raw conv2 output (N,H,W,C) bf16.  The BN2 affine is fused with
    the zero-pad / bf16 cast into one XLA pass (exact: applied pre-padding);
    the stride-2 phase decomposition is a free reshape."""
    n, h, w, c = h2_nhwc.shape
    ho, wo = h // 2, w // 2
    cout = w_pairs.shape[-1]
    xa = h2_nhwc.astype(jnp.float32) * scale + shift
    xp = jnp.pad(xa, ((0, 0), (1, 1), (1, 1), (0, 0))).astype(MXU_DTYPE)
    xp = xp.reshape(n, ho + 1, 2, wo + 1, 2 * c)              # pure reshape
    return pl.pallas_call(
        _conv4x4_s2_kernel,
        out_shape=jax.ShapeDtypeStruct((n, ho, wo, cout), jnp.float32),
        grid=(n,),
        in_specs=[pl.BlockSpec((1, ho + 1, 2, wo + 1, 2 * c),
                               lambda i: (i, 0, 0, 0, 0)),
                  pl.BlockSpec((8, 2 * c, cout), lambda i: (0, 0, 0)),
                  pl.BlockSpec((1, cout), lambda i: (0, 0))],
        out_specs=pl.BlockSpec((1, ho, wo, cout), lambda i: (i, 0, 0, 0)),
        compiler_params=pltpu.CompilerParams(
            dimension_semantics=("parallel",),
            vmem_limit_bytes=_VMEM_LIMIT),
    )(xp, w_pairs, bias.reshape(1, cout))


# ----------------------------------------------------------------------------
# Kernel 3: ConvTranspose2d(k=4, s=2, p=1) upsample, decomposed over the 2x2
# output phases.  BN2 affine + zero padding happen in VMEM; the output layout
# (H, 2, W, 2*Cout) makes the final (2H, 2W, Cout) view a pure reshape.
# ----------------------------------------------------------------------------
_T_TAPS = (((1, 1), (0, 3)), ((1, 2), (2, 0)))   # phase r -> ((pad offset, k index), ...)


def _conv_t4x4_s2_kernel(x_ref, w_ref, b_ref, sc_ref, sh_ref, o_ref, xp):
    _, h, w, c = x_ref.shape
    cout = b_ref.shape[-1]

    xp[...] = jnp.zeros(xp.shape, xp.dtype)
    xin = x_ref[0].astype(jnp.float32) * sc_ref[0] + sh_ref[0]
    xp[1:h + 1, 1:w + 1, :] = xin.astype(xp.dtype)

    bias = b_ref[...].astype(jnp.float32)
    # One flattened view per x-offset (3 relayout copies instead of 16).
    xflat = [xp[:, ox:ox + w, :].reshape((h + 2) * w, c) for ox in range(3)]
    for ry in range(2):
        for rx in range(2):
            acc = jnp.zeros((h * w, cout), jnp.float32)
            for (oy, ky) in _T_TAPS[ry]:
                for (ox, kx) in _T_TAPS[rx]:
                    a = xflat[ox][oy * w:(oy + h) * w, :]
                    acc = acc + jnp.dot(a, w_ref[ky * 4 + kx],
                                        preferred_element_type=jnp.float32)
            acc = (acc + bias).reshape(h, w, cout)
            o_ref[0, :, ry, :, rx * cout:(rx + 1) * cout] = acc.astype(o_ref.dtype)


def conv_transpose4x4_s2(h2_nhwc, scale, shift, w_taps, bias):
    n, h, w, c = h2_nhwc.shape
    cout = w_taps.shape[-1]
    out = pl.pallas_call(
        _conv_t4x4_s2_kernel,
        out_shape=jax.ShapeDtypeStruct((n, h, 2, w, 2 * cout), jnp.float32),
        grid=(n,),
        in_specs=[pl.BlockSpec((1, h, w, c), lambda i: (i, 0, 0, 0)),
                  pl.BlockSpec((16, c, cout), lambda i: (0, 0, 0)),
                  pl.BlockSpec((1, cout), lambda i: (0, 0)),
                  pl.BlockSpec((1, 1, c), lambda i: (0, 0, 0)),
                  pl.BlockSpec((1, 1, c), lambda i: (0, 0, 0))],
        out_specs=pl.BlockSpec((1, h, 2, w, 2 * cout),
                               lambda i: (i, 0, 0, 0, 0)),
        scratch_shapes=[pltpu.VMEM((h + 2, w + 2, c), MXU_DTYPE)],
        compiler_params=pltpu.CompilerParams(
            dimension_semantics=("parallel",),
            vmem_limit_bytes=_VMEM_LIMIT),
    )(h2_nhwc, w_taps, bias.reshape(1, cout),
      scale.reshape(1, 1, c), shift.reshape(1, 1, c))
    return out.reshape(n, 2 * h, 2 * w, cout)                 # pure reshape


# ----------------------------------------------------------------------------
# Weight preparation / BatchNorm epilogue glue (tiny jnp)
# ----------------------------------------------------------------------------
def _prep_conv3x3_weight(w, c_in_p, c_out_p):
    """PyTorch Conv2d (O, I, 3, 3) -> (9, Cin_p, Cout_p) bf16."""
    o, i, kh, kw = w.shape
    wt = jnp.transpose(w, (2, 3, 1, 0)).reshape(kh * kw, i, o)
    wt = jnp.pad(wt, ((0, 0), (0, c_in_p - i), (0, c_out_p - o)))
    return wt.astype(MXU_DTYPE)


def _prep_conv4x4_s2_weight(w, c_in_p, c_out_p):
    """PyTorch Conv2d (O, I, 4, 4) -> (8, 2*Cin_p, Cout_p) bf16 with the two
    column taps of each pair (kx = 2q + px) folded into the K dimension."""
    o, i, _, _ = w.shape
    wt = jnp.transpose(w, (2, 3, 1, 0))                                   # (4,4,I,O)
    wt = jnp.pad(wt, ((0, 0), (0, 0), (0, c_in_p - i), (0, c_out_p - o)))
    return wt.reshape(8, 2 * c_in_p, c_out_p).astype(MXU_DTYPE)


def _prep_conv_transpose_weight(w, c_in_p, c_out_p):
    """PyTorch ConvTranspose2d (I, O, 4, 4) -> (16, Cin_p, Cout_p) bf16."""
    i, o, kh, kw = w.shape
    wt = jnp.transpose(w, (2, 3, 0, 1)).reshape(kh * kw, i, o)
    wt = jnp.pad(wt, ((0, 0), (0, c_in_p - i), (0, c_out_p - o)))
    return wt.astype(MXU_DTYPE)


def _bn_scale_shift(stats, n_rows, gamma, beta, eps=1e-5):
    """Fold per-batch-block [sum, sum^2] (f32) into per-channel scale/shift for
    training-mode BatchNorm (biased variance, eps=1e-5)."""
    s = jnp.sum(stats, axis=0)                 # (2, C)
    mean = s[0] / n_rows
    var = jnp.maximum(s[1] / n_rows - mean * mean, 0.0)
    scale = gamma * jax.lax.rsqrt(var + eps)
    shift = beta - mean * scale
    return scale, shift


# ----------------------------------------------------------------------------
# Block parameters + forward
# ----------------------------------------------------------------------------
def init_block_params(key, in_ch, out_ch, time_emb_dim, up=False):
    cin1 = 2 * in_ch if up else in_ch
    ks = jax.random.split(key, 8)

    def w(k, shape, fan_in):
        return jax.random.normal(k, shape, jnp.float32) / jnp.sqrt(float(fan_in))

    p = {}
    p["conv1_w"] = w(ks[0], (out_ch, cin1, 3, 3), cin1 * 9)      # PyTorch (O,I,kh,kw)
    p["conv1_b"] = w(ks[1], (out_ch,), cin1 * 9)
    p["conv2_w"] = w(ks[2], (out_ch, out_ch, 3, 3), out_ch * 9)
    p["conv2_b"] = w(ks[3], (out_ch,), out_ch * 9)
    p["time_w"] = w(ks[4], (time_emb_dim, out_ch), time_emb_dim)  # stored (in, out)
    p["time_b"] = w(ks[5], (out_ch,), time_emb_dim)
    # transform: Conv2d layout (O,I,kh,kw) for down, ConvTranspose (I,O,kh,kw) for up
    p["tr_w"] = w(ks[6], (out_ch, out_ch, 4, 4), out_ch * 16)
    p["tr_b"] = w(ks[7], (out_ch,), out_ch * 16)
    p["bn1_g"] = jnp.ones((out_ch,), jnp.float32)
    p["bn1_b"] = jnp.zeros((out_ch,), jnp.float32)
    p["bn2_g"] = jnp.ones((out_ch,), jnp.float32)
    p["bn2_b"] = jnp.zeros((out_ch,), jnp.float32)
    return p


def block_forward(params, x, t, *, up=False):
    """x: (N, C_in, H, W) NCHW, t: (N, time_emb_dim).  Returns NCHW output."""
    n, _, h, w = x.shape
    out_ch = params["conv1_b"].shape[0]
    cin1 = params["conv1_w"].shape[1]
    cp = _round_up(out_ch, LANE)
    cin1_p = _round_up(cin1, LANE)
    n_rows = n * h * w

    xh = _pad_last(jnp.transpose(x, (0, 2, 3, 1)), cin1_p).astype(MXU_DTYPE)

    # ---- conv1 + ReLU (+ BN1 partial stats); padding done in VMEM
    w1 = _prep_conv3x3_weight(params["conv1_w"], cin1_p, cp)
    y1, st1 = conv3x3_relu_stats(xh, w1, _pad_last(params["conv1_b"], cp))
    sc1, sh1 = _bn_scale_shift(st1, n_rows,
                               _pad_last(params["bn1_g"], cp),
                               _pad_last(params["bn1_b"], cp))
    # Time-embedding MLP is tiny -> plain jnp.
    te = jnp.maximum(t @ params["time_w"] + params["time_b"], 0.0)   # (N, out_ch)
    off1 = sh1[None, :] + _pad_last(te, cp)                          # (N, cp)

    # ---- conv2 + ReLU (+ BN2 partial stats); BN1 affine + te fused as the
    #      conv2 input prologue (applied pre-padding -> border exact)
    w2 = _prep_conv3x3_weight(params["conv2_w"], cp, cp)
    y2, st2 = conv3x3_relu_stats(y1.reshape(n, h, w, cp), w2,
                                 _pad_last(params["conv2_b"], cp),
                                 scale=sc1, offset=off1)
    sc2, sh2 = _bn_scale_shift(st2, n_rows,
                               _pad_last(params["bn2_g"], cp),
                               _pad_last(params["bn2_b"], cp))

    # ---- transform (stride-2 conv or stride-2 transposed conv), BN2 fused
    bt = _pad_last(params["tr_b"], cp)
    h2 = y2.reshape(n, h, w, cp)
    if up:
        wt = _prep_conv_transpose_weight(params["tr_w"], cp, cp)
        out = conv_transpose4x4_s2(h2, sc2, sh2, wt, bt)             # (N, 2H, 2W, cp)
    else:
        wt = _prep_conv4x4_s2_weight(params["tr_w"], cp, cp)
        out = conv4x4_s2(h2, sc2, sh2, wt, bt)                       # (N, H/2, W/2, cp)

    return jnp.transpose(out[..., :out_ch], (0, 3, 1, 2))            # NCHW


# ----------------------------------------------------------------------------
# Pure-JAX f32 reference (same math as the PyTorch Block, training-mode BN)
# ----------------------------------------------------------------------------
def _reference_forward(params, x, t, *, up=False):
    out_ch = params["conv1_b"].shape[0]
    xh = jnp.transpose(x, (0, 2, 3, 1))

    def conv3x3(xin, wc, b):
        n_, h_, w_, _ = xin.shape
        xp = jnp.pad(xin, ((0, 0), (1, 1), (1, 1), (0, 0)))
        cols = [xp[:, ky:ky + h_, kx:kx + w_, :] for ky in range(3) for kx in range(3)]
        a = jnp.stack(cols, axis=3).reshape(n_ * h_ * w_, -1)
        wm = jnp.transpose(wc, (2, 3, 1, 0)).reshape(-1, wc.shape[0])
        return (a @ wm + b).reshape(n_, h_, w_, -1)

    def bn(y, g, b, eps=1e-5):
        mean = jnp.mean(y, axis=(0, 1, 2))
        var = jnp.mean(jnp.square(y - mean), axis=(0, 1, 2))
        return (y - mean) * jax.lax.rsqrt(var + eps) * g + b

    h1 = bn(jnp.maximum(conv3x3(xh, params["conv1_w"], params["conv1_b"]), 0.0),
            params["bn1_g"], params["bn1_b"])
    te = jnp.maximum(t @ params["time_w"] + params["time_b"], 0.0)
    h1 = h1 + te[:, None, None, :]
    h2 = bn(jnp.maximum(conv3x3(h1, params["conv2_w"], params["conv2_b"]), 0.0),
            params["bn2_g"], params["bn2_b"])

    n_, h_, w_, c_ = h2.shape
    if up:
        ho, wo = 2 * h_, 2 * w_
        xd = jnp.zeros((n_, 2 * h_ - 1, 2 * w_ - 1, c_), h2.dtype).at[:, ::2, ::2, :].set(h2)
        xp = jnp.pad(xd, ((0, 0), (2, 2), (2, 2), (0, 0)))
        cols = [xp[:, ky:ky + ho, kx:kx + wo, :] for ky in range(4) for kx in range(4)]
        a = jnp.stack(cols, axis=3).reshape(n_ * ho * wo, -1)
        wm = jnp.transpose(params["tr_w"][:, :, ::-1, ::-1], (2, 3, 0, 1)).reshape(-1, out_ch)
    else:
        ho, wo = h_ // 2, w_ // 2
        xp = jnp.pad(h2, ((0, 0), (1, 1), (1, 1), (0, 0)))
        cols = [jax.lax.slice(xp, (0, ky, kx, 0),
                              (n_, ky + 2 * (ho - 1) + 1, kx + 2 * (wo - 1) + 1, c_),
                              (1, 2, 2, 1))
                for ky in range(4) for kx in range(4)]
        a = jnp.stack(cols, axis=3).reshape(n_ * ho * wo, -1)
        wm = jnp.transpose(params["tr_w"], (2, 3, 1, 0)).reshape(-1, out_ch)
    out = (a @ wm + params["tr_b"]).reshape(n_, ho, wo, out_ch)
    return jnp.transpose(out, (0, 3, 1, 2))


# ----------------------------------------------------------------------------
if __name__ == "__main__":
    key = jax.random.PRNGKey(0)
    k_x, k_t, k_p, k_x2, k_p2 = jax.random.split(key, 5)

    in_ch, out_ch, temb = 4, 8, 32
    N, H, W = 2, 16, 16

    t = jax.random.normal(k_t, (N, temb), jnp.float32)

    # Down block (up=False): transform is Conv2d(4, stride 2, pad 1)
    params_dn = init_block_params(k_p, in_ch, out_ch, temb, up=False)
    x = jax.random.normal(k_x, (N, in_ch, H, W), jnp.float32)
    fwd_dn = jax.jit(functools.partial(block_forward, up=False))
    y_dn = fwd_dn(params_dn, x, t)
    jax.block_until_ready(y_dn)
    assert y_dn.shape == (N, out_ch, H // 2, W // 2), y_dn.shape
    ref_dn = _reference_forward(params_dn, x, t, up=False)
    err_dn = float(jnp.max(jnp.abs(y_dn - ref_dn)))
    assert err_dn < 0.25, f"down-block mismatch: max abs err {err_dn}"   # bf16 tolerance

    # Up block (up=True): conv1 expects 2*in_ch channels, transform is ConvTranspose2d
    params_up = init_block_params(k_p2, in_ch, out_ch, temb, up=True)
    x_up = jax.random.normal(k_x2, (N, 2 * in_ch, H, W), jnp.float32)
    fwd_up = jax.jit(functools.partial(block_forward, up=True))
    y_up = fwd_up(params_up, x_up, t)
    jax.block_until_ready(y_up)
    assert y_up.shape == (N, out_ch, 2 * H, 2 * W), y_up.shape
    ref_up = _reference_forward(params_up, x_up, t, up=True)
    err_up = float(jnp.max(jnp.abs(y_up - ref_up)))
    assert err_up < 0.25, f"up-block mismatch: max abs err {err_up}"

    print("KERNEL_OK")
</pallas_src>

<mosaic_0001>
module attributes {stable_mosaic.version = 11 : i64} {
  func.func @_conv3x3_kernel(%arg0: i32, %arg1: memref<1x16x16x128xbf16, #tpu.memory_space<vmem>>, %arg2: memref<9x128x128xbf16, #tpu.memory_space<vmem>>, %arg3: memref<1x128xf32, #tpu.memory_space<vmem>>, %arg4: memref<1x256x128xbf16, #tpu.memory_space<vmem>>, %arg5: memref<1x2x128xf32, #tpu.memory_space<vmem>>, %arg6: memref<18x18x128xbf16, #tpu.memory_space<vmem>>) attributes {dimension_semantics = [#tpu.dimension_semantics<parallel>], iteration_bounds = array<i64: 2>, scalar_prefetch = 0 : i64, scratch_operands = 1 : i64, tpu.core_type = #tpu.core_type<tc>, window_params = [{transform_indices = @transform_0, window_bounds = array<i64: 1, 16, 16, 128>}, {pipeline_mode = #tpu.pipeline_mode<synchronous>, transform_indices = @transform_1, window_bounds = array<i64: 9, 128, 128>}, {pipeline_mode = #tpu.pipeline_mode<synchronous>, transform_indices = @transform_2, window_bounds = array<i64: 1, 128>}, {transform_indices = @transform_3, window_bounds = array<i64: 1, 256, 128>}, {transform_indices = @transform_4, window_bounds = array<i64: 1, 2, 128>}]} {
    %cst = arith.constant 0.000000e+00 : bf16
    %0 = vector.broadcast %cst : bf16 to vector<18x18x128xbf16>
    %c0 = arith.constant 0 : index
    %c0_0 = arith.constant 0 : index
    %c0_1 = arith.constant 0 : index
    %1 = vector.load %arg6[%c0, %c0_0, %c0_1] : memref<18x18x128xbf16, #tpu.memory_space<vmem>>, vector<18x18x128xbf16>
    tpu.vector_store %arg6[%c0, %c0_0, %c0_1], %0 {strides = array<i32>} : memref<18x18x128xbf16, #tpu.memory_space<vmem>>, vector<18x18x128xbf16>,
    %c0_2 = arith.constant 0 : index
    %c0_3 = arith.constant 0 : index
    %c0_4 = arith.constant 0 : index
    %c0_5 = arith.constant 0 : index
    %2 = vector.load %arg1[%c0_2, %c0_3, %c0_4, %c0_5] : memref<1x16x16x128xbf16, #tpu.memory_space<vmem>>, vector<1x16x16x128xbf16>
    %3 = vector.shape_cast %2 : vector<1x16x16x128xbf16> to vector<16x16x128xbf16>
    %c1 = arith.constant 1 : index
    %c1_6 = arith.constant 1 : index
    %c0_7 = arith.constant 0 : index
    %4 = vector.load %arg6[%c1, %c1_6, %c0_7] : memref<18x18x128xbf16, #tpu.memory_space<vmem>>, vector<16x16x128xbf16>
    tpu.vector_store %arg6[%c1, %c1_6, %c0_7], %3 {strides = array<i32>} : memref<18x18x128xbf16, #tpu.memory_space<vmem>>, vector<16x16x128xbf16>,
    %c0_8 = arith.constant 0 : index
    %c0_9 = arith.constant 0 : index
    %5 = vector.load %arg3[%c0_8, %c0_9] : memref<1x128xf32, #tpu.memory_space<vmem>>, vector<1x128xf32>
    %cst_10 = arith.constant 0.000000e+00 : f32
    %6 = vector.broadcast %cst_10 : f32 to vector<256x128xf32>
    %c0_11 = arith.constant 0 : index
    %c0_12 = arith.constant 0 : index
    %c0_13 = arith.constant 0 : index
    %7 = vector.load %arg6[%c0_11, %c0_12, %c0_13] : memref<18x18x128xbf16, #tpu.memory_space<vmem>>, vector<18x16x128xbf16>
    %8 = vector.shape_cast %7 : vector<18x16x128xbf16> to vector<288x128xbf16>
    %9 = vector.extract_strided_slice %8 {offsets = [0, 0], sizes = [256, 128], strides = [1, 1]} : vector<288x128xbf16> to vector<256x128xbf16>
    %c0_14 = arith.constant 0 : index
    %c0_15 = arith.constant 0 : index
    %c0_16 = arith.constant 0 : index
    %10 = vector.load %arg2[%c0_14, %c0_15, %c0_16] : memref<9x128x128xbf16, #tpu.memory_space<vmem>>, vector<1x128x128xbf16>
    %11 = vector.shape_cast %10 : vector<1x128x128xbf16> to vector<128x128xbf16>
    %cst_17 = arith.constant dense<0.000000e+00> : vector<256x128xf32>
    %12 = tpu.matmul %9, %11, %cst_17 {dimension_numbers = #tpu.dot_dimension_numbers<[1], [0], [0], [1], [0, 0, 1, 1], [], []>} : vector<256x128xbf16>, vector<128x128xbf16>, vector<256x128xf32> -> vector<256x128xf32>
    %13 = arith.addf %6, %12 : vector<256x128xf32>
    %14 = vector.extract_strided_slice %8 {offsets = [16, 0], sizes = [256, 128], strides = [1, 1]} : vector<288x128xbf16> to vector<256x128xbf16>
    %c3 = arith.constant 3 : index
    %c0_18 = arith.constant 0 : index
    %c0_19 = arith.constant 0 : index
    %15 = vector.load %arg2[%c3, %c0_18, %c0_19] : memref<9x128x128xbf16, #tpu.memory_space<vmem>>, vector<1x128x128xbf16>
    %16 = vector.shape_cast %15 : vector<1x128x128xbf16> to vector<128x128xbf16>
    %cst_20 = arith.constant dense<0.000000e+00> : vector<256x128xf32>
    %17 = tpu.matmul %14, %16, %cst_20 {dimension_numbers = #tpu.dot_dimension_numbers<[1], [0], [0], [1], [0, 0, 1, 1], [], []>} : vector<256x128xbf16>, vector<128x128xbf16>, vector<256x128xf32> -> vector<256x128xf32>
    %18 = arith.addf %13, %17 : vector<256x128xf32>
    %19 = vector.extract_strided_slice %8 {offsets = [32, 0], sizes = [256, 128], strides = [1, 1]} : vector<288x128xbf16> to vector<256x128xbf16>
    %c6 = arith.constant 6 : index
    %c0_21 = arith.constant 0 : index
    %c0_22 = arith.constant 0 : index
    %20 = vector.load %arg2[%c6, %c0_21, %c0_22] : memref<9x128x128xbf16, #tpu.memory_space<vmem>>, vector<1x128x128xbf16>
    %21 = vector.shape_cast %20 : vector<1x128x128xbf16> to vector<128x128xbf16>
    %cst_23 = arith.constant dense<0.000000e+00> : vector<256x128xf32>
    %22 = tpu.matmul %19, %21, %cst_23 {dimension_numbers = #tpu.dot_dimension_numbers<[1], [0], [0], [1], [0, 0, 1, 1], [], []>} : vector<256x128xbf16>, vector<128x128xbf16>, vector<256x128xf32> -> vector<256x128xf32>
    %23 = arith.addf %18, %22 : vector<256x128xf32>
    %c0_24 = arith.constant 0 : index
    %c1_25 = arith.constant 1 : index
    %c0_26 = arith.constant 0 : index
    %24 = vector.load %arg6[%c0_24, %c1_25, %c0_26] : memref<18x18x128xbf16, #tpu.memory_space<vmem>>, vector<18x16x128xbf16>
    %25 = vector.shape_cast %24 : vector<18x16x128xbf16> to vector<288x128xbf16>
    %26 = vector.extract_strided_slice %25 {offsets = [0, 0], sizes = [256, 128], strides = [1, 1]} : vector<288x128xbf16> to vector<256x128xbf16>
    %c1_27 = arith.constant 1 : index
    %c0_28 = arith.constant 0 : index
    %c0_29 = arith.constant 0 : index
    %27 = vector.load %arg2[%c1_27, %c0_28, %c0_29] : memref<9x128x128xbf16, #tpu.memory_space<vmem>>, vector<1x128x128xbf16>
    %28 = vector.shape_cast %27 : vector<1x128x128xbf16> to vector<128x128xbf16>
    %cst_30 = arith.constant dense<0.000000e+00> : vector<256x128xf32>
    %29 = tpu.matmul %26, %28, %cst_30 {dimension_numbers = #tpu.dot_dimension_numbers<[1], [0], [0], [1], [0, 0, 1, 1], [], []>} : vector<256x128xbf16>, vector<128x128xbf16>, vector<256x128xf32> -> vector<256x128xf32>
    %30 = arith.addf %23, %29 : vector<256x128xf32>
    %31 = vector.extract_strided_slice %25 {offsets = [16, 0], sizes = [256, 128], strides = [1, 1]} : vector<288x128xbf16> to vector<256x128xbf16>
    %c4 = arith.constant 4 : index
    %c0_31 = arith.constant 0 : index
    %c0_32 = arith.constant 0 : index
    %32 = vector.load %arg2[%c4, %c0_31, %c0_32] : memref<9x128x128xbf16, #tpu.memory_space<vmem>>, vector<1x128x128xbf16>
    %33 = vector.shape_cast %32 : vector<1x128x128xbf16> to vector<128x128xbf16>
    %cst_33 = arith.constant dense<0.000000e+00> : vector<256x128xf32>
    %34 = tpu.matmul %31, %33, %cst_33 {dimension_numbers = #tpu.dot_dimension_numbers<[1], [0], [0], [1], [0, 0, 1, 1], [], []>} : vector<256x128xbf16>, vector<128x128xbf16>, vector<256x128xf32> -> vector<256x128xf32>
    %35 = arith.addf %30, %34 : vector<256x128xf32>
    %36 = vector.extract_strided_slice %25 {offsets = [32, 0], sizes = [256, 128], strides = [1, 1]} : vector<288x128xbf16> to vector<256x128xbf16>
    %c7 = arith.constant 7 : index
    %c0_34 = arith.constant 0 : index
    %c0_35 = arith.constant 0 : index
    %37 = vector.load %arg2[%c7, %c0_34, %c0_35] : memref<9x128x128xbf16, #tpu.memory_space<vmem>>, vector<1x128x128xbf16>
    %38 = vector.shape_cast %37 : vector<1x128x128xbf16> to vector<128x128xbf16>
    %cst_36 = arith.constant dense<0.000000e+00> : vector<256x128xf32>
    %39 = tpu.matmul %36, %38, %cst_36 {dimension_numbers = #tpu.dot_dimension_numbers<[1], [0], [0], [1], [0, 0, 1, 1], [], []>} : vector<256x128xbf16>, vector<128x128xbf16>, vector<256x128xf32> -> vector<256x128xf32>
    %40 = arith.addf %35, %39 : vector<256x128xf32>
    %c0_37 = arith.constant 0 : index
    %c2 = arith.constant 2 : index
    %c0_38 = arith.constant 0 : index
    %41 = vector.load %arg6[%c0_37, %c2, %c0_38] : memref<18x18x128xbf16, #tpu.memory_space<vmem>>, vector<18x16x128xbf16>
    %42 = vector.shape_cast %41 : vector<18x16x128xbf16> to vector<288x128xbf16>
    %43 = vector.extract_strided_slice %42 {offsets = [0, 0], sizes = [256, 128], strides = [1, 1]} : vector<288x128xbf16> to vector<256x128xbf16>
    %c2_39 = arith.constant 2 : index
    %c0_40 = arith.constant 0 : index
    %c0_41 = arith.constant 0 : index
    %44 = vector.load %arg2[%c2_39, %c0_40, %c0_41] : memref<9x128x128xbf16, #tpu.memory_space<vmem>>, vector<1x128x128xbf16>
    %45 = vector.shape_cast %44 : vector<1x128x128xbf16> to vector<128x128xbf16>
    %cst_42 = arith.constant dense<0.000000e+00> : vector<256x128xf32>
    %46 = tpu.matmul %43, %45, %cst_42 {dimension_numbers = #tpu.dot_dimension_numbers<[1], [0], [0], [1], [0, 0, 1, 1], [], []>} : vector<256x128xbf16>, vector<128x128xbf16>, vector<256x128xf32> -> vector<256x128xf32>
    %47 = arith.addf %40, %46 : vector<256x128xf32>
    %48 = vector.extract_strided_slice %42 {offsets = [16, 0], sizes = [256, 128], strides = [1, 1]} : vector<288x128xbf16> to vector<256x128xbf16>
    %c5 = arith.constant 5 : index
    %c0_43 = arith.constant 0 : index
    %c0_44 = arith.constant 0 : index
    %49 = vector.load %arg2[%c5, %c0_43, %c0_44] : memref<9x128x128xbf16, #tpu.memory_space<vmem>>, vector<1x128x128xbf16>
    %50 = vector.shape_cast %49 : vector<1x128x128xbf16> to vector<128x128xbf16>
    %cst_45 = arith.constant dense<0.000000e+00> : vector<256x128xf32>
    %51 = tpu.matmul %48, %50, %cst_45 {dimension_numbers = #tpu.dot_dimension_numbers<[1], [0], [0], [1], [0, 0, 1, 1], [], []>} : vector<256x128xbf16>, vector<128x128xbf16>, vector<256x128xf32> -> vector<256x128xf32>
    %52 = arith.addf %47, %51 : vector<256x128xf32>
    %53 = vector.extract_strided_slice %42 {offsets = [32, 0], sizes = [256, 128], strides = [1, 1]} : vector<288x128xbf16> to vector<256x128xbf16>
    %c8 = arith.constant 8 : index
    %c0_46 = arith.constant 0 : index
    %c0_47 = arith.constant 0 : index
    %54 = vector.load %arg2[%c8, %c0_46, %c0_47] : memref<9x128x128xbf16, #tpu.memory_space<vmem>>, vector<1x128x128xbf16>
    %55 = vector.shape_cast %54 : vector<1x128x128xbf16> to vector<128x128xbf16>
    %cst_48 = arith.constant dense<0.000000e+00> : vector<256x128xf32>
    %56 = tpu.matmul %53, %55, %cst_48 {dimension_numbers = #tpu.dot_dimension_numbers<[1], [0], [0], [1], [0, 0, 1, 1], [], []>} : vector<256x128xbf16>, vector<128x128xbf16>, vector<256x128xf32> -> vector<256x128xf32>
    %57 = arith.addf %52, %56 : vector<256x128xf32>
    %58 = vector.broadcast %5 : vector<1x128xf32> to vector<256x128xf32>
    %59 = arith.addf %57, %58 : vector<256x128xf32>
    %cst_49 = arith.constant 0.000000e+00 : f32
    %60 = vector.broadcast %cst_49 : f32 to vector<256x128xf32>
    %61 = arith.maximumf %59, %60 : vector<256x128xf32>
    %cst_50 = arith.constant dense<0.000000e+00> : vector<128xf32>
    %62 = vector.multi_reduction <add>, %61, %cst_50 [0] : vector<256x128xf32> to vector<128xf32>
    %63 = vector.shape_cast %62 : vector<128xf32> to vector<1x128xf32>
    %64 = arith.mulf %61, %61 : vector<256x128xf32>
    %cst_51 = arith.constant dense<0.000000e+00> : vector<128xf32>
    %65 = vector.multi_reduction <add>, %64, %cst_51 [0] : vector<256x128xf32> to vector<128xf32>
    %66 = vector.shape_cast %65 : vector<128xf32> to vector<1x128xf32>
    %67 = tpu.concatenate %63, %66 in 0 : vector<1x128xf32>, vector<1x128xf32> -> vector<2x128xf32>
    %c0_52 = arith.constant 0 : index
    %c0_53 = arith.constant 0 : index
    %c0_54 = arith.constant 0 : index
    %68 = vector.load %arg5[%c0_52, %c0_53, %c0_54] : memref<1x2x128xf32, #tpu.memory_space<vmem>>, vector<1x2x128xf32>
    %69 = vector.shape_cast %68 : vector<1x2x128xf32> to vector<2x128xf32>
    %70 = vector.shape_cast %67 : vector<2x128xf32> to vector<1x2x128xf32>
    tpu.vector_store %arg5[%c0_52, %c0_53, %c0_54], %70 {strides = array<i32>} : memref<1x2x128xf32, #tpu.memory_space<vmem>>, vector<1x2x128xf32>,
    %71 = arith.truncf %61 : vector<256x128xf32> to vector<256x128xbf16>
    %c0_55 = arith.constant 0 : index
    %c0_56 = arith.constant 0 : index
    %c0_57 = arith.constant 0 : index
    %72 = vector.load %arg4[%c0_55, %c0_56, %c0_57] : memref<1x256x128xbf16, #tpu.memory_space<vmem>>, vector<1x256x128xbf16>
    %73 = vector.shape_cast %72 : vector<1x256x128xbf16> to vector<256x128xbf16>
    %74 = vector.shape_cast %71 : vector<256x128xbf16> to vector<1x256x128xbf16>
    tpu.vector_store %arg4[%c0_55, %c0_56, %c0_57], %74 {strides = array<i32>} : memref<1x256x128xbf16, #tpu.memory_space<vmem>>, vector<1x256x128xbf16>,
    return
  }
  func.func @transform_0(%arg0: i32) -> (i32, i32, i32, i32) {
    %c0_i32 = arith.constant 0 : i32
    %c0_i32_0 = arith.constant 0 : i32
    %c0_i32_1 = arith.constant 0 : i32
    %c0_i32_2 = arith.constant 0 : i32
    return %arg0, %c0_i32, %c0_i32_0, %c0_i32_1 : i32, i32, i32, i32
  }
  func.func @transform_1(%arg0: i32) -> (i32, i32, i32) {
    %c0_i32 = arith.constant 0 : i32
    %c0_i32_0 = arith.constant 0 : i32
    %c0_i32_1 = arith.constant 0 : i32
    %c0_i32_2 = arith.constant 0 : i32
    return %c0_i32, %c0_i32_0, %c0_i32_1 : i32, i32, i32
  }
  func.func @transform_2(%arg0: i32) -> (i32, i32) {
    %c0_i32 = arith.constant 0 : i32
    %c0_i32_0 = arith.constant 0 : i32
    %c0_i32_1 = arith.constant 0 : i32
    return %c0_i32, %c0_i32_0 : i32, i32
  }
  func.func @transform_3(%arg0: i32) -> (i32, i32, i32) {
    %c0_i32 = arith.constant 0 : i32
    %c0_i32_0 = arith.constant 0 : i32
    %c0_i32_1 = arith.constant 0 : i32
    return %arg0, %c0_i32, %c0_i32_0 : i32, i32, i32
  }
  func.func @transform_4(%arg0: i32) -> (i32, i32, i32) {
    %c0_i32 = arith.constant 0 : i32
    %c0_i32_0 = arith.constant 0 : i32
    %c0_i32_1 = arith.constant 0 : i32
    return %arg0, %c0_i32, %c0_i32_0 : i32, i32, i32
  }
}

module attributes {stable_mosaic.version = 11 : i64} {
  func.func @_conv3x3_kernel(%arg0: i32, %arg1: memref<1x16x16x128xbf16, #tpu.memory_space<vmem>>, %arg2: memref<9x128x128xbf16, #tpu.memory_space<vmem>>, %arg3: memref<1x128xf32, #tpu.memory_space<vmem>>, %arg4: memref<1x1x128xf32, #tpu.memory_space<vmem>>, %arg5: memref<1x1x128xf32, #tpu.memory_space<vmem>>, %arg6: memref<1x256x128xbf16, #tpu.memory_space<vmem>>, %arg7: memref<1x2x128xf32, #tpu.memory_space<vmem>>, %arg8: memref<18x18x128xbf16, #tpu.memory_space<vmem>>) attributes {dimension_semantics = [#tpu.dimension_semantics<parallel>], iteration_bounds = array<i64: 2>, scalar_prefetch = 0 : i64, scratch_operands = 1 : i64, tpu.core_type = #tpu.core_type<tc>, window_params = [{transform_indices = @transform_0, window_bounds = array<i64: 1, 16, 16, 128>}, {pipeline_mode = #tpu.pipeline_mode<synchronous>, transform_indices = @transform_1, window_bounds = array<i64: 9, 128, 128>}, {pipeline_mode = #tpu.pipeline_mode<synchronous>, transform_indices = @transform_2, window_bounds = array<i64: 1, 128>}, {pipeline_mode = #tpu.pipeline_mode<synchronous>, transform_indices = @transform_3, window_bounds = array<i64: 1, 1, 128>}, {transform_indices = @transform_4, window_bounds = array<i64: 1, 1, 128>}, {transform_indices = @transform_5, window_bounds = array<i64: 1, 256, 128>}, {transform_indices = @transform_6, window_bounds = array<i64: 1, 2, 128>}]} {
    %cst = arith.constant 0.000000e+00 : bf16
    %0 = vector.broadcast %cst : bf16 to vector<18x18x128xbf16>
    %c0 = arith.constant 0 : index
    %c0_0 = arith.constant 0 : index
    %c0_1 = arith.constant 0 : index
    %1 = vector.load %arg8[%c0, %c0_0, %c0_1] : memref<18x18x128xbf16, #tpu.memory_space<vmem>>, vector<18x18x128xbf16>
    tpu.vector_store %arg8[%c0, %c0_0, %c0_1], %0 {strides = array<i32>} : memref<18x18x128xbf16, #tpu.memory_space<vmem>>, vector<18x18x128xbf16>,
    %c0_2 = arith.constant 0 : index
    %c0_3 = arith.constant 0 : index
    %c0_4 = arith.constant 0 : index
    %c0_5 = arith.constant 0 : index
    %2 = vector.load %arg1[%c0_2, %c0_3, %c0_4, %c0_5] : memref<1x16x16x128xbf16, #tpu.memory_space<vmem>>, vector<1x16x16x128xbf16>
    %3 = vector.shape_cast %2 : vector<1x16x16x128xbf16> to vector<16x16x128xbf16>
    %4 = arith.extf %3 : vector<16x16x128xbf16> to vector<16x16x128xf32>
    %c0_6 = arith.constant 0 : index
    %c0_7 = arith.constant 0 : index
    %c0_8 = arith.constant 0 : index
    %5 = vector.load %arg4[%c0_6, %c0_7, %c0_8] : memref<1x1x128xf32, #tpu.memory_space<vmem>>, vector<1x1x128xf32>
    %6 = vector.shape_cast %5 : vector<1x1x128xf32> to vector<1x128xf32>
    %7 = vector.shape_cast %6 : vector<1x128xf32> to vector<1x1x128xf32>
    %8 = vector.broadcast %7 : vector<1x1x128xf32> to vector<16x16x128xf32>
    %9 = arith.mulf %4, %8 : vector<16x16x128xf32>
    %c0_9 = arith.constant 0 : index
    %c0_10 = arith.constant 0 : index
    %c0_11 = arith.constant 0 : index
    %10 = vector.load %arg5[%c0_9, %c0_10, %c0_11] : memref<1x1x128xf32, #tpu.memory_space<vmem>>, vector<1x1x128xf32>
    %11 = vector.shape_cast %10 : vector<1x1x128xf32> to vector<1x128xf32>
    %12 = vector.shape_cast %11 : vector<1x128xf32> to vector<1x1x128xf32>
    %13 = vector.broadcast %12 : vector<1x1x128xf32> to vector<16x16x128xf32>
    %14 = arith.addf %9, %13 : vector<16x16x128xf32>
    %15 = arith.truncf %14 : vector<16x16x128xf32> to vector<16x16x128xbf16>
    %c1 = arith.constant 1 : index
    %c1_12 = arith.constant 1 : index
    %c0_13 = arith.constant 0 : index
    %16 = vector.load %arg8[%c1, %c1_12, %c0_13] : memref<18x18x128xbf16, #tpu.memory_space<vmem>>, vector<16x16x128xbf16>
    tpu.vector_store %arg8[%c1, %c1_12, %c0_13], %15 {strides = array<i32>} : memref<18x18x128xbf16, #tpu.memory_space<vmem>>, vector<16x16x128xbf16>,
    %c0_14 = arith.constant 0 : index
    %c0_15 = arith.constant 0 : index
    %17 = vector.load %arg3[%c0_14, %c0_15] : memref<1x128xf32, #tpu.memory_space<vmem>>, vector<1x128xf32>
    %cst_16 = arith.constant 0.000000e+00 : f32
    %18 = vector.broadcast %cst_16 : f32 to vector<256x128xf32>
    %c0_17 = arith.constant 0 : index
    %c0_18 = arith.constant 0 : index
    %c0_19 = arith.constant 0 : index
    %19 = vector.load %arg8[%c0_17, %c0_18, %c0_19] : memref<18x18x128xbf16, #tpu.memory_space<vmem>>, vector<18x16x128xbf16>
    %20 = vector.shape_cast %19 : vector<18x16x128xbf16> to vector<288x128xbf16>
    %21 = vector.extract_strided_slice %20 {offsets = [0, 0], sizes = [256, 128], strides = [1, 1]} : vector<288x128xbf16> to vector<256x128xbf16>
    %c0_20 = arith.constant 0 : index
    %c0_21 = arith.constant 0 : index
    %c0_22 = arith.constant 0 : index
    %22 = vector.load %arg2[%c0_20, %c0_21, %c0_22] : memref<9x128x128xbf16, #tpu.memory_space<vmem>>, vector<1x128x128xbf16>
    %23 = vector.shape_cast %22 : vector<1x128x128xbf16> to vector<128x128xbf16>
    %cst_23 = arith.constant dense<0.000000e+00> : vector<256x128xf32>
    %24 = tpu.matmul %21, %23, %cst_23 {dimension_numbers = #tpu.dot_dimension_numbers<[1], [0], [0], [1], [0, 0, 1, 1], [], []>} : vector<256x128xbf16>, vector<128x128xbf16>, vector<256x128xf32> -> vector<256x128xf32>
    %25 = arith.addf %18, %24 : vector<256x128xf32>
    %26 = vector.extract_strided_slice %20 {offsets = [16, 0], sizes = [256, 128], strides = [1, 1]} : vector<288x128xbf16> to vector<256x128xbf16>
    %c3 = arith.constant 3 : index
    %c0_24 = arith.constant 0 : index
    %c0_25 = arith.constant 0 : index
    %27 = vector.load %arg2[%c3, %c0_24, %c0_25] : memref<9x128x128xbf16, #tpu.memory_space<vmem>>, vector<1x128x128xbf16>
    %28 = vector.shape_cast %27 : vector<1x128x128xbf16> to vector<128x128xbf16>
    %cst_26 = arith.constant dense<0.000000e+00> : vector<256x128xf32>
    %29 = tpu.matmul %26, %28, %cst_26 {dimension_numbers = #tpu.dot_dimension_numbers<[1], [0], [0], [1], [0, 0, 1, 1], [], []>} : vector<256x128xbf16>, vector<128x128xbf16>, vector<256x128xf32> -> vector<256x128xf32>
    %30 = arith.addf %25, %29 : vector<256x128xf32>
    %31 = vector.extract_strided_slice %20 {offsets = [32, 0], sizes = [256, 128], strides = [1, 1]} : vector<288x128xbf16> to vector<256x128xbf16>
    %c6 = arith.constant 6 : index
    %c0_27 = arith.constant 0 : index
    %c0_28 = arith.constant 0 : index
    %32 = vector.load %arg2[%c6, %c0_27, %c0_28] : memref<9x128x128xbf16, #tpu.memory_space<vmem>>, vector<1x128x128xbf16>
    %33 = vector.shape_cast %32 : vector<1x128x128xbf16> to vector<128x128xbf16>
    %cst_29 = arith.constant dense<0.000000e+00> : vector<256x128xf32>
    %34 = tpu.matmul %31, %33, %cst_29 {dimension_numbers = #tpu.dot_dimension_numbers<[1], [0], [0], [1], [0, 0, 1, 1], [], []>} : vector<256x128xbf16>, vector<128x128xbf16>, vector<256x128xf32> -> vector<256x128xf32>
    %35 = arith.addf %30, %34 : vector<256x128xf32>
    %c0_30 = arith.constant 0 : index
    %c1_31 = arith.constant 1 : index
    %c0_32 = arith.constant 0 : index
    %36 = vector.load %arg8[%c0_30, %c1_31, %c0_32] : memref<18x18x128xbf16, #tpu.memory_space<vmem>>, vector<18x16x128xbf16>
    %37 = vector.shape_cast %36 : vector<18x16x128xbf16> to vector<288x128xbf16>
    %38 = vector.extract_strided_slice %37 {offsets = [0, 0], sizes = [256, 128], strides = [1, 1]} : vector<288x128xbf16> to vector<256x128xbf16>
    %c1_33 = arith.constant 1 : index
    %c0_34 = arith.constant 0 : index
    %c0_35 = arith.constant 0 : index
    %39 = vector.load %arg2[%c1_33, %c0_34, %c0_35] : memref<9x128x128xbf16, #tpu.memory_space<vmem>>, vector<1x128x128xbf16>
    %40 = vector.shape_cast %39 : vector<1x128x128xbf16> to vector<128x128xbf16>
    %cst_36 = arith.constant dense<0.000000e+00> : vector<256x128xf32>
    %41 = tpu.matmul %38, %40, %cst_36 {dimension_numbers = #tpu.dot_dimension_numbers<[1], [0], [0], [1], [0, 0, 1, 1], [], []>} : vector<256x128xbf16>, vector<128x128xbf16>, vector<256x128xf32> -> vector<256x128xf32>
    %42 = arith.addf %35, %41 : vector<256x128xf32>
    %43 = vector.extract_strided_slice %37 {offsets = [16, 0], sizes = [256, 128], strides = [1, 1]} : vector<288x128xbf16> to vector<256x128xbf16>
    %c4 = arith.constant 4 : index
    %c0_37 = arith.constant 0 : index
    %c0_38 = arith.constant 0 : index
    %44 = vector.load %arg2[%c4, %c0_37, %c0_38] : memref<9x128x128xbf16, #tpu.memory_space<vmem>>, vector<1x128x128xbf16>
    %45 = vector.shape_cast %44 : vector<1x128x128xbf16> to vector<128x128xbf16>
    %cst_39 = arith.constant dense<0.000000e+00> : vector<256x128xf32>
    %46 = tpu.matmul %43, %45, %cst_39 {dimension_numbers = #tpu.dot_dimension_numbers<[1], [0], [0], [1], [0, 0, 1, 1], [], []>} : vector<256x128xbf16>, vector<128x128xbf16>, vector<256x128xf32> -> vector<256x128xf32>
    %47 = arith.addf %42, %46 : vector<256x128xf32>
    %48 = vector.extract_strided_slice %37 {offsets = [32, 0], sizes = [256, 128], strides = [1, 1]} : vector<288x128xbf16> to vector<256x128xbf16>
    %c7 = arith.constant 7 : index
    %c0_40 = arith.constant 0 : index
    %c0_41 = arith.constant 0 : index
    %49 = vector.load %arg2[%c7, %c0_40, %c0_41] : memref<9x128x128xbf16, #tpu.memory_space<vmem>>, vector<1x128x128xbf16>
    %50 = vector.shape_cast %49 : vector<1x128x128xbf16> to vector<128x128xbf16>
    %cst_42 = arith.constant dense<0.000000e+00> : vector<256x128xf32>
    %51 = tpu.matmul %48, %50, %cst_42 {dimension_numbers = #tpu.dot_dimension_numbers<[1], [0], [0], [1], [0, 0, 1, 1], [], []>} : vector<256x128xbf16>, vector<128x128xbf16>, vector<256x128xf32> -> vector<256x128xf32>
    %52 = arith.addf %47, %51 : vector<256x128xf32>
    %c0_43 = arith.constant 0 : index
    %c2 = arith.constant 2 : index
    %c0_44 = arith.constant 0 : index
    %53 = vector.load %arg8[%c0_43, %c2, %c0_44] : memref<18x18x128xbf16, #tpu.memory_space<vmem>>, vector<18x16x128xbf16>
    %54 = vector.shape_cast %53 : vector<18x16x128xbf16> to vector<288x128xbf16>
    %55 = vector.extract_strided_slice %54 {offsets = [0, 0], sizes = [256, 128], strides = [1, 1]} : vector<288x128xbf16> to vector<256x128xbf16>
    %c2_45 = arith.constant 2 : index
    %c0_46 = arith.constant 0 : index
    %c0_47 = arith.constant 0 : index
    %56 = vector.load %arg2[%c2_45, %c0_46, %c0_47] : memref<9x128x128xbf16, #tpu.memory_space<vmem>>, vector<1x128x128xbf16>
    %57 = vector.shape_cast %56 : vector<1x128x128xbf16> to vector<128x128xbf16>
    %cst_48 = arith.constant dense<0.000000e+00> : vector<256x128xf32>
    %58 = tpu.matmul %55, %57, %cst_48 {dimension_numbers = #tpu.dot_dimension_numbers<[1], [0], [0], [1], [0, 0, 1, 1], [], []>} : vector<256x128xbf16>, vector<128x128xbf16>, vector<256x128xf32> -> vector<256x128xf32>
    %59 = arith.addf %52, %58 : vector<256x128xf32>
    %60 = vector.extract_strided_slice %54 {offsets = [16, 0], sizes = [256, 128], strides = [1, 1]} : vector<288x128xbf16> to vector<256x128xbf16>
    %c5 = arith.constant 5 : index
    %c0_49 = arith.constant 0 : index
    %c0_50 = arith.constant 0 : index
    %61 = vector.load %arg2[%c5, %c0_49, %c0_50] : memref<9x128x128xbf16, #tpu.memory_space<vmem>>, vector<1x128x128xbf16>
    %62 = vector.shape_cast %61 : vector<1x128x128xbf16> to vector<128x128xbf16>
    %cst_51 = arith.constant dense<0.000000e+00> : vector<256x128xf32>
    %63 = tpu.matmul %60, %62, %cst_51 {dimension_numbers = #tpu.dot_dimension_numbers<[1], [0], [0], [1], [0, 0, 1, 1], [], []>} : vector<256x128xbf16>, vector<128x128xbf16>, vector<256x128xf32> -> vector<256x128xf32>
    %64 = arith.addf %59, %63 : vector<256x128xf32>
    %65 = vector.extract_strided_slice %54 {offsets = [32, 0], sizes = [256, 128], strides = [1, 1]} : vector<288x128xbf16> to vector<256x128xbf16>
    %c8 = arith.constant 8 : index
    %c0_52 = arith.constant 0 : index
    %c0_53 = arith.constant 0 : index
    %66 = vector.load %arg2[%c8, %c0_52, %c0_53] : memref<9x128x128xbf16, #tpu.memory_space<vmem>>, vector<1x128x128xbf16>
    %67 = vector.shape_cast %66 : vector<1x128x128xbf16> to vector<128x128xbf16>
    %cst_54 = arith.constant dense<0.000000e+00> : vector<256x128xf32>
    %68 = tpu.matmul %65, %67, %cst_54 {dimension_numbers = #tpu.dot_dimension_numbers<[1], [0], [0], [1], [0, 0, 1, 1], [], []>} : vector<256x128xbf16>, vector<128x128xbf16>, vector<256x128xf32> -> vector<256x128xf32>
    %69 = arith.addf %64, %68 : vector<256x128xf32>
    %70 = vector.broadcast %17 : vector<1x128xf32> to vector<256x128xf32>
    %71 = arith.addf %69, %70 : vector<256x128xf32>
    %cst_55 = arith.constant 0.000000e+00 : f32
    %72 = vector.broadcast %cst_55 : f32 to vector<256x128xf32>
    %73 = arith.maximumf %71, %72 : vector<256x128xf32>
    %cst_56 = arith.constant dense<0.000000e+00> : vector<128xf32>
    %74 = vector.multi_reduction <add>, %73, %cst_56 [0] : vector<256x128xf32> to vector<128xf32>
    %75 = vector.shape_cast %74 : vector<128xf32> to vector<1x128xf32>
    %76 = arith.mulf %73, %73 : vector<256x128xf32>
    %cst_57 = arith.constant dense<0.000000e+00> : vector<128xf32>
    %77 = vector.multi_reduction <add>, %76, %cst_57 [0] : vector<256x128xf32> to vector<128xf32>
    %78 = vector.shape_cast %77 : vector<128xf32> to vector<1x128xf32>
    %79 = tpu.concatenate %75, %78 in 0 : vector<1x128xf32>, vector<1x128xf32> -> vector<2x128xf32>
    %c0_58 = arith.constant 0 : index
    %c0_59 = arith.constant 0 : index
    %c0_60 = arith.constant 0 : index
    %80 = vector.load %arg7[%c0_58, %c0_59, %c0_60] : memref<1x2x128xf32, #tpu.memory_space<vmem>>, vector<1x2x128xf32>
    %81 = vector.shape_cast %80 : vector<1x2x128xf32> to vector<2x128xf32>
    %82 = vector.shape_cast %79 : vector<2x128xf32> to vector<1x2x128xf32>
    tpu.vector_store %arg7[%c0_58, %c0_59, %c0_60], %82 {strides = array<i32>} : memref<1x2x128xf32, #tpu.memory_space<vmem>>, vector<1x2x128xf32>,
    %83 = arith.truncf %73 : vector<256x128xf32> to vector<256x128xbf16>
    %c0_61 = arith.constant 0 : index
    %c0_62 = arith.constant 0 : index
    %c0_63 = arith.constant 0 : index
    %84 = vector.load %arg6[%c0_61, %c0_62, %c0_63] : memref<1x256x128xbf16, #tpu.memory_space<vmem>>, vector<1x256x128xbf16>
    %85 = vector.shape_cast %84 : vector<1x256x128xbf16> to vector<256x128xbf16>
    %86 = vector.shape_cast %83 : vector<256x128xbf16> to vector<1x256x128xbf16>
    tpu.vector_store %arg6[%c0_61, %c0_62, %c0_63], %86 {strides = array<i32>} : memref<1x256x128xbf16, #tpu.memory_space<vmem>>, vector<1x256x128xbf16>,
    return
  }
  func.func @transform_0(%arg0: i32) -> (i32, i32, i32, i32) {
    %c0_i32 = arith.constant 0 : i32
    %c0_i32_0 = arith.constant 0 : i32
    %c0_i32_1 = arith.constant 0 : i32
    %c0_i32_2 = arith.constant 0 : i32
    return %arg0, %c0_i32, %c0_i32_0, %c0_i32_1 : i32, i32, i32, i32
  }
  func.func @transform_1(%arg0: i32) -> (i32, i32, i32) {
    %c0_i32 = arith.constant 0 : i32
    %c0_i32_0 = arith.constant 0 : i32
    %c0_i32_1 = arith.constant 0 : i32
    %c0_i32_2 = arith.constant 0 : i32
    return %c0_i32, %c0_i32_0, %c0_i32_1 : i32, i32, i32
  }
  func.func @transform_2(%arg0: i32) -> (i32, i32) {
    %c0_i32 = arith.constant 0 : i32
    %c0_i32_0 = arith.constant 0 : i32
    %c0_i32_1 = arith.constant 0 : i32
    return %c0_i32, %c0_i32_0 : i32, i32
  }
  func.func @transform_3(%arg0: i32) -> (i32, i32, i32) {
    %c0_i32 = arith.constant 0 : i32
    %c0_i32_0 = arith.constant 0 : i32
    %c0_i32_1 = arith.constant 0 : i32
    %c0_i32_2 = arith.constant 0 : i32
    return %c0_i32, %c0_i32_0, %c0_i32_1 : i32, i32, i32
  }
  func.func @transform_4(%arg0: i32) -> (i32, i32, i32) {
    %c0_i32 = arith.constant 0 : i32
    %c0_i32_0 = arith.constant 0 : i32
    %c0_i32_1 = arith.constant 0 : i32
    return %arg0, %c0_i32, %c0_i32_0 : i32, i32, i32
  }
  func.func @transform_5(%arg0: i32) -> (i32, i32, i32) {
    %c0_i32 = arith.constant 0 : i32
    %c0_i32_0 = arith.constant 0 : i32
    %c0_i32_1 = arith.constant 0 : i32
    return %arg0, %c0_i32, %c0_i32_0 : i32, i32, i32
  }
  func.func @transform_6(%arg0: i32) -> (i32, i32, i32) {
    %c0_i32 = arith.constant 0 : i32
    %c0_i32_0 = arith.constant 0 : i32
    %c0_i32_1 = arith.constant 0 : i32
    return %arg0, %c0_i32, %c0_i32_0 : i32, i32, i32
  }
}

module attributes {stable_mosaic.version = 11 : i64} {
  func.func @_conv4x4_s2_kernel(%arg0: i32, %arg1: memref<1x9x2x9x256xbf16, #tpu.memory_space<vmem>>, %arg2: memref<8x256x128xbf16, #tpu.memory_space<vmem>>, %arg3: memref<1x128xf32, #tpu.memory_space<vmem>>, %arg4: memref<1x8x8x128xf32, #tpu.memory_space<vmem>>) attributes {dimension_semantics = [#tpu.dimension_semantics<parallel>], iteration_bounds = array<i64: 2>, scalar_prefetch = 0 : i64, scratch_operands = 0 : i64, tpu.core_type = #tpu.core_type<tc>, window_params = [{transform_indices = @transform_0, window_bounds = array<i64: 1, 9, 2, 9, 256>}, {pipeline_mode = #tpu.pipeline_mode<synchronous>, transform_indices = @transform_1, window_bounds = array<i64: 8, 256, 128>}, {pipeline_mode = #tpu.pipeline_mode<synchronous>, transform_indices = @transform_2, window_bounds = array<i64: 1, 128>}, {transform_indices = @transform_3, window_bounds = array<i64: 1, 8, 8, 128>}]} {
    %c0 = arith.constant 0 : index
    %c0_0 = arith.constant 0 : index
    %0 = vector.load %arg3[%c0, %c0_0] : memref<1x128xf32, #tpu.memory_space<vmem>>, vector<1x128xf32>
    %cst = arith.constant 0.000000e+00 : f32
    %1 = vector.broadcast %cst : f32 to vector<64x128xf32>
    %c0_1 = arith.constant 0 : index
    %c0_2 = arith.constant 0 : index
    %c0_3 = arith.constant 0 : index
    %c0_4 = arith.constant 0 : index
    %c0_5 = arith.constant 0 : index
    %2 = vector.load %arg1[%c0_1, %c0_2, %c0_3, %c0_4, %c0_5] : memref<1x9x2x9x256xbf16, #tpu.memory_space<vmem>>, vector<1x8x1x8x256xbf16>
    %3 = vector.shape_cast %2 : vector<1x8x1x8x256xbf16> to vector<8x8x256xbf16>
    %4 = vector.shape_cast %3 : vector<8x8x256xbf16> to vector<64x256xbf16>
    %c0_6 = arith.constant 0 : index
    %c0_7 = arith.constant 0 : index
    %c0_8 = arith.constant 0 : index
    %5 = vector.load %arg2[%c0_6, %c0_7, %c0_8] : memref<8x256x128xbf16, #tpu.memory_space<vmem>>, vector<1x256x128xbf16>
    %6 = vector.shape_cast %5 : vector<1x256x128xbf16> to vector<256x128xbf16>
    %cst_9 = arith.constant dense<0.000000e+00> : vector<64x128xf32>
    %7 = tpu.matmul %4, %6, %cst_9 {dimension_numbers = #tpu.dot_dimension_numbers<[1], [0], [0], [1], [0, 0, 1, 1], [], []>} : vector<64x256xbf16>, vector<256x128xbf16>, vector<64x128xf32> -> vector<64x128xf32>
    %8 = arith.addf %1, %7 : vector<64x128xf32>
    %c0_10 = arith.constant 0 : index
    %c0_11 = arith.constant 0 : index
    %c0_12 = arith.constant 0 : index
    %c1 = arith.constant 1 : index
    %c0_13 = arith.constant 0 : index
    %9 = vector.load %arg1[%c0_10, %c0_11, %c0_12, %c1, %c0_13] : memref<1x9x2x9x256xbf16, #tpu.memory_space<vmem>>, vector<1x8x1x8x256xbf16>
    %10 = vector.shape_cast %9 : vector<1x8x1x8x256xbf16> to vector<8x8x256xbf16>
    %11 = vector.shape_cast %10 : vector<8x8x256xbf16> to vector<64x256xbf16>
    %c1_14 = arith.constant 1 : index
    %c0_15 = arith.constant 0 : index
    %c0_16 = arith.constant 0 : index
    %12 = vector.load %arg2[%c1_14, %c0_15, %c0_16] : memref<8x256x128xbf16, #tpu.memory_space<vmem>>, vector<1x256x128xbf16>
    %13 = vector.shape_cast %12 : vector<1x256x128xbf16> to vector<256x128xbf16>
    %cst_17 = arith.constant dense<0.000000e+00> : vector<64x128xf32>
    %14 = tpu.matmul %11, %13, %cst_17 {dimension_numbers = #tpu.dot_dimension_numbers<[1], [0], [0], [1], [0, 0, 1, 1], [], []>} : vector<64x256xbf16>, vector<256x128xbf16>, vector<64x128xf32> -> vector<64x128xf32>
    %15 = arith.addf %8, %14 : vector<64x128xf32>
    %c0_18 = arith.constant 0 : index
    %c0_19 = arith.constant 0 : index
    %c1_20 = arith.constant 1 : index
    %c0_21 = arith.constant 0 : index
    %c0_22 = arith.constant 0 : index
    %16 = vector.load %arg1[%c0_18, %c0_19, %c1_20, %c0_21, %c0_22] : memref<1x9x2x9x256xbf16, #tpu.memory_space<vmem>>, vector<1x8x1x8x256xbf16>
    %17 = vector.shape_cast %16 : vector<1x8x1x8x256xbf16> to vector<8x8x256xbf16>
    %18 = vector.shape_cast %17 : vector<8x8x256xbf16> to vector<64x256xbf16>
    %c2 = arith.constant 2 : index
    %c0_23 = arith.constant 0 : index
    %c0_24 = arith.constant 0 : index
    %19 = vector.load %arg2[%c2, %c0_23, %c0_24] : memref<8x256x128xbf16, #tpu.memory_space<vmem>>, vector<1x256x128xbf16>
    %20 = vector.shape_cast %19 : vector<1x256x128xbf16> to vector<256x128xbf16>
    %cst_25 = arith.constant dense<0.000000e+00> : vector<64x128xf32>
    %21 = tpu.matmul %18, %20, %cst_25 {dimension_numbers = #tpu.dot_dimension_numbers<[1], [0], [0], [1], [0, 0, 1, 1], [], []>} : vector<64x256xbf16>, vector<256x128xbf16>, vector<64x128xf32> -> vector<64x128xf32>
    %22 = arith.addf %15, %21 : vector<64x128xf32>
    %c0_26 = arith.constant 0 : index
    %c0_27 = arith.constant 0 : index
    %c1_28 = arith.constant 1 : index
    %c1_29 = arith.constant 1 : index
    %c0_30 = arith.constant 0 : index
    %23 = vector.load %arg1[%c0_26, %c0_27, %c1_28, %c1_29, %c0_30] : memref<1x9x2x9x256xbf16, #tpu.memory_space<vmem>>, vector<1x8x1x8x256xbf16>
    %24 = vector.shape_cast %23 : vector<1x8x1x8x256xbf16> to vector<8x8x256xbf16>
    %25 = vector.shape_cast %24 : vector<8x8x256xbf16> to vector<64x256xbf16>
    %c3 = arith.constant 3 : index
    %c0_31 = arith.constant 0 : index
    %c0_32 = arith.constant 0 : index
    %26 = vector.load %arg2[%c3, %c0_31, %c0_32] : memref<8x256x128xbf16, #tpu.memory_space<vmem>>, vector<1x256x128xbf16>
    %27 = vector.shape_cast %26 : vector<1x256x128xbf16> to vector<256x128xbf16>
    %cst_33 = arith.constant dense<0.000000e+00> : vector<64x128xf32>
    %28 = tpu.matmul %25, %27, %cst_33 {dimension_numbers = #tpu.dot_dimension_numbers<[1], [0], [0], [1], [0, 0, 1, 1], [], []>} : vector<64x256xbf16>, vector<256x128xbf16>, vector<64x128xf32> -> vector<64x128xf32>
    %29 = arith.addf %22, %28 : vector<64x128xf32>
    %c0_34 = arith.constant 0 : index
    %c1_35 = arith.constant 1 : index
    %c0_36 = arith.constant 0 : index
    %c0_37 = arith.constant 0 : index
    %c0_38 = arith.constant 0 : index
    %30 = vector.load %arg1[%c0_34, %c1_35, %c0_36, %c0_37, %c0_38] : memref<1x9x2x9x256xbf16, #tpu.memory_space<vmem>>, vector<1x8x1x8x256xbf16>
    %31 = vector.shape_cast %30 : vector<1x8x1x8x256xbf16> to vector<8x8x256xbf16>
    %32 = vector.shape_cast %31 : vector<8x8x256xbf16> to vector<64x256xbf16>
    %c4 = arith.constant 4 : index
    %c0_39 = arith.constant 0 : index
    %c0_40 = arith.constant 0 : index
    %33 = vector.load %arg2[%c4, %c0_39, %c0_40] : memref<8x256x128xbf16, #tpu.memory_space<vmem>>, vector<1x256x128xbf16>
    %34 = vector.shape_cast %33 : vector<1x256x128xbf16> to vector<256x128xbf16>
    %cst_41 = arith.constant dense<0.000000e+00> : vector<64x128xf32>
    %35 = tpu.matmul %32, %34, %cst_41 {dimension_numbers = #tpu.dot_dimension_numbers<[1], [0], [0], [1], [0, 0, 1, 1], [], []>} : vector<64x256xbf16>, vector<256x128xbf16>, vector<64x128xf32> -> vector<64x128xf32>
    %36 = arith.addf %29, %35 : vector<64x128xf32>
    %c0_42 = arith.constant 0 : index
    %c1_43 = arith.constant 1 : index
    %c0_44 = arith.constant 0 : index
    %c1_45 = arith.constant 1 : index
    %c0_46 = arith.constant 0 : index
    %37 = vector.load %arg1[%c0_42, %c1_43, %c0_44, %c1_45, %c0_46] : memref<1x9x2x9x256xbf16, #tpu.memory_space<vmem>>, vector<1x8x1x8x256xbf16>
    %38 = vector.shape_cast %37 : vector<1x8x1x8x256xbf16> to vector<8x8x256xbf16>
    %39 = vector.shape_cast %38 : vector<8x8x256xbf16> to vector<64x256xbf16>
    %c5 = arith.constant 5 : index
    %c0_47 = arith.constant 0 : index
    %c0_48 = arith.constant 0 : index
    %40 = vector.load %arg2[%c5, %c0_47, %c0_48] : memref<8x256x128xbf16, #tpu.memory_space<vmem>>, vector<1x256x128xbf16>
    %41 = vector.shape_cast %40 : vector<1x256x128xbf16> to vector<256x128xbf16>
    %cst_49 = arith.constant dense<0.000000e+00> : vector<64x128xf32>
    %42 = tpu.matmul %39, %41, %cst_49 {dimension_numbers = #tpu.dot_dimension_numbers<[1], [0], [0], [1], [0, 0, 1, 1], [], []>} : vector<64x256xbf16>, vector<256x128xbf16>, vector<64x128xf32> -> vector<64x128xf32>
    %43 = arith.addf %36, %42 : vector<64x128xf32>
    %c0_50 = arith.constant 0 : index
    %c1_51 = arith.constant 1 : index
    %c1_52 = arith.constant 1 : index
    %c0_53 = arith.constant 0 : index
    %c0_54 = arith.constant 0 : index
    %44 = vector.load %arg1[%c0_50, %c1_51, %c1_52, %c0_53, %c0_54] : memref<1x9x2x9x256xbf16, #tpu.memory_space<vmem>>, vector<1x8x1x8x256xbf16>
    %45 = vector.shape_cast %44 : vector<1x8x1x8x256xbf16> to vector<8x8x256xbf16>
    %46 = vector.shape_cast %45 : vector<8x8x256xbf16> to vector<64x256xbf16>
    %c6 = arith.constant 6 : index
    %c0_55 = arith.constant 0 : index
    %c0_56 = arith.constant 0 : index
    %47 = vector.load %arg2[%c6, %c0_55, %c0_56] : memref<8x256x128xbf16, #tpu.memory_space<vmem>>, vector<1x256x128xbf16>
    %48 = vector.shape_cast %47 : vector<1x256x128xbf16> to vector<256x128xbf16>
    %cst_57 = arith.constant dense<0.000000e+00> : vector<64x128xf32>
    %49 = tpu.matmul %46, %48, %cst_57 {dimension_numbers = #tpu.dot_dimension_numbers<[1], [0], [0], [1], [0, 0, 1, 1], [], []>} : vector<64x256xbf16>, vector<256x128xbf16>, vector<64x128xf32> -> vector<64x128xf32>
    %50 = arith.addf %43, %49 : vector<64x128xf32>
    %c0_58 = arith.constant 0 : index
    %c1_59 = arith.constant 1 : index
    %c1_60 = arith.constant 1 : index
    %c1_61 = arith.constant 1 : index
    %c0_62 = arith.constant 0 : index
    %51 = vector.load %arg1[%c0_58, %c1_59, %c1_60, %c1_61, %c0_62] : memref<1x9x2x9x256xbf16, #tpu.memory_space<vmem>>, vector<1x8x1x8x256xbf16>
    %52 = vector.shape_cast %51 : vector<1x8x1x8x256xbf16> to vector<8x8x256xbf16>
    %53 = vector.shape_cast %52 : vector<8x8x256xbf16> to vector<64x256xbf16>
    %c7 = arith.constant 7 : index
    %c0_63 = arith.constant 0 : index
    %c0_64 = arith.constant 0 : index
    %54 = vector.load %arg2[%c7, %c0_63, %c0_64] : memref<8x256x128xbf16, #tpu.memory_space<vmem>>, vector<1x256x128xbf16>
    %55 = vector.shape_cast %54 : vector<1x256x128xbf16> to vector<256x128xbf16>
    %cst_65 = arith.constant dense<0.000000e+00> : vector<64x128xf32>
    %56 = tpu.matmul %53, %55, %cst_65 {dimension_numbers = #tpu.dot_dimension_numbers<[1], [0], [0], [1], [0, 0, 1, 1], [], []>} : vector<64x256xbf16>, vector<256x128xbf16>, vector<64x128xf32> -> vector<64x128xf32>
    %57 = arith.addf %50, %56 : vector<64x128xf32>
    %58 = vector.broadcast %0 : vector<1x128xf32> to vector<64x128xf32>
    %59 = arith.addf %57, %58 : vector<64x128xf32>
    %60 = vector.shape_cast %59 : vector<64x128xf32> to vector<8x8x128xf32>
    %c0_66 = arith.constant 0 : index
    %c0_67 = arith.constant 0 : index
    %c0_68 = arith.constant 0 : index
    %c0_69 = arith.constant 0 : index
    %61 = vector.load %arg4[%c0_66, %c0_67, %c0_68, %c0_69] : memref<1x8x8x128xf32, #tpu.memory_space<vmem>>, vector<1x8x8x128xf32>
    %62 = vector.shape_cast %61 : vector<1x8x8x128xf32> to vector<8x8x128xf32>
    %63 = vector.shape_cast %60 : vector<8x8x128xf32> to vector<1x8x8x128xf32>
    tpu.vector_store %arg4[%c0_66, %c0_67, %c0_68, %c0_69], %63 {strides = array<i32>} : memref<1x8x8x128xf32, #tpu.memory_space<vmem>>, vector<1x8x8x128xf32>,
    return
  }
  func.func @transform_0(%arg0: i32) -> (i32, i32, i32, i32, i32) {
    %c0_i32 = arith.constant 0 : i32
    %c0_i32_0 = arith.constant 0 : i32
    %c0_i32_1 = arith.constant 0 : i32
    %c0_i32_2 = arith.constant 0 : i32
    %c0_i32_3 = arith.constant 0 : i32
    return %arg0, %c0_i32, %c0_i32_0, %c0_i32_1, %c0_i32_2 : i32, i32, i32, i32, i32
  }
  func.func @transform_1(%arg0: i32) -> (i32, i32, i32) {
    %c0_i32 = arith.constant 0 : i32
    %c0_i32_0 = arith.constant 0 : i32
    %c0_i32_1 = arith.constant 0 : i32
    %c0_i32_2 = arith.constant 0 : i32
    return %c0_i32, %c0_i32_0, %c0_i32_1 : i32, i32, i32
  }
  func.func @transform_2(%arg0: i32) -> (i32, i32) {
    %c0_i32 = arith.constant 0 : i32
    %c0_i32_0 = arith.constant 0 : i32
    %c0_i32_1 = arith.constant 0 : i32
    return %c0_i32, %c0_i32_0 : i32, i32
  }
  func.func @transform_3(%arg0: i32) -> (i32, i32, i32, i32) {
    %c0_i32 = arith.constant 0 : i32
    %c0_i32_0 = arith.constant 0 : i32
    %c0_i32_1 = arith.constant 0 : i32
    %c0_i32_2 = arith.constant 0 : i32
    return %arg0, %c0_i32, %c0_i32_0, %c0_i32_1 : i32, i32, i32, i32
  }
}

</mosaic_0001>

<bundles_post_ra>
// kernel: block_forward.3
= control target key start
LH: loop header
LB: loop body
LE: loop exit
PB: predicated region body
PF: predicated region fallthrough
CT: control target
= control target key end

     0   :  { %s4468_s15 = smov 0   ;;  %s5710_s0 = inlined_call_operand.vmem [shape: bf16[2,16,16,128], index: 0, kind: input, shape index: {}]   ;;  %s5711_s1 = inlined_call_operand.vmem [shape: bf16[9,128,128], index: 1, kind: input, shape index: {}]   ;;  %s5712_s2 = inlined_call_operand.vmem [shape: f32[1,128], index: 2, kind: input, shape index: {}]   ;;  %s5713_s3 = inlined_call_operand.vmem [shape: bf16[2,256,128], index: 3, kind: output, shape index: {0}]   ;;  %s5714_s4 = inlined_call_operand.vmem [shape: f32[2,2,128], index: 4, kind: output, shape index: {1}]  }
   0x1 LB: > { %s3651_s16 = sadd.s32 4294967295, %s4440_s15   ;;  %p3655_p0 = scmp.ge.s32.totalorder %s4440_s15, 1  ;;  %s4440_s15 = sphi %s4468_s15, %s15_s15  }
   0x2   : > { %p165_p1 = scmp.lt.s32.totalorder %s4440_s15, 3 }
   0x4   : > { %p166_p2 = pnand %p3655_p0, %p165_p1 }
   0x6   : > { %169 = sbr.rel (%p166_p2) target bundleno = 805 (0x325), region = 32 }
   0xb   : > { %v4204_v0 = vld [vmem:[%s5711_s1 + $0xf8] sm:$0xff]  ;;  %p195_p3 = scmp.lt.s32.totalorder %s3651_s16, 1  ;;  %v4442_v1 = vmov 0   ;;  %v4203_v2 = vld [vmem:[%s5711_s1 + $0xf0] sm:$0xff]  ;;  %vm296_vm0 = vsmask.f32 256 }
   0xc   : > { %225 = vst [vmem:[#allocation2 + $0x3c] sm:$0xf] %v4442_v1  ;;  %4356 = vmatpush.bf16.msra.mxu1 %v4204_v0  ;;  %4357 = vmatpush.bf16.msra.mxu2 %v4204_v0  ;;  %v4202_v3 = vld [vmem:[%s5711_s1 + $0xe8] sm:$0xff]  ;;  %vm620_vm1 = vcmask 1043456   ;;  %vm297_vm2 = vsmask.f32 4368 }
   0xd   : > { %s5766_s16 = smov (!%p195_p3, %s3651_s16), 1  ;;  %226 = vst [vmem:[#allocation2 + $0x40] sm:$0xf] %v4442_v1  ;;  %4358 = vmatpush.bf16.msra.mxu3 %v4204_v0  ;;  %951 = vmatpush.bf16.msra.mxu0 %v4204_v0  ;;  %vm621_vm3 = vsmask.f32 7938  ;;  %vm4506_vm4 = vmor %vm296_vm0, %vm297_vm2  ;;  %v4201_v13 = vld [vmem:[%s5711_s1 + $0xe0] sm:$0xff] }
   0xe   : > { %s4169_s23 = sshll.u32 %s5766_s16, 7  ;;  %210 = vst [vmem:[#allocation2] sm:$0xf] %v4442_v1  ;;  %vm4518_vm5 = vmand %vm620_vm1, %vm621_vm3  ;;  %v4200_v21 = vld [vmem:[%s5711_s1 + $0xd8] sm:$0xff]  ;;  %v4199_v22 = vld [vmem:[%s5711_s1 + $0xd0] sm:$0xff]  ;;  %vm627_vm6 = vcmask 1040384  }
   0xf   : > { %s4496_s26 = scalar_lea.vmem %s5710_s0, %s4169_s23  ;;  %211 = vst [vmem:[#allocation2 + $0x4] sm:$0xf] %v4442_v1  ;;  %v4198_v23 = vld [vmem:[%s5711_s1 + $0xc8] sm:$0xff]  ;;  %v4197_v24 = vld [vmem:[%s5711_s1 + $0xc0] sm:$0xff]  ;;  %v4212_v35 = vld [vmem:[%s5711_s1 + $0x1b8] sm:$0xff]  ;;  %vm2566_vm11 = vcmask 1042432   ;;  %s5560_s7 = scalar_lea.vmem %s5713_s3, %s4169_s23 }
  0x10   : > { %4359 = vmatpush.bf16.msra.mxu1 %v4203_v2  ;;  %4360 = vmatpush.bf16.msra.mxu2 %v4203_v2  ;;  %v272_v4 = vld [vmem:[%s4496_s26 + $0x20] sm:$0xf]  ;;  %v273_v5 = vld [vmem:[%s4496_s26 + $0x24] sm:$0xf]  ;;  %212 = vst [vmem:[#allocation2 + $0x8] sm:$0x1] %v4442_v1  ;;  %vm4929_vm7 = vmand %vm627_vm6, %vm296_vm0 }
  0x11   : > { %4361 = vmatpush.bf16.msra.mxu3 %v4203_v2  ;;  %952 = vmatpush.bf16.msra.mxu0 %v4203_v2  ;;  %v368_v6 = vshrl.u32 %v272_v4, 16  ;;  %v371_v7 = vshll.u32 %v272_v4, 16  ;;  %v376_v8 = vshrl.u32 %v273_v5, 16  ;;  %v379_v9 = vshll.u32 %v273_v5, 16  ;;  %213 = vst [vmem:[#allocation2 + $0xc] sm:$0xf] %v4442_v1 }
  0x12   : > { %214 = vst [vmem:[#allocation2 + $0x10] sm:$0xf] %v4442_v1  ;;  %v4560_v26 = vld [vmem:[%s4496_s26 + $0x40] sm:$0xf]  ;;  %v4565_v27 = vld [vmem:[%s4496_s26 + $0x44] sm:$0xf] }
  0x13   : > { %v370_v11 = vrot.slane %v368_v6, 7  ;;  %v4510_v12 = vrot.slane %v376_v8, 7  ;;  %215 = vst [vmem:[#allocation2 + $0x14] sm:$0x1] %v4442_v1  ;;  %v653_v15 = vld [vmem:[#allocation2 + $0x3c] sm:$0xf] }
  0x14   : > { %4362 = vmatpush.bf16.msra.mxu1 %v4202_v3  ;;  %4363 = vmatpush.bf16.msra.mxu2 %v4202_v3  ;;  %216 = vst [vmem:[#allocation2 + $0x18] sm:$0xf] %v4442_v1  ;;  %v436_v28 = vshrl.u32 %v4560_v26, 16  ;;  %v4570_v29 = vld [vmem:[%s4496_s26 + $0x60] sm:$0xf]  ;;  %v444_v32 = vshrl.u32 %v4565_v27, 16 }
  0x15   : > { %4364 = vmatpush.bf16.msra.mxu3 %v4202_v3  ;;  %953 = vmatpush.bf16.msra.mxu0 %v4202_v3  ;;  %v373_v16 = vor.u32 %v371_v7, %v370_v11  ;;  %v374_v17 = vrot.slane %v370_v11, 4  ;;  %v381_v18 = vor.u32 %v379_v9, %v4510_v12  ;;  %217 = vst [vmem:[#allocation2 + $0x1c] sm:$0xf] %v4442_v1  ;;  %v4575_v30 = vld [vmem:[%s4496_s26 + $0x64] sm:$0xf]  ;;  %v504_v33 = vshrl.u32 %v4570_v29, 16 }
  0x16   : > { %218 = vst [vmem:[#allocation2 + $0x20] sm:$0x1] %v4442_v1  ;;  %v4578_v31 = vld [vmem:[%s4496_s26] sm:$0xf]  ;;  %v4584_v34 = vrot.slane %v436_v28, 7  ;;  %v512_v36 = vshrl.u32 %v4575_v30, 16 }
  0x17   : > { %v382_v19 = vsel %vm4506_vm4, %v374_v17, %v381_v18  ;;  %v654_v20 = vsel %vm4518_vm5, %v373_v16, %v653_v15  ;;  %219 = vst [vmem:[#allocation2 + $0x24] sm:$0xf] %v4442_v1  ;;  %v4592_v37 = vld [vmem:[%s4496_s26 + $0x4] sm:$0xf]  ;;  %v300_v38 = vshrl.u32 %v4578_v31, 16  ;;  %v439_v39 = vshll.u32 %v4560_v26, 16 }
  0x18   : > { %4365 = vmatpush.bf16.msra.mxu1 %v4201_v13  ;;  %4366 = vmatpush.bf16.msra.mxu2 %v4201_v13  ;;  %655 = vst [vmem:[#allocation2 + $0x3c] sm:$0xf] %v654_v20  ;;  %v4220_v40 = vld [vmem:[%s5711_s1 + $0x78] sm:$0xff]  ;;  %v4211_v42 = vld [vmem:[%s5711_s1 + $0x1b0] sm:$0xff]  ;;  %v4607_v43 = vrot.slane %v444_v32, 7  ;;  %v447_v44 = vshll.u32 %v4565_v27, 16 }
  0x19   : > { %4367 = vmatpush.bf16.msra.mxu3 %v4201_v13  ;;  %954 = vmatpush.bf16.msra.mxu0 %v4201_v13  ;;  %656 = vst [vmem:[#allocation2 + $0x40] sm:$0xf] %v382_v19  ;;  %v4196_v41 = vld [vmem:[%s5711_s1 + $0x38] sm:$0xff]  ;;  %v4610_v45 = vrot.slane %v504_v33, 7  ;;  %v442_v47 = vrot.slane %v4584_v34, 4  ;;  %v507_v48 = vshll.u32 %v4570_v29, 16  ;;  %v441_v6 = vor.u32 %v439_v39, %v4584_v34 }
  0x1a   : > { %220 = vst [vmem:[#allocation2 + $0x28] sm:$0xf] %v4442_v1  ;;  %v4228_v46 = vld [vmem:[%s5711_s1 + $0x138] sm:$0xff]  ;;  %v4219_v49 = vld [vmem:[%s5711_s1 + $0x70] sm:$0xff]  ;;  %v4625_v51 = vrot.slane %v512_v36, 7  ;;  %v515_v52 = vshll.u32 %v4575_v30, 16  ;;  %v449_v7 = vor.u32 %v447_v44, %v4607_v43 }
  0x1b   : > { %221 = vst [vmem:[#allocation2 + $0x2c] sm:$0x1] %v4442_v1  ;;  %v4195_v50 = vld [vmem:[%s5711_s1 + $0x30] sm:$0xff]  ;;  %v4628_v53 = vrot.slane %v300_v38, 7  ;;  %v308_v54 = vshrl.u32 %v4592_v37, 16  ;;  %v510_v57 = vrot.slane %v4610_v45, 4  ;;  %v4673_v15 = vor.u32 %v507_v48, %v4610_v45 }
  0x1c   : > { %4368 = vmatpush.bf16.msra.mxu1 %v4200_v21  ;;  %4369 = vmatpush.bf16.msra.mxu2 %v4200_v21  ;;  %222 = vst [vmem:[#allocation2 + $0x30] sm:$0xf] %v4442_v1  ;;  %v4633_v55 = vld [vmem:[%s4496_s26 + $0x28] sm:$0xf]  ;;  %v4636_v56 = vld [vmem:[%s4496_s26 + $0x2c] sm:$0xf]  ;;  %v517_v16 = vor.u32 %v515_v52, %v4625_v51  ;;  %v450_v33 = vsel %vm4506_vm4, %v442_v47, %v449_v7 }
  0x1d   : > { %4370 = vmatpush.bf16.msra.mxu3 %v4200_v21  ;;  %955 = vmatpush.bf16.msra.mxu0 %v4200_v21  ;;  %223 = vst [vmem:[#allocation2 + $0x34] sm:$0xf] %v4442_v1  ;;  %v303_v58 = vshll.u32 %v4578_v31, 16  ;;  %v4642_v59 = vld [vmem:[%s4496_s26 + $0x48] sm:$0xf]  ;;  %v385_v62 = vshrl.u32 %v4633_v55, 16 }
  0x1e   : > { %224 = vst [vmem:[#allocation2 + $0x38] sm:$0x1] %v4442_v1  ;;  %v4646_v60 = vld [vmem:[%s4496_s26 + $0x4c] sm:$0xf]  ;;  %v4649_v61 = vld [vmem:[%s4496_s26 + $0x68] sm:$0xf]  ;;  %v518_v39 = vsel %vm4506_vm4, %v510_v57, %v517_v16 }
  0x1f   : > { %227 = vst [vmem:[#allocation2 + $0x44] sm:$0x1] %v4442_v1  ;;  %v393_v63 = vshrl.u32 %v4636_v56, 16  ;;  %v4655_v0 = vld [vmem:[%s4496_s26 + $0x6c] sm:$0xf]  ;;  %v306_v2 = vrot.slane %v4628_v53, 4 }
  0x20   : > { %4371 = vmatpush.bf16.msra.mxu1 %v4199_v22  ;;  %4372 = vmatpush.bf16.msra.mxu2 %v4199_v22  ;;  %228 = vst [vmem:[#allocation2 + $0x48] sm:$0xf] %v4442_v1  ;;  %v4176_v25 = vld [vmem:[#allocation2 + $0x3c] sm:$0xff]  ;;  %v4659_v3 = vrot.slane %v308_v54, 7  ;;  %v311_v4 = vshll.u32 %v4592_v37, 16  ;;  %v453_v5 = vshrl.u32 %v4642_v59, 16 }
  0x21   : > { %4373 = vmatpush.bf16.msra.mxu3 %v4199_v22  ;;  %956 = vmatpush.bf16.msra.mxu0 %v4199_v22  ;;  %229 = vst [vmem:[#allocation2 + $0x4c] sm:$0xf] %v4442_v1  ;;  %v461_v8 = vshrl.u32 %v4646_v60, 16  ;;  %v521_v9 = vshrl.u32 %v4649_v61, 16  ;;  %v4669_v11 = vld [vmem:[%s4496_s26 + $0x8] sm:$0xf] }
  0x22   : > { %230 = vst [vmem:[#allocation2 + $0x50] sm:$0x1] %v4442_v1  ;;  %v388_v17 = vshll.u32 %v4633_v55, 16  ;;  %v529_v18 = vshrl.u32 %v4655_v0, 16  ;;  %v4679_v19 = vld [vmem:[#allocation2 + $0xc] sm:$0xf] }
  0x23   : > { %231 = vst [vmem:[#allocation2 + $0x54] sm:$0xf] %v4442_v1  ;;  %v4681_v20 = vrot.slane %v385_v62, 7  ;;  %v4683_v21 = vrot.slane %v393_v63, 7  ;;  %v396_v22 = vshll.u32 %v4636_v56, 16  ;;  %v4692_v26 = vrot.slane %v453_v5, 7 }
  0x24   : > { %4374 = vmatpush.bf16.msra.mxu1 %v4198_v23  ;;  %4375 = vmatpush.bf16.msra.mxu2 %v4198_v23  ;;  %232 = vst [vmem:[#allocation2 + $0x58] sm:$0xf] %v4442_v1  ;;  %v456_v27 = vshll.u32 %v4642_v59, 16  ;;  %v4696_v28 = vld [vmem:[%s4496_s26 + $0xc] sm:$0xf]  ;;  %v4699_v29 = vrot.slane %v461_v8, 7 }
  0x25   : > { %4376 = vmatpush.bf16.msra.mxu3 %v4198_v23  ;;  %957 = vmatpush.bf16.msra.mxu0 %v4198_v23  ;;  %233 = vst [vmem:[#allocation2 + $0x5c] sm:$0x1] %v4442_v1  ;;  %v317_v23 = vshrl.u32 %v4669_v11, 16  ;;  %v464_v30 = vshll.u32 %v4646_v60, 16  ;;  %v4702_v31 = vrot.slane %v521_v9, 7  ;;  %v532_v32 = vshll.u32 %v4655_v0, 16 }
  0x26   : > { %234 = vst [vmem:[#allocation2 + $0x60] sm:$0xf] %v4442_v1  ;;  %v4710_v36 = vrot.slane %v529_v18, 7  ;;  %v4210_v37 = vld [vmem:[%s5711_s1 + $0x1a8] sm:$0xff]  ;;  %v325_v34 = vshrl.u32 %v4696_v28, 16  ;;  %v390_v45 = vor.u32 %v388_v17, %v4681_v20  ;;  %v4227_v48 = vld [vmem:[%s5711_s1 + $0x130] sm:$0xff] }
  0x27   : > { %235 = vst [vmem:[#allocation2 + $0x64] sm:$0xf] %v4442_v1  ;;  %v4218_v47 = vld [vmem:[%s5711_s1 + $0x68] sm:$0xff]  ;;  %v459_v54 = vrot.slane %v4692_v26, 4  ;;  %v524_v56 = vshll.u32 %v4649_v61, 16  ;;  %v4209_v57 = vld [vmem:[%s5711_s1 + $0x1a0] sm:$0xff]  ;;  %v466_v59 = vor.u32 %v464_v30, %v4699_v29 }
  0x28   : > { %4377 = vmatpush.bf16.msra.mxu1 %v4197_v24  ;;  %4378 = vmatpush.bf16.msra.mxu2 %v4197_v24  ;;  %236 = vst [vmem:[#allocation2 + $0x68] sm:$0x1] %v4442_v1  ;;  %v4217_v60 = vld [vmem:[%s5711_s1 + $0x60] sm:$0xff]  ;;  %v4226_v61 = vld [vmem:[%s5711_s1 + $0x128] sm:$0xff]  ;;  %v277_v62 = vld [vmem:[%s4496_s26 + $0x34] sm:$0xf]  ;;  %v534_v0 = vor.u32 %v532_v32, %v4710_v36 }
  0x29   : > { %4379 = vmatpush.bf16.msra.mxu3 %v4197_v24  ;;  %958 = vmatpush.bf16.msra.mxu0 %v4197_v24  ;;  %237 = vst [vmem:[#allocation2 + $0x6c] sm:$0xf] %v4442_v1  ;;  %v4689_v24 = vor.u32 %v303_v58, %v4628_v53  ;;  %v391_v53 = vrot.slane %v4681_v20, 4  ;;  %v398_v58 = vor.u32 %v396_v22, %v4683_v21  ;;  %v527_v63 = vrot.slane %v4702_v31, 4  ;;  %v284_v18 = vld [vmem:[%s4496_s26 + $0x50] sm:$0xf] }
  0x2a   : > { %238 = vst [vmem:[#allocation2 + $0x70] sm:$0xf] %v4442_v1  ;;  %v410_v5 = vshrl.u32 %v277_v62, 16  ;;  %v4771_v8 = vrot.slane %v325_v34, 7  ;;  %v328_v9 = vshll.u32 %v4696_v28, 16  ;;  %v413_v17 = vshll.u32 %v277_v62, 16 }
  0x2b   : > { %979 = vmatmul.bf16.vlgmr.msra.gmra.mxu1 %v4176_v25  ;;  %239 = vst [vmem:[#allocation2 + $0x74] sm:$0x1] %v4442_v1  ;;  %v313_v25 = vor.u32 %v311_v4, %v4659_v3  ;;  %v624_v44 = vsel %vm4518_vm5, %v4689_v24, %v4679_v19  ;;  %v4193_v4 = vld [vmem:[%s5711_s1 + $0x20] sm:$0xff]  ;;  %v399_v19 = vsel %vm4506_vm4, %v391_v53, %v398_v58  ;;  %v470_v24 = vshrl.u32 %v284_v18, 16  ;;  %v268_v62 = vld [vmem:[%s4496_s26 + $0x10] sm:$0xf] }
  0x2c   : > { %240 = vst [vmem:[#allocation2 + $0x78] sm:$0xf] %v4442_v1  ;;  %1254 = vmatpush.bf16.msrb.mxu2 %v4212_v35  ;;  %1094 = vmatpush.bf16.msrb.mxu1 %v4196_v41  ;;  %v4724_v41 = vld [vmem:[%s4496_s26 + $0x30] sm:$0xf]  ;;  %v4785_v22 = vrot.slane %v410_v5, 7  ;;  %v473_v28 = vshll.u32 %v284_v18, 16  ;;  %v330_v32 = vor.u32 %v328_v9, %v4771_v8 }
  0x2d   : > { %241 = vst [vmem:[#allocation2 + $0x7c] sm:$0xf] %v4442_v1  ;;  %1993 = vmatpush.bf16.msrb.mxu3 %v4220_v40  ;;  %2183 = vmatpush.bf16.msrb.mxu0 %v4228_v46  ;;  %v4720_v40 = vrot.slane %v317_v23, 7  ;;  %v660_v46 = vld [vmem:[#allocation2 + $0x48] sm:$0xf]  ;;  %v405_v16 = vshll.u32 %v4724_v41, 16 }
  0x2e   : > { %242 = vst [vmem:[#allocation2 + $0x80] sm:$0x1] %v4442_v1  ;;  %v285_v23 = vld [vmem:[%s4496_s26 + $0x54] sm:$0xf]  ;;  %v4208_v5 = vld [vmem:[%s5711_s1 + $0x198] sm:$0xff]  ;;  %vm2567_vm12 = vcmask 1046532  }
  0x2f   : > { %243 = vst [vmem:[#allocation2 + $0x84] sm:$0xf] %v4442_v1  ;;  %v323_v7 = vrot.slane %v4720_v40, 4  ;;  %v478_v30 = vshrl.u32 %v285_v23, 16  ;;  %v269_v9 = vld [vmem:[%s4496_s26 + $0x14] sm:$0xf]  ;;  %vm5354_vm13 = vmor %vm2566_vm11, %vm2567_vm12 }
  0x30   : > { %244 = vst [vmem:[#allocation2 + $0x88] sm:$0xf] %v4442_v1  ;;  %1255 = vmatpush.bf16.msrb.mxu2 %v4211_v42  ;;  %1095 = vmatpush.bf16.msrb.mxu1 %v4195_v50  ;;  %v681_v13 = vld [vmem:[#allocation2 + $0x6c] sm:$0xf]  ;;  %v314_v42 = vsel %vm4506_vm4, %v306_v2, %v313_v25  ;;  %v402_v50 = vshrl.u32 %v4724_v41, 16  ;;  %v320_v2 = vshll.u32 %v4669_v11, 16  ;;  %v661_v11 = vsel %vm4518_vm5, %v390_v45, %v660_v46 }
  0x31   : > { %245 = vst [vmem:[#allocation2 + $0x8c] sm:$0x1] %v4442_v1  ;;  %1994 = vmatpush.bf16.msrb.mxu3 %v4219_v49  ;;  %v682_v38 = vsel %vm4518_vm5, %v441_v6, %v681_v13  ;;  %v4194_v49 = vld [vmem:[%s5711_s1 + $0x28] sm:$0xff]  ;;  %2184 = vmatpush.bf16.msrb.mxu0 %v4227_v48  ;;  %v467_v25 = vsel %vm4506_vm4, %v459_v54, %v466_v59  ;;  %v4798_v34 = vrot.slane %v478_v30, 7  ;;  %v293_v41 = vld [vmem:[%s4496_s26 + $0x74] sm:$0xf] }
  0x32   : > { %246 = vst [vmem:[#allocation2 + $0x90] sm:$0xf] %v4442_v1  ;;  %v4774_v13 = vrot.slane %v402_v50, 7  ;;  %v415_v46 = vor.u32 %v413_v17, %v4785_v22  ;;  %v546_v48 = vshrl.u32 %v293_v41, 16  ;;  %v549_v54 = vshll.u32 %v293_v41, 16  ;;  %v4192_v30 = vld [vmem:[%s5711_s1 + $0x18] sm:$0xff] }
  0x33   : > { %247 = vst [vmem:[#allocation2 + $0x94] sm:$0xf] %v4442_v1  ;;  %v688_v55 = vld [vmem:[#allocation2 + $0x78] sm:$0xf]  ;;  %v342_v17 = vshrl.u32 %v269_v9, 16  ;;  %v345_v18 = vshll.u32 %v269_v9, 16 }
  0x34   : > { %248 = vst [vmem:[#allocation2 + $0x98] sm:$0x1] %v4442_v1  ;;  %1256 = vmatpush.bf16.msrb.mxu2 %v4210_v37  ;;  %1096 = vmatpush.bf16.msrb.mxu1 %v4194_v49  ;;  %v481_v37 = vshll.u32 %v285_v23, 16  ;;  %v408_v45 = vrot.slane %v4774_v13, 4  ;;  %v4216_v23 = vld [vmem:[%s5711_s1 + $0x58] sm:$0xff]  ;;  %s3660_s9 = sshll.u32 %s5766_s16, 1 }
  0x35   : > { %249 = vst [vmem:[#allocation2 + $0x9c] sm:$0xf] %v4442_v1  ;;  %1995 = vmatpush.bf16.msrb.mxu3 %v4218_v47  ;;  %2185 = vmatpush.bf16.msrb.mxu0 %v4226_v61  ;;  %vm1429_vm8 = vsmask.f32 3328  ;;  %vm1430_vm9 = vsmask.f32 7440  ;;  %s208_s12 = scalar_lea.vmem %s5714_s4, %s3660_s9 }
  0x36   : > { %250 = vst [vmem:[#allocation2 + $0xa0] sm:$0xf] %v4442_v1  ;;  %v483_v58 = vor.u32 %v481_v37, %v4798_v34  ;;  %vm4976_vm10 = vmor %vm1429_vm8, %vm1430_vm9 }
  0x37   : > { %251 = vst [vmem:[#allocation2 + $0xa4] sm:$0x1] %v4442_v1 }
  0x38   : > { %252 = vst [vmem:[#allocation2 + $0xa8] sm:$0xf] %v4442_v1  ;;  %1257 = vmatpush.bf16.msrb.mxu2 %v4209_v57  ;;  %1097 = vmatpush.bf16.msrb.mxu1 %v4193_v4 }
  0x39   : > { %253 = vst [vmem:[#allocation2 + $0xac] sm:$0xf] %v4442_v1  ;;  %1996 = vmatpush.bf16.msrb.mxu3 %v4217_v60  ;;  %v702_v9 = vld [vmem:[#allocation2 + $0x90] sm:$0xf] }
  0x3a   : > { %254 = vst [vmem:[#allocation2 + $0xb0] sm:$0x1] %v4442_v1 }
  0x3b   : > { %255 = vst [vmem:[#allocation2 + $0xb4] sm:$0xf] %v4442_v1 }
  0x3c   : > { %256 = vst [vmem:[#allocation2 + $0xb8] sm:$0xf] %v4442_v1  ;;  %v709_v35 = vld [vmem:[#allocation2 + $0x9c] sm:$0xf]  ;;  %1258 = vmatpush.bf16.msrb.mxu2 %v4208_v5  ;;  %1098 = vmatpush.bf16.msrb.mxu1 %v4192_v30 }
  0x3d   : > { %257 = vst [vmem:[#allocation2 + $0xbc] sm:$0x1] %v4442_v1  ;;  %v710_v52 = vsel %vm4518_vm5, %v4673_v15, %v709_v35  ;;  %v526_v15 = vor.u32 %v524_v56, %v4702_v31  ;;  %v535_v31 = vsel %vm4506_vm4, %v527_v63, %v534_v0  ;;  %v472_v35 = vrot.slane %v470_v24, 7  ;;  %v4225_v24 = vld [vmem:[%s5711_s1 + $0x120] sm:$0xff]  ;;  %1997 = vmatpush.bf16.msrb.mxu3 %v4216_v23 }
  0x3e   : > { %258 = vst [vmem:[#allocation2 + $0xc0] sm:$0xf] %v4442_v1  ;;  %v331_v56 = vsel %vm4506_vm4, %v323_v7, %v330_v32  ;;  %v416_v0 = vsel %vm4506_vm4, %v408_v45, %v415_v46  ;;  %2186 = vmatpush.bf16.msrb.mxu0 %v4225_v24  ;;  %v4215_v32 = vld [vmem:[%s5711_s1 + $0x50] sm:$0xff] }
  0x3f   : > { %259 = vst [vmem:[#allocation2 + $0xc4] sm:$0xf] %v4442_v1  ;;  %v716_v6 = vld [vmem:[#allocation2 + $0xa8] sm:$0xf]  ;;  %v475_v50 = vor.u32 %v473_v28, %v472_v35  ;;  %v476_v57 = vrot.slane %v472_v35, 4  ;;  %v4840_v28 = vrot.slane %v342_v17, 7 }
  0x40   : > { %260 = vst [vmem:[#allocation2 + $0xc8] sm:$0x1] %v4442_v1 }
  0x41   : > { %261 = vst [vmem:[#allocation2 + $0xcc] sm:$0xf] %v4442_v1  ;;  %v347_v35 = vor.u32 %v345_v18, %v4840_v28  ;;  %1998 = vmatpush.bf16.msrb.mxu3 %v4215_v32  ;;  %v270_v32 = vld [vmem:[%s4496_s26 + $0x18] sm:$0xf] }
  0x42   : > { %262 = vst [vmem:[#allocation2 + $0xd0] sm:$0xf] %v4442_v1  ;;  %v723_v61 = vld [vmem:[#allocation2 + $0xb4] sm:$0xf] }
  0x43   : > { %263 = vst [vmem:[#allocation2 + $0xd4] sm:$0x1] %v4442_v1  ;;  %v458_v1 = vor.u32 %v456_v27, %v4692_v26  ;;  %v322_v26 = vor.u32 %v320_v2, %v4720_v40  ;;  %v632_v27 = vld [vmem:[#allocation2 + $0x18] sm:$0xf]  ;;  %v407_v40 = vor.u32 %v405_v16, %v4774_v13  ;;  %v337_v13 = vshll.u32 %v268_v62, 16 }
  0x44   : > { %683 = vst [vmem:[#allocation2 + $0x6c] sm:$0xf] %v682_v38  ;;  %v292_v38 = vld [vmem:[%s4496_s26 + $0x70] sm:$0xf] }
  0x45   : > { %684 = vst [vmem:[#allocation2 + $0x70] sm:$0xf] %v450_v33  ;;  %v689_v20 = vsel %vm4518_vm5, %v458_v1, %v688_v55  ;;  %v667_v33 = vld [vmem:[#allocation2 + $0x54] sm:$0xf]  ;;  %v541_v47 = vshll.u32 %v292_v38, 16  ;;  %v633_v49 = vsel %vm4518_vm5, %v322_v26, %v632_v27  ;;  %v4808_v1 = vrot.slane %v546_v48, 7 }
  0x46   : > { %711 = vst [vmem:[#allocation2 + $0x9c] sm:$0xf] %v710_v52  ;;  %v695_v52 = vld [vmem:[#allocation2 + $0x84] sm:$0xf]  ;;  %v668_v59 = vsel %vm4518_vm5, %v407_v40, %v667_v33  ;;  %v4224_v33 = vld [vmem:[%s5711_s1 + $0x118] sm:$0xff] }
  0x47   : > { %712 = vst [vmem:[#allocation2 + $0xa0] sm:$0xf] %v518_v39  ;;  %v717_v39 = vsel %vm4518_vm5, %v526_v15, %v716_v6  ;;  %v551_v4 = vor.u32 %v549_v54, %v4808_v1  ;;  %v334_v6 = vshrl.u32 %v268_v62, 16  ;;  %v696_v7 = vsel %vm4518_vm5, %v475_v50, %v695_v52  ;;  %v279_v40 = vld [vmem:[%s4496_s26 + $0x3c] sm:$0xf]  ;;  %2187 = vmatpush.bf16.msrb.mxu0 %v4224_v33 }
  0x48   : > { %625 = vst [vmem:[#allocation2 + $0xc] sm:$0xf] %v624_v44  ;;  %v484_v15 = vsel %vm4506_vm4, %v476_v57, %v483_v58  ;;  %v427_v45 = vshrl.u32 %v279_v40, 16  ;;  %v430_v46 = vshll.u32 %v279_v40, 16  ;;  %v286_v50 = vld [vmem:[%s4496_s26 + $0x58] sm:$0xf] }
  0x49   : > { %626 = vst [vmem:[#allocation2 + $0x10] sm:$0xf] %v314_v42  ;;  %v538_v42 = vshrl.u32 %v292_v38, 16  ;;  %v336_v16 = vrot.slane %v334_v6, 7  ;;  %v4191_v38 = vld [vmem:[%s5711_s1 + $0x10] sm:$0xff]  ;;  %v487_v54 = vshrl.u32 %v286_v50, 16 }
  0x4a   : > { %662 = vst [vmem:[#allocation2 + $0x48] sm:$0xf] %v661_v11  ;;  %1099 = vmatpush.bf16.msrb.mxu1 %v4191_v38  ;;  %v674_v52 = vld [vmem:[#allocation2 + $0x60] sm:$0xf]  ;;  %v271_v33 = vld [vmem:[%s4496_s26 + $0x1c] sm:$0xf] }
  0x4b   : > { %663 = vst [vmem:[#allocation2 + $0x4c] sm:$0xf] %v399_v19  ;;  %v540_v53 = vrot.slane %v538_v42, 7  ;;  %v339_v26 = vor.u32 %v337_v13, %v336_v16  ;;  %v340_v27 = vrot.slane %v336_v16, 4  ;;  %v489_v62 = vrot.slane %v487_v54, 7  ;;  %v4205_v54 = vld [vmem:[%s5711_s1 + $0x180] sm:$0xff] }
  0x4c   : > { %v4180_v44 = vld [vmem:[#allocation2 + $0x6c] sm:$0xff]  ;;  %690 = vst [vmem:[#allocation2 + $0x78] sm:$0xf] %v689_v20  ;;  %v639_v20 = vld [vmem:[#allocation2 + $0x24] sm:$0xf]  ;;  %v351_v38 = vshrl.u32 %v270_v32, 16 }
  0x4d   : > { %691 = vst [vmem:[#allocation2 + $0x7c] sm:$0xf] %v467_v25  ;;  %999 = vmatmul.bf16.vlgmr.msra.gmra.mxu2 %v4180_v44  ;;  %v543_v60 = vor.u32 %v541_v47, %v540_v53  ;;  %v544_v2 = vrot.slane %v540_v53, 4  ;;  %v640_v37 = vsel %vm4518_vm5, %v339_v26, %v639_v20  ;;  %v348_v41 = vsel %vm4506_vm4, %v340_v27, %v347_v35  ;;  %v287_v53 = vld [vmem:[%s4496_s26 + $0x5c] sm:$0xf]  ;;  %v4206_v26 = vld [vmem:[%s5711_s1 + $0x188] sm:$0xff] }
  0x4e   : > { %v4184_v55 = vld [vmem:[#allocation2 + $0x9c] sm:$0xff]  ;;  %718 = vst [vmem:[#allocation2 + $0xa8] sm:$0xf] %v717_v39  ;;  %v278_v39 = vld [vmem:[%s4496_s26 + $0x38] sm:$0xf]  ;;  %v493_v18 = vrot.slane %v489_v62, 4 }
  0x4f   : > { %719 = vst [vmem:[#allocation2 + $0xac] sm:$0xf] %v535_v31  ;;  %1019 = vmatmul.bf16.vlgmr.msra.gmra.mxu3 %v4184_v55  ;;  %v724_v19 = vsel %vm4518_vm5, %v543_v60, %v723_v61  ;;  %v552_v25 = vsel %vm4506_vm4, %v544_v2, %v551_v4  ;;  %v4207_v31 = vld [vmem:[%s5711_s1 + $0x190] sm:$0xff]  ;;  %v419_v42 = vshrl.u32 %v278_v39, 16  ;;  %v422_v44 = vshll.u32 %v278_v39, 16  ;;  %v4214_v39 = vld [vmem:[%s5711_s1 + $0x48] sm:$0xff] }
  0x50   : > { %v4813_v63 = vld [vmem:[#allocation2 + $0xc] sm:$0xff]  ;;  %634 = vst [vmem:[#allocation2 + $0x18] sm:$0xf] %v633_v49  ;;  %1259 = vmatpush.bf16.msrb.mxu2 %v4207_v31  ;;  %v4866_v49 = vrot.slane %v427_v45, 7  ;;  %v490_v55 = vshll.u32 %v286_v50, 16  ;;  %v498_v2 = vshll.u32 %v287_v53, 16  ;;  %1999 = vmatpush.bf16.msrb.mxu3 %v4214_v39 }
  0x51   : > { %635 = vst [vmem:[#allocation2 + $0x1c] sm:$0xf] %v331_v56  ;;  %959 = vmatmul.bf16.vlgmr.msra.gmra.mxu0 %v4813_v63  ;;  %v421_v48 = vrot.slane %v419_v42, 7  ;;  %v294_v61 = vld [vmem:[%s4496_s26 + $0x78] sm:$0xf]  ;;  %v354_v42 = vshll.u32 %v270_v32, 16 }
  0x52   : > { %v4825_v11 = vld [vmem:[#allocation2 + $0x48] sm:$0xff]  ;;  %669 = vst [vmem:[#allocation2 + $0x54] sm:$0xf] %v668_v59  ;;  %v432_v60 = vor.u32 %v430_v46, %v4866_v49  ;;  %v295_v4 = vld [vmem:[%s4496_s26 + $0x7c] sm:$0xf]  ;;  %v555_v5 = vshrl.u32 %v294_v61, 16  ;;  %v492_v17 = vor.u32 %v490_v55, %v489_v62 }
  0x53   : > { %670 = vst [vmem:[#allocation2 + $0x58] sm:$0xf] %v416_v0  ;;  %984 = vmatmul.bf16.gmra.mxu1 %v4825_v11  ;;  %v424_v58 = vor.u32 %v422_v44, %v421_v48  ;;  %v425_v59 = vrot.slane %v421_v48, 4  ;;  %v495_v0 = vshrl.u32 %v287_v53, 16  ;;  %v558_v13 = vshll.u32 %v294_v61, 16  ;;  %v4223_v46 = vld [vmem:[%s5711_s1 + $0x110] sm:$0xff] }
  0x54   : > { %697 = vst [vmem:[#allocation2 + $0x84] sm:$0xf] %v696_v7  ;;  %v4864_v47 = vld [vmem:[#allocation2 + $0x78] sm:$0xff]  ;;  %v730_v16 = vld [vmem:[#allocation2 + $0xc0] sm:$0xf]  ;;  %v557_v20 = vrot.slane %v555_v5, 7  ;;  %v703_v30 = vsel %vm4518_vm5, %v492_v17, %v702_v9  ;;  %1260 = vmatpush.bf16.msrb.mxu2 %v4206_v26  ;;  %2188 = vmatpush.bf16.msrb.mxu0 %v4223_v46 }
  0x55   : > { %698 = vst [vmem:[#allocation2 + $0x88] sm:$0xf] %v484_v15  ;;  %v433_v6 = vsel %vm4506_vm4, %v425_v59, %v432_v60  ;;  %v675_v7 = vsel %vm4518_vm5, %v424_v58, %v674_v52  ;;  %v563_v15 = vshrl.u32 %v295_v4, 16  ;;  %v359_v44 = vshrl.u32 %v271_v33, 16  ;;  %v646_v45 = vld [vmem:[#allocation2 + $0x30] sm:$0xf] }
  0x56   : > { %725 = vst [vmem:[#allocation2 + $0xb4] sm:$0xf] %v724_v19  ;;  %v4185_v56 = vld [vmem:[#allocation2 + $0xa8] sm:$0xff]  ;;  %v4880_v19 = vrot.slane %v495_v0, 7  ;;  %v560_v31 = vor.u32 %v558_v13, %v557_v20  ;;  %v561_v35 = vrot.slane %v557_v20, 4  ;;  %v353_v52 = vrot.slane %v351_v38, 7 }
  0x57   : > { %726 = vst [vmem:[#allocation2 + $0xb8] sm:$0xf] %v552_v25  ;;  %v4884_v24 = vrot.slane %v563_v15, 7  ;;  %v566_v25 = vshll.u32 %v295_v4, 16  ;;  %v4190_v48 = vld [vmem:[%s5711_s1 + $0x8] sm:$0xff]  ;;  %v362_v53 = vshll.u32 %v271_v33, 16 }
  0x58   : > { %641 = vst [vmem:[#allocation2 + $0x24] sm:$0xf] %v640_v37  ;;  %v4870_v57 = vld [vmem:[#allocation2 + $0x18] sm:$0xff]  ;;  %v500_v27 = vor.u32 %v498_v2, %v4880_v19  ;;  %v4213_v55 = vld [vmem:[%s5711_s1 + $0x40] sm:$0xff]  ;;  %v4919_v58 = vrot.slane %v359_v44, 7  ;;  %1100 = vmatpush.bf16.msrb.mxu1 %v4190_v48  ;;  %v4222_v59 = vld [vmem:[%s5711_s1 + $0x108] sm:$0xff]  ;;  %1261 = vmatpush.bf16.msrb.mxu2 %v4205_v54 }
  0x59   : > { %642 = vst [vmem:[#allocation2 + $0x28] sm:$0xf] %v348_v41  ;;  %v568_v37 = vor.u32 %v566_v25, %v4884_v24  ;;  %v731_v41 = vsel %vm4518_vm5, %v560_v31, %v730_v16  ;;  %v4189_v60 = vld [vmem:[%s5711_s1] sm:$0xff]  ;;  %v357_v62 = vrot.slane %v353_v52, 4  ;;  %2000 = vmatpush.bf16.msrb.mxu3 %v4213_v55  ;;  %v629_v4 = vld [vmem:[#allocation2 + $0x14] sm:$0x1]  ;;  %2189 = vmatpush.bf16.msrb.mxu0 %v4222_v59 }
  0x5a   : > { %676 = vst [vmem:[#allocation2 + $0x60] sm:$0xf] %v675_v7  ;;  %v4882_v23 = vld [vmem:[#allocation2 + $0x54] sm:$0xff]  ;;  %v501_v40 = vsel %vm4506_vm4, %v493_v18, %v500_v27  ;;  %v364_v0 = vor.u32 %v362_v53, %v4919_v58  ;;  %v332_v13 = vrot.slane %v4771_v8, 4  ;;  %v636_v15 = vld [vmem:[#allocation2 + $0x20] sm:$0x1] }
  0x5b   : > { %677 = vst [vmem:[#allocation2 + $0x64] sm:$0xf] %v433_v6  ;;  %v569_v50 = vsel %vm4506_vm4, %v561_v35, %v568_v37  ;;  %v4221_v6 = vld [vmem:[%s5711_s1 + $0x100] sm:$0xff]  ;;  %v4244_v17 = vld [vmem:[%s5711_s1 + $0xb8] sm:$0xff]  ;;  %v1378_v27 = vld [vmem:[#allocation2 + $0xc] sm:$0xf] }
  0x5c   : > { %704 = vst [vmem:[#allocation2 + $0x90] sm:$0xf] %v703_v30  ;;  %v365_v5 = vsel %vm4506_vm4, %v357_v62, %v364_v0  ;;  %1101 = vmatpush.bf16.msrb.mxu1 %v4189_v60  ;;  %v4943_v9 = vld [vmem:[#allocation2 + $0x84] sm:$0xff]  ;;  %v1375_v18 = vld [vmem:[#allocation2] sm:$0xf]  ;;  %v637_v20 = vsel %vm4929_vm7, %v332_v13, %v636_v15  ;;  %2824 = vmatpush.bf16.msra.mxu2 %v4244_v17  ;;  %v4252_v25 = vld [vmem:[%s5711_s1 + $0x178] sm:$0xff] }
  0x5d   : > { %1004 = vmatmul.bf16.gmra.mxu2 %v4864_v47  ;;  %705 = vst [vmem:[#allocation2 + $0x94] sm:$0xf] %v501_v40  ;;  %2190 = vmatpush.bf16.msrb.mxu0 %v4221_v6  ;;  %v1376_v8 = vld [vmem:[#allocation2 + $0x4] sm:$0xf]  ;;  %v4236_v26 = vld [vmem:[%s5711_s1 + $0x1f8] sm:$0xff]  ;;  %v1433_v32 = vshrl.u32 %v1375_v18, 16 }
  0x5e   : > { %732 = vst [vmem:[#allocation2 + $0xc0] sm:$0xf] %v731_v41  ;;  %v4186_v14 = vld [vmem:[#allocation2 + $0xb4] sm:$0xff]  ;;  %v1379_v31 = vld [vmem:[#allocation2 + $0x10] sm:$0xf]  ;;  %3014 = vmatpush.bf16.msra.mxu3 %v4252_v25  ;;  %v1436_v33 = vshll.u32 %v1375_v18, 16 }
  0x5f   : > { %1024 = vmatmul.bf16.gmra.mxu3 %v4185_v56  ;;  %v315_v56 = vrot.slane %v4659_v3, 4  ;;  %733 = vst [vmem:[#allocation2 + $0xc4] sm:$0xf] %v569_v50  ;;  %v356_v3 = vor.u32 %v354_v42, %v353_v52  ;;  %v4260_v30 = vld [vmem:[%s5711_s1 + $0x238] sm:$0xff]  ;;  %v1442_v35 = vshll.u32 %v1376_v8, 16  ;;  %v1446_v37 = vshrl.u32 %v1376_v8, 16 }
  0x60   : > { %649 = vst [vmem:[#allocation2 + $0x34] sm:$0xf] %v365_v5  ;;  %v4947_v10 = vld [vmem:[#allocation2 + $0x24] sm:$0xff]  ;;  %2373 = vmatpush.bf16.msra.mxu1 %v4236_v26  ;;  %v1457_v38 = vshrl.u32 %v1378_v27, 16  ;;  %v1460_v39 = vshll.u32 %v1378_v27, 16  ;;  %v1466_v40 = vshll.u32 %v1379_v31, 16 }
  0x61   : > { %964 = vmatmul.bf16.gmra.mxu0 %v4870_v57  ;;  %v647_v2 = vsel %vm4518_vm5, %v356_v3, %v646_v45  ;;  %v630_v7 = vsel %vm4929_vm7, %v315_v56, %v629_v4  ;;  %638 = vst [vmem:[#allocation2 + $0x20] sm:$0x1] %v637_v20  ;;  %v1470_v41 = vshrl.u32 %v1379_v31, 16  ;;  %v1435_v42 = vrot.slane %v1433_v32, 4  ;;  %v1377_v50 = vld [vmem:[#allocation2 + $0x8] sm:$0x1] }
  0x62   : > { %648 = vst [vmem:[#allocation2 + $0x30] sm:$0xf] %v647_v2  ;;  %v4949_v16 = vld [vmem:[#allocation2 + $0x60] sm:$0xff]  ;;  %3204 = vmatpush.bf16.msra.mxu0 %v4260_v30  ;;  %v1438_v44 = vrot.slane %v1436_v33, 5  ;;  %v1444_v45 = vrot.slane %v1442_v35, 5  ;;  %v1448_v46 = vrot.slane %v1446_v37, 4 }
  0x63   : > { %989 = vmatmul.bf16.gmra.mxu1 %v4882_v23  ;;  %631 = vst [vmem:[#allocation2 + $0x14] sm:$0x1] %v630_v7  ;;  %v1459_v52 = vrot.slane %v1457_v38, 4  ;;  %v1462_v53 = vrot.slane %v1460_v39, 5  ;;  %v1468_v54 = vrot.slane %v1466_v40, 5  ;;  %v1472_v55 = vrot.slane %v1470_v41, 4 }
  0x64   : > { %v4967_v48 = vld [vmem:[#allocation2 + $0x90] sm:$0xff]  ;;  %v349_v56 = vrot.slane %v4840_v28, 4  ;;  %v1439_v3 = vor.u32 %v1438_v44, %v1435_v42  ;;  %v1449_v62 = vor.u32 %v1448_v46, %v1444_v45  ;;  %v1452_v0 = vshll.u32 %v1377_v50, 16  ;;  %v643_v7 = vld [vmem:[#allocation2 + $0x2c] sm:$0x1]  ;;  %v4229_v61 = vld [vmem:[%s5711_s1 + $0x1c0] sm:$0xff] }
  0x65   : > { %v1463_v4 = vor.u32 %v1462_v53, %v1459_v52  ;;  %v1473_v5 = vor.u32 %v1472_v55, %v1468_v54  ;;  %v1381_v26 = vld [vmem:[#allocation2 + $0x18] sm:$0xf]  ;;  %v1382_v27 = vld [vmem:[#allocation2 + $0x1c] sm:$0xf]  ;;  %v366_v53 = vrot.slane %v4919_v58, 4  ;;  %v4251_v58 = vld [vmem:[%s5711_s1 + $0x170] sm:$0xff] }
  0x66   : > { %v4187_v59 = vld [vmem:[#allocation2 + $0xc0] sm:$0xff]  ;;  %v644_v28 = vsel %vm4929_vm7, %v349_v56, %v643_v7  ;;  %v1440_v13 = vrot.slane %v1439_v3, 4  ;;  %v1450_v15 = vrot.slane %v1449_v62, 4  ;;  %v1454_v17 = vrot.slane %v1452_v0, 5  ;;  %v650_v62 = vld [vmem:[#allocation2 + $0x38] sm:$0x1]  ;;  %3015 = vmatpush.bf16.msra.mxu3 %v4251_v58 }
  0x67   : > { %645 = vst [vmem:[#allocation2 + $0x2c] sm:$0x1] %v644_v28  ;;  %v1464_v20 = vrot.slane %v1463_v4, 4  ;;  %v1474_v8 = vrot.slane %v1473_v5, 4  ;;  %v1481_v33 = vshrl.u32 %v1381_v26, 16  ;;  %v1484_v37 = vshll.u32 %v1381_v26, 16 }
  0x68   : > { %v1445_v30 = vsel %vm4976_vm10, %v1440_v13, %v1444_v45  ;;  %v1455_v31 = vsel %vm4976_vm10, %v1450_v15, %v1454_v17  ;;  %v1490_v38 = vshll.u32 %v1382_v27, 16  ;;  %v1494_v39 = vshrl.u32 %v1382_v27, 16  ;;  %v1383_v56 = vld [vmem:[#allocation2 + $0x20] sm:$0x1]  ;;  %v4243_v0 = vld [vmem:[%s5711_s1 + $0xb0] sm:$0xff] }
  0x69   : > { %v4971_v2 = vld [vmem:[#allocation2 + $0x30] sm:$0xff]  ;;  %v1469_v32 = vsel %vm4976_vm10, %v1464_v20, %v1468_v54  ;;  %v1881_v40 = vunpack.c.l.b16 %v1445_v30  ;;  %v1882_v41 = vunpack.c.l.b16 %v1455_v31  ;;  %v1483_v46 = vrot.slane %v1481_v33, 4  ;;  %v1384_v5 = vld [vmem:[#allocation2 + $0x24] sm:$0xf]  ;;  %2825 = vmatpush.bf16.msra.mxu2 %v4243_v0 }
  0x6a   : > { %v1380_v60 = vld [vmem:[#allocation2 + $0x14] sm:$0x1]  ;;  %v1883_v42 = vunpack.c.l.b16 %v1469_v32  ;;  %v1486_v50 = vrot.slane %v1484_v37, 5  ;;  %v1492_v45 = vrot.slane %v1490_v38, 5  ;;  %v1496_v52 = vrot.slane %v1494_v39, 4 }
  0x6b   : > { %v1476_v6 = vshll.u32 %v1380_v60, 16  ;;  %v1913_v55 = vpack.c.b16 %v1882_v41, %v1881_v40  ;;  %v1500_v3 = vshll.u32 %v1383_v56, 16  ;;  %v651_v4 = vsel %vm4929_vm7, %v366_v53, %v650_v62  ;;  %v4235_v7 = vld [vmem:[%s5711_s1 + $0x1f0] sm:$0xff] }
  0x6c   : > { %v1497_v60 = vor.u32 %v1496_v52, %v1492_v45  ;;  %652 = vst [vmem:[#allocation2 + $0x38] sm:$0x1] %v651_v4  ;;  %v1505_v17 = vshrl.u32 %v1384_v5, 16  ;;  %v1508_v20 = vshll.u32 %v1384_v5, 16  ;;  %2374 = vmatpush.bf16.msra.mxu1 %v4235_v7  ;;  %v383_v38 = vrot.slane %v4510_v12, 4 }
  0x6d   : > { %1009 = vmatmul.bf16.gmra.mxu2 %v4943_v9  ;;  %v1478_v25 = vrot.slane %v1476_v6, 5  ;;  %v1385_v6 = vld [vmem:[#allocation2 + $0x28] sm:$0xf]  ;;  %v1502_v15 = vrot.slane %v1500_v3, 5  ;;  %v1387_v53 = vld [vmem:[#allocation2 + $0x30] sm:$0xf] }
  0x6e   : > { %v1498_v13 = vrot.slane %v1497_v60, 4  ;;  %v1507_v30 = vrot.slane %v1505_v17, 4  ;;  %v1510_v31 = vrot.slane %v1508_v20, 5  ;;  %v1388_v12 = vld [vmem:[#allocation2 + $0x34] sm:$0xf]  ;;  %v4242_v20 = vld [vmem:[%s5711_s1 + $0xa8] sm:$0xff] }
  0x6f   : > { %1029 = vmatmul.bf16.gmra.mxu3 %v4186_v14  ;;  %v4171_v14 = vld [vmem:[#allocation2] sm:$0xff]  ;;  %v1479_v35 = vsel %vm4976_vm10, %v1474_v8, %v1478_v25  ;;  %v1514_v8 = vshll.u32 %v1385_v6, 16  ;;  %v1518_v25 = vshrl.u32 %v1385_v6, 16  ;;  %v1538_v60 = vshll.u32 %v1388_v12, 16  ;;  %v664_v17 = vld [vmem:[#allocation2 + $0x50] sm:$0x1]  ;;  %2826 = vmatpush.bf16.msra.mxu2 %v4242_v20 }
  0x70   : > { %v1884_v44 = vunpack.c.l.b16 %v1479_v35  ;;  %v1503_v27 = vsel %vm4976_vm10, %v1498_v13, %v1502_v15  ;;  %v1511_v39 = vor.u32 %v1510_v31, %v1507_v30  ;;  %v1542_v3 = vshrl.u32 %v1388_v12, 16  ;;  %v4234_v30 = vld [vmem:[%s5711_s1 + $0x1e8] sm:$0xff]  ;;  %v1390_v31 = vld [vmem:[#allocation2 + $0x3c] sm:$0xf] }
  0x71   : > { %969 = vmatmul.bf16.gmra.mxu0 %v4947_v10  ;;  %v1516_v32 = vrot.slane %v1514_v8, 5  ;;  %v1520_v33 = vrot.slane %v1518_v25, 4  ;;  %v1886_v37 = vunpack.c.l.b16 %v1503_v27  ;;  %v1540_v6 = vrot.slane %v1538_v60, 5  ;;  %v4250_v27 = vld [vmem:[%s5711_s1 + $0x168] sm:$0xff]  ;;  %2375 = vmatpush.bf16.msra.mxu1 %v4234_v30 }
  0x72   : > { %v1914_v54 = vpack.c.b16 %v1884_v44, %v1883_v42  ;;  %v657_v44 = vld [vmem:[#allocation2 + $0x44] sm:$0x1]  ;;  %v1544_v58 = vrot.slane %v1542_v3, 4  ;;  %3016 = vmatpush.bf16.msra.mxu3 %v4250_v27  ;;  %v671_v3 = vld [vmem:[#allocation2 + $0x5c] sm:$0x1] }
  0x73   : > { %994 = vmatmul.bf16.gmra.mxu1 %v4949_v16  ;;  %v1521_v40 = vor.u32 %v1520_v33, %v1516_v32  ;;  %v1389_v7 = vld [vmem:[#allocation2 + $0x38] sm:$0x1] }
  0x74   : > { %v1545_v13 = vor.u32 %v1544_v58, %v1540_v6  ;;  %v1548_v15 = vshll.u32 %v1389_v7, 16 }
  0x76   : > { %v1546_v25 = vrot.slane %v1545_v13, 4 }
  0x7d   : > { %1014 = vmatmul.bf16.gmra.mxu2 %v4967_v48 }
  0x7f   : > { %1034 = vmatmul.bf16.gmra.mxu3 %v4187_v59  ;;  %v1487_v59 = vor.u32 %v1486_v50, %v1483_v46  ;;  %v658_v46 = vsel %vm4929_vm7, %v383_v38, %v657_v44  ;;  %v1512_v50 = vrot.slane %v1511_v39, 4 }
  0x80   : > { %659 = vst [vmem:[#allocation2 + $0x44] sm:$0x1] %v658_v46 }
  0x81   : > { %974 = vmatmul.bf16.gmra.mxu0 %v4971_v2  ;;  %v1488_v28 = vrot.slane %v1487_v59, 4  ;;  %v1532_v59 = vshll.u32 %v1387_v53, 16 }
  0x83   : > { %1102 = vmatmul.bf16.vlgmr.msrb.gmra.mxu1 %v4171_v14  ;;  %v4259_v14 = vld [vmem:[%s5711_s1 + $0x230] sm:$0xff]  ;;  %v1493_v26 = vsel %vm4976_vm10, %v1488_v28, %v1492_v45  ;;  %v1522_v45 = vrot.slane %v1521_v40, 4  ;;  %v1534_v5 = vrot.slane %v1532_v59, 5  ;;  %v4258_v40 = vld [vmem:[%s5711_s1 + $0x228] sm:$0xff] }
  0x84   : > { %3205 = vmatpush.bf16.msra.mxu0 %v4259_v14  ;;  %v1885_v35 = vunpack.c.l.b16 %v1493_v26  ;;  %v400_v14 = vrot.slane %v4683_v21, 4  ;;  %v1550_v26 = vrot.slane %v1548_v15, 5 }
  0x86   : > { %v5011_v42 = vpack.c.b16 %v1886_v37, %v1885_v35  ;;  %v665_v8 = vsel %vm4929_vm7, %v400_v14, %v664_v17  ;;  %v1551_v35 = vsel %vm4976_vm10, %v1546_v25, %v1550_v26  ;;  %v1553_v37 = vshrl.u32 %v1390_v31, 16 }
  0x87   : > { %666 = vst [vmem:[#allocation2 + $0x50] sm:$0x1] %v665_v8 }
  0x88   : > { %3206 = vmatpush.bf16.msra.mxu0 %v4258_v40  ;;  %v1555_v44 = vrot.slane %v1553_v37, 4 }
  0x8d   : > { %1262 = vmatmul.bf16.vlgmr.msrb.gmra.mxu2 %v4870_v57 }
  0x8e   : > { %v1395_v30 = vld [vmem:[#allocation2 + $0x50] sm:$0x1] }
  0x8f   : > { %2001 = vmatmul.bf16.vlgmr.msrb.gmra.mxu3 %v1913_v55  ;;  %v1517_v55 = vsel %vm4976_vm10, %v1512_v50, %v1516_v32  ;;  %v1391_v32 = vld [vmem:[#allocation2 + $0x40] sm:$0xf] }
  0x90   : > { %v1887_v62 = vunpack.c.l.b16 %v1517_v55  ;;  %v1562_v38 = vshll.u32 %v1391_v32, 16  ;;  %v1566_v39 = vshrl.u32 %v1391_v32, 16  ;;  %v4390_v55 = vld [vmem:[#allocation2 + $0x3c] sm:$0xff] }
  0x91   : > { %2191 = vmatmul.bf16.vlgmr.msrb.gmra.mxu0 %v1914_v54 }
  0x92   : > { %v1564_v50 = vrot.slane %v1562_v38, 5  ;;  %v4241_v38 = vld [vmem:[%s5711_s1 + $0xa0] sm:$0xff] }
  0x93   : > { %1107 = vmatmul.bf16.gmra.mxu1 %v4813_v63  ;;  %v1386_v63 = vld [vmem:[#allocation2 + $0x2c] sm:$0x1]  ;;  %2827 = vmatpush.bf16.msra.mxu2 %v4241_v38 }
  0x94   : > { %v1524_v41 = vshll.u32 %v1386_v63, 16  ;;  %v1556_v63 = vshll.u32 %v1390_v31, 16 }
  0x96   : > { %v1526_v52 = vrot.slane %v1524_v41, 5  ;;  %v1890_v41 = vunpack.c.l.b16 %v1551_v35  ;;  %v1558_v46 = vrot.slane %v1556_v63, 5  ;;  %v678_v63 = vld [vmem:[#allocation2 + $0x68] sm:$0x1] }
  0x98   : > { %v1527_v56 = vsel %vm4976_vm10, %v1522_v45, %v1526_v52  ;;  %v1568_v45 = vrot.slane %v1566_v39, 4  ;;  %v417_v52 = vrot.slane %v4785_v22, 4  ;;  %v1393_v22 = vld [vmem:[#allocation2 + $0x48] sm:$0xf] }
  0x99   : > { %v1888_v0 = vunpack.c.l.b16 %v1527_v56  ;;  %v1577_v58 = vshrl.u32 %v1393_v22, 16  ;;  %v1580_v7 = vshll.u32 %v1393_v22, 16 }
  0x9a   : > { %v1569_v59 = vor.u32 %v1568_v45, %v1564_v50  ;;  %v1396_v45 = vld [vmem:[#allocation2 + $0x54] sm:$0xf] }
  0x9b   : > { %v1579_v20 = vrot.slane %v1577_v58, 4  ;;  %v1582_v8 = vrot.slane %v1580_v7, 5 }
  0x9d   : > { %1267 = vmatmul.bf16.gmra.mxu2 %v4947_v10  ;;  %v1583_v31 = vor.u32 %v1582_v8, %v1579_v20  ;;  %v451_v8 = vrot.slane %v4607_v43, 4 }
  0x9f   : > { %2006 = vmatmul.bf16.gmra.mxu3 %v1914_v54  ;;  %v1529_v54 = vshrl.u32 %v1387_v53, 16  ;;  %v1392_v53 = vld [vmem:[#allocation2 + $0x44] sm:$0x1] }
  0xa0   : > { %v1572_v60 = vshll.u32 %v1392_v53, 16  ;;  %v4233_v53 = vld [vmem:[%s5711_s1 + $0x1e0] sm:$0xff] }
  0xa1   : > { %2196 = vmatmul.bf16.gmra.mxu0 %v5011_v42  ;;  %v1531_v4 = vrot.slane %v1529_v54, 4  ;;  %v1559_v54 = vor.u32 %v1558_v46, %v1555_v44  ;;  %v4249_v46 = vld [vmem:[%s5711_s1 + $0x160] sm:$0xff]  ;;  %2376 = vmatpush.bf16.msra.mxu1 %v4233_v53 }
  0xa2   : > { %3017 = vmatpush.bf16.msra.mxu3 %v4249_v46 }
  0xa3   : > { %1112 = vmatmul.bf16.gmra.mxu1 %v4870_v57  ;;  %v5023_v57 = vpack.c.b16 %v1888_v0, %v1887_v62  ;;  %v1535_v28 = vor.u32 %v1534_v5, %v1531_v4  ;;  %v672_v62 = vsel %vm4929_vm7, %v417_v52, %v671_v3  ;;  %v1394_v0 = vld [vmem:[#allocation2 + $0x4c] sm:$0xf]  ;;  %v1560_v4 = vrot.slane %v1559_v54, 4  ;;  %v1397_v52 = vld [vmem:[#allocation2 + $0x58] sm:$0xf] }
  0xa4   : > { %673 = vst [vmem:[#allocation2 + $0x5c] sm:$0x1] %v672_v62  ;;  %v1570_v5 = vrot.slane %v1569_v59, 4  ;;  %v1586_v14 = vshll.u32 %v1394_v0, 16  ;;  %v1604_v3 = vshll.u32 %v1396_v45, 16  ;;  %v1610_v62 = vshll.u32 %v1397_v52, 16 }
  0xa5   : > { %v1536_v21 = vrot.slane %v1535_v28, 4  ;;  %v1590_v28 = vshrl.u32 %v1394_v0, 16  ;;  %v1565_v13 = vsel %vm4976_vm10, %v1560_v4, %v1564_v50  ;;  %v1614_v22 = vshrl.u32 %v1397_v52, 16  ;;  %v4257_v4 = vld [vmem:[%s5711_s1 + $0x220] sm:$0xff] }
  0xa6   : > { %v1891_v26 = vunpack.c.l.b16 %v1565_v13  ;;  %3207 = vmatpush.bf16.msra.mxu0 %v4257_v4 }
  0xa7   : > { %v1541_v33 = vsel %vm4976_vm10, %v1536_v21, %v1540_v6  ;;  %v1574_v6 = vrot.slane %v1572_v60, 5  ;;  %v1588_v21 = vrot.slane %v1586_v14, 5  ;;  %v1592_v25 = vrot.slane %v1590_v28, 4 }
  0xa8   : > { %v5047_v12 = vpop.f32.mrf.mxu1  ;;  %v1601_v60 = vshrl.u32 %v1396_v45, 16  ;;  %v1606_v14 = vrot.slane %v1604_v3, 5  ;;  %v1612_v28 = vrot.slane %v1610_v62, 5  ;;  %v1616_v13 = vrot.slane %v1614_v22, 4 }
  0xa9   : > { %v1575_v15 = vsel %vm4976_vm10, %v1570_v5, %v1574_v6  ;;  %v1593_v32 = vor.u32 %v1592_v25, %v1588_v21 }
  0xaa   : > { %v1892_v27 = vunpack.c.l.b16 %v1575_v15  ;;  %v1603_v7 = vrot.slane %v1601_v60, 4 }
  0xab   : > { %v1398_v20 = vld [vmem:[#allocation2 + $0x5c] sm:$0x1] }
  0xac   : > { %v5064_v35 = vpack.c.b16 %v1892_v27, %v1891_v26  ;;  %v1607_v25 = vor.u32 %v1606_v14, %v1603_v7  ;;  %v1617_v26 = vor.u32 %v1616_v13, %v1612_v28  ;;  %v1620_v27 = vshll.u32 %v1398_v20, 16 }
  0xad   : > { %1272 = vmatmul.bf16.gmra.mxu2 %v4971_v2  ;;  %v468_v14 = vrot.slane %v4699_v29, 4 }
  0xae   : > { %v1608_v43 = vrot.slane %v1607_v25, 4  ;;  %v1622_v38 = vrot.slane %v1620_v27, 5  ;;  %v692_v27 = vld [vmem:[#allocation2 + $0x80] sm:$0x1] }
  0xaf   : > { %2011 = vmatmul.bf16.gmra.mxu3 %v5011_v42  ;;  %v693_v29 = vsel %vm4929_vm7, %v468_v14, %v692_v27 }
  0xb0   : > { %v5060_v17 = vpop.f32.mrf.mxu1  ;;  %694 = vst [vmem:[#allocation2 + $0x80] sm:$0x1] %v693_v29 }
  0xb1   : > { %2201 = vmatmul.bf16.gmra.mxu0 %v5023_v57 }
  0xb3   : > { %1117 = vmatmul.bf16.gmra.mxu1 %v4947_v10  ;;  %v1889_v10 = vunpack.c.l.b16 %v1541_v33  ;;  %v1596_v33 = vshll.u32 %v1395_v30, 16 }
  0xb5   : > { %v5049_v56 = vpack.c.b16 %v1890_v41, %v1889_v10  ;;  %v1584_v10 = vrot.slane %v1583_v31, 4  ;;  %v1594_v41 = vrot.slane %v1593_v32, 4  ;;  %v1598_v44 = vrot.slane %v1596_v33, 5 }
  0xb7   : > { %v1589_v54 = vsel %vm4976_vm10, %v1584_v10, %v1588_v21  ;;  %v1599_v59 = vsel %vm4976_vm10, %v1594_v41, %v1598_v44  ;;  %v1399_v10 = vld [vmem:[#allocation2 + $0x60] sm:$0xf]  ;;  %v1400_v41 = vld [vmem:[#allocation2 + $0x64] sm:$0xf]  ;;  %v1613_v44 = vsel %vm4976_vm10, %v1608_v43, %v1612_v28 }
  0xb8   : > { %v1894_v6 = vunpack.c.l.b16 %v1599_v59  ;;  %v1625_v52 = vshrl.u32 %v1399_v10, 16  ;;  %v1628_v53 = vshll.u32 %v1399_v10, 16  ;;  %v1638_v59 = vshrl.u32 %v1400_v41, 16 }
  0xb9   : > { %v1895_v62 = vunpack.c.l.b16 %v1613_v44 }
  0xba   : > { %v1627_v4 = vrot.slane %v1625_v52, 4  ;;  %v1640_v7 = vrot.slane %v1638_v59, 4  ;;  %v1403_v52 = vld [vmem:[#allocation2 + $0x70] sm:$0xf] }
  0xbd   : > { %1277 = vmatmul.bf16.gmra.mxu2 %v4390_v55 }
  0xbf   : > { %2016 = vmatmul.bf16.gmra.mxu3 %v5023_v57 }
  0xc1   : > { %2206 = vmatmul.bf16.gmra.mxu0 %v5049_v56 }
  0xc3   : > { %1122 = vmatmul.bf16.gmra.mxu1 %v4971_v2  ;;  %v434_v2 = vrot.slane %v4866_v49, 4 }
  0xc5   : > { %v679_v39 = vsel %vm4929_vm7, %v434_v2, %v678_v63  ;;  %v685_v2 = vld [vmem:[#allocation2 + $0x74] sm:$0x1]  ;;  %v1618_v63 = vrot.slane %v1617_v26, 4 }
  0xc6   : > { %680 = vst [vmem:[#allocation2 + $0x68] sm:$0x1] %v679_v39  ;;  %v686_v31 = vsel %vm4929_vm7, %v451_v8, %v685_v2  ;;  %v4240_v2 = vld [vmem:[%s5711_s1 + $0x98] sm:$0xff] }
  0xc7   : > { %687 = vst [vmem:[#allocation2 + $0x74] sm:$0x1] %v686_v31  ;;  %v1623_v46 = vsel %vm4976_vm10, %v1618_v63, %v1622_v38  ;;  %2828 = vmatpush.bf16.msra.mxu2 %v4240_v2  ;;  %v4248_v63 = vld [vmem:[%s5711_s1 + $0x158] sm:$0xff] }
  0xc8   : > { %3018 = vmatpush.bf16.msra.mxu3 %v4248_v63  ;;  %v485_v63 = vrot.slane %v4798_v34, 4 }
  0xcd   : > { %1282 = vmatmul.bf16.gmra.mxu2 %v4825_v11  ;;  %v1401_v28 = vld [vmem:[#allocation2 + $0x68] sm:$0x1] }
  0xce   : > { %v5066_v37 = vpop.f32.mrf.mxu0  ;;  %v1644_v26 = vshll.u32 %v1401_v28, 16 }
  0xcf   : > { %2021 = vmatmul.bf16.gmra.mxu3 %v5049_v56 }
  0xd0   : > { %v5074_v49 = vpop.f32.mrf.mxu2  ;;  %v5076_v40 = vpop.f32.mrf.mxu1  ;;  %v1646_v44 = vrot.slane %v1644_v26, 5 }
  0xd1   : > { %2211 = vmatmul.bf16.gmra.mxu0 %v5064_v35 }
  0xd2   : > { %v5082_v50 = vpop.f32.mrf.mxu3 }
  0xd3   : > { %1127 = vmatmul.bf16.gmra.mxu1 %v4390_v55  ;;  %v1893_v55 = vunpack.c.l.b16 %v1589_v54  ;;  %v1634_v54 = vshll.u32 %v1400_v41, 16 }
  0xd5   : > { %v5104_v21 = vpack.c.b16 %v1894_v6, %v1893_v55  ;;  %v1630_v55 = vrot.slane %v1628_v53, 5  ;;  %v1636_v6 = vrot.slane %v1634_v54, 5  ;;  %v4232_v53 = vld [vmem:[%s5711_s1 + $0x1d8] sm:$0xff] }
  0xd6   : > { %v5091_v0 = vpop.f32.mrf.mxu0  ;;  %2377 = vmatpush.bf16.msra.mxu1 %v4232_v53 }
  0xd7   : > { %v1631_v8 = vor.u32 %v1630_v55, %v1627_v4  ;;  %v1641_v25 = vor.u32 %v1640_v7, %v1636_v6  ;;  %v1658_v55 = vshll.u32 %v1403_v52, 16  ;;  %v1662_v7 = vshrl.u32 %v1403_v52, 16 }
  0xd8   : > { %v5096_v5 = vpop.f32.mrf.mxu2  ;;  %v5098_v58 = vpop.f32.mrf.mxu1 }
  0xd9   : > { %v1632_v10 = vrot.slane %v1631_v8, 4  ;;  %v1642_v41 = vrot.slane %v1641_v25, 4  ;;  %v1664_v29 = vrot.slane %v1662_v7, 4 }
  0xda   : > { %v5100_v15 = vpop.f32.mrf.mxu3 }
  0xdb   : > { %5725 = vst [vmem:[#allocation3_spill] sm:$0xff] %v5100_v15  ;;  %v1647_v4 = vsel %vm4976_vm10, %v1642_v41, %v1646_v44  ;;  %v5173_v41 = vld [vmem:[#allocation2 + $0x6c] sm:$0xff] }
  0xdc   : > { %v1898_v25 = vunpack.c.l.b16 %v1647_v4 }
  0xdd   : > { %1287 = vmatmul.bf16.gmra.mxu2 %v4882_v23 }
  0xde   : > { %v5106_v30 = vpop.f32.mrf.mxu0 }
  0xdf   : > { %2026 = vmatmul.bf16.gmra.mxu3 %v5064_v35 }
  0xe0   : > { %v5111_v32 = vpop.f32.mrf.mxu2  ;;  %v5113_v33 = vpop.f32.mrf.mxu1 }
  0xe1   : > { %2216 = vmatmul.bf16.gmra.mxu0 %v5104_v21 }
  0xe2   : > { %v5116_v39 = vpop.f32.mrf.mxu3 }
  0xe3   : > { %5726 = vst [vmem:[#allocation4_spill] sm:$0xff] %v5116_v39  ;;  %1132 = vmatmul.bf16.gmra.mxu1 %v4825_v11  ;;  %v1896_v11 = vunpack.c.l.b16 %v1623_v46  ;;  %v1402_v46 = vld [vmem:[#allocation2 + $0x6c] sm:$0xf] }
  0xe4   : > { %v1649_v54 = vshrl.u32 %v1402_v46, 16  ;;  %v1652_v59 = vshll.u32 %v1402_v46, 16 }
  0xe5   : > { %v5133_v13 = vpack.c.b16 %v1896_v11, %v1895_v62  ;;  %v1637_v11 = vsel %vm4976_vm10, %v1632_v10, %v1636_v6  ;;  %v1660_v6 = vrot.slane %v1658_v55, 5  ;;  %v1404_v10 = vld [vmem:[#allocation2 + $0x74] sm:$0x1] }
  0xe6   : > { %v5123_v45 = vpop.f32.mrf.mxu0  ;;  %v1897_v8 = vunpack.c.l.b16 %v1637_v11  ;;  %v1651_v26 = vrot.slane %v1649_v54, 4  ;;  %v1654_v27 = vrot.slane %v1652_v59, 5  ;;  %v1668_v11 = vshll.u32 %v1404_v10, 16  ;;  %v699_v54 = vld [vmem:[#allocation2 + $0x8c] sm:$0x1] }
  0xe7   : > { %v1665_v53 = vor.u32 %v1664_v29, %v1660_v6  ;;  %v700_v59 = vsel %vm4929_vm7, %v485_v63, %v699_v54 }
  0xe8   : > { %v5125_v60 = vpop.f32.mrf.mxu2  ;;  %v5127_v3 = vpop.f32.mrf.mxu1  ;;  %v5176_v44 = vpack.c.b16 %v1898_v25, %v1897_v8  ;;  %v1655_v46 = vor.u32 %v1654_v27, %v1651_v26  ;;  %701 = vst [vmem:[#allocation2 + $0x8c] sm:$0x1] %v700_v59  ;;  %v1670_v26 = vrot.slane %v1668_v11, 5  ;;  %v1406_v27 = vld [vmem:[#allocation2 + $0x7c] sm:$0xf] }
  0xe9   : > { %v1666_v25 = vrot.slane %v1665_v53, 4  ;;  %v1682_v54 = vshll.u32 %v1406_v27, 16  ;;  %v1686_v59 = vshrl.u32 %v1406_v27, 16 }
  0xea   : > { %v5129_v22 = vpop.f32.mrf.mxu3  ;;  %v1656_v7 = vrot.slane %v1655_v46, 4 }
  0xeb   : > { %5727 = vst [vmem:[#allocation5_spill] sm:$0xff] %v5129_v22  ;;  %v1688_v22 = vrot.slane %v1686_v59, 4 }
  0xec   : > { %v1661_v63 = vsel %vm4976_vm10, %v1656_v7, %v1660_v6  ;;  %v1407_v6 = vld [vmem:[#allocation2 + $0x80] sm:$0x1]  ;;  %v502_v7 = vrot.slane %v4880_v19, 4 }
  0xed   : > { %1292 = vmatmul.bf16.gmra.mxu2 %v4949_v16 }
  0xee   : > { %v5135_v20 = vpop.f32.mrf.mxu0 }
  0xef   : > { %2031 = vmatmul.bf16.gmra.mxu3 %v5104_v21 }
  0xf0   : > { %v5143_v31 = vpop.f32.mrf.mxu2  ;;  %v5145_v43 = vpop.f32.mrf.mxu1 }
  0xf1   : > { %2221 = vmatmul.bf16.gmra.mxu0 %v5133_v13 }
  0xf2   : > { %v5151_v38 = vpop.f32.mrf.mxu3 }
  0xf3   : > { %5728 = vst [vmem:[#allocation6_spill] sm:$0xff] %v5151_v38  ;;  %1137 = vmatmul.bf16.gmra.mxu1 %v4882_v23  ;;  %v4256_v23 = vld [vmem:[%s5711_s1 + $0x218] sm:$0xff] }
  0xf4   : > { %3208 = vmatpush.bf16.msra.mxu0 %v4256_v23  ;;  %v1405_v23 = vld [vmem:[#allocation2 + $0x78] sm:$0xf] }
  0xf5   : > { %v1673_v29 = vshrl.u32 %v1405_v23, 16  ;;  %v1676_v10 = vshll.u32 %v1405_v23, 16  ;;  %v1684_v23 = vrot.slane %v1682_v54, 5 }
  0xf6   : > { %v5157_v62 = vpop.f32.mrf.mxu0 }
  0xf7   : > { %v1675_v11 = vrot.slane %v1673_v29, 4  ;;  %v706_v29 = vld [vmem:[#allocation2 + $0x98] sm:$0x1] }
  0xf8   : > { %v5166_v14 = vpop.f32.mrf.mxu2  ;;  %v5168_v28 = vpop.f32.mrf.mxu1 }
  0xfa   : > { %v5170_v2 = vpop.f32.mrf.mxu3 }
  0xfb   : > { %5729 = vst [vmem:[#allocation7_spill] sm:$0xff] %v5170_v2 }
  0xfd   : > { %1297 = vmatmul.bf16.gmra.mxu2 %v5173_v41 }
  0xfe   : > { %v5178_v52 = vpop.f32.mrf.mxu0 }
  0xff   : > { %2036 = vmatmul.bf16.gmra.mxu3 %v5133_v13 }
 0x100   : > { %v5183_v4 = vpop.f32.mrf.mxu2  ;;  %v1103_v34 = vpop.f32.mrf.mxu1 }
 0x101   : > { %2226 = vmatmul.bf16.gmra.mxu0 %v5176_v44  ;;  %v1104_v55 = vadd.f32 %v1103_v34, %v5066_v37  ;;  %v1671_v37 = vsel %vm4976_vm10, %v1666_v25, %v1670_v26  ;;  %v1899_v34 = vunpack.c.l.b16 %v1661_v63  ;;  %v1689_v26 = vor.u32 %v1688_v22, %v1684_v23 }
 0x102   : > { %v5187_v8 = vpop.f32.mrf.mxu3  ;;  %v1900_v38 = vunpack.c.l.b16 %v1671_v37  ;;  %v1692_v63 = vshll.u32 %v1407_v6, 16  ;;  %v1408_v37 = vld [vmem:[#allocation2 + $0x84] sm:$0xf] }
 0x103   : > { %5730 = vst [vmem:[#allocation8_spill] sm:$0xff] %v5187_v8  ;;  %1142 = vmatmul.bf16.gmra.mxu1 %v4949_v16  ;;  %v1678_v8 = vrot.slane %v1676_v10, 5  ;;  %v707_v10 = vsel %vm4929_vm7, %v502_v7, %v706_v29  ;;  %v1697_v7 = vshrl.u32 %v1408_v37, 16 }
 0x104   : > { %v5203_v25 = vpack.c.b16 %v1900_v38, %v1899_v34  ;;  %708 = vst [vmem:[#allocation2 + $0x98] sm:$0x1] %v707_v10  ;;  %v1690_v38 = vrot.slane %v1689_v26, 4  ;;  %v1694_v59 = vrot.slane %v1692_v63, 5  ;;  %v4247_v34 = vld [vmem:[%s5711_s1 + $0x150] sm:$0xff] }
 0x105   : > { %v1679_v27 = vor.u32 %v1678_v8, %v1675_v11  ;;  %v1409_v11 = vld [vmem:[#allocation2 + $0x88] sm:$0xf]  ;;  %3019 = vmatpush.bf16.msra.mxu3 %v4247_v34 }
 0x106   : > { %v5192_v2 = vpop.f32.mrf.mxu0  ;;  %v1695_v26 = vsel %vm4976_vm10, %v1690_v38, %v1694_v59  ;;  %v1706_v63 = vshll.u32 %v1409_v11, 16  ;;  %v1710_v29 = vshrl.u32 %v1409_v11, 16 }
 0x107   : > { %v1680_v8 = vrot.slane %v1679_v27, 4  ;;  %v1700_v27 = vshll.u32 %v1408_v37, 16 }
 0x108   : > { %v5196_v46 = vpop.f32.mrf.mxu2  ;;  %v1105_v53 = vpop.f32.mrf.mxu1  ;;  %v1708_v59 = vrot.slane %v1706_v63, 5 }
 0x109   : > { %v1106_v16 = vadd.f32 %v1105_v53, %v5091_v0  ;;  %v4239_v0 = vld [vmem:[%s5711_s1 + $0x90] sm:$0xff] }
 0x10a   : > { %v5199_v39 = vpop.f32.mrf.mxu3  ;;  %2829 = vmatpush.bf16.msra.mxu2 %v4239_v0 }
 0x10b   : > { %5731 = vst [vmem:[#allocation9_spill] sm:$0xff] %v5199_v39 }
 0x10d   : > { %1302 = vmatmul.bf16.gmra.mxu2 %v4864_v47 }
 0x10e   : > { %v2192_v15 = vpop.f32.mrf.mxu0 }
 0x10f   : > { %2041 = vmatmul.bf16.gmra.mxu3 %v5176_v44 }
 0x110   : > { %v1263_v54 = vpop.f32.mrf.mxu2  ;;  %v1108_v19 = vpop.f32.mrf.mxu1 }
 0x111   : > { %2231 = vmatmul.bf16.gmra.mxu0 %v5203_v25  ;;  %v1343_v47 = vadd.f32 %v1263_v54, %v1104_v55  ;;  %v1109_v22 = vadd.f32 %v1108_v19, %v5106_v30  ;;  %v4231_v55 = vld [vmem:[%s5711_s1 + $0x1d0] sm:$0xff]  ;;  %v1685_v30 = vsel %vm4976_vm10, %v1680_v8, %v1684_v23  ;;  %v1699_v23 = vrot.slane %v1697_v7, 4 }
 0x112   : > { %v2002_v53 = vpop.f32.mrf.mxu3  ;;  %2378 = vmatpush.bf16.msra.mxu1 %v4231_v55  ;;  %v1901_v19 = vunpack.c.l.b16 %v1685_v30  ;;  %v1702_v8 = vrot.slane %v1700_v27, 5 }
 0x113   : > { %v2082_v6 = vadd.f32 %v2002_v53, %v1343_v47  ;;  %1147 = vmatmul.bf16.gmra.mxu1 %v5173_v41  ;;  %v4255_v41 = vld [vmem:[%s5711_s1 + $0x210] sm:$0xff]  ;;  %v1902_v47 = vunpack.c.l.b16 %v1695_v26  ;;  %v1712_v53 = vrot.slane %v1710_v29, 4 }
 0x114   : > { %3209 = vmatpush.bf16.msra.mxu0 %v4255_v41 }
 0x115   : > { %v5224_v0 = vadd.f32 %v2192_v15, %v2082_v6  ;;  %v1410_v15 = vld [vmem:[#allocation2 + $0x8c] sm:$0x1]  ;;  %v519_v6 = vrot.slane %v4625_v51, 4  ;;  %v5232_v39 = vpack.c.b16 %v1902_v47, %v1901_v19  ;;  %v1713_v30 = vor.u32 %v1712_v53, %v1708_v59 }
 0x116   : > { %v2194_v10 = vpop.f32.mrf.mxu0  ;;  %v1716_v26 = vshll.u32 %v1410_v15, 16 }
 0x117   : > { %5732 = vst [vmem:[#allocation10_spill] sm:$0xff] %v5224_v0  ;;  %v1703_v0 = vor.u32 %v1702_v8, %v1699_v23  ;;  %v4392_v8 = vld [vmem:[#allocation2 + $0x78] sm:$0xff] }
 0x118   : > { %v1265_v54 = vpop.f32.mrf.mxu2  ;;  %v1110_v34 = vpop.f32.mrf.mxu1  ;;  %v1718_v19 = vrot.slane %v1716_v26, 5 }
 0x119   : > { %v1344_v37 = vadd.f32 %v1265_v54, %v1106_v16  ;;  %v1111_v38 = vadd.f32 %v1110_v34, %v5123_v45  ;;  %v713_v16 = vld [vmem:[#allocation2 + $0xa4] sm:$0x1]  ;;  %v1704_v51 = vrot.slane %v1703_v0, 4  ;;  %v1714_v54 = vrot.slane %v1713_v30, 4  ;;  %v1412_v34 = vld [vmem:[#allocation2 + $0x94] sm:$0xf] }
 0x11a   : > { %v2004_v11 = vpop.f32.mrf.mxu3  ;;  %v714_v45 = vsel %vm4929_vm7, %v519_v6, %v713_v16  ;;  %v1730_v15 = vshll.u32 %v1412_v34, 16 }
 0x11b   : > { %v2083_v55 = vadd.f32 %v2004_v11, %v1344_v37  ;;  %715 = vst [vmem:[#allocation2 + $0xa4] sm:$0x1] %v714_v45  ;;  %v1709_v37 = vsel %vm4976_vm10, %v1704_v51, %v1708_v59  ;;  %v1719_v0 = vsel %vm4976_vm10, %v1714_v54, %v1718_v19  ;;  %v536_v54 = vrot.slane %v4710_v36, 4 }
 0x11c   : > { %v1903_v30 = vunpack.c.l.b16 %v1709_v37  ;;  %v1904_v26 = vunpack.c.l.b16 %v1719_v0  ;;  %v1732_v59 = vrot.slane %v1730_v15, 5 }
 0x11d   : > { %1307 = vmatmul.bf16.gmra.mxu2 %v4943_v9  ;;  %v5234_v7 = vadd.f32 %v2194_v10, %v2083_v55  ;;  %v1411_v10 = vld [vmem:[#allocation2 + $0x90] sm:$0xf] }
 0x11e   : > { %v2197_v27 = vpop.f32.mrf.mxu0  ;;  %v1721_v53 = vshrl.u32 %v1411_v10, 16  ;;  %v1724_v11 = vshll.u32 %v1411_v10, 16 }
 0x11f   : > { %2046 = vmatmul.bf16.gmra.mxu3 %v5203_v25 }
 0x120   : > { %v1268_v63 = vpop.f32.mrf.mxu2  ;;  %v1113_v29 = vpop.f32.mrf.mxu1  ;;  %v1723_v45 = vrot.slane %v1721_v53, 4 }
 0x121   : > { %2236 = vmatmul.bf16.gmra.mxu0 %v5232_v39  ;;  %v1345_v9 = vadd.f32 %v1268_v63, %v1109_v22  ;;  %v1114_v41 = vadd.f32 %v1113_v29, %v5135_v20  ;;  %v1734_v22 = vshrl.u32 %v1412_v34, 16  ;;  %v1726_v63 = vrot.slane %v1724_v11, 5 }
 0x122   : > { %v2007_v47 = vpop.f32.mrf.mxu3 }
 0x123   : > { %v2084_v23 = vadd.f32 %v2007_v47, %v1345_v9  ;;  %1152 = vmatmul.bf16.gmra.mxu1 %v4392_v8  ;;  %v1736_v51 = vrot.slane %v1734_v22, 4  ;;  %v1413_v47 = vld [vmem:[#allocation2 + $0x98] sm:$0x1]  ;;  %v1727_v34 = vor.u32 %v1726_v63, %v1723_v45  ;;  %v1415_v45 = vld [vmem:[#allocation2 + $0xa0] sm:$0xf] }
 0x124   : > { %v1740_v8 = vshll.u32 %v1413_v47, 16 }
 0x125   : > { %v5245_v6 = vadd.f32 %v2197_v27, %v2084_v23  ;;  %v5250_v27 = vpack.c.b16 %v1904_v26, %v1903_v30  ;;  %v1737_v23 = vor.u32 %v1736_v51, %v1732_v59  ;;  %v1414_v30 = vld [vmem:[#allocation2 + $0x9c] sm:$0xf]  ;;  %v4246_v26 = vld [vmem:[%s5711_s1 + $0x148] sm:$0xff] }
 0x126   : > { %v2199_v20 = vpop.f32.mrf.mxu0  ;;  %3020 = vmatpush.bf16.msra.mxu3 %v4246_v26  ;;  %v1745_v51 = vshrl.u32 %v1414_v30, 16  ;;  %v553_v26 = vrot.slane %v4808_v1, 4 }
 0x128   : > { %v1270_v55 = vpop.f32.mrf.mxu2  ;;  %v1115_v16 = vpop.f32.mrf.mxu1 }
 0x129   : > { %v1346_v29 = vadd.f32 %v1270_v55, %v1111_v38  ;;  %v1116_v9 = vadd.f32 %v1115_v16, %v5157_v62  ;;  %v720_v38 = vld [vmem:[#allocation2 + $0xb0] sm:$0x1]  ;;  %v4238_v62 = vld [vmem:[%s5711_s1 + $0x88] sm:$0xff]  ;;  %v1742_v55 = vrot.slane %v1740_v8, 5 }
 0x12a   : > { %v2009_v10 = vpop.f32.mrf.mxu3  ;;  %v721_v36 = vsel %vm4929_vm7, %v536_v54, %v720_v38  ;;  %2830 = vmatpush.bf16.msra.mxu2 %v4238_v62  ;;  %v1754_v54 = vshll.u32 %v1415_v45, 16  ;;  %v4254_v8 = vld [vmem:[%s5711_s1 + $0x208] sm:$0xff] }
 0x12b   : > { %v2085_v19 = vadd.f32 %v2009_v10, %v1346_v29  ;;  %722 = vst [vmem:[#allocation2 + $0xb0] sm:$0x1] %v721_v36  ;;  %v4393_v29 = vld [vmem:[#allocation2 + $0x84] sm:$0xff]  ;;  %v1748_v10 = vshll.u32 %v1414_v30, 16  ;;  %3210 = vmatpush.bf16.msra.mxu0 %v4254_v8 }
 0x12d   : > { %1312 = vmatmul.bf16.gmra.mxu2 %v4967_v48  ;;  %v5252_v37 = vadd.f32 %v2199_v20, %v2085_v19  ;;  %v1728_v48 = vrot.slane %v1727_v34, 4  ;;  %v1738_v20 = vrot.slane %v1737_v23, 4  ;;  %v1758_v19 = vshrl.u32 %v1415_v45, 16 }
 0x12e   : > { %v2202_v53 = vpop.f32.mrf.mxu0 }
 0x12f   : > { %5733 = vst [vmem:[#allocation11_spill] sm:$0xff] %v5252_v37  ;;  %2051 = vmatmul.bf16.gmra.mxu3 %v5232_v39  ;;  %v1743_v47 = vsel %vm4976_vm10, %v1738_v20, %v1742_v55  ;;  %v1756_v20 = vrot.slane %v1754_v54, 5  ;;  %v1760_v55 = vrot.slane %v1758_v19, 4 }
 0x130   : > { %v1273_v11 = vpop.f32.mrf.mxu2  ;;  %v1118_v0 = vpop.f32.mrf.mxu1  ;;  %v1906_v36 = vunpack.c.l.b16 %v1743_v47 }
 0x131   : > { %2241 = vmatmul.bf16.gmra.mxu0 %v5250_v27  ;;  %v1347_v15 = vadd.f32 %v1273_v11, %v1114_v41  ;;  %v1119_v22 = vadd.f32 %v1118_v0, %v5178_v52  ;;  %v4230_v41 = vld [vmem:[%s5711_s1 + $0x1c8] sm:$0xff]  ;;  %v1733_v52 = vsel %vm4976_vm10, %v1728_v48, %v1732_v59  ;;  %v1747_v59 = vrot.slane %v1745_v51, 4 }
 0x132   : > { %v2012_v16 = vpop.f32.mrf.mxu3  ;;  %2379 = vmatpush.bf16.msra.mxu1 %v4230_v41  ;;  %v1905_v62 = vunpack.c.l.b16 %v1733_v52  ;;  %v1750_v0 = vrot.slane %v1748_v10, 5  ;;  %v1761_v41 = vor.u32 %v1760_v55, %v1756_v20 }
 0x133   : > { %v2086_v63 = vadd.f32 %v2012_v16, %v1347_v15  ;;  %1157 = vmatmul.bf16.gmra.mxu1 %v4393_v29 }
 0x134   : > { %v5279_v45 = vpack.c.b16 %v1906_v36, %v1905_v62  ;;  %v1751_v29 = vor.u32 %v1750_v0, %v1747_v59  ;;  %v1762_v8 = vrot.slane %v1761_v41, 4  ;;  %v1418_v59 = vld [vmem:[#allocation2 + $0xac] sm:$0xf] }
 0x135   : > { %v5272_v34 = vadd.f32 %v2202_v53, %v2086_v63  ;;  %v1416_v53 = vld [vmem:[#allocation2 + $0xa4] sm:$0x1]  ;;  %v5281_v63 = vld [vmem:[#allocation2 + $0x9c] sm:$0xff] }
 0x136   : > { %v2204_v23 = vpop.f32.mrf.mxu0  ;;  %5735 = vst [vmem:[#allocation13_spill] sm:$0xff] %v5279_v45  ;;  %v1764_v52 = vshll.u32 %v1416_v53, 16  ;;  %v1752_v19 = vrot.slane %v1751_v29, 4  ;;  %2380 = vmatpush.bf16.msra.mxu1 %v4229_v61 }
 0x137   : > { %5734 = vst [vmem:[#allocation12_spill] sm:$0xff] %v5272_v34 }
 0x138   : > { %v1275_v38 = vpop.f32.mrf.mxu2  ;;  %v1120_v11 = vpop.f32.mrf.mxu1  ;;  %v1757_v0 = vsel %vm4976_vm10, %v1752_v19, %v1756_v20  ;;  %v570_v19 = vrot.slane %v4884_v24, 4  ;;  %v4237_v24 = vld [vmem:[%s5711_s1 + $0x80] sm:$0xff] }
 0x139   : > { %v1348_v48 = vadd.f32 %v1275_v38, %v1116_v9  ;;  %v1121_v15 = vadd.f32 %v1120_v11, %v5192_v2  ;;  %v727_v2 = vld [vmem:[#allocation2 + $0xbc] sm:$0x1]  ;;  %v1766_v38 = vrot.slane %v1764_v52, 5  ;;  %v1417_v11 = vld [vmem:[#allocation2 + $0xa8] sm:$0xf]  ;;  %2831 = vmatpush.bf16.msra.mxu2 %v4237_v24 }
 0x13a   : > { %v2014_v30 = vpop.f32.mrf.mxu3  ;;  %v728_v10 = vsel %vm4929_vm7, %v553_v26, %v727_v2  ;;  %v1769_v53 = vshrl.u32 %v1417_v11, 16  ;;  %v1778_v26 = vshll.u32 %v1418_v59, 16  ;;  %v1907_v2 = vunpack.c.l.b16 %v1757_v0 }
 0x13b   : > { %v2087_v16 = vadd.f32 %v2014_v30, %v1348_v48  ;;  %729 = vst [vmem:[#allocation2 + $0xbc] sm:$0x1] %v728_v10  ;;  %v1767_v48 = vsel %vm4976_vm10, %v1762_v8, %v1766_v38  ;;  %v5297_v38 = vld [vmem:[#allocation2 + $0xa8] sm:$0xff] }
 0x13c   : > { %v1908_v10 = vunpack.c.l.b16 %v1767_v48 }
 0x13d   : > { %1317 = vmatmul.bf16.gmra.mxu2 %v5281_v63  ;;  %v5284_v51 = vadd.f32 %v2204_v23, %v2087_v16  ;;  %v4395_v23 = vld [vmem:[#allocation2 + $0x90] sm:$0xff]  ;;  %v1782_v16 = vshrl.u32 %v1418_v59, 16 }
 0x13e   : > { %v2207_v9 = vpop.f32.mrf.mxu0 }
 0x13f   : > { %5736 = vst [vmem:[#allocation14_spill] sm:$0xff] %v5284_v51  ;;  %2056 = vmatmul.bf16.gmra.mxu3 %v5250_v27  ;;  %v1784_v20 = vrot.slane %v1782_v16, 4 }
 0x140   : > { %v1278_v1 = vpop.f32.mrf.mxu2  ;;  %v1123_v47 = vpop.f32.mrf.mxu1 }
 0x141   : > { %2246 = vmatmul.bf16.gmra.mxu0 %v5279_v45  ;;  %v1349_v54 = vadd.f32 %v1278_v1, %v1119_v22  ;;  %v1772_v22 = vshll.u32 %v1417_v11, 16 }
 0x142   : > { %v2017_v62 = vpop.f32.mrf.mxu3 }
 0x143   : > { %v2088_v36 = vadd.f32 %v2017_v62, %v1349_v54  ;;  %1162 = vmatmul.bf16.gmra.mxu1 %v4395_v23  ;;  %v1771_v54 = vrot.slane %v1769_v53, 4  ;;  %v1774_v62 = vrot.slane %v1772_v22, 5  ;;  %v1780_v23 = vrot.slane %v1778_v26, 5  ;;  %v734_v53 = vld [vmem:[#allocation2 + $0xc8] sm:$0x1] }
 0x144   : > { %v1124_v22 = vadd.f32 %v1123_v47, %v5047_v12  ;;  %v735_v26 = vsel %vm4929_vm7, %v570_v19, %v734_v53  ;;  %v4245_v12 = vld [vmem:[%s5711_s1 + $0x140] sm:$0xff] }
 0x145   : > { %v5294_v55 = vadd.f32 %v2207_v9, %v2088_v36  ;;  %v1419_v9 = vld [vmem:[#allocation2 + $0xb0] sm:$0x1]  ;;  %v5300_v36 = vpack.c.b16 %v1908_v10, %v1907_v2  ;;  %v1775_v59 = vor.u32 %v1774_v62, %v1771_v54  ;;  %v1785_v0 = vor.u32 %v1784_v20, %v1780_v23  ;;  %736 = vst [vmem:[#allocation2 + $0xc8] sm:$0x1] %v735_v26  ;;  %v1421_v2 = vld [vmem:[#allocation2 + $0xb8] sm:$0xf] }
 0x146   : > { %v2209_v30 = vpop.f32.mrf.mxu0  ;;  %v1788_v48 = vshll.u32 %v1419_v9, 16  ;;  %3021 = vmatpush.bf16.msra.mxu3 %v4245_v12  ;;  %v1806_v9 = vshrl.u32 %v1421_v2, 16 }
 0x147   : > { %5737 = vst [vmem:[#allocation15_spill] sm:$0xff] %v5294_v55  ;;  %v1776_v10 = vrot.slane %v1775_v59, 4 }
 0x148   : > { %v1280_v29 = vpop.f32.mrf.mxu2  ;;  %v1125_v41 = vpop.f32.mrf.mxu1  ;;  %5738 = vst [vmem:[#allocation16_spill] sm:$0xff] %v5300_v36  ;;  %v1790_v54 = vrot.slane %v1788_v48, 5 }
 0x149   : > { %v1350_v52 = vadd.f32 %v1280_v29, %v1121_v15  ;;  %v1781_v59 = vsel %vm4976_vm10, %v1776_v10, %v1780_v23  ;;  %v1126_v48 = vadd.f32 %v1125_v41, %v5060_v17  ;;  %v1422_v23 = vld [vmem:[#allocation2 + $0xbc] sm:$0x1] }
 0x14a   : > { %v2019_v1 = vpop.f32.mrf.mxu3  ;;  %v1909_v12 = vunpack.c.l.b16 %v1781_v59  ;;  %v1812_v61 = vshll.u32 %v1422_v23, 16 }
 0x14b   : > { %v2089_v8 = vadd.f32 %v2019_v1, %v1350_v52  ;;  %v1420_v52 = vld [vmem:[#allocation2 + $0xb4] sm:$0xf]  ;;  %v1786_v1 = vrot.slane %v1785_v0, 4 }
 0x14c   : > { %v1793_v20 = vshrl.u32 %v1420_v52, 16  ;;  %v1796_v19 = vshll.u32 %v1420_v52, 16 }
 0x14d   : > { %1322 = vmatmul.bf16.gmra.mxu2 %v5297_v38  ;;  %v5302_v11 = vadd.f32 %v2209_v30, %v2089_v8  ;;  %v1802_v8 = vshll.u32 %v1421_v2, 16  ;;  %v1791_v0 = vsel %vm4976_vm10, %v1786_v1, %v1790_v54 }
 0x14e   : > { %v2212_v15 = vpop.f32.mrf.mxu0 }
 0x14f   : > { %5739 = vst [vmem:[#allocation17_spill] sm:$0xff] %v5302_v11  ;;  %2061 = vmatmul.bf16.gmra.mxu3 %v5279_v45  ;;  %v1804_v52 = vrot.slane %v1802_v8, 5  ;;  %v4398_v8 = vld [vmem:[#allocation2 + $0x4] sm:$0xf]  ;;  %v4403_v11 = vld [vmem:[#allocation2 + $0x20] sm:$0x1] }
 0x150   : > { %v1283_v16 = vpop.f32.mrf.mxu2  ;;  %v1128_v29 = vpop.f32.mrf.mxu1  ;;  %v2588_v55 = vrot.slane %v4403_v11, 5 }
 0x151   : > { %2251 = vmatmul.bf16.gmra.mxu0 %v5300_v36  ;;  %v1351_v30 = vadd.f32 %v1283_v16, %v1124_v22  ;;  %v1795_v16 = vrot.slane %v1793_v20, 4 }
 0x152   : > { %v2022_v47 = vpop.f32.mrf.mxu3 }
 0x153   : > { %v2090_v62 = vadd.f32 %v2022_v47, %v1351_v30  ;;  %1167 = vmatmul.bf16.gmra.mxu1 %v5281_v63  ;;  %v4253_v63 = vld [vmem:[%s5711_s1 + $0x200] sm:$0xff]  ;;  %v1798_v30 = vrot.slane %v1796_v19, 5  ;;  %v1910_v47 = vunpack.c.l.b16 %v1791_v0  ;;  %v1129_v19 = vadd.f32 %v1128_v29, %v5076_v40 }
 0x154   : > { %3211 = vmatpush.bf16.msra.mxu0 %v4253_v63 }
 0x155   : > { %v5319_v53 = vadd.f32 %v2212_v15, %v2090_v62  ;;  %v1808_v15 = vrot.slane %v1806_v9, 4  ;;  %v1799_v1 = vor.u32 %v1798_v30, %v1795_v16  ;;  %v5332_v17 = vpack.c.b16 %v1910_v47, %v1909_v12  ;;  %v1423_v16 = vld [vmem:[#allocation2 + $0xc0] sm:$0xf]  ;;  %v1424_v12 = vld [vmem:[#allocation2 + $0xc4] sm:$0xf] }
 0x156   : > { %v2214_v22 = vpop.f32.mrf.mxu0  ;;  %v2571_v9 = vrot.slane %v4398_v8, 5  ;;  %v1817_v23 = vshrl.u32 %v1423_v16, 16  ;;  %v1826_v8 = vshll.u32 %v1424_v12, 16 }
 0x157   : > { %5740 = vst [vmem:[#allocation18_spill] sm:$0xff] %v5319_v53  ;;  %v1809_v54 = vor.u32 %v1808_v15, %v1804_v52  ;;  %v5329_v53 = vld [vmem:[#allocation2 + $0xb4] sm:$0xff]  ;;  %v1800_v63 = vrot.slane %v1799_v1, 4  ;;  %v4399_v15 = vld [vmem:[#allocation2 + $0x10] sm:$0xf] }
 0x158   : > { %v1285_v24 = vpop.f32.mrf.mxu2  ;;  %v1130_v26 = vpop.f32.mrf.mxu1  ;;  %v1828_v34 = vrot.slane %v1826_v8, 5  ;;  %v1425_v8 = vld [vmem:[#allocation2 + $0xc8] sm:$0x1] }
 0x159   : > { %v1352_v2 = vadd.f32 %v1285_v24, %v1126_v48  ;;  %v1810_v48 = vrot.slane %v1809_v54, 4  ;;  %v1814_v24 = vrot.slane %v1812_v61, 5  ;;  %v1805_v54 = vsel %vm4976_vm10, %v1800_v63, %v1804_v52 }
 0x15a   : > { %v2024_v10 = vpop.f32.mrf.mxu3  ;;  %v1131_v51 = vadd.f32 %v1130_v26, %v5098_v58  ;;  %v1911_v52 = vunpack.c.l.b16 %v1805_v54  ;;  %v2496_v58 = vld [vmem:[#allocation2 + $0x18] sm:$0xe] }
 0x15b   : > { %v2091_v62 = vadd.f32 %v2024_v10, %v1352_v2  ;;  %v5341_v2 = vld [vmem:[#allocation2 + $0x1c] sm:$0xf]  ;;  %v2573_v10 = vrot.slane %v2571_v9, 4  ;;  %v1815_v61 = vsel %vm4976_vm10, %v1810_v48, %v1814_v24  ;;  %v2494_v48 = vld [vmem:[#allocation2] sm:$0xe]  ;;  %v4007_v45 = vrot.slane %v2496_v58, 9 }
 0x15c   : > { %v1912_v63 = vunpack.c.l.b16 %v1815_v61  ;;  %v2495_v24 = vld [vmem:[#allocation2 + $0xc] sm:$0xe] }
 0x15d   : > { %1327 = vmatmul.bf16.gmra.mxu2 %v5329_v53  ;;  %v5334_v41 = vadd.f32 %v2214_v22, %v2091_v62  ;;  %v2578_v22 = vrot.slane %v4399_v15, 5  ;;  %v4401_v62 = vld [vmem:[#allocation2 + $0x8] sm:$0x1] }
 0x15e   : > { %v2217_v20 = vpop.f32.mrf.mxu0  ;;  %v2574_v1 = vrot.slane %v4401_v62, 5 }
 0x15f   : > { %5741 = vst [vmem:[#allocation19_spill] sm:$0xff] %v5334_v41  ;;  %2066 = vmatmul.bf16.gmra.mxu3 %v5300_v36  ;;  %v2580_v40 = vrot.slane %v2578_v22, 4  ;;  %v4402_v41 = vld [vmem:[#allocation2 + $0x14] sm:$0x1]  ;;  %v1819_v36 = vrot.slane %v1817_v23, 4 }
 0x160   : > { %v1288_v59 = vpop.f32.mrf.mxu2  ;;  %v5338_v0 = vpop.f32.mrf.mxu1  ;;  %v2575_v54 = vsel %vm5354_vm13, %v2573_v10, %v2574_v1 }
 0x161   : > { %2256 = vmatmul.bf16.gmra.mxu0 %v5332_v17  ;;  %v1353_v30 = vadd.f32 %v1288_v59, %v1129_v19  ;;  %v1820_v19 = vshll.u32 %v1423_v16, 16  ;;  %v1830_v59 = vshrl.u32 %v1424_v12, 16 }
 0x162   : > { %v2027_v29 = vpop.f32.mrf.mxu3 }
 0x163   : > { %v2092_v47 = vadd.f32 %v2027_v29, %v1353_v30  ;;  %1172 = vmatmul.bf16.gmra.mxu1 %v5297_v38  ;;  %v2581_v30 = vrot.slane %v4402_v41, 5  ;;  %v5743_v38 = vrot.slane %v5341_v2, 5 }
 0x165   : > { %v5349_v15 = vadd.f32 %v2217_v20, %v2092_v47  ;;  %v2587_v29 = vrot.slane %v5743_v38, 4  ;;  %v4005_v20 = vrot.slane %v2494_v48, 9  ;;  %v4006_v47 = vrot.slane %v2495_v24, 9 }
 0x166   : > { %v2219_v62 = vpop.f32.mrf.mxu0  ;;  %v1832_v38 = vrot.slane %v1830_v59, 4  ;;  %v2713_v48 = vunpack.c.l.b16 %v2575_v54 }
 0x167   : > { %5742 = vst [vmem:[#allocation20_spill] sm:$0xff] %v5349_v15  ;;  %v1822_v15 = vrot.slane %v1820_v19, 5  ;;  %v2572_v23 = vsel %vm5354_vm13, %v4005_v20, %v2571_v9  ;;  %v2579_v61 = vsel %vm5354_vm13, %v4006_v47, %v2578_v22  ;;  %v2589_v9 = vsel %vm5354_vm13, %v2587_v29, %v2588_v55  ;;  %v4404_v20 = vld [vmem:[#allocation2 + $0xc0] sm:$0xff] }
 0x168   : > { %v1290_v16 = vpop.f32.mrf.mxu2  ;;  %v1135_v12 = vpop.f32.mrf.mxu1  ;;  %v2712_v59 = vunpack.c.l.b16 %v2572_v23  ;;  %v2714_v24 = vunpack.c.l.b16 %v2579_v61  ;;  %v2717_v22 = vunpack.c.l.b16 %v2589_v9  ;;  %v1134_v55 = vadd.f32 %v5338_v0, %v5113_v33 }
 0x169   : > { %v1354_v41 = vadd.f32 %v1290_v16, %v1131_v51  ;;  %v2582_v51 = vsel %vm5354_vm13, %v2580_v40, %v2581_v30  ;;  %v5366_v16 = vpack.c.b16 %v1912_v63, %v1911_v52  ;;  %v1823_v10 = vor.u32 %v1822_v15, %v1819_v36 }
 0x16a   : > { %v2029_v26 = vpop.f32.mrf.mxu3  ;;  %v2715_v37 = vunpack.c.l.b16 %v2582_v51  ;;  %v2744_v1 = vpack.c.b16 %v2713_v48, %v2712_v59  ;;  %v1833_v30 = vor.u32 %v1832_v38, %v1828_v34  ;;  %v5746_v52 = vrot.slane %v5341_v2, 5  ;;  %v4188_v48 = vld [vmem:[#allocation2 + $0xcc] sm:$0xff] }
 0x16b   : > { %v2093_v19 = vadd.f32 %v2029_v26, %v1354_v41  ;;  %v1836_v41 = vshll.u32 %v1425_v8, 16  ;;  %v1824_v58 = vrot.slane %v1823_v10, 4  ;;  %v1136_v51 = vadd.f32 %v1135_v12, %v5127_v3 }
 0x16c   : > { %v5372_v26 = vpack.c.b16 %v2715_v37, %v2714_v24  ;;  %v2586_v63 = vsel %vm5354_vm13, %v4007_v45, %v5746_v52  ;;  %v1834_v23 = vrot.slane %v1833_v30, 4 }
 0x16d   : > { %1332 = vmatmul.bf16.gmra.mxu2 %v4404_v20  ;;  %v5370_v47 = vadd.f32 %v2219_v62, %v2093_v19  ;;  %v2716_v36 = vunpack.c.l.b16 %v2586_v63  ;;  %v1838_v2 = vrot.slane %v1836_v41, 5  ;;  %v1829_v0 = vsel %vm4976_vm10, %v1824_v58, %v1828_v34 }
 0x16e   : > { %v2222_v40 = vpop.f32.mrf.mxu0  ;;  %v2131_v24 = vunpack.c.l.b16 %v1829_v0 }
 0x16f   : > { %2071 = vmatmul.bf16.gmra.mxu3 %v5332_v17  ;;  %v5382_v38 = vpack.c.b16 %v2717_v22, %v2716_v36  ;;  %v1839_v61 = vsel %vm4976_vm10, %v1834_v23, %v1838_v2  ;;  %v4405_v2 = vld [vmem:[#allocation2 + $0x28] sm:$0xf] }
 0x170   : > { %v1293_v15 = vpop.f32.mrf.mxu2  ;;  %v1138_v29 = vpop.f32.mrf.mxu1  ;;  %v2132_v9 = vunpack.c.l.b16 %v1839_v61 }
 0x171   : > { %2261 = vmatmul.bf16.gmra.mxu0 %v5366_v16  ;;  %v1355_v62 = vadd.f32 %v1293_v15, %v1134_v55  ;;  %v1139_v34 = vadd.f32 %v1138_v29, %v5145_v43 }
 0x172   : > { %v2032_v37 = vpop.f32.mrf.mxu3 }
 0x173   : > { %v2094_v54 = vadd.f32 %v2032_v37, %v1355_v62  ;;  %1177 = vmatmul.bf16.gmra.mxu1 %v5329_v53  ;;  %v5392_v53 = vpack.c.b16 %v2132_v9, %v2131_v24 }
 0x175   : > { %v5385_v45 = vadd.f32 %v2222_v40, %v2094_v54  ;;  %v2592_v54 = vrot.slane %v4405_v2, 5 }
 0x176   : > { %v2224_v33 = vpop.f32.mrf.mxu0 }
 0x178   : > { %v1295_v19 = vpop.f32.mrf.mxu2  ;;  %v1140_v8 = vpop.f32.mrf.mxu1 }
 0x179   : > { %v1356_v59 = vadd.f32 %v1295_v19, %v1136_v51  ;;  %v1141_v36 = vadd.f32 %v1140_v8, %v5168_v28  ;;  %v2594_v8 = vrot.slane %v2592_v54, 4 }
 0x17a   : > { %v2034_v20 = vpop.f32.mrf.mxu3 }
 0x17b   : > { %v2095_v10 = vadd.f32 %v2034_v20, %v1356_v59  ;;  %v4406_v59 = vld [vmem:[#allocation2 + $0x2c] sm:$0x1] }
 0x17d   : > { %1337 = vmatmul.bf16.gmra.mxu2 %v4188_v48  ;;  %v5394_v22 = vadd.f32 %v2224_v33, %v2095_v10 }
 0x17e   : > { %v2227_v40 = vpop.f32.mrf.mxu0 }
 0x17f   : > { %2076 = vmatmul.bf16.gmra.mxu3 %v5366_v16 }
 0x180   : > { %v1298_v30 = vpop.f32.mrf.mxu2  ;;  %v1143_v3 = vpop.f32.mrf.mxu1 }
 0x181   : > { %2266 = vmatmul.bf16.gmra.mxu0 %v5392_v53  ;;  %v1357_v12 = vadd.f32 %v1298_v30, %v1139_v34  ;;  %v1144_v33 = vadd.f32 %v1143_v3, %v5074_v49 }
 0x182   : > { %v2037_v41 = vpop.f32.mrf.mxu3 }
 0x183   : > { %v2096_v52 = vadd.f32 %v2037_v41, %v1357_v12  ;;  %2381 = vmatmul.bf16.vlgmr.msra.gmra.mxu1 %v5011_v42  ;;  %v2497_v42 = vld [vmem:[#allocation2 + $0x24] sm:$0xe] }
 0x184   : > { %v4008_v19 = vrot.slane %v2497_v42, 9 }
 0x185   : > { %v5400_v63 = vadd.f32 %v2227_v40, %v2096_v52 }
 0x186   : > { %v2229_v55 = vpop.f32.mrf.mxu0  ;;  %v2593_v49 = vsel %vm5354_vm13, %v4008_v19, %v2592_v54 }
 0x187   : > { %v2718_v3 = vunpack.c.l.b16 %v2593_v49 }
 0x188   : > { %v1300_v15 = vpop.f32.mrf.mxu2  ;;  %v1145_v62 = vpop.f32.mrf.mxu1 }
 0x189   : > { %v1358_v37 = vadd.f32 %v1300_v15, %v1141_v36  ;;  %v1146_v10 = vadd.f32 %v1145_v62, %v5096_v5  ;;  %v4407_v15 = vld [vmem:[#allocation2 + $0x34] sm:$0xf]  ;;  %v2498_v5 = vld [vmem:[#allocation2 + $0x30] sm:$0xe] }
 0x18a   : > { %v2039_v43 = vpop.f32.mrf.mxu3  ;;  %v4009_v54 = vrot.slane %v2498_v5, 9 }
 0x18b   : > { %v2097_v29 = vadd.f32 %v2039_v43, %v1358_v37  ;;  %v2599_v37 = vrot.slane %v4407_v15, 5 }
 0x18d   : > { %2832 = vmatmul.bf16.vlgmr.msra.gmra.mxu2 %v2744_v1  ;;  %v5403_v58 = vadd.f32 %v2229_v55, %v2097_v29  ;;  %v2595_v1 = vrot.slane %v4406_v59, 5 }
 0x18e   : > { %v2232_v23 = vpop.f32.mrf.mxu0 }
 0x18f   : > { %3022 = vmatmul.bf16.vlgmr.msra.gmra.mxu3 %v5372_v26  ;;  %v2596_v20 = vsel %vm5354_vm13, %v2594_v8, %v2595_v1 }
 0x190   : > { %v1303_v0 = vpop.f32.mrf.mxu2  ;;  %v1148_v61 = vpop.f32.mrf.mxu1  ;;  %v2719_v12 = vunpack.c.l.b16 %v2596_v20 }
 0x191   : > { %3212 = vmatmul.bf16.vlgmr.msra.gmra.mxu0 %v5382_v38  ;;  %v1359_v28 = vadd.f32 %v1303_v0, %v1144_v33  ;;  %v1149_v43 = vadd.f32 %v1148_v61, %v5111_v32  ;;  %v4408_v33 = vld [vmem:[#allocation2 + $0x38] sm:$0x1]  ;;  %v2600_v32 = vsel %vm5354_vm13, %v4009_v54, %v2599_v37 }
 0x192   : > { %v2042_v51 = vpop.f32.mrf.mxu3  ;;  %v2602_v42 = vrot.slane %v4408_v33, 5 }
 0x193   : > { %v2098_v48 = vadd.f32 %v2042_v51, %v1359_v28  ;;  %2386 = vmatmul.bf16.gmra.mxu1 %v5023_v57  ;;  %v5417_v57 = vpack.c.b16 %v2719_v12, %v2718_v3 }
 0x195   : > { %v5409_v24 = vadd.f32 %v2232_v23, %v2098_v48  ;;  %v2720_v48 = vunpack.c.l.b16 %v2600_v32 }
 0x196   : > { %v2234_v9 = vpop.f32.mrf.mxu0 }
 0x198   : > { %v1305_v40 = vpop.f32.mrf.mxu2  ;;  %v1150_v34 = vpop.f32.mrf.mxu1 }
 0x199   : > { %v1360_v30 = vadd.f32 %v1305_v40, %v1146_v10  ;;  %v1151_v19 = vadd.f32 %v1150_v34, %v5125_v60  ;;  %v2499_v60 = vld [vmem:[#allocation2 + $0x3c] sm:$0xe] }
 0x19a   : > { %v2044_v41 = vpop.f32.mrf.mxu3  ;;  %v4010_v15 = vrot.slane %v2499_v60, 9 }
 0x19b   : > { %v2099_v52 = vadd.f32 %v2044_v41, %v1360_v30  ;;  %v4409_v30 = vld [vmem:[#allocation2 + $0x40] sm:$0xf] }
 0x19c   : > { %v2606_v3 = vrot.slane %v4409_v30, 5  ;;  %v4412_v30 = vld [vmem:[#allocation2 + $0x50] sm:$0x1] }
 0x19d   : > { %2837 = vmatmul.bf16.gmra.mxu2 %v5372_v26  ;;  %v5419_v55 = vadd.f32 %v2234_v9, %v2099_v52  ;;  %v2601_v26 = vrot.slane %v2599_v37, 4  ;;  %v4410_v37 = vld [vmem:[#allocation2 + $0x44] sm:$0x1] }
 0x19e   : > { %v2237_v36 = vpop.f32.mrf.mxu0 }
 0x19f   : > { %3027 = vmatmul.bf16.gmra.mxu3 %v5382_v38  ;;  %v2603_v61 = vsel %vm5354_vm13, %v2601_v26, %v2602_v42 }
 0x1a0   : > { %v1308_v62 = vpop.f32.mrf.mxu2  ;;  %v1153_v29 = vpop.f32.mrf.mxu1  ;;  %v2721_v9 = vunpack.c.l.b16 %v2603_v61 }
 0x1a1   : > { %3217 = vmatmul.bf16.gmra.mxu0 %v5417_v57  ;;  %v1361_v23 = vadd.f32 %v1308_v62, %v1149_v43  ;;  %v1154_v12 = vadd.f32 %v1153_v29, %v5143_v31  ;;  %v2609_v43 = vrot.slane %v4410_v37, 5  ;;  %v2607_v31 = vsel %vm5354_vm13, %v4010_v15, %v2606_v3 }
 0x1a2   : > { %v2047_v2 = vpop.f32.mrf.mxu3  ;;  %v2722_v42 = vunpack.c.l.b16 %v2607_v31 }
 0x1a3   : > { %v2100_v0 = vadd.f32 %v2047_v2, %v1361_v23  ;;  %2391 = vmatmul.bf16.gmra.mxu1 %v5049_v56  ;;  %v5433_v56 = vpack.c.b16 %v2721_v9, %v2720_v48 }
 0x1a5   : > { %v5425_v28 = vadd.f32 %v2237_v36, %v2100_v0 }
 0x1a6   : > { %v2239_v51 = vpop.f32.mrf.mxu0 }
 0x1a8   : > { %v1310_v8 = vpop.f32.mrf.mxu2  ;;  %v1155_v59 = vpop.f32.mrf.mxu1 }
 0x1a9   : > { %v1362_v1 = vadd.f32 %v1310_v8, %v1151_v19  ;;  %v1156_v2 = vadd.f32 %v1155_v59, %v5166_v14  ;;  %v4411_v8 = vld [vmem:[#allocation2 + $0x4c] sm:$0xf]  ;;  %v2500_v14 = vld [vmem:[#allocation2 + $0x48] sm:$0xe] }
 0x1aa   : > { %v2049_v49 = vpop.f32.mrf.mxu3 }
 0x1ab   : > { %v2101_v20 = vadd.f32 %v2049_v49, %v1362_v1  ;;  %v2613_v1 = vrot.slane %v4411_v8, 5 }
 0x1ad   : > { %2842 = vmatmul.bf16.gmra.mxu2 %v5382_v38  ;;  %v5435_v10 = vadd.f32 %v2239_v51, %v2101_v20  ;;  %v2608_v38 = vrot.slane %v2606_v3, 4  ;;  %v2616_v3 = vrot.slane %v4412_v30, 5 }
 0x1ae   : > { %v2242_v40 = vpop.f32.mrf.mxu0 }
 0x1af   : > { %3032 = vmatmul.bf16.gmra.mxu3 %v5417_v57  ;;  %v2610_v29 = vsel %vm5354_vm13, %v2608_v38, %v2609_v43 }
 0x1b0   : > { %v1313_v34 = vpop.f32.mrf.mxu2  ;;  %v1158_v41 = vpop.f32.mrf.mxu1  ;;  %v2723_v0 = vunpack.c.l.b16 %v2610_v29 }
 0x1b1   : > { %3222 = vmatmul.bf16.gmra.mxu0 %v5433_v56  ;;  %v1363_v52 = vadd.f32 %v1313_v34, %v1154_v12  ;;  %v1159_v48 = vadd.f32 %v1158_v41, %v5183_v4 }
 0x1b2   : > { %v2052_v36 = vpop.f32.mrf.mxu3 }
 0x1b3   : > { %v2102_v5 = vadd.f32 %v2052_v36, %v1363_v52  ;;  %2396 = vmatmul.bf16.gmra.mxu1 %v5064_v35  ;;  %v5449_v35 = vpack.c.b16 %v2723_v0, %v2722_v42 }
 0x1b5   : > { %v5441_v62 = vadd.f32 %v2242_v40, %v2102_v5  ;;  %v4011_v40 = vrot.slane %v2500_v14, 9 }
 0x1b6   : > { %v2244_v23 = vpop.f32.mrf.mxu0 }
 0x1b7   : > { %v2614_v4 = vsel %vm5354_vm13, %v4011_v40, %v2613_v1 }
 0x1b8   : > { %v1315_v54 = vpop.f32.mrf.mxu2  ;;  %v1160_v26 = vpop.f32.mrf.mxu1  ;;  %v2724_v37 = vunpack.c.l.b16 %v2614_v4 }
 0x1b9   : > { %v1364_v33 = vadd.f32 %v1315_v54, %v1156_v2  ;;  %v1161_v52 = vadd.f32 %v1160_v26, %v5196_v46  ;;  %v4413_v2 = vld [vmem:[#allocation2 + $0x58] sm:$0xf]  ;;  %v2501_v46 = vld [vmem:[#allocation2 + $0x54] sm:$0xe] }
 0x1ba   : > { %v2054_v51 = vpop.f32.mrf.mxu3  ;;  %v2620_v54 = vrot.slane %v4413_v2, 5 }
 0x1bb   : > { %v2103_v32 = vadd.f32 %v2054_v51, %v1364_v33 }
 0x1bd   : > { %2847 = vmatmul.bf16.gmra.mxu2 %v5417_v57  ;;  %v5451_v61 = vadd.f32 %v2244_v23, %v2103_v32  ;;  %v2615_v57 = vrot.slane %v2613_v1, 4  ;;  %v4012_v32 = vrot.slane %v2501_v46, 9 }
 0x1be   : > { %v2247_v19 = vpop.f32.mrf.mxu0 }
 0x1bf   : > { %3037 = vmatmul.bf16.gmra.mxu3 %v5433_v56  ;;  %v2617_v41 = vsel %vm5354_vm13, %v2615_v57, %v2616_v3 }
 0x1c0   : > { %v1318_v59 = vpop.f32.mrf.mxu2  ;;  %v1163_v9 = vpop.f32.mrf.mxu1  ;;  %v2725_v43 = vunpack.c.l.b16 %v2617_v41 }
 0x1c1   : > { %3227 = vmatmul.bf16.gmra.mxu0 %v5449_v35  ;;  %v1365_v49 = vadd.f32 %v1318_v59, %v1159_v48  ;;  %v1164_v33 = vadd.f32 %v1163_v9, %v5082_v50  ;;  %v2621_v50 = vsel %vm5354_vm13, %v4012_v32, %v2620_v54  ;;  %v5747_v9 = vld [vmem:[#allocation3_spill] sm:$0xff]  ;;  %v5749_v32 = vld [vmem:[#allocation5_spill] sm:$0xff] }
 0x1c2   : > { %v2057_v20 = vpop.f32.mrf.mxu3  ;;  %v2726_v30 = vunpack.c.l.b16 %v2621_v50 }
 0x1c3   : > { %v2104_v12 = vadd.f32 %v2057_v20, %v1365_v49  ;;  %2401 = vmatmul.bf16.gmra.mxu1 %v5104_v21  ;;  %v5465_v21 = vpack.c.b16 %v2725_v43, %v2724_v37 }
 0x1c5   : > { %v5457_v60 = vadd.f32 %v2247_v19, %v2104_v12  ;;  %v4414_v19 = vld [vmem:[#allocation2 + $0x5c] sm:$0x1] }
 0x1c6   : > { %v2249_v34 = vpop.f32.mrf.mxu0  ;;  %v2623_v8 = vrot.slane %v4414_v19, 5 }
 0x1c8   : > { %v1320_v36 = vpop.f32.mrf.mxu2  ;;  %v1165_v15 = vpop.f32.mrf.mxu1 }
 0x1c9   : > { %v1366_v38 = vadd.f32 %v1320_v36, %v1161_v52  ;;  %v1166_v49 = vadd.f32 %v1165_v15, %v5747_v9  ;;  %v4415_v52 = vld [vmem:[#allocation2 + $0x64] sm:$0xf]  ;;  %v2502_v15 = vld [vmem:[#allocation2 + $0x60] sm:$0xe] }
 0x1ca   : > { %v2059_v5 = vpop.f32.mrf.mxu3  ;;  %v2627_v36 = vrot.slane %v4415_v52, 5  ;;  %v4013_v2 = vrot.slane %v2502_v15, 9 }
 0x1cb   : > { %v2105_v23 = vadd.f32 %v2059_v5, %v1366_v38  ;;  %v5748_v38 = vld [vmem:[#allocation4_spill] sm:$0xff] }
 0x1cd   : > { %2852 = vmatmul.bf16.gmra.mxu2 %v5433_v56  ;;  %v5467_v31 = vadd.f32 %v2249_v34, %v2105_v23  ;;  %v2622_v56 = vrot.slane %v2620_v54, 4  ;;  %v4416_v54 = vld [vmem:[#allocation2 + $0x68] sm:$0x1] }
 0x1ce   : > { %v2252_v29 = vpop.f32.mrf.mxu0 }
 0x1cf   : > { %3042 = vmatmul.bf16.gmra.mxu3 %v5449_v35  ;;  %v2624_v59 = vsel %vm5354_vm13, %v2622_v56, %v2623_v8 }
 0x1d0   : > { %v1323_v26 = vpop.f32.mrf.mxu2  ;;  %v1168_v42 = vpop.f32.mrf.mxu1  ;;  %v2727_v3 = vunpack.c.l.b16 %v2624_v59 }
 0x1d1   : > { %3232 = vmatmul.bf16.gmra.mxu0 %v5465_v21  ;;  %v1367_v0 = vadd.f32 %v1323_v26, %v1164_v33  ;;  %v1169_v37 = vadd.f32 %v1168_v42, %v5748_v38  ;;  %v2630_v33 = vrot.slane %v4416_v54, 5  ;;  %v2628_v42 = vsel %vm5354_vm13, %v4013_v2, %v2627_v36 }
 0x1d2   : > { %v2062_v51 = vpop.f32.mrf.mxu3 }
 0x1d3   : > { %v2106_v1 = vadd.f32 %v2062_v51, %v1367_v0  ;;  %2406 = vmatmul.bf16.gmra.mxu1 %v5133_v13  ;;  %v5481_v13 = vpack.c.b16 %v2727_v3, %v2726_v30  ;;  %v5750_v3 = vld [vmem:[#allocation6_spill] sm:$0xff] }
 0x1d5   : > { %v5473_v48 = vadd.f32 %v2252_v29, %v2106_v1 }
 0x1d6   : > { %v2254_v14 = vpop.f32.mrf.mxu0 }
 0x1d8   : > { %v1325_v20 = vpop.f32.mrf.mxu2  ;;  %v1170_v40 = vpop.f32.mrf.mxu1 }
 0x1d9   : > { %v1368_v57 = vadd.f32 %v1325_v20, %v1166_v49  ;;  %v1171_v56 = vadd.f32 %v1170_v40, %v5749_v32  ;;  %v2503_v40 = vld [vmem:[#allocation2 + $0x6c] sm:$0xe] }
 0x1da   : > { %v2064_v12 = vpop.f32.mrf.mxu3  ;;  %v4014_v38 = vrot.slane %v2503_v40, 9  ;;  %v4420_v40 = vld [vmem:[#allocation2 + $0x80] sm:$0x1] }
 0x1db   : > { %v2107_v34 = vadd.f32 %v2064_v12, %v1368_v57  ;;  %v4417_v57 = vld [vmem:[#allocation2 + $0x70] sm:$0xf] }
 0x1dc   : > { %v2634_v30 = vrot.slane %v4417_v57, 5 }
 0x1dd   : > { %2857 = vmatmul.bf16.gmra.mxu2 %v5449_v35  ;;  %v5483_v4 = vadd.f32 %v2254_v14, %v2107_v34  ;;  %v2629_v35 = vrot.slane %v2627_v36, 4  ;;  %v2728_v14 = vunpack.c.l.b16 %v2628_v42 }
 0x1de   : > { %v2257_v41 = vpop.f32.mrf.mxu0 }
 0x1df   : > { %3047 = vmatmul.bf16.gmra.mxu3 %v5465_v21  ;;  %v2631_v51 = vsel %vm5354_vm13, %v2629_v35, %v2630_v33  ;;  %v5751_v35 = vld [vmem:[#allocation7_spill] sm:$0xff] }
 0x1e0   : > { %v1328_v43 = vpop.f32.mrf.mxu2  ;;  %v1173_v5 = vpop.f32.mrf.mxu1  ;;  %v2729_v50 = vunpack.c.l.b16 %v2631_v51 }
 0x1e1   : > { %3237 = vmatmul.bf16.gmra.mxu0 %v5481_v13  ;;  %v1369_v23 = vadd.f32 %v1328_v43, %v1169_v37  ;;  %v1174_v12 = vadd.f32 %v1173_v5, %v5750_v3  ;;  %v4418_v37 = vld [vmem:[#allocation2 + $0x74] sm:$0x1]  ;;  %v2635_v5 = vsel %vm5354_vm13, %v4014_v38, %v2634_v30 }
 0x1e2   : > { %v2067_v29 = vpop.f32.mrf.mxu3  ;;  %v2637_v15 = vrot.slane %v4418_v37, 5  ;;  %v2730_v42 = vunpack.c.l.b16 %v2635_v5  ;;  %v5753_v37 = vld [vmem:[#allocation9_spill] sm:$0xff] }
 0x1e3   : > { %v2108_v46 = vadd.f32 %v2067_v29, %v1369_v23  ;;  %2411 = vmatmul.bf16.gmra.mxu1 %v5176_v44  ;;  %v5497_v44 = vpack.c.b16 %v2729_v50, %v2728_v14  ;;  %v4419_v14 = vld [vmem:[#allocation2 + $0x7c] sm:$0xf] }
 0x1e4   : > { %v2641_v50 = vrot.slane %v4419_v14, 5 }
 0x1e5   : > { %v5489_v26 = vadd.f32 %v2257_v41, %v2108_v46 }
 0x1e6   : > { %v2259_v0 = vpop.f32.mrf.mxu0 }
 0x1e8   : > { %v1330_v19 = vpop.f32.mrf.mxu2  ;;  %v1175_v8 = vpop.f32.mrf.mxu1 }
 0x1e9   : > { %v1370_v1 = vadd.f32 %v1330_v19, %v1171_v56  ;;  %v1176_v54 = vadd.f32 %v1175_v8, %v5751_v35  ;;  %v2504_v8 = vld [vmem:[#allocation2 + $0x78] sm:$0xe] }
 0x1ea   : > { %v2069_v59 = vpop.f32.mrf.mxu3 }
 0x1eb   : > { %v2109_v9 = vadd.f32 %v2069_v59, %v1370_v1  ;;  %v5752_v59 = vld [vmem:[#allocation8_spill] sm:$0xff] }
 0x1ed   : > { %2862 = vmatmul.bf16.gmra.mxu2 %v5465_v21  ;;  %v5499_v49 = vadd.f32 %v2259_v0, %v2109_v9  ;;  %v2636_v21 = vrot.slane %v2634_v30, 4 }
 0x1ee   : > { %v2262_v20 = vpop.f32.mrf.mxu0 }
 0x1ef   : > { %3052 = vmatmul.bf16.gmra.mxu3 %v5481_v13  ;;  %v2638_v2 = vsel %vm5354_vm13, %v2636_v21, %v2637_v15 }
 0x1f0   : > { %v1333_v34 = vpop.f32.mrf.mxu2  ;;  %v1178_v41 = vpop.f32.mrf.mxu1  ;;  %v2731_v51 = vunpack.c.l.b16 %v2638_v2 }
 0x1f1   : > { %3242 = vmatmul.bf16.gmra.mxu0 %v5497_v44  ;;  %v1371_v52 = vadd.f32 %v1333_v34, %v1174_v12  ;;  %v1179_v9 = vadd.f32 %v1178_v41, %v5752_v59  ;;  %v4015_v12 = vrot.slane %v2504_v8, 9  ;;  %v2644_v34 = vrot.slane %v4420_v40, 5 }
 0x1f2   : > { %v2072_v36 = vpop.f32.mrf.mxu3 }
 0x1f3   : > { %v2110_v43 = vadd.f32 %v2072_v36, %v1371_v52  ;;  %2416 = vmatmul.bf16.gmra.mxu1 %v5203_v25  ;;  %v5513_v25 = vpack.c.b16 %v2731_v51, %v2730_v42  ;;  %v2642_v41 = vsel %vm5354_vm13, %v4015_v12, %v2641_v50  ;;  %v4421_v51 = vld [vmem:[#allocation2 + $0x88] sm:$0xf] }
 0x1f4   : > { %v2732_v2 = vunpack.c.l.b16 %v2642_v41 }
 0x1f5   : > { %v5505_v23 = vadd.f32 %v2262_v20, %v2110_v43 }
 0x1f6   : > { %v2264_v29 = vpop.f32.mrf.mxu0 }
 0x1f8   : > { %v1335_v33 = vpop.f32.mrf.mxu2  ;;  %v1180_v46 = vpop.f32.mrf.mxu1 }
 0x1f9   : > { %v1372_v0 = vadd.f32 %v1335_v33, %v1176_v54  ;;  %v1181_v15 = vadd.f32 %v1180_v46, %v5753_v37  ;;  %v2505_v46 = vld [vmem:[#allocation2 + $0x84] sm:$0xe] }
 0x1fa   : > { %v2074_v32 = vpop.f32.mrf.mxu3  ;;  %v4016_v8 = vrot.slane %v2505_v46, 9 }
 0x1fb   : > { %v2111_v56 = vadd.f32 %v2074_v32, %v1372_v0  ;;  %v2648_v32 = vrot.slane %v4421_v51, 5 }
 0x1fd   : > { %2867 = vmatmul.bf16.gmra.mxu2 %v5481_v13  ;;  %v5515_v19 = vadd.f32 %v2264_v29, %v2111_v56  ;;  %v2643_v13 = vrot.slane %v2641_v50, 4  ;;  %v5754_v56 = vld [vmem:[#allocation10_spill] sm:$0xff]  ;;  %v2649_v40 = vsel %vm5354_vm13, %v4016_v8, %v2648_v32 }
 0x1fe   : > { %v2267_v1 = vpop.f32.mrf.mxu0  ;;  %v2734_v37 = vunpack.c.l.b16 %v2649_v40 }
 0x1ff   : > { %3057 = vmatmul.bf16.gmra.mxu3 %v5497_v44  ;;  %v2645_v21 = vsel %vm5354_vm13, %v2643_v13, %v2644_v34 }
 0x200   : > { %v1338_v20 = vpop.f32.mrf.mxu2  ;;  %v2382_v57 = vpop.f32.mrf.mxu1  ;;  %v2733_v35 = vunpack.c.l.b16 %v2645_v21 }
 0x201   : > { %3247 = vmatmul.bf16.gmra.mxu0 %v5513_v25  ;;  %v1373_v30 = vadd.f32 %v1338_v20, %v1179_v9  ;;  %v4422_v20 = vld [vmem:[#allocation2 + $0x8c] sm:$0x1] }
 0x202   : > { %v2077_v3 = vpop.f32.mrf.mxu3 }
 0x203   : > { %v2112_v52 = vadd.f32 %v2077_v3, %v1373_v30  ;;  %2421 = vmatmul.bf16.gmra.mxu1 %v5232_v39  ;;  %v5529_v39 = vpack.c.b16 %v2733_v35, %v2732_v2  ;;  %v2651_v30 = vrot.slane %v4422_v20, 5 }
 0x205   : > { %v5521_v36 = vadd.f32 %v2267_v1, %v2112_v52  ;;  %v2462_v1 = vadd.f32 %v2382_v57, %v5754_v56  ;;  %v5540_v57 = vld [vmem:[%s5712_s2] ss:$0 sm:$0xff] }
 0x206   : > { %v2269_v38 = vpop.f32.mrf.mxu0 }
 0x208   : > { %v1340_v43 = vpop.f32.mrf.mxu2  ;;  %v2384_v29 = vpop.f32.mrf.mxu1 }
 0x209   : > { %v1374_v5 = vadd.f32 %v1340_v43, %v1181_v15  ;;  %v2463_v52 = vadd.f32 %v2384_v29, %v5234_v7 }
 0x20a   : > { %v2079_v54 = vpop.f32.mrf.mxu3 }
 0x20b   : > { %v2113_v33 = vadd.f32 %v2079_v54, %v1374_v5 }
 0x20d   : > { %2872 = vmatmul.bf16.gmra.mxu2 %v5497_v44  ;;  %v5531_v0 = vadd.f32 %v2269_v38, %v2113_v33  ;;  %v2650_v44 = vrot.slane %v2648_v32, 4  ;;  %v2506_v32 = vld [vmem:[#allocation2 + $0x90] sm:$0xe] }
 0x20e   : > { %v3213_v42 = vpop.f32.mrf.mxu0 }
 0x20f   : > { %3062 = vmatmul.bf16.gmra.mxu3 %v5513_v25  ;;  %v2652_v34 = vsel %vm5354_vm13, %v2650_v44, %v2651_v30 }
 0x210   : > { %v2833_v14 = vpop.f32.mrf.mxu2  ;;  %v2387_v50 = vpop.f32.mrf.mxu1 }
 0x211   : > { %3252 = vmatmul.bf16.gmra.mxu0 %v5529_v39  ;;  %v2913_v59 = vadd.f32 %v2833_v14, %v2462_v1  ;;  %v2464_v29 = vadd.f32 %v2387_v50, %v5245_v6  ;;  %v4424_v50 = vld [vmem:[#allocation2 + $0x98] sm:$0x1] }
 0x212   : > { %v3023_v9 = vpop.f32.mrf.mxu3  ;;  %v2658_v8 = vrot.slane %v4424_v50, 5  ;;  %v2507_v50 = vld [vmem:[#allocation2 + $0x9c] sm:$0xe] }
 0x213   : > { %v3103_v3 = vadd.f32 %v3023_v9, %v2913_v59  ;;  %2426 = vmatmul.bf16.gmra.mxu1 %v5250_v27  ;;  %v2735_v27 = vunpack.c.l.b16 %v2652_v34  ;;  %v4017_v9 = vrot.slane %v2506_v32, 9 }
 0x215   : > { %v3293_v12 = vadd.f32 %v3213_v42, %v3103_v3  ;;  %v5549_v35 = vpack.c.b16 %v2735_v27, %v2734_v37  ;;  %v4423_v42 = vld [vmem:[#allocation2 + $0x94] sm:$0xf]  ;;  %v5756_v37 = vld [vmem:[#allocation11_spill] sm:$0xff] }
 0x216   : > { %v3215_v13 = vpop.f32.mrf.mxu0  ;;  %v2655_v51 = vrot.slane %v4423_v42, 5 }
 0x217   : > { %v3328_v15 = vadd.f32 %v5540_v57, %v3293_v12  ;;  %v5755_v12 = vld [vmem:[#allocation13_spill] sm:$0xff] }
 0x218   : > { %v2835_v38 = vpop.f32.mrf.mxu2  ;;  %v2389_v41 = vpop.f32.mrf.mxu1  ;;  %v2657_v6 = vrot.slane %v2655_v51, 4 }
 0x219   : > { %v2914_v21 = vadd.f32 %v2835_v38, %v2463_v52  ;;  %v3360_v54 = vmax.f32 %v3328_v15, 0.0  ;;  %v2656_v52 = vsel %vm5354_vm13, %v4017_v9, %v2655_v51  ;;  %v2465_v27 = vadd.f32 %v2389_v41, %v5756_v37  ;;  %v5757_v9 = vld [vmem:[#allocation12_spill] sm:$0xff] }
 0x21a   : > { %v3025_v43 = vpop.f32.mrf.mxu3  ;;  %v2659_v38 = vsel %vm5354_vm13, %v2657_v6, %v2658_v8 }
 0x21b   : > { %v3104_v5 = vadd.f32 %v3025_v43, %v2914_v21  ;;  %v3429_v14 = vmul.f32 %v3360_v54, %v3360_v54  ;;  %v2737_v42 = vunpack.c.l.b16 %v2659_v38 }
 0x21d   : > { %v3294_v2 = vadd.f32 %v3215_v13, %v3104_v5  ;;  %2877 = vmatmul.bf16.gmra.mxu2 %v5513_v25 }
 0x21e   : > { %v3218_v33 = vpop.f32.mrf.mxu0 }
 0x21f   : > { %v3329_v7 = vadd.f32 %v5540_v57, %v3294_v2  ;;  %3067 = vmatmul.bf16.gmra.mxu3 %v5529_v39 }
 0x220   : > { %v2838_v56 = vpop.f32.mrf.mxu2  ;;  %v2392_v1 = vpop.f32.mrf.mxu1 }
 0x221   : > { %v3361_v46 = vmax.f32 %v3329_v7, 0.0  ;;  %3257 = vmatmul.bf16.gmra.mxu0 %v5549_v35  ;;  %v2915_v25 = vadd.f32 %v2838_v56, %v2464_v29  ;;  %v2466_v6 = vadd.f32 %v2392_v1, %v5757_v9  ;;  %v5758_v1 = vld [vmem:[#allocation16_spill] sm:$0xff] }
 0x222   : > { %v3028_v59 = vpop.f32.mrf.mxu3 }
 0x223   : > { %v3392_v44 = vadd.f32 %v3361_v46, %v3360_v54  ;;  %v3430_v20 = vmul.f32 %v3361_v46, %v3361_v46  ;;  %v4264_v30 = vpack.c.bf16 %v3361_v46, %v3360_v54  ;;  %v3105_v3 = vadd.f32 %v3028_v59, %v2915_v25  ;;  %2431 = vmatmul.bf16.gmra.mxu1 %v5755_v12 }
 0x224   : > { %v2736_v54 = vunpack.c.l.b16 %v2656_v52 }
 0x225   : > { %v3461_v13 = vadd.f32 %v3430_v20, %v3429_v14  ;;  %4265 = vst [vmem:[%s5560_s7] sm:$0xff] %v4264_v30   ;;  %v3295_v40 = vadd.f32 %v3218_v33, %v3105_v3  ;;  %v4425_v14 = vld [vmem:[#allocation2 + $0xa0] sm:$0xf]  ;;  %v4018_v3 = vrot.slane %v2507_v50, 9 }
 0x226   : > { %v3220_v34 = vpop.f32.mrf.mxu0  ;;  %v5571_v51 = vpack.c.b16 %v2737_v42, %v2736_v54  ;;  %v2662_v59 = vrot.slane %v4425_v14, 5 }
 0x227   : > { %v3330_v21 = vadd.f32 %v5540_v57, %v3295_v40 }
 0x228   : > { %v2840_v15 = vpop.f32.mrf.mxu2  ;;  %v2394_v43 = vpop.f32.mrf.mxu1  ;;  %v2664_v12 = vrot.slane %v2662_v59, 4 }
 0x229   : > { %v3362_v5 = vmax.f32 %v3330_v21, 0.0  ;;  %v2916_v2 = vadd.f32 %v2840_v15, %v2465_v27 }
 0x22a   : > { %v3030_v7 = vpop.f32.mrf.mxu3 }
 0x22b   : > { %v3393_v29 = vadd.f32 %v3392_v44, %v3362_v5  ;;  %v3431_v33 = vmul.f32 %v3362_v5, %v3362_v5  ;;  %v3106_v32 = vadd.f32 %v3030_v7, %v2916_v2  ;;  %v2663_v2 = vsel %vm5354_vm13, %v4018_v3, %v2662_v59  ;;  %v5759_v7 = vld [vmem:[#allocation14_spill] sm:$0xff]  ;;  %v5760_v3 = vld [vmem:[#allocation15_spill] sm:$0xff] }
 0x22c   : > { %v2738_v14 = vunpack.c.l.b16 %v2663_v2 }
 0x22d   : > { %v3462_v56 = vadd.f32 %v3461_v13, %v3431_v33  ;;  %v3296_v46 = vadd.f32 %v3220_v34, %v3106_v32  ;;  %2882 = vmatmul.bf16.gmra.mxu2 %v5529_v39  ;;  %v4426_v13 = vld [vmem:[#allocation2 + $0xa4] sm:$0x1]  ;;  %v2467_v33 = vadd.f32 %v2394_v43, %v5759_v7 }
 0x22e   : > { %v3223_v25 = vpop.f32.mrf.mxu0  ;;  %v2665_v40 = vrot.slane %v4426_v13, 5  ;;  %v2508_v13 = vld [vmem:[#allocation2 + $0xa8] sm:$0xe] }
 0x22f   : > { %v3331_v41 = vadd.f32 %v5540_v57, %v3296_v46  ;;  %3072 = vmatmul.bf16.gmra.mxu3 %v5549_v35 }
 0x230   : > { %v2843_v8 = vpop.f32.mrf.mxu2  ;;  %v2397_v44 = vpop.f32.mrf.mxu1  ;;  %v2666_v54 = vsel %vm5354_vm13, %v2664_v12, %v2665_v40 }
 0x231   : > { %v3363_v20 = vmax.f32 %v3331_v41, 0.0  ;;  %3262 = vmatmul.bf16.gmra.mxu0 %v5571_v51  ;;  %v2917_v30 = vadd.f32 %v2843_v8, %v2466_v6  ;;  %v2739_v41 = vunpack.c.l.b16 %v2666_v54  ;;  %v2468_v12 = vadd.f32 %v2397_v44, %v5760_v3 }
 0x232   : > { %v3033_v39 = vpop.f32.mrf.mxu3 }
 0x233   : > { %v3394_v34 = vadd.f32 %v3393_v29, %v3363_v20  ;;  %v3432_v52 = vmul.f32 %v3363_v20, %v3363_v20  ;;  %v4269_v38 = vpack.c.bf16 %v3363_v20, %v3362_v5  ;;  %v3107_v21 = vadd.f32 %v3033_v39, %v2917_v30  ;;  %2436 = vmatmul.bf16.gmra.mxu1 %v5758_v1  ;;  %v4427_v30 = vld [vmem:[#allocation2 + $0xac] sm:$0xf] }
 0x234   : > { %v5586_v59 = vpack.c.b16 %v2739_v41, %v2738_v14  ;;  %v2669_v39 = vrot.slane %v4427_v30, 5  ;;  %v5761_v41 = vld [vmem:[#allocation17_spill] sm:$0xff] }
 0x235   : > { %v3463_v37 = vadd.f32 %v3462_v56, %v3432_v52  ;;  %4341 = vst [vmem:[%s5560_s7 + $0x8] sm:$0xff] %v4269_v38   ;;  %v3297_v27 = vadd.f32 %v3223_v25, %v3107_v21  ;;  %v4019_v21 = vrot.slane %v2508_v13, 9 }
 0x236   : > { %v3225_v15 = vpop.f32.mrf.mxu0  ;;  %v2671_v1 = vrot.slane %v2669_v39, 4 }
 0x237   : > { %v3332_v42 = vadd.f32 %v5540_v57, %v3297_v27 }
 0x238   : > { %v2845_v29 = vpop.f32.mrf.mxu2  ;;  %v2399_v32 = vpop.f32.mrf.mxu1 }
 0x239   : > { %v3364_v5 = vmax.f32 %v3332_v42, 0.0  ;;  %v2918_v46 = vadd.f32 %v2845_v29, %v2467_v33  ;;  %v2670_v29 = vsel %vm5354_vm13, %v4019_v21, %v2669_v39  ;;  %v2509_v21 = vld [vmem:[#allocation2 + $0xb4] sm:$0xe] }
 0x23a   : > { %v3035_v56 = vpop.f32.mrf.mxu3 }
 0x23b   : > { %v3395_v9 = vadd.f32 %v3394_v34, %v3364_v5  ;;  %v3433_v25 = vmul.f32 %v3364_v5, %v3364_v5  ;;  %v3108_v6 = vadd.f32 %v3035_v56, %v2918_v46  ;;  %v2469_v56 = vadd.f32 %v2399_v32, %v5761_v41 }
 0x23d   : > { %v3464_v50 = vadd.f32 %v3463_v37, %v3433_v25  ;;  %v3298_v8 = vadd.f32 %v3225_v15, %v3108_v6  ;;  %2887 = vmatmul.bf16.gmra.mxu2 %v5549_v35  ;;  %v4428_v37 = vld [vmem:[#allocation2 + $0xb0] sm:$0x1] }
 0x23e   : > { %v3228_v20 = vpop.f32.mrf.mxu0  ;;  %v2672_v27 = vrot.slane %v4428_v37, 5 }
 0x23f   : > { %v3333_v43 = vadd.f32 %v5540_v57, %v3298_v8  ;;  %3077 = vmatmul.bf16.gmra.mxu3 %v5571_v51  ;;  %v2740_v8 = vunpack.c.l.b16 %v2670_v29 }
 0x240   : > { %v2848_v40 = vpop.f32.mrf.mxu2  ;;  %v2402_v34 = vpop.f32.mrf.mxu1  ;;  %v2673_v46 = vsel %vm5354_vm13, %v2671_v1, %v2672_v27 }
 0x241   : > { %v3365_v52 = vmax.f32 %v3333_v43, 0.0  ;;  %3267 = vmatmul.bf16.gmra.mxu0 %v5586_v59  ;;  %v2919_v38 = vadd.f32 %v2848_v40, %v2468_v12  ;;  %v4429_v40 = vld [vmem:[#allocation2 + $0xb8] sm:$0xf] }
 0x242   : > { %v3038_v35 = vpop.f32.mrf.mxu3 }
 0x243   : > { %v3396_v15 = vadd.f32 %v3395_v9, %v3365_v52  ;;  %v3434_v2 = vmul.f32 %v3365_v52, %v3365_v52  ;;  %v4274_v54 = vpack.c.bf16 %v3365_v52, %v3364_v5  ;;  %v3109_v42 = vadd.f32 %v3038_v35, %v2919_v38  ;;  %2441 = vmatmul.bf16.gmra.mxu1 %v5332_v17  ;;  %v5762_v38 = vld [vmem:[#allocation18_spill] sm:$0xff] }
 0x244   : > { %v2741_v17 = vunpack.c.l.b16 %v2673_v46  ;;  %v2676_v52 = vrot.slane %v4429_v40, 5  ;;  %v2470_v35 = vadd.f32 %v2402_v34, %v5762_v38  ;;  %v1426_v34 = vld [vmem:[#allocation2 + $0xcc] sm:$0xf] }
 0x245   : > { %v3465_v44 = vadd.f32 %v3464_v50, %v3434_v2  ;;  %4342 = vst [vmem:[%s5560_s7 + $0x10] sm:$0xff] %v4274_v54   ;;  %v3299_v7 = vadd.f32 %v3228_v20, %v3109_v42  ;;  %v4020_v2 = vrot.slane %v2509_v21, 9  ;;  %v4430_v42 = vld [vmem:[#allocation2 + $0xbc] sm:$0x1] }
 0x246   : > { %v3230_v33 = vpop.f32.mrf.mxu0  ;;  %v5601_v39 = vpack.c.b16 %v2741_v17, %v2740_v8  ;;  %v2678_v54 = vrot.slane %v2676_v52, 4  ;;  %v1841_v17 = vshrl.u32 %v1426_v34, 16 }
 0x247   : > { %v3334_v14 = vadd.f32 %v5540_v57, %v3299_v7 }
 0x248   : > { %v2850_v9 = vpop.f32.mrf.mxu2  ;;  %v2404_v25 = vpop.f32.mrf.mxu1 }
 0x249   : > { %v3366_v5 = vmax.f32 %v3334_v14, 0.0  ;;  %v2920_v6 = vadd.f32 %v2850_v9, %v2469_v56  ;;  %v5609_v56 = vld [vmem:[#allocation2 + $0xd0] sm:$0xf] }
 0x24a   : > { %v3040_v50 = vpop.f32.mrf.mxu3 }
 0x24b   : > { %v3397_v30 = vadd.f32 %v3396_v15, %v3366_v5  ;;  %v3435_v20 = vmul.f32 %v3366_v5, %v3366_v5  ;;  %v3110_v43 = vadd.f32 %v3040_v50, %v2920_v6  ;;  %v2677_v6 = vsel %vm5354_vm13, %v4020_v2, %v2676_v52 }
 0x24c   : > { %v1844_v50 = vshll.u32 %v1426_v34, 16 }
 0x24d   : > { %v3466_v3 = vadd.f32 %v3465_v44, %v3435_v20  ;;  %v3300_v12 = vadd.f32 %v3230_v33, %v3110_v43  ;;  %2892 = vmatmul.bf16.gmra.mxu2 %v5571_v51  ;;  %v2679_v44 = vrot.slane %v4430_v42, 5 }
 0x24e   : > { %v3233_v13 = vpop.f32.mrf.mxu0  ;;  %v1846_v21 = vrot.slane %v1844_v50, 5 }
 0x24f   : > { %v3335_v32 = vadd.f32 %v5540_v57, %v3300_v12  ;;  %3082 = vmatmul.bf16.gmra.mxu3 %v5586_v59  ;;  %v2680_v8 = vsel %vm5354_vm13, %v2678_v54, %v2679_v44  ;;  %v1854_v12 = vshrl.u32 %v5609_v56, 16  ;;  %v5622_v44 = vld [vmem:[#allocation2 + $0xd4] sm:$0x1] }
 0x250   : > { %v2853_v1 = vpop.f32.mrf.mxu2  ;;  %v2407_v37 = vpop.f32.mrf.mxu1  ;;  %v2743_v38 = vunpack.c.l.b16 %v2680_v8  ;;  %v2510_v8 = vld [vmem:[#allocation2 + $0xc0] sm:$0xe] }
 0x251   : > { %v3367_v27 = vmax.f32 %v3335_v32, 0.0  ;;  %3272 = vmatmul.bf16.gmra.mxu0 %v5601_v39  ;;  %v2921_v15 = vadd.f32 %v2853_v1, %v2470_v35  ;;  %v2742_v32 = vunpack.c.l.b16 %v2677_v6  ;;  %v1843_v35 = vrot.slane %v1841_v17, 4  ;;  %v5764_v6 = vld [vmem:[#allocation20_spill] sm:$0xff] }
 0x252   : > { %v3043_v51 = vpop.f32.mrf.mxu3  ;;  %v1856_v2 = vrot.slane %v1854_v12, 4 }
 0x253   : > { %v3398_v7 = vadd.f32 %v3397_v30, %v3367_v27  ;;  %v3436_v33 = vmul.f32 %v3367_v27, %v3367_v27  ;;  %v4279_v29 = vpack.c.bf16 %v3367_v27, %v3366_v5  ;;  %v3111_v46 = vadd.f32 %v3043_v51, %v2921_v15  ;;  %2446 = vmatmul.bf16.gmra.mxu1 %v5366_v16  ;;  %v5763_v30 = vld [vmem:[#allocation19_spill] sm:$0xff] }
 0x254   : > { %v2471_v20 = vadd.f32 %v2404_v25, %v5763_v30  ;;  %v5620_v42 = vpack.c.b16 %v2743_v38, %v2742_v32  ;;  %v1847_v34 = vor.u32 %v1846_v21, %v1843_v35 }
 0x255   : > { %v3467_v14 = vadd.f32 %v3466_v3, %v3436_v33  ;;  %4343 = vst [vmem:[%s5560_s7 + $0x18] sm:$0xff] %v4279_v29   ;;  %v3301_v41 = vadd.f32 %v3233_v13, %v3111_v46  ;;  %v1850_v3 = vshll.u32 %v5609_v56, 16  ;;  %v4431_v29 = vld [vmem:[#allocation2 + $0xc4] sm:$0xf] }
 0x256   : > { %v3235_v9 = vpop.f32.mrf.mxu0  ;;  %v2683_v46 = vrot.slane %v4431_v29, 5 }
 0x257   : > { %v3336_v5 = vadd.f32 %v5540_v57, %v3301_v41  ;;  %v1852_v51 = vrot.slane %v1850_v3, 5  ;;  %v4432_v3 = vld [vmem:[#allocation2 + $0xc8] sm:$0x1] }
 0x258   : > { %v2855_v16 = vpop.f32.mrf.mxu2  ;;  %v2409_v43 = vpop.f32.mrf.mxu1  ;;  %v2686_v12 = vrot.slane %v4432_v3, 5 }
 0x259   : > { %v3368_v13 = vmax.f32 %v3336_v5, 0.0  ;;  %v2922_v40 = vadd.f32 %v2855_v16, %v2471_v20  ;;  %v4021_v20 = vrot.slane %v2510_v8, 9  ;;  %v2685_v16 = vrot.slane %v2683_v46, 4 }
 0x25a   : > { %v3045_v52 = vpop.f32.mrf.mxu3 }
 0x25b   : > { %v3399_v1 = vadd.f32 %v3398_v7, %v3368_v13  ;;  %v3437_v27 = vmul.f32 %v3368_v13, %v3368_v13  ;;  %v3112_v15 = vadd.f32 %v3045_v52, %v2922_v40  ;;  %v2472_v7 = vadd.f32 %v2407_v37, %v5764_v6 }
 0x25c   : > { %v1848_v40 = vrot.slane %v1847_v34, 4  ;;  %v2687_v29 = vsel %vm5354_vm13, %v2685_v16, %v2686_v12  ;;  %v2511_v12 = vld [vmem:[#allocation2 + $0xcc] sm:$0xe] }
 0x25d   : > { %v3468_v54 = vadd.f32 %v3467_v14, %v3437_v27  ;;  %v3302_v25 = vadd.f32 %v3235_v9, %v3112_v15  ;;  %2897 = vmatmul.bf16.gmra.mxu2 %v5586_v59  ;;  %v1857_v9 = vor.u32 %v1856_v2, %v1852_v51  ;;  %v1860_v59 = vshll.u32 %v5622_v44, 16 }
 0x25e   : > { %v3238_v33 = vpop.f32.mrf.mxu0  ;;  %v2963_v8 = vunpack.c.l.b16 %v2687_v29 }
 0x25f   : > { %v3337_v41 = vadd.f32 %v5540_v57, %v3302_v25  ;;  %3087 = vmatmul.bf16.gmra.mxu3 %v5601_v39  ;;  %v1858_v35 = vrot.slane %v1857_v9, 4  ;;  %v1862_v21 = vrot.slane %v1860_v59, 5  ;;  %v2684_v25 = vsel %vm5354_vm13, %v4021_v20, %v2683_v46 }
 0x260   : > { %v2858_v17 = vpop.f32.mrf.mxu2  ;;  %v2412_v14 = vpop.f32.mrf.mxu1  ;;  %v2690_v20 = vrot.slane %v5609_v56, 5 }
 0x261   : > { %v3369_v50 = vmax.f32 %v3337_v41, 0.0  ;;  %3277 = vmatmul.bf16.gmra.mxu0 %v5620_v42  ;;  %v2923_v5 = vadd.f32 %v2858_v17, %v2472_v7  ;;  %v2962_v7 = vunpack.c.l.b16 %v2684_v25  ;;  %v2474_v16 = vadd.f32 %v2412_v14, %v5385_v45 }
 0x262   : > { %v3048_v30 = vpop.f32.mrf.mxu3 }
 0x263   : > { %v3400_v37 = vadd.f32 %v3399_v1, %v3369_v50  ;;  %v3438_v32 = vmul.f32 %v3369_v50, %v3369_v50  ;;  %v4284_v38 = vpack.c.bf16 %v3369_v50, %v3368_v13  ;;  %v3113_v52 = vadd.f32 %v3048_v30, %v2923_v5  ;;  %2451 = vmatmul.bf16.gmra.mxu1 %v5392_v53 }
 0x264   : > { %v2473_v1 = vadd.f32 %v2409_v43, %v5370_v47  ;;  %v1853_v13 = vsel %vm4976_vm10, %v1848_v40, %v1852_v51  ;;  %v2964_v43 = vpack.c.b16 %v2963_v8, %v2962_v7 }
 0x265   : > { %v3469_v27 = vadd.f32 %v3468_v54, %v3438_v32  ;;  %4344 = vst [vmem:[%s5560_s7 + $0x20] sm:$0xff] %v4284_v38   ;;  %v3303_v15 = vadd.f32 %v3238_v33, %v3113_v52  ;;  %v1863_v54 = vsel %vm4976_vm10, %v1858_v35, %v1862_v21  ;;  %v2321_v17 = vunpack.c.l.b16 %v1853_v13 }
 0x266   : > { %v3240_v2 = vpop.f32.mrf.mxu0  ;;  %v2322_v5 = vunpack.c.l.b16 %v1863_v54  ;;  %v2692_v35 = vrot.slane %v2690_v20, 4  ;;  %v2693_v21 = vrot.slane %v5622_v44, 5 }
 0x267   : > { %v3338_v34 = vadd.f32 %v5540_v57, %v3303_v15 }
 0x268   : > { %v2860_v53 = vpop.f32.mrf.mxu2  ;;  %v2414_v41 = vpop.f32.mrf.mxu1  ;;  %v2323_v3 = vpack.c.b16 %v2322_v5, %v2321_v17 }
 0x269   : > { %v3370_v33 = vmax.f32 %v3338_v34, 0.0  ;;  %v2924_v6 = vadd.f32 %v2860_v53, %v2473_v1  ;;  %v2694_v34 = vsel %vm5354_vm13, %v2692_v35, %v2693_v21  ;;  %v2475_v13 = vadd.f32 %v2414_v41, %v5394_v22 }
 0x26a   : > { %v3050_v46 = vpop.f32.mrf.mxu3  ;;  %v3153_v7 = vunpack.c.l.b16 %v2694_v34 }
 0x26b   : > { %v3401_v9 = vadd.f32 %v3400_v37, %v3370_v33  ;;  %v3439_v59 = vmul.f32 %v3370_v33, %v3370_v33  ;;  %v3114_v50 = vadd.f32 %v3050_v46, %v2924_v6 }
 0x26d   : > { %v3470_v30 = vadd.f32 %v3469_v27, %v3439_v59  ;;  %v3304_v47 = vadd.f32 %v3240_v2, %v3114_v50  ;;  %2902 = vmatmul.bf16.gmra.mxu2 %v5601_v39  ;;  %v4022_v39 = vrot.slane %v2511_v12, 9 }
 0x26e   : > { %v3243_v51 = vpop.f32.mrf.mxu0 }
 0x26f   : > { %v3339_v18 = vadd.f32 %v5540_v57, %v3304_v47  ;;  %3092 = vmatmul.bf16.gmra.mxu3 %v5620_v42  ;;  %v2691_v29 = vsel %vm5354_vm13, %v4022_v39, %v2690_v20 }
 0x270   : > { %v2863_v40 = vpop.f32.mrf.mxu2  ;;  %v2417_v37 = vpop.f32.mrf.mxu1  ;;  %v3152_v6 = vunpack.c.l.b16 %v2691_v29 }
 0x271   : > { %v3371_v32 = vmax.f32 %v3339_v18, 0.0  ;;  %3282 = vmatmul.bf16.gmra.mxu0 %v2964_v43  ;;  %v2925_v38 = vadd.f32 %v2863_v40, %v2474_v16  ;;  %v2476_v22 = vadd.f32 %v2417_v37, %v5400_v63 }
 0x272   : > { %v3053_v52 = vpop.f32.mrf.mxu3  ;;  %v3154_v11 = vpack.c.b16 %v3153_v7, %v3152_v6 }
 0x273   : > { %v3402_v56 = vadd.f32 %v3401_v9, %v3371_v32  ;;  %v3440_v27 = vmul.f32 %v3371_v32, %v3371_v32  ;;  %v4289_v15 = vpack.c.bf16 %v3371_v32, %v3370_v33  ;;  %v3115_v2 = vadd.f32 %v3053_v52, %v2925_v38  ;;  %2456 = vmatmul.bf16.gmra.mxu1 %v2323_v3 }
 0x275   : > { %v3471_v45 = vadd.f32 %v3470_v30, %v3440_v27  ;;  %4345 = vst [vmem:[%s5560_s7 + $0x28] sm:$0xff] %v4289_v15   ;;  %v3305_v14 = vadd.f32 %v3243_v51, %v3115_v2 }
 0x276   : > { %v3245_v25 = vpop.f32.mrf.mxu0 }
 0x277   : > { %v3340_v1 = vadd.f32 %v5540_v57, %v3305_v14 }
 0x278   : > { %v2865_v44 = vpop.f32.mrf.mxu2  ;;  %v2419_v53 = vpop.f32.mrf.mxu1 }
 0x279   : > { %v3372_v54 = vmax.f32 %v3340_v1, 0.0  ;;  %v2926_v33 = vadd.f32 %v2865_v44, %v2475_v13  ;;  %v2477_v39 = vadd.f32 %v2419_v53, %v5403_v58 }
 0x27a   : > { %v3055_v8 = vpop.f32.mrf.mxu3 }
 0x27b   : > { %v3403_v46 = vadd.f32 %v3402_v56, %v3372_v54  ;;  %v3441_v17 = vmul.f32 %v3372_v54, %v3372_v54  ;;  %v3116_v9 = vadd.f32 %v3055_v8, %v2926_v33 }
 0x27d   : > { %v3472_v59 = vadd.f32 %v3471_v45, %v3441_v17  ;;  %v3306_v50 = vadd.f32 %v3245_v25, %v3116_v9  ;;  %2907 = vmatmul.bf16.gmra.mxu2 %v5620_v42 }
 0x27e   : > { %v3248_v5 = vpop.f32.mrf.mxu0 }
 0x27f   : > { %v3341_v30 = vadd.f32 %v5540_v57, %v3306_v50  ;;  %3097 = vmatmul.bf16.gmra.mxu3 %v2964_v43 }
 0x280   : > { %v2868_v41 = vpop.f32.mrf.mxu2  ;;  %v2422_v47 = vpop.f32.mrf.mxu1 }
 0x281   : > { %v3373_v51 = vmax.f32 %v3341_v30, 0.0  ;;  %3287 = vmatmul.bf16.gmra.mxu0 %v3154_v11  ;;  %v2927_v20 = vadd.f32 %v2868_v41, %v2476_v22  ;;  %v2478_v29 = vadd.f32 %v2422_v47, %v5409_v24 }
 0x282   : > { %v3058_v18 = vpop.f32.mrf.mxu3 }
 0x283   : > { %v3404_v16 = vadd.f32 %v3403_v46, %v3373_v51  ;;  %v3442_v3 = vmul.f32 %v3373_v51, %v3373_v51  ;;  %v4294_v12 = vpack.c.bf16 %v3373_v51, %v3372_v54  ;;  %v3117_v40 = vadd.f32 %v3058_v18, %v2927_v20 }
 0x285   : > { %v3473_v32 = vadd.f32 %v3472_v59, %v3442_v3  ;;  %4346 = vst [vmem:[%s5560_s7 + $0x30] sm:$0xff] %v4294_v12   ;;  %v3307_v42 = vadd.f32 %v3248_v5, %v3117_v40 }
 0x286   : > { %v3250_v38 = vpop.f32.mrf.mxu0 }
 0x287   : > { %v3342_v52 = vadd.f32 %v5540_v57, %v3307_v42 }
 0x288   : > { %v2870_v63 = vpop.f32.mrf.mxu2  ;;  %v2424_v43 = vpop.f32.mrf.mxu1 }
 0x289   : > { %v3374_v37 = vmax.f32 %v3342_v52, 0.0  ;;  %v2928_v35 = vadd.f32 %v2870_v63, %v2477_v39  ;;  %v2479_v9 = vadd.f32 %v2424_v43, %v5419_v55 }
 0x28a   : > { %v3060_v21 = vpop.f32.mrf.mxu3 }
 0x28b   : > { %v3405_v56 = vadd.f32 %v3404_v16, %v3374_v37  ;;  %v3443_v27 = vmul.f32 %v3374_v37, %v3374_v37  ;;  %v3118_v15 = vadd.f32 %v3060_v21, %v2928_v35 }
 0x28d   : > { %v3474_v2 = vadd.f32 %v3473_v32, %v3443_v27  ;;  %v3308_v45 = vadd.f32 %v3250_v38, %v3118_v15 }
 0x28e   : > { %v3253_v14 = vpop.f32.mrf.mxu0 }
 0x28f   : > { %v3343_v25 = vadd.f32 %v5540_v57, %v3308_v45 }
 0x290   : > { %v2873_v34 = vpop.f32.mrf.mxu2  ;;  %v2427_v1 = vpop.f32.mrf.mxu1 }
 0x291   : > { %v3375_v13 = vmax.f32 %v3343_v25, 0.0  ;;  %v2929_v58 = vadd.f32 %v2873_v34, %v2478_v29  ;;  %v2480_v16 = vadd.f32 %v2427_v1, %v5425_v28 }
 0x292   : > { %v3063_v44 = vpop.f32.mrf.mxu3 }
 0x293   : > { %v3406_v53 = vadd.f32 %v3405_v56, %v3375_v13  ;;  %v3444_v54 = vmul.f32 %v3375_v13, %v3375_v13  ;;  %v4299_v33 = vpack.c.bf16 %v3375_v13, %v3374_v37  ;;  %v3119_v6 = vadd.f32 %v3063_v44, %v2929_v58 }
 0x295   : > { %v3475_v7 = vadd.f32 %v3474_v2, %v3444_v54  ;;  %4347 = vst [vmem:[%s5560_s7 + $0x38] sm:$0xff] %v4299_v33   ;;  %v3309_v8 = vadd.f32 %v3253_v14, %v3119_v6 }
 0x296   : > { %v3255_v46 = vpop.f32.mrf.mxu0 }
 0x297   : > { %v3344_v17 = vadd.f32 %v5540_v57, %v3309_v8 }
 0x298   : > { %v2875_v59 = vpop.f32.mrf.mxu2  ;;  %v2429_v50 = vpop.f32.mrf.mxu1 }
 0x299   : > { %v3376_v24 = vmax.f32 %v3344_v17, 0.0  ;;  %v2930_v11 = vadd.f32 %v2875_v59, %v2479_v9  ;;  %v2481_v21 = vadd.f32 %v2429_v50, %v5435_v10 }
 0x29a   : > { %v3065_v5 = vpop.f32.mrf.mxu3 }
 0x29b   : > { %v3407_v30 = vadd.f32 %v3406_v53, %v3376_v24  ;;  %v3445_v22 = vmul.f32 %v3376_v24, %v3376_v24  ;;  %v3120_v41 = vadd.f32 %v3065_v5, %v2930_v11 }
 0x29d   : > { %v3476_v47 = vadd.f32 %v3475_v7, %v3445_v22  ;;  %v3310_v51 = vadd.f32 %v3255_v46, %v3120_v41 }
 0x29e   : > { %v3258_v20 = vpop.f32.mrf.mxu0 }
 0x29f   : > { %v3345_v18 = vadd.f32 %v5540_v57, %v3310_v51 }
 0x2a0   : > { %v2878_v3 = vpop.f32.mrf.mxu2  ;;  %v2432_v12 = vpop.f32.mrf.mxu1 }
 0x2a1   : > { %v3377_v40 = vmax.f32 %v3345_v18, 0.0  ;;  %v2931_v55 = vadd.f32 %v2878_v3, %v2480_v16  ;;  %v2482_v58 = vadd.f32 %v2432_v12, %v5441_v62 }
 0x2a2   : > { %v3068_v32 = vpop.f32.mrf.mxu3 }
 0x2a3   : > { %v3408_v42 = vadd.f32 %v3407_v30, %v3377_v40  ;;  %v3446_v38 = vmul.f32 %v3377_v40, %v3377_v40  ;;  %v4304_v52 = vpack.c.bf16 %v3377_v40, %v3376_v24  ;;  %v3121_v39 = vadd.f32 %v3068_v32, %v2931_v55 }
 0x2a5   : > { %v3477_v63 = vadd.f32 %v3476_v47, %v3446_v38  ;;  %4348 = vst [vmem:[%s5560_s7 + $0x40] sm:$0xff] %v4304_v52   ;;  %v3311_v43 = vadd.f32 %v3258_v20, %v3121_v39 }
 0x2a6   : > { %v3260_v37 = vpop.f32.mrf.mxu0 }
 0x2a7   : > { %v3346_v35 = vadd.f32 %v5540_v57, %v3311_v43 }
 0x2a8   : > { %v2880_v56 = vpop.f32.mrf.mxu2  ;;  %v2434_v27 = vpop.f32.mrf.mxu1 }
 0x2a9   : > { %v3378_v28 = vmax.f32 %v3346_v35, 0.0  ;;  %v2932_v15 = vadd.f32 %v2880_v56, %v2481_v21  ;;  %v2483_v24 = vadd.f32 %v2434_v27, %v5451_v61 }
 0x2aa   : > { %v3070_v2 = vpop.f32.mrf.mxu3 }
 0x2ab   : > { %v3409_v45 = vadd.f32 %v3408_v42, %v3378_v28  ;;  %v3447_v14 = vmul.f32 %v3378_v28, %v3378_v28  ;;  %v3122_v25 = vadd.f32 %v3070_v2, %v2932_v15 }
 0x2ad   : > { %v3478_v29 = vadd.f32 %v3477_v63, %v3447_v14  ;;  %v3312_v34 = vadd.f32 %v3260_v37, %v3122_v25 }
 0x2ae   : > { %v3263_v1 = vpop.f32.mrf.mxu0 }
 0x2af   : > { %v3347_v13 = vadd.f32 %v5540_v57, %v3312_v34 }
 0x2b0   : > { %v2883_v44 = vpop.f32.mrf.mxu2  ;;  %v2437_v53 = vpop.f32.mrf.mxu1 }
 0x2b1   : > { %v3379_v54 = vmax.f32 %v3347_v13, 0.0  ;;  %v2933_v10 = vadd.f32 %v2883_v44, %v2482_v58  ;;  %v2484_v12 = vadd.f32 %v2437_v53, %v5457_v60 }
 0x2b2   : > { %v3073_v33 = vpop.f32.mrf.mxu3 }
 0x2b3   : > { %v3410_v6 = vadd.f32 %v3409_v45, %v3379_v54  ;;  %v3448_v7 = vmul.f32 %v3379_v54, %v3379_v54  ;;  %v4309_v8 = vpack.c.bf16 %v3379_v54, %v3378_v28  ;;  %v3123_v46 = vadd.f32 %v3073_v33, %v2933_v10 }
 0x2b5   : > { %v3479_v17 = vadd.f32 %v3478_v29, %v3448_v7  ;;  %4349 = vst [vmem:[%s5560_s7 + $0x48] sm:$0xff] %v4309_v8   ;;  %v3313_v9 = vadd.f32 %v3263_v1, %v3123_v46 }
 0x2b6   : > { %v3265_v59 = vpop.f32.mrf.mxu0 }
 0x2b7   : > { %v3348_v50 = vadd.f32 %v5540_v57, %v3313_v9 }
 0x2b8   : > { %v2885_v11 = vpop.f32.mrf.mxu2  ;;  %v2439_v5 = vpop.f32.mrf.mxu1 }
 0x2b9   : > { %v3380_v62 = vmax.f32 %v3348_v50, 0.0  ;;  %v2934_v30 = vadd.f32 %v2885_v11, %v2483_v24  ;;  %v2485_v56 = vadd.f32 %v2439_v5, %v5467_v31 }
 0x2ba   : > { %v3075_v22 = vpop.f32.mrf.mxu3 }
 0x2bb   : > { %v3411_v41 = vadd.f32 %v3410_v6, %v3380_v62  ;;  %v3449_v47 = vmul.f32 %v3380_v62, %v3380_v62  ;;  %v3124_v51 = vadd.f32 %v3075_v22, %v2934_v30 }
 0x2bd   : > { %v3480_v20 = vadd.f32 %v3479_v17, %v3449_v47  ;;  %v3314_v18 = vadd.f32 %v3265_v59, %v3124_v51 }
 0x2be   : > { %v3268_v16 = vpop.f32.mrf.mxu0 }
 0x2bf   : > { %v3349_v3 = vadd.f32 %v5540_v57, %v3314_v18 }
 0x2c0   : > { %v2888_v40 = vpop.f32.mrf.mxu2  ;;  %v2442_v55 = vpop.f32.mrf.mxu1 }
 0x2c1   : > { %v3381_v32 = vmax.f32 %v3349_v3, 0.0  ;;  %v2935_v61 = vadd.f32 %v2888_v40, %v2484_v12  ;;  %v2486_v58 = vadd.f32 %v2442_v55, %v5473_v48 }
 0x2c2   : > { %v3078_v42 = vpop.f32.mrf.mxu3 }
 0x2c3   : > { %v3412_v38 = vadd.f32 %v3411_v41, %v3381_v32  ;;  %v3450_v52 = vmul.f32 %v3381_v32, %v3381_v32  ;;  %v4314_v39 = vpack.c.bf16 %v3381_v32, %v3380_v62  ;;  %v3125_v63 = vadd.f32 %v3078_v42, %v2935_v61 }
 0x2c5   : > { %v3481_v43 = vadd.f32 %v3480_v20, %v3450_v52  ;;  %4350 = vst [vmem:[%s5560_s7 + $0x50] sm:$0xff] %v4314_v39   ;;  %v3315_v37 = vadd.f32 %v3268_v16, %v3125_v63 }
 0x2c6   : > { %v3270_v35 = vpop.f32.mrf.mxu0 }
 0x2c7   : > { %v3350_v21 = vadd.f32 %v5540_v57, %v3315_v37 }
 0x2c8   : > { %v2890_v27 = vpop.f32.mrf.mxu2  ;;  %v2444_v28 = vpop.f32.mrf.mxu1 }
 0x2c9   : > { %v3382_v60 = vmax.f32 %v3350_v21, 0.0  ;;  %v2936_v15 = vadd.f32 %v2890_v27, %v2485_v56  ;;  %v2487_v50 = vadd.f32 %v2444_v28, %v5483_v4 }
 0x2ca   : > { %v3080_v2 = vpop.f32.mrf.mxu3 }
 0x2cb   : > { %v3413_v45 = vadd.f32 %v3412_v38, %v3382_v60  ;;  %v3451_v14 = vmul.f32 %v3382_v60, %v3382_v60  ;;  %v3126_v25 = vadd.f32 %v3080_v2, %v2936_v15 }
 0x2cd   : > { %v3482_v29 = vadd.f32 %v3481_v43, %v3451_v14  ;;  %v3316_v34 = vadd.f32 %v3270_v35, %v3126_v25 }
 0x2ce   : > { %v3273_v1 = vpop.f32.mrf.mxu0 }
 0x2cf   : > { %v3351_v13 = vadd.f32 %v5540_v57, %v3316_v34 }
 0x2d0   : > { %v2893_v44 = vpop.f32.mrf.mxu2  ;;  %v2447_v10 = vpop.f32.mrf.mxu1 }
 0x2d1   : > { %v3383_v53 = vmax.f32 %v3351_v13, 0.0  ;;  %v2937_v54 = vadd.f32 %v2893_v44, %v2486_v58  ;;  %v2488_v16 = vadd.f32 %v2447_v10, %v5489_v26 }
 0x2d2   : > { %v3083_v31 = vpop.f32.mrf.mxu3 }
 0x2d3   : > { %v3414_v33 = vadd.f32 %v3413_v45, %v3383_v53  ;;  %v3452_v6 = vmul.f32 %v3383_v53, %v3383_v53  ;;  %v4319_v7 = vpack.c.bf16 %v3383_v53, %v3382_v60  ;;  %v3127_v8 = vadd.f32 %v3083_v31, %v2937_v54 }
 0x2d5   : > { %v3483_v46 = vadd.f32 %v3482_v29, %v3452_v6  ;;  %4351 = vst [vmem:[%s5560_s7 + $0x58] sm:$0xff] %v4319_v7   ;;  %v3317_v17 = vadd.f32 %v3273_v1, %v3127_v8 }
 0x2d6   : > { %v3275_v9 = vpop.f32.mrf.mxu0 }
 0x2d7   : > { %v3352_v59 = vadd.f32 %v5540_v57, %v3317_v17 }
 0x2d8   : > { %v2895_v24 = vpop.f32.mrf.mxu2  ;;  %v2449_v41 = vpop.f32.mrf.mxu1 }
 0x2d9   : > { %v3384_v11 = vmax.f32 %v3352_v59, 0.0  ;;  %v2938_v48 = vadd.f32 %v2895_v24, %v2487_v50  ;;  %v2489_v37 = vadd.f32 %v2449_v41, %v5499_v49 }
 0x2da   : > { %v3085_v5 = vpop.f32.mrf.mxu3 }
 0x2db   : > { %v3415_v62 = vadd.f32 %v3414_v33, %v3384_v11  ;;  %v3453_v30 = vmul.f32 %v3384_v11, %v3384_v11  ;;  %v3128_v22 = vadd.f32 %v3085_v5, %v2938_v48  ;;  %v4433_v5 = vld [vmem:[%s5712_s2] ss:$0 sm:$0xff] }
 0x2dd   : > { %v3484_v47 = vadd.f32 %v3483_v46, %v3453_v30  ;;  %v3318_v51 = vadd.f32 %v3275_v9, %v3128_v22 }
 0x2de   : > { %v3278_v20 = vpop.f32.mrf.mxu0 }
 0x2df   : > { %v3353_v18 = vadd.f32 %v5540_v57, %v3318_v51 }
 0x2e0   : > { %v2898_v3 = vpop.f32.mrf.mxu2  ;;  %v2452_v63 = vpop.f32.mrf.mxu1 }
 0x2e1   : > { %v3385_v12 = vmax.f32 %v3353_v18, 0.0  ;;  %v2939_v40 = vadd.f32 %v2898_v3, %v2488_v16  ;;  %v2490_v25 = vadd.f32 %v2452_v63, %v5505_v23 }
 0x2e2   : > { %v3088_v4 = vpop.f32.mrf.mxu3 }
 0x2e3   : > { %v3416_v55 = vadd.f32 %v3415_v62, %v3385_v12  ;;  %v3454_v32 = vmul.f32 %v3385_v12, %v3385_v12  ;;  %v4324_v61 = vpack.c.bf16 %v3385_v12, %v3384_v11  ;;  %v3129_v42 = vadd.f32 %v3088_v4, %v2939_v40 }
 0x2e5   : > { %v3485_v38 = vadd.f32 %v3484_v47, %v3454_v32  ;;  %4352 = vst [vmem:[%s5560_s7 + $0x60] sm:$0xff] %v4324_v61   ;;  %v3319_v52 = vadd.f32 %v3278_v20, %v3129_v42 }
 0x2e6   : > { %v3280_v39 = vpop.f32.mrf.mxu0 }
 0x2e7   : > { %v3354_v43 = vadd.f32 %v5540_v57, %v3319_v52 }
 0x2e8   : > { %v2900_v35 = vpop.f32.mrf.mxu2  ;;  %v2454_v34 = vpop.f32.mrf.mxu1 }
 0x2e9   : > { %v3386_v21 = vmax.f32 %v3354_v43, 0.0  ;;  %v2940_v26 = vadd.f32 %v2900_v35, %v2489_v37  ;;  %v2491_v6 = vadd.f32 %v2454_v34, %v5515_v19 }
 0x2ea   : > { %v3090_v56 = vpop.f32.mrf.mxu3 }
 0x2eb   : > { %v3417_v27 = vadd.f32 %v3416_v55, %v3386_v21  ;;  %v3455_v28 = vmul.f32 %v3386_v21, %v3386_v21  ;;  %v3130_v60 = vadd.f32 %v3090_v56, %v2940_v26 }
 0x2ed   : > { %v3486_v15 = vadd.f32 %v3485_v38, %v3455_v28  ;;  %v3320_v2 = vadd.f32 %v3280_v39, %v3130_v60 }
 0x2ee   : > { %v3283_v45 = vpop.f32.mrf.mxu0 }
 0x2ef   : > { %v3355_v14 = vadd.f32 %v5540_v57, %v3320_v2 }
 0x2f0   : > { %v2903_v29 = vpop.f32.mrf.mxu2  ;;  %v2457_v9 = vpop.f32.mrf.mxu1 }
 0x2f1   : > { %v3387_v1 = vmax.f32 %v3355_v14, 0.0  ;;  %v2941_v13 = vadd.f32 %v2903_v29, %v2490_v25 }
 0x2f2   : > { %v3093_v49 = vpop.f32.mrf.mxu3 }
 0x2f3   : > { %v3418_v58 = vadd.f32 %v3417_v27, %v3387_v1  ;;  %v3456_v44 = vmul.f32 %v3387_v1, %v3387_v1  ;;  %v4329_v53 = vpack.c.bf16 %v3387_v1, %v3386_v21  ;;  %v3131_v54 = vadd.f32 %v3093_v49, %v2941_v13 }
 0x2f5   : > { %v3487_v31 = vadd.f32 %v3486_v15, %v3456_v44  ;;  %4353 = vst [vmem:[%s5560_s7 + $0x68] sm:$0xff] %v4329_v53   ;;  %v3321_v10 = vadd.f32 %v3283_v45, %v3131_v54 }
 0x2f6   : > { %v3285_v7 = vpop.f32.mrf.mxu0 }
 0x2f7   : > { %v3356_v33 = vadd.f32 %v5540_v57, %v3321_v10  ;;  %v2492_v57 = vadd.f32 %v2457_v9, %v5521_v36 }
 0x2f8   : > { %v2905_v8 = vpop.f32.mrf.mxu2  ;;  %v2459_v3 = vpop.f32.mrf.mxu1 }
 0x2f9   : > { %v3388_v46 = vmax.f32 %v3356_v33, 0.0  ;;  %v2942_v23 = vadd.f32 %v2905_v8, %v2491_v6  ;;  %v2493_v55 = vadd.f32 %v2459_v3, %v5531_v0 }
 0x2fa   : > { %v3095_v17 = vpop.f32.mrf.mxu3 }
 0x2fb   : > { %v3419_v59 = vadd.f32 %v3418_v58, %v3388_v46  ;;  %v3457_v50 = vmul.f32 %v3388_v46, %v3388_v46  ;;  %v3132_v24 = vadd.f32 %v3095_v17, %v2942_v23 }
 0x2fd   : > { %v3488_v11 = vadd.f32 %v3487_v31, %v3457_v50  ;;  %v3322_v48 = vadd.f32 %v3285_v7, %v3132_v24 }
 0x2fe   : > { %v3288_v41 = vpop.f32.mrf.mxu0 }
 0x2ff   : > { %v3357_v62 = vadd.f32 %v4433_v5, %v3322_v48 }
 0x300   : > { %v2908_v19 = vpop.f32.mrf.mxu2 }
 0x301   : > { %v3389_v30 = vmax.f32 %v3357_v62, 0.0  ;;  %v2943_v22 = vadd.f32 %v2908_v19, %v2492_v57 }
 0x302   : > { %v3098_v47 = vpop.f32.mrf.mxu3 }
 0x303   : > { %v3420_v51 = vadd.f32 %v3419_v59, %v3389_v30  ;;  %v3458_v20 = vmul.f32 %v3389_v30, %v3389_v30  ;;  %v4334_v18 = vpack.c.bf16 %v3389_v30, %v3388_v46  ;;  %v3133_v16 = vadd.f32 %v3098_v47, %v2943_v22 }
 0x305   : > { %v3489_v12 = vadd.f32 %v3488_v11, %v3458_v20  ;;  %4354 = vst [vmem:[%s5560_s7 + $0x70] sm:$0xff] %v4334_v18   ;;  %v3323_v40 = vadd.f32 %v3288_v41, %v3133_v16 }
 0x306   : > { %v3290_v63 = vpop.f32.mrf.mxu0 }
 0x307   : > { %v3358_v4 = vadd.f32 %v4433_v5, %v3323_v40 }
 0x308   : > { %v2910_v32 = vpop.f32.mrf.mxu2 }
 0x309   : > { %v3390_v61 = vmax.f32 %v3358_v4, 0.0  ;;  %v2944_v36 = vadd.f32 %v2910_v32, %v2493_v55 }
 0x30a   : > { %v3100_v42 = vpop.f32.mrf.mxu3 }
 0x30b   : > { %v3421_v38 = vadd.f32 %v3420_v51, %v3390_v61  ;;  %v3459_v52 = vmul.f32 %v3390_v61, %v3390_v61  ;;  %v3134_v39 = vadd.f32 %v3100_v42, %v2944_v36 }
 0x30d   : > { %v3490_v43 = vadd.f32 %v3489_v12, %v3459_v52  ;;  %v3324_v37 = vadd.f32 %v3290_v63, %v3134_v39 }
 0x30f   : > { %v3359_v35 = vadd.f32 %v4433_v5, %v3324_v37 }
 0x311   : > { %v3391_v21 = vmax.f32 %v3359_v35, 0.0 }
 0x313   : > { %v3422_v26 = vadd.f32 %v3421_v38, %v3391_v21  ;;  %v3460_v56 = vmul.f32 %v3391_v21, %v3391_v21  ;;  %v4339_v27 = vpack.c.bf16 %v3391_v21, %v3390_v61 }
 0x315   : > { %v3423_v28 = vrot.slane %v3422_v26, 4  ;;  %v3491_v60 = vadd.f32 %v3490_v43, %v3460_v56  ;;  %4355 = vst [vmem:[%s5560_s7 + $0x78] sm:$0xff] %v4339_v27  }
 0x317   : > { %v3424_v0 = vadd.f32 %v3423_v28, %v3422_v26  ;;  %v3492_v15 = vrot.slane %v3491_v60, 4 }
 0x319   : > { %v3425_v2 = vrot.slane %v3424_v0, 2  ;;  %v3493_v45 = vadd.f32 %v3492_v15, %v3491_v60 }
 0x31b   : > { %v3426_v14 = vadd.f32 %v3425_v2, %v3424_v0  ;;  %v3494_v25 = vrot.slane %v3493_v45, 2 }
 0x31d   : > { %v3427_v29 = vrot.slane %v3426_v14, 1  ;;  %v3495_v34 = vadd.f32 %v3494_v25, %v3493_v45 }
 0x31f   : > { %v3496_v1 = vrot.slane %v3495_v34, 1  ;;  %v3428_v13 = vadd.f32 %v3427_v29, %v3426_v14 }
 0x321   : > { %v3497_v49 = vadd.f32 %v3496_v1, %v3495_v34 }
 0x323   : > { %v3499_v58 = vsel %vm627_vm6, %v3428_v13, %v3497_v49 }
 0x324   : > { %3500 = vst [vmem:[%s208_s12] sm:$0x3] %v3499_v58 }
 0x325 PF: > { %s15_s15 = sadd.s32 1, %s4440_s15  }
 0x326   : > { %p12_p4 = scmp.ge.s32.totalorder %s15_s15, 4  }
 0x328   :  { %14 = sbr.rel (!%p12_p4) target bundleno = 1 (0x1), region = 83 }

// kernel: block_forward.4
= control target key start
LH: loop header
LB: loop body
LE: loop exit
PB: predicated region body
PF: predicated region fallthrough
CT: control target
= control target key end

     0   :  { %s4772_s21 = smov 0   ;;  %s6097_s0 = inlined_call_operand.vmem [shape: bf16[2,16,16,128], index: 0, kind: input, shape index: {}]   ;;  %s6098_s1 = inlined_call_operand.vmem [shape: bf16[9,128,128], index: 1, kind: input, shape index: {}]   ;;  %s6099_s2 = inlined_call_operand.vmem [shape: f32[1,128], index: 2, kind: input, shape index: {}]   ;;  %s6100_s3 = inlined_call_operand.vmem [shape: f32[1,1,128], index: 3, kind: input, shape index: {}]   ;;  %s6101_s4 = inlined_call_operand.vmem [shape: f32[2,1,128], index: 4, kind: input, shape index: {}]   ;;  %s6102_s5 = inlined_call_operand.vmem [shape: bf16[2,256,128], index: 5, kind: output, shape index: {0}]   ;;  %s6103_s6 = inlined_call_operand.vmem [shape: f32[2,2,128], index: 6, kind: output, shape index: {1}]  }
   0x1 LB: > { %s3864_s22 = sadd.s32 4294967295, %s4734_s21   ;;  %p3868_p0 = scmp.ge.s32.totalorder %s4734_s21, 1  ;;  %s4734_s21 = sphi %s4772_s21, %s17_s21  }
   0x2   : > { %p223_p1 = scmp.lt.s32.totalorder %s4734_s21, 3 }
   0x4   : > { %p224_p2 = pnand %p3868_p0, %p223_p1 }
   0x6   : > { %227 = sbr.rel (%p224_p2) target bundleno = 805 (0x325), region = 40 }
   0xb   : > { %v4417_v0 = vld [vmem:[%s6098_s1 + $0xf8] sm:$0xff]  ;;  %p260_p3 = scmp.lt.s32.totalorder %s3864_s22, 1  ;;  %v4736_v1 = vmov 0   ;;  %v4416_v2 = vld [vmem:[%s6098_s1 + $0xf0] sm:$0xff]  ;;  %v4805_v3 = vld [vmem:[%s6100_s3] ss:$0 sm:$0xff] }
   0xc   : > { %293 = vst [vmem:[#allocation2 + $0x3c] sm:$0xf] %v4736_v1  ;;  %4648 = vmatpush.bf16.msra.mxu1 %v4417_v0  ;;  %4649 = vmatpush.bf16.msra.mxu2 %v4417_v0  ;;  %v4415_v4 = vld [vmem:[%s6098_s1 + $0xe8] sm:$0xff]  ;;  %v4414_v15 = vld [vmem:[%s6098_s1 + $0xe0] sm:$0xff]  ;;  %vm824_vm0 = vcmask 1043456   ;;  %v4413_v21 = vld [vmem:[%s6098_s1 + $0xd8] sm:$0xff] }
   0xd   : > { %s6155_s22 = smov (!%p260_p3, %s3864_s22), 1  ;;  %294 = vst [vmem:[#allocation2 + $0x40] sm:$0xf] %v4736_v1  ;;  %4650 = vmatpush.bf16.msra.mxu3 %v4417_v0  ;;  %1155 = vmatpush.bf16.msra.mxu0 %v4417_v0  ;;  %vm500_vm1 = vsmask.f32 256  ;;  %v4412_v38 = vld [vmem:[%s6098_s1 + $0xd0] sm:$0xff] }
   0xe   : > { %s4382_s27 = sshll.u32 %s6155_s22, 7  ;;  %s267_s30 = scalar_lea.vmem %s6101_s4, %s6155_s22  ;;  %278 = vst [vmem:[#allocation2] sm:$0xf] %v4736_v1  ;;  %vm501_vm2 = vsmask.f32 4368  ;;  %v4411_v53 = vld [vmem:[%s6098_s1 + $0xc8] sm:$0xff] }
   0xf   : > { %s4800_s9 = scalar_lea.vmem %s6097_s0, %s4382_s27  ;;  %279 = vst [vmem:[#allocation2 + $0x4] sm:$0xf] %v4736_v1  ;;  %v4814_v9 = vld [vmem:[%s267_s30] ss:$0 sm:$0xff]  ;;  %vm825_vm3 = vsmask.f32 7938  ;;  %vm4844_vm4 = vmor %vm500_vm1, %vm501_vm2  ;;  %s5947_s11 = scalar_lea.vmem %s6102_s5, %s4382_s27 }
  0x10   : > { %4651 = vmatpush.bf16.msra.mxu1 %v4416_v2  ;;  %4652 = vmatpush.bf16.msra.mxu2 %v4416_v2  ;;  %v4621_v5 = vld [vmem:[%s4800_s9 + $0x20] sm:$0xff]   ;;  %280 = vst [vmem:[#allocation2 + $0x8] sm:$0x1] %v4736_v1  ;;  %vm4859_vm5 = vmand %vm824_vm0, %vm825_vm3  ;;  %vm831_vm6 = vcmask 1040384   ;;  %v4457_v39 = vld [vmem:[%s6098_s1 + $0xb8] sm:$0xff]  ;;  %vm2770_vm11 = vcmask 1042432  }
  0x11   : > { %v4625_v6 = vld [vmem:[%s4800_s9 + $0x40] sm:$0xff]   ;;  %4653 = vmatpush.bf16.msra.mxu3 %v4416_v2  ;;  %1156 = vmatpush.bf16.msra.mxu0 %v4416_v2  ;;  %v4492_v7 = vunpack.c.l.bf16 %v4621_v5  ;;  %v4493_v8 = vunpack.c.h.bf16 %v4621_v5  ;;  %281 = vst [vmem:[#allocation2 + $0xc] sm:$0xf] %v4736_v1  ;;  %vm5271_vm7 = vmand %vm831_vm6, %vm500_vm1  ;;  %vm1633_vm8 = vsmask.f32 3328  ;;  %vm2771_vm12 = vcmask 1046532  }
  0x12   : > { %v4508_v10 = vunpack.c.l.bf16 %v4625_v6  ;;  %v4509_v11 = vunpack.c.h.bf16 %v4625_v6  ;;  %282 = vst [vmem:[#allocation2 + $0x10] sm:$0xf] %v4736_v1  ;;  %v4629_v20 = vld [vmem:[%s4800_s9 + $0x60] sm:$0xff]   ;;  %vm1634_vm9 = vsmask.f32 7440  ;;  %vm5741_vm13 = vmor %vm2770_vm11, %vm2771_vm12  ;;  %s3873_s13 = sshll.u32 %s6155_s22, 1 }
  0x13   : > { %v408_v12 = vmul.f32 %v4805_v3, %v4492_v7  ;;  %v409_v13 = vmul.f32 %v4805_v3, %v4493_v8  ;;  %283 = vst [vmem:[#allocation2 + $0x14] sm:$0x1] %v4736_v1  ;;  %v4524_v24 = vunpack.c.l.bf16 %v4629_v20  ;;  %v4525_v26 = vunpack.c.h.bf16 %v4629_v20  ;;  %v4475_v37 = vld [vmem:[%s4800_s9] sm:$0xff]   ;;  %v857_v40 = vld [vmem:[#allocation2 + $0x3c] sm:$0xf]  ;;  %vm5363_vm10 = vmor %vm1633_vm8, %vm1634_vm9  ;;  %s276_s16 = scalar_lea.vmem %s6103_s6, %s3873_s13 }
  0x14   : > { %v416_v14 = vmul.f32 %v4805_v3, %v4508_v10  ;;  %4654 = vmatpush.bf16.msra.mxu1 %v4415_v4  ;;  %4655 = vmatpush.bf16.msra.mxu2 %v4415_v4  ;;  %v417_v16 = vmul.f32 %v4805_v3, %v4509_v11  ;;  %284 = vst [vmem:[#allocation2 + $0x18] sm:$0xf] %v4736_v1  ;;  %v4476_v42 = vunpack.c.l.bf16 %v4475_v37  ;;  %v4477_v43 = vunpack.c.h.bf16 %v4475_v37  ;;  %v4410_v61 = vld [vmem:[%s6098_s1 + $0xc0] sm:$0xff] }
  0x15   : > { %4656 = vmatpush.bf16.msra.mxu3 %v4415_v4  ;;  %1157 = vmatpush.bf16.msra.mxu0 %v4415_v4  ;;  %v444_v17 = vadd.f32 %v4814_v9, %v408_v12  ;;  %v445_v18 = vadd.f32 %v4814_v9, %v409_v13  ;;  %285 = vst [vmem:[#allocation2 + $0x1c] sm:$0xf] %v4736_v1 }
  0x16   : > { %v452_v19 = vadd.f32 %v4814_v9, %v416_v14  ;;  %286 = vst [vmem:[#allocation2 + $0x20] sm:$0x1] %v4736_v1  ;;  %v453_v25 = vadd.f32 %v4814_v9, %v417_v16  ;;  %v424_v35 = vmul.f32 %v4805_v3, %v4524_v24  ;;  %v425_v36 = vmul.f32 %v4805_v3, %v4525_v26  ;;  %v4626_v16 = vld [vmem:[%s4800_s9 + $0x48] sm:$0xff]   ;;  %v1580_v32 = vld [vmem:[#allocation2 + $0x4] sm:$0xf] }
  0x17   : > { %v476_v22 = vpack.c.bf16 %v444_v17, %v444_v17  ;;  %v477_v23 = vpack.c.bf16 %v445_v18, %v445_v18  ;;  %287 = vst [vmem:[#allocation2 + $0x24] sm:$0xf] %v4736_v1  ;;  %v400_v52 = vmul.f32 %v4805_v3, %v4476_v42  ;;  %v401_v55 = vmul.f32 %v4805_v3, %v4477_v43  ;;  %v4630_v17 = vld [vmem:[%s4800_s9 + $0x68] sm:$0xff]  }
  0x18   : > { %4657 = vmatpush.bf16.msra.mxu1 %v4414_v15  ;;  %4658 = vmatpush.bf16.msra.mxu2 %v4414_v15  ;;  %288 = vst [vmem:[#allocation2 + $0x28] sm:$0xf] %v4736_v1  ;;  %v4841_v31 = vpack.c.bf16 %v452_v19, %v452_v19  ;;  %v485_v41 = vpack.c.bf16 %v453_v25, %v453_v25  ;;  %v4513_v24 = vunpack.c.h.bf16 %v4626_v16  ;;  %v4528_v25 = vunpack.c.l.bf16 %v4630_v17 }
  0x19   : > { %4659 = vmatpush.bf16.msra.mxu3 %v4414_v15  ;;  %1158 = vmatpush.bf16.msra.mxu0 %v4414_v15  ;;  %v572_v27 = vshrl.u32 %v476_v22, 16  ;;  %v575_v28 = vshll.u32 %v476_v22, 16  ;;  %v580_v29 = vshrl.u32 %v477_v23, 16  ;;  %v583_v30 = vshll.u32 %v477_v23, 16  ;;  %289 = vst [vmem:[#allocation2 + $0x2c] sm:$0x1] %v4736_v1 }
  0x1a   : > { %290 = vst [vmem:[#allocation2 + $0x30] sm:$0xf] %v4736_v1  ;;  %v640_v47 = vshrl.u32 %v4841_v31, 16  ;;  %v460_v48 = vadd.f32 %v4814_v9, %v424_v35  ;;  %v461_v51 = vadd.f32 %v4814_v9, %v425_v36  ;;  %v648_v56 = vshrl.u32 %v485_v41, 16  ;;  %v4622_v15 = vld [vmem:[%s4800_s9 + $0x28] sm:$0xff]  }
  0x1b   : > { %v574_v33 = vrot.slane %v572_v27, 7  ;;  %v4848_v34 = vrot.slane %v580_v29, 7  ;;  %291 = vst [vmem:[#allocation2 + $0x34] sm:$0xf] %v4736_v1  ;;  %v436_v58 = vadd.f32 %v4814_v9, %v400_v52  ;;  %v437_v60 = vadd.f32 %v4814_v9, %v401_v55  ;;  %v4618_v22 = vld [vmem:[%s4800_s9 + $0x8] sm:$0xff]  }
  0x1c   : > { %4660 = vmatpush.bf16.msra.mxu1 %v4413_v21  ;;  %4661 = vmatpush.bf16.msra.mxu2 %v4413_v21  ;;  %292 = vst [vmem:[#allocation2 + $0x38] sm:$0x1] %v4736_v1  ;;  %v4879_v54 = vpack.c.bf16 %v460_v48, %v460_v48  ;;  %v4882_v57 = vpack.c.bf16 %v461_v51, %v461_v51  ;;  %v4887_v59 = vrot.slane %v640_v47, 7  ;;  %v4897_v0 = vrot.slane %v648_v56, 7 }
  0x1d   : > { %4662 = vmatpush.bf16.msra.mxu3 %v4413_v21  ;;  %1159 = vmatpush.bf16.msra.mxu0 %v4413_v21  ;;  %v577_v44 = vor.u32 %v575_v28, %v574_v33  ;;  %v578_v45 = vrot.slane %v574_v33, 4  ;;  %v585_v46 = vor.u32 %v583_v30, %v4848_v34  ;;  %295 = vst [vmem:[#allocation2 + $0x44] sm:$0x1] %v4736_v1  ;;  %v651_v2 = vshll.u32 %v485_v41, 16 }
  0x1e   : > { %296 = vst [vmem:[#allocation2 + $0x48] sm:$0xf] %v4736_v1  ;;  %v708_v62 = vshrl.u32 %v4879_v54, 16  ;;  %v716_v63 = vshrl.u32 %v4882_v57, 16  ;;  %v4899_v4 = vpack.c.bf16 %v436_v58, %v436_v58  ;;  %v643_v5 = vshll.u32 %v4841_v31, 16 }
  0x1f   : > { %v586_v49 = vsel %vm4844_vm4, %v578_v45, %v585_v46  ;;  %v858_v50 = vsel %vm4859_vm5, %v577_v44, %v857_v40  ;;  %297 = vst [vmem:[#allocation2 + $0x4c] sm:$0xf] %v4736_v1  ;;  %v646_v6 = vrot.slane %v4887_v59, 4  ;;  %v4905_v7 = vpack.c.bf16 %v437_v60, %v437_v60  ;;  %v4409_v60 = vld [vmem:[%s6098_s1 + $0x38] sm:$0xff] }
  0x20   : > { %4663 = vmatpush.bf16.msra.mxu1 %v4412_v38  ;;  %4664 = vmatpush.bf16.msra.mxu2 %v4412_v38  ;;  %859 = vst [vmem:[#allocation2 + $0x3c] sm:$0xf] %v858_v50  ;;  %v4908_v10 = vrot.slane %v708_v62, 7  ;;  %v4910_v11 = vrot.slane %v716_v63, 7  ;;  %v719_v12 = vshll.u32 %v4882_v57, 16  ;;  %v653_v13 = vor.u32 %v651_v2, %v4897_v0 }
  0x21   : > { %4665 = vmatpush.bf16.msra.mxu3 %v4412_v38  ;;  %1160 = vmatpush.bf16.msra.mxu0 %v4412_v38  ;;  %860 = vst [vmem:[#allocation2 + $0x40] sm:$0xf] %v586_v49  ;;  %v504_v14 = vshrl.u32 %v4899_v4, 16  ;;  %v507_v18 = vshll.u32 %v4899_v4, 16  ;;  %v4496_v19 = vunpack.c.l.bf16 %v4622_v15  ;;  %v4497_v20 = vunpack.c.h.bf16 %v4622_v15  ;;  %v4432_v15 = vld [vmem:[%s6098_s1 + $0x70] sm:$0xff] }
  0x22   : > { %298 = vst [vmem:[#allocation2 + $0x50] sm:$0x1] %v4736_v1  ;;  %v4512_v21 = vunpack.c.l.bf16 %v4626_v16  ;;  %v512_v23 = vshrl.u32 %v4905_v7, 16  ;;  %v4529_v26 = vunpack.c.h.bf16 %v4630_v17  ;;  %v515_v27 = vshll.u32 %v4905_v7, 16  ;;  %v4408_v16 = vld [vmem:[%s6098_s1 + $0x30] sm:$0xff] }
  0x23   : > { %299 = vst [vmem:[#allocation2 + $0x54] sm:$0xf] %v4736_v1  ;;  %v410_v28 = vmul.f32 %v4805_v3, %v4496_v19  ;;  %v411_v29 = vmul.f32 %v4805_v3, %v4497_v20  ;;  %v419_v31 = vmul.f32 %v4805_v3, %v4513_v24  ;;  %v426_v33 = vmul.f32 %v4805_v3, %v4528_v25 }
  0x24   : > { %4666 = vmatpush.bf16.msra.mxu1 %v4411_v53  ;;  %4667 = vmatpush.bf16.msra.mxu2 %v4411_v53  ;;  %300 = vst [vmem:[#allocation2 + $0x58] sm:$0xf] %v4736_v1  ;;  %v418_v30 = vmul.f32 %v4805_v3, %v4512_v21  ;;  %v427_v35 = vmul.f32 %v4805_v3, %v4529_v26  ;;  %v4480_v36 = vunpack.c.l.bf16 %v4618_v22  ;;  %v4934_v37 = vrot.slane %v504_v14, 7 }
  0x25   : > { %4668 = vmatpush.bf16.msra.mxu3 %v4411_v53  ;;  %1161 = vmatpush.bf16.msra.mxu0 %v4411_v53  ;;  %301 = vst [vmem:[#allocation2 + $0x5c] sm:$0x1] %v4736_v1  ;;  %v446_v38 = vadd.f32 %v4814_v9, %v410_v28  ;;  %v447_v40 = vadd.f32 %v4814_v9, %v411_v29  ;;  %v4940_v42 = vrot.slane %v512_v23, 7  ;;  %v4481_v45 = vunpack.c.h.bf16 %v4618_v22  ;;  %v4425_v53 = vld [vmem:[%s6098_s1 + $0x1b8] sm:$0xff] }
  0x26   : > { %302 = vst [vmem:[#allocation2 + $0x60] sm:$0xf] %v4736_v1  ;;  %v454_v41 = vadd.f32 %v4814_v9, %v418_v30  ;;  %v455_v43 = vadd.f32 %v4814_v9, %v419_v31  ;;  %v462_v44 = vadd.f32 %v4814_v9, %v426_v33  ;;  %v402_v49 = vmul.f32 %v4805_v3, %v4480_v36 }
  0x27   : > { %303 = vst [vmem:[#allocation2 + $0x64] sm:$0xf] %v4736_v1  ;;  %v478_v46 = vpack.c.bf16 %v446_v38, %v446_v38  ;;  %v4945_v47 = vpack.c.bf16 %v447_v40, %v447_v40  ;;  %v4952_v50 = vor.u32 %v643_v5, %v4887_v59  ;;  %v4956_v51 = vsel %vm4844_vm4, %v646_v6, %v653_v13  ;;  %v5033_v40 = vld [vmem:[#allocation2 + $0x48] sm:$0xf] }
  0x28   : > { %4669 = vmatpush.bf16.msra.mxu1 %v4410_v61  ;;  %4670 = vmatpush.bf16.msra.mxu2 %v4410_v61  ;;  %v4389_v8 = vld [vmem:[#allocation2 + $0x3c] sm:$0xff]  ;;  %304 = vst [vmem:[#allocation2 + $0x68] sm:$0x1] %v4736_v1  ;;  %v4947_v48 = vpack.c.bf16 %v454_v41, %v454_v41  ;;  %v711_v52 = vshll.u32 %v4879_v54, 16  ;;  %v463_v55 = vadd.f32 %v4814_v9, %v427_v35  ;;  %v714_v56 = vrot.slane %v4908_v10, 4 }
  0x29   : > { %4671 = vmatpush.bf16.msra.mxu3 %v4410_v61  ;;  %1162 = vmatpush.bf16.msra.mxu0 %v4410_v61  ;;  %305 = vst [vmem:[#allocation2 + $0x6c] sm:$0xf] %v4736_v1  ;;  %v721_v57 = vor.u32 %v719_v12, %v4910_v11  ;;  %v589_v58 = vshrl.u32 %v478_v46, 16  ;;  %v597_v59 = vshrl.u32 %v4945_v47, 16  ;;  %v4433_v54 = vld [vmem:[%s6098_s1 + $0x78] sm:$0xff]  ;;  %v4424_v61 = vld [vmem:[%s6098_s1 + $0x1b0] sm:$0xff]  ;;  %v487_v62 = vpack.c.bf16 %v455_v43, %v455_v43 }
  0x2a   : > { %306 = vst [vmem:[#allocation2 + $0x70] sm:$0xf] %v4736_v1  ;;  %v657_v63 = vshrl.u32 %v4947_v48, 16  ;;  %v403_v2 = vmul.f32 %v4805_v3, %v4481_v45  ;;  %v438_v4 = vadd.f32 %v4814_v9, %v402_v49  ;;  %v4982_v5 = vor.u32 %v507_v18, %v4934_v37  ;;  %v4441_v12 = vld [vmem:[%s6098_s1 + $0x138] sm:$0xff]  ;;  %v4623_v49 = vld [vmem:[%s4800_s9 + $0x30] sm:$0xff]  }
  0x2b   : > { %1183 = vmatmul.bf16.vlgmr.msra.gmra.mxu1 %v4389_v8  ;;  %307 = vst [vmem:[#allocation2 + $0x74] sm:$0x1] %v4736_v1  ;;  %v510_v6 = vrot.slane %v4934_v37, 4  ;;  %v517_v7 = vor.u32 %v515_v27, %v4940_v42  ;;  %v4986_v8 = vld [vmem:[#allocation2 + $0xc] sm:$0xf]  ;;  %v4991_v13 = vpack.c.bf16 %v462_v44, %v462_v44  ;;  %v4995_v14 = vor.u32 %v711_v52, %v4908_v10 }
  0x2c   : > { %308 = vst [vmem:[#allocation2 + $0x78] sm:$0xf] %v4736_v1  ;;  %1458 = vmatpush.bf16.msrb.mxu2 %v4425_v53  ;;  %1298 = vmatpush.bf16.msrb.mxu1 %v4409_v60  ;;  %v591_v17 = vrot.slane %v589_v58, 7  ;;  %v592_v18 = vshll.u32 %v478_v46, 16  ;;  %v495_v19 = vpack.c.bf16 %v463_v55, %v463_v55  ;;  %v5006_v20 = vsel %vm4844_vm4, %v714_v56, %v721_v57 }
  0x2d   : > { %309 = vst [vmem:[#allocation2 + $0x7c] sm:$0xf] %v4736_v1  ;;  %2197 = vmatpush.bf16.msrb.mxu3 %v4433_v54  ;;  %2387 = vmatpush.bf16.msrb.mxu0 %v4441_v12  ;;  %v5008_v10 = vrot.slane %v597_v59, 7  ;;  %v600_v21 = vshll.u32 %v4945_v47, 16  ;;  %v439_v22 = vadd.f32 %v4814_v9, %v403_v2  ;;  %v659_v23 = vrot.slane %v657_v63, 7 }
  0x2e   : > { %310 = vst [vmem:[#allocation2 + $0x80] sm:$0x1] %v4736_v1  ;;  %v660_v24 = vshll.u32 %v4947_v48, 16  ;;  %v665_v25 = vshrl.u32 %v487_v62, 16  ;;  %v470_v26 = vpack.c.bf16 %v438_v4, %v438_v4  ;;  %v5019_v28 = vsel %vm4844_vm4, %v510_v6, %v517_v7 }
  0x2f   : > { %311 = vst [vmem:[#allocation2 + $0x84] sm:$0xf] %v4736_v1  ;;  %v828_v29 = vsel %vm4859_vm5, %v4982_v5, %v4986_v8  ;;  %v668_v30 = vshll.u32 %v487_v62, 16  ;;  %v725_v31 = vshrl.u32 %v4991_v13, 16  ;;  %v5027_v33 = vor.u32 %v592_v18, %v591_v17  ;;  %v871_v5 = vld [vmem:[#allocation2 + $0x54] sm:$0xf] }
  0x30   : > { %312 = vst [vmem:[#allocation2 + $0x88] sm:$0xf] %v4736_v1  ;;  %1459 = vmatpush.bf16.msrb.mxu2 %v4424_v61  ;;  %v5015_v27 = vld [vmem:[#allocation2 + $0x6c] sm:$0xf]  ;;  %1299 = vmatpush.bf16.msrb.mxu1 %v4408_v16  ;;  %v595_v35 = vrot.slane %v591_v17, 4  ;;  %v5029_v36 = vrot.slane %v665_v25, 7  ;;  %v602_v38 = vor.u32 %v600_v21, %v5008_v10  ;;  %v471_v44 = vpack.c.bf16 %v439_v22, %v439_v22 }
  0x31   : > { %313 = vst [vmem:[#allocation2 + $0x8c] sm:$0x1] %v4736_v1  ;;  %2198 = vmatpush.bf16.msrb.mxu3 %v4432_v15  ;;  %v733_v37 = vshrl.u32 %v495_v19, 16  ;;  %v727_v41 = vrot.slane %v725_v31, 7  ;;  %v736_v43 = vshll.u32 %v495_v19, 16  ;;  %v5036_v45 = vor.u32 %v660_v24, %v659_v23  ;;  %v4627_v61 = vld [vmem:[%s4800_s9 + $0x50] sm:$0xff]  }
  0x32   : > { %314 = vst [vmem:[#allocation2 + $0x90] sm:$0xf] %v4736_v1  ;;  %v728_v46 = vshll.u32 %v4991_v13, 16  ;;  %v521_v48 = vshrl.u32 %v470_v26, 16  ;;  %v886_v52 = vsel %vm4859_vm5, %v4952_v50, %v5015_v27  ;;  %v663_v53 = vrot.slane %v659_v23, 4  ;;  %v4631_v19 = vld [vmem:[%s4800_s9 + $0x70] sm:$0xff]  }
  0x33   : > { %315 = vst [vmem:[#allocation2 + $0x94] sm:$0xf] %v4736_v1  ;;  %v5039_v47 = vrot.slane %v733_v37, 7  ;;  %v670_v55 = vor.u32 %v668_v30, %v5029_v36  ;;  %v5048_v56 = vld [vmem:[#allocation2 + $0x78] sm:$0xf]  ;;  %v529_v57 = vshrl.u32 %v471_v44, 16  ;;  %v5058_v50 = vsel %vm4844_vm4, %v595_v35, %v602_v38 }
  0x34   : > { %316 = vst [vmem:[#allocation2 + $0x98] sm:$0x1] %v4736_v1  ;;  %v731_v58 = vrot.slane %v727_v41, 4  ;;  %v5052_v54 = vrot.slane %v521_v48, 7  ;;  %v524_v60 = vshll.u32 %v470_v26, 16  ;;  %v865_v63 = vsel %vm4859_vm5, %v5027_v33, %v5033_v40  ;;  %v4423_v23 = vld [vmem:[%s6098_s1 + $0x1a8] sm:$0xff] }
  0x35   : > { %317 = vst [vmem:[#allocation2 + $0x9c] sm:$0xf] %v4736_v1  ;;  %v738_v59 = vor.u32 %v736_v43, %v5039_v47  ;;  %v4500_v2 = vunpack.c.l.bf16 %v4623_v49  ;;  %v4501_v4 = vunpack.c.h.bf16 %v4623_v49  ;;  %v893_v6 = vsel %vm4859_vm5, %v5036_v45, %v5048_v56  ;;  %v5096_v26 = vld [vmem:[%s4800_s9 + $0x10] sm:$0xff]   ;;  %1460 = vmatpush.bf16.msrb.mxu2 %v4423_v23  ;;  %v4431_v37 = vld [vmem:[%s6098_s1 + $0x68] sm:$0xff]  ;;  %v4422_v48 = vld [vmem:[%s6098_s1 + $0x1a0] sm:$0xff] }
  0x36   : > { %318 = vst [vmem:[#allocation2 + $0xa0] sm:$0xf] %v4736_v1  ;;  %v5069_v7 = vor.u32 %v728_v46, %v727_v41  ;;  %v5071_v12 = vrot.slane %v529_v57, 7  ;;  %v532_v13 = vshll.u32 %v471_v44, 16  ;;  %v5076_v15 = vsel %vm4844_vm4, %v663_v53, %v670_v55  ;;  %v4440_v38 = vld [vmem:[%s6098_s1 + $0x130] sm:$0xff]  ;;  %v4407_v41 = vld [vmem:[%s6098_s1 + $0x28] sm:$0xff]  ;;  %2199 = vmatpush.bf16.msrb.mxu3 %v4431_v37 }
  0x37   : > { %319 = vst [vmem:[#allocation2 + $0xa4] sm:$0x1] %v4736_v1  ;;  %v412_v16 = vmul.f32 %v4805_v3, %v4500_v2  ;;  %v413_v17 = vmul.f32 %v4805_v3, %v4501_v4  ;;  %v4516_v18 = vunpack.c.l.bf16 %v4627_v61  ;;  %v5087_v22 = vsel %vm4844_vm4, %v731_v58, %v738_v59  ;;  %2388 = vmatpush.bf16.msrb.mxu0 %v4440_v38  ;;  %v4430_v58 = vld [vmem:[%s6098_s1 + $0x60] sm:$0xff] }
  0x38   : > { %320 = vst [vmem:[#allocation2 + $0xa8] sm:$0xf] %v4736_v1  ;;  %v5093_v24 = vor.u32 %v524_v60, %v5052_v54  ;;  %v4517_v25 = vunpack.c.h.bf16 %v4627_v61  ;;  %v527_v27 = vrot.slane %v5052_v54, 4  ;;  %v534_v35 = vor.u32 %v532_v13, %v5071_v12  ;;  %v4406_v59 = vld [vmem:[%s6098_s1 + $0x20] sm:$0xff]  ;;  %1300 = vmatpush.bf16.msrb.mxu1 %v4407_v41 }
  0x39   : > { %321 = vst [vmem:[#allocation2 + $0xac] sm:$0xf] %v4736_v1  ;;  %v449_v30 = vadd.f32 %v4814_v9, %v413_v17  ;;  %v420_v31 = vmul.f32 %v4805_v3, %v4516_v18  ;;  %v4532_v44 = vunpack.c.l.bf16 %v4631_v19  ;;  %v4533_v46 = vunpack.c.h.bf16 %v4631_v19  ;;  %1461 = vmatpush.bf16.msrb.mxu2 %v4422_v48  ;;  %v899_v33 = vld [vmem:[#allocation2 + $0x84] sm:$0xf] }
  0x3a   : > { %322 = vst [vmem:[#allocation2 + $0xb0] sm:$0x1] %v4736_v1  ;;  %v421_v43 = vmul.f32 %v4805_v3, %v4517_v25  ;;  %v4484_v57 = vunpack.c.l.bf16 %v5096_v26  ;;  %v4485_v23 = vunpack.c.h.bf16 %v5096_v26  ;;  %v836_v25 = vld [vmem:[#allocation2 + $0x18] sm:$0xf]  ;;  %2200 = vmatpush.bf16.msrb.mxu3 %v4430_v58 }
  0x3b   : > { %323 = vst [vmem:[#allocation2 + $0xb4] sm:$0xf] %v4736_v1  ;;  %v481_v53 = vpack.c.bf16 %v449_v30, %v449_v30  ;;  %v456_v55 = vadd.f32 %v4814_v9, %v420_v31  ;;  %v428_v61 = vmul.f32 %v4805_v3, %v4532_v44  ;;  %v837_v48 = vsel %vm4859_vm5, %v5093_v24, %v836_v25 }
  0x3c   : > { %324 = vst [vmem:[#allocation2 + $0xb8] sm:$0xf] %v4736_v1  ;;  %v913_v62 = vld [vmem:[#allocation2 + $0x9c] sm:$0xf]  ;;  %v457_v60 = vadd.f32 %v4814_v9, %v421_v43  ;;  %v404_v31 = vmul.f32 %v4805_v3, %v4484_v57  ;;  %1301 = vmatpush.bf16.msrb.mxu1 %v4406_v59  ;;  %v405_v40 = vmul.f32 %v4805_v3, %v4485_v23 }
  0x3d   : > { %325 = vst [vmem:[#allocation2 + $0xbc] sm:$0x1] %v4736_v1  ;;  %v914_v21 = vsel %vm4859_vm5, %v4995_v14, %v913_v62  ;;  %v448_v14 = vadd.f32 %v4814_v9, %v412_v16  ;;  %v614_v4 = vshrl.u32 %v481_v53, 16  ;;  %v617_v13 = vshll.u32 %v481_v53, 16 }
  0x3e   : > { %326 = vst [vmem:[#allocation2 + $0xc0] sm:$0xf] %v4736_v1  ;;  %v488_v17 = vpack.c.bf16 %v456_v55, %v456_v55  ;;  %v489_v18 = vpack.c.bf16 %v457_v60, %v457_v60  ;;  %v464_v19 = vadd.f32 %v4814_v9, %v428_v61 }
  0x3f   : > { %327 = vst [vmem:[#allocation2 + $0xc4] sm:$0xf] %v4736_v1  ;;  %v480_v49 = vpack.c.bf16 %v448_v14, %v448_v14  ;;  %v920_v16 = vld [vmem:[#allocation2 + $0xa8] sm:$0xf]  ;;  %v5137_v30 = vrot.slane %v614_v4, 7 }
  0x40   : > { %328 = vst [vmem:[#allocation2 + $0xc8] sm:$0x1] %v4736_v1  ;;  %v677_v26 = vshll.u32 %v488_v17, 16  ;;  %v682_v37 = vshrl.u32 %v489_v18, 16  ;;  %v921_v38 = vsel %vm4859_vm5, %v5069_v7, %v920_v16  ;;  %v535_v7 = vsel %vm4844_vm4, %v527_v27, %v534_v35  ;;  %v5178_v35 = vld [vmem:[%s4800_s9 + $0x58] sm:$0xff]  }
  0x41   : > { %329 = vst [vmem:[#allocation2 + $0xcc] sm:$0xf] %v4736_v1  ;;  %v606_v62 = vshrl.u32 %v480_v49, 16  ;;  %v609_v2 = vshll.u32 %v480_v49, 16  ;;  %v619_v44 = vor.u32 %v617_v13, %v5137_v30  ;;  %v4624_v49 = vld [vmem:[%s4800_s9 + $0x38] sm:$0xff]  }
  0x42   : > { %330 = vst [vmem:[#allocation2 + $0xd0] sm:$0xf] %v4736_v1  ;;  %v4504_v60 = vunpack.c.l.bf16 %v4624_v49  ;;  %v927_v13 = vld [vmem:[#allocation2 + $0xb4] sm:$0xf]  ;;  %v4421_v16 = vld [vmem:[%s6098_s1 + $0x198] sm:$0xff] }
  0x43   : > { %331 = vst [vmem:[#allocation2 + $0xd4] sm:$0x1] %v4736_v1  ;;  %v4439_v1 = vld [vmem:[%s6098_s1 + $0x128] sm:$0xff]  ;;  %v608_v14 = vrot.slane %v606_v62, 7  ;;  %v4505_v62 = vunpack.c.h.bf16 %v4624_v49  ;;  %1462 = vmatpush.bf16.msrb.mxu2 %v4421_v16  ;;  %v4428_v49 = vld [vmem:[%s6098_s1 + $0x50] sm:$0xff] }
  0x44   : > { %887 = vst [vmem:[#allocation2 + $0x6c] sm:$0xf] %v886_v52  ;;  %v429_v52 = vmul.f32 %v4805_v3, %v4533_v46  ;;  %2389 = vmatpush.bf16.msrb.mxu0 %v4439_v1 }
  0x45   : > { %888 = vst [vmem:[#allocation2 + $0x70] sm:$0xf] %v4956_v51  ;;  %v611_v41 = vor.u32 %v609_v2, %v608_v14  ;;  %v612_v43 = vrot.slane %v608_v14, 4  ;;  %v4521_v14 = vunpack.c.h.bf16 %v5178_v35 }
  0x46   : > { %915 = vst [vmem:[#allocation2 + $0x9c] sm:$0xf] %v914_v21  ;;  %v465_v51 = vadd.f32 %v4814_v9, %v429_v52  ;;  %v674_v21 = vshrl.u32 %v488_v17, 16 }
  0x47   : > { %916 = vst [vmem:[#allocation2 + $0xa0] sm:$0xf] %v5006_v20  ;;  %v685_v20 = vshll.u32 %v489_v18, 16  ;;  %v620_v54 = vsel %vm4844_vm4, %v612_v43, %v619_v44  ;;  %v872_v45 = vsel %vm4859_vm5, %v611_v41, %v871_v5  ;;  %v4520_v18 = vunpack.c.l.bf16 %v5178_v35  ;;  %v4429_v44 = vld [vmem:[%s6098_s1 + $0x58] sm:$0xff]  ;;  %v4438_v5 = vld [vmem:[%s6098_s1 + $0x120] sm:$0xff] }
  0x48   : > { %829 = vst [vmem:[#allocation2 + $0xc] sm:$0xf] %v828_v29  ;;  %v676_v8 = vrot.slane %v674_v21, 7  ;;  %v5156_v29 = vrot.slane %v682_v37, 7  ;;  %v497_v46 = vpack.c.bf16 %v465_v51, %v465_v51  ;;  %v5201_v51 = vld [vmem:[%s4800_s9 + $0x78] sm:$0xff]   ;;  %2201 = vmatpush.bf16.msrb.mxu3 %v4429_v44  ;;  %2390 = vmatpush.bf16.msrb.mxu0 %v4438_v5  ;;  %v519_v5 = vrot.slane %v4940_v42, 4 }
  0x49   : > { %830 = vst [vmem:[#allocation2 + $0x10] sm:$0xf] %v5019_v28  ;;  %v496_v28 = vpack.c.bf16 %v464_v19, %v464_v19 }
  0x4a   : > { %866 = vst [vmem:[#allocation2 + $0x48] sm:$0xf] %v865_v63  ;;  %v440_v63 = vadd.f32 %v4814_v9, %v404_v31  ;;  %v680_v27 = vrot.slane %v676_v8, 4  ;;  %v687_v24 = vor.u32 %v685_v20, %v5156_v29  ;;  %v750_v58 = vshrl.u32 %v497_v46, 16 }
  0x4b   : > { %867 = vst [vmem:[#allocation2 + $0x4c] sm:$0xf] %v5058_v50  ;;  %v679_v50 = vor.u32 %v677_v26, %v676_v8  ;;  %v742_v55 = vshrl.u32 %v496_v28, 16  ;;  %v745_v57 = vshll.u32 %v496_v28, 16  ;;  %v753_v1 = vshll.u32 %v497_v46, 16  ;;  %v4405_v8 = vld [vmem:[%s6098_s1 + $0x18] sm:$0xff] }
  0x4c   : > { %v4393_v53 = vld [vmem:[#allocation2 + $0x6c] sm:$0xff]  ;;  %894 = vst [vmem:[#allocation2 + $0x78] sm:$0xf] %v893_v6  ;;  %v688_v56 = vsel %vm4844_vm4, %v680_v27, %v687_v24  ;;  %v441_v6 = vadd.f32 %v4814_v9, %v405_v40  ;;  %v472_v52 = vpack.c.bf16 %v440_v63, %v440_v63  ;;  %v415_v20 = vmul.f32 %v4805_v3, %v4505_v62  ;;  %v843_v63 = vld [vmem:[#allocation2 + $0x24] sm:$0xf] }
  0x4d   : > { %895 = vst [vmem:[#allocation2 + $0x7c] sm:$0xf] %v5076_v15  ;;  %1203 = vmatmul.bf16.vlgmr.msra.gmra.mxu2 %v4393_v53  ;;  %v744_v61 = vrot.slane %v742_v55, 7  ;;  %v5187_v15 = vrot.slane %v750_v58, 7  ;;  %v900_v4 = vsel %vm4859_vm5, %v679_v50, %v899_v33  ;;  %v422_v40 = vmul.f32 %v4805_v3, %v4520_v18  ;;  %v4437_v53 = vld [vmem:[%s6098_s1 + $0x118] sm:$0xff]  ;;  %1302 = vmatpush.bf16.msrb.mxu1 %v4405_v8 }
  0x4e   : > { %v4397_v59 = vld [vmem:[#allocation2 + $0x9c] sm:$0xff]  ;;  %922 = vst [vmem:[#allocation2 + $0xa8] sm:$0xf] %v921_v38  ;;  %v473_v17 = vpack.c.bf16 %v441_v6, %v441_v6  ;;  %v538_v21 = vshrl.u32 %v472_v52, 16  ;;  %v541_v26 = vshll.u32 %v472_v52, 16  ;;  %v451_v33 = vadd.f32 %v4814_v9, %v415_v20  ;;  %2202 = vmatpush.bf16.msrb.mxu3 %v4428_v49  ;;  %2391 = vmatpush.bf16.msrb.mxu0 %v4437_v53 }
  0x4f   : > { %923 = vst [vmem:[#allocation2 + $0xac] sm:$0xf] %v5087_v22  ;;  %1223 = vmatmul.bf16.vlgmr.msra.gmra.mxu3 %v4397_v59  ;;  %v414_v22 = vmul.f32 %v4805_v3, %v4504_v60  ;;  %v747_v19 = vor.u32 %v745_v57, %v744_v61  ;;  %v748_v23 = vrot.slane %v744_v61, 4  ;;  %v755_v25 = vor.u32 %v753_v1, %v5187_v15  ;;  %v4404_v57 = vld [vmem:[%s6098_s1 + $0x10] sm:$0xff]  ;;  %v4620_v6 = vld [vmem:[%s4800_s9 + $0x18] sm:$0xff]  }
  0x50   : > { %v5189_v2 = vld [vmem:[#allocation2 + $0xc] sm:$0xff]  ;;  %838 = vst [vmem:[#allocation2 + $0x18] sm:$0xf] %v837_v48  ;;  %v546_v37 = vshrl.u32 %v473_v17, 16  ;;  %v549_v43 = vshll.u32 %v473_v17, 16  ;;  %v540_v46 = vrot.slane %v538_v21, 7  ;;  %v423_v50 = vmul.f32 %v4805_v3, %v4521_v14 }
  0x51   : > { %839 = vst [vmem:[#allocation2 + $0x1c] sm:$0xf] %v535_v7  ;;  %1163 = vmatmul.bf16.vlgmr.msra.gmra.mxu0 %v5189_v2  ;;  %v756_v38 = vsel %vm4844_vm4, %v748_v23, %v755_v25  ;;  %v928_v41 = vsel %vm4859_vm5, %v747_v19, %v927_v13  ;;  %v450_v28 = vadd.f32 %v4814_v9, %v414_v22  ;;  %v4420_v48 = vld [vmem:[%s6098_s1 + $0x190] sm:$0xff]  ;;  %v4536_v27 = vunpack.c.l.bf16 %v5201_v51  ;;  %v878_v18 = vld [vmem:[#allocation2 + $0x60] sm:$0xf] }
  0x52   : > { %v5204_v31 = vld [vmem:[#allocation2 + $0x48] sm:$0xff]  ;;  %873 = vst [vmem:[#allocation2 + $0x54] sm:$0xf] %v872_v45  ;;  %v5222_v7 = vrot.slane %v546_v37, 7  ;;  %v543_v24 = vor.u32 %v541_v26, %v540_v46  ;;  %v544_v35 = vrot.slane %v540_v46, 4  ;;  %1463 = vmatpush.bf16.msrb.mxu2 %v4420_v48  ;;  %v4537_v58 = vunpack.c.h.bf16 %v5201_v51  ;;  %1303 = vmatpush.bf16.msrb.mxu1 %v4404_v57 }
  0x53   : > { %874 = vst [vmem:[#allocation2 + $0x58] sm:$0xf] %v620_v54  ;;  %1188 = vmatmul.bf16.gmra.mxu1 %v5204_v31  ;;  %v482_v54 = vpack.c.bf16 %v450_v28, %v450_v28  ;;  %v483_v1 = vpack.c.bf16 %v451_v33, %v451_v33  ;;  %v459_v52 = vadd.f32 %v4814_v9, %v423_v50  ;;  %v4488_v14 = vunpack.c.l.bf16 %v4620_v6 }
  0x54   : > { %901 = vst [vmem:[#allocation2 + $0x84] sm:$0xf] %v900_v4  ;;  %v551_v55 = vor.u32 %v549_v43, %v5222_v7  ;;  %v844_v61 = vsel %vm4859_vm5, %v543_v24, %v843_v63  ;;  %v430_v62 = vmul.f32 %v4805_v3, %v4536_v27  ;;  %v5250_v22 = vld [vmem:[#allocation2 + $0x78] sm:$0xff]  ;;  %v431_v23 = vmul.f32 %v4805_v3, %v4537_v58  ;;  %v833_v24 = vld [vmem:[#allocation2 + $0x14] sm:$0x1] }
  0x55   : > { %902 = vst [vmem:[#allocation2 + $0x88] sm:$0xf] %v688_v56  ;;  %v623_v59 = vshrl.u32 %v482_v54, 16  ;;  %v626_v45 = vshll.u32 %v482_v54, 16  ;;  %v458_v56 = vadd.f32 %v4814_v9, %v422_v40  ;;  %v631_v13 = vshrl.u32 %v483_v1, 16 }
  0x56   : > { %929 = vst [vmem:[#allocation2 + $0xb4] sm:$0xf] %v928_v41  ;;  %v552_v60 = vsel %vm4844_vm4, %v544_v35, %v551_v55  ;;  %v634_v16 = vshll.u32 %v483_v1, 16  ;;  %v491_v19 = vpack.c.bf16 %v459_v52, %v459_v52  ;;  %v466_v25 = vadd.f32 %v4814_v9, %v430_v62  ;;  %v4398_v20 = vld [vmem:[#allocation2 + $0xa8] sm:$0xff]  ;;  %v906_v40 = vld [vmem:[#allocation2 + $0x90] sm:$0xf] }
  0x57   : > { %930 = vst [vmem:[#allocation2 + $0xb8] sm:$0xf] %v756_v38  ;;  %v625_v4 = vrot.slane %v623_v59, 7  ;;  %v490_v17 = vpack.c.bf16 %v458_v56, %v458_v56  ;;  %v5254_v26 = vrot.slane %v631_v13, 7  ;;  %v467_v44 = vadd.f32 %v4814_v9, %v431_v23  ;;  %v4419_v59 = vld [vmem:[%s6098_s1 + $0x188] sm:$0xff]  ;;  %v4436_v13 = vld [vmem:[%s6098_s1 + $0x110] sm:$0xff] }
  0x58   : > { %845 = vst [vmem:[#allocation2 + $0x24] sm:$0xf] %v844_v61  ;;  %v699_v41 = vshrl.u32 %v491_v19, 16  ;;  %v702_v43 = vshll.u32 %v491_v19, 16  ;;  %v5262_v48 = vld [vmem:[#allocation2 + $0x18] sm:$0xff]  ;;  %v498_v63 = vpack.c.bf16 %v466_v25, %v466_v25  ;;  %v4489_v53 = vunpack.c.h.bf16 %v4620_v6  ;;  %1464 = vmatpush.bf16.msrb.mxu2 %v4419_v59  ;;  %v4418_v19 = vld [vmem:[%s6098_s1 + $0x180] sm:$0xff]  ;;  %2392 = vmatpush.bf16.msrb.mxu0 %v4436_v13 }
  0x59   : > { %846 = vst [vmem:[#allocation2 + $0x28] sm:$0xf] %v552_v60  ;;  %v628_v51 = vor.u32 %v626_v45, %v625_v4  ;;  %v629_v21 = vrot.slane %v625_v4, 4  ;;  %v691_v37 = vshrl.u32 %v490_v17, 16  ;;  %v694_v38 = vshll.u32 %v490_v17, 16  ;;  %v4427_v4 = vld [vmem:[%s6098_s1 + $0x48] sm:$0xff] }
  0x5a   : > { %v636_v8 = vor.u32 %v634_v16, %v5254_v26  ;;  %v5264_v33 = vrot.slane %v699_v41, 7  ;;  %v499_v49 = vpack.c.bf16 %v467_v44, %v467_v44  ;;  %v406_v27 = vmul.f32 %v4805_v3, %v4488_v14  ;;  %v5275_v55 = vld [vmem:[#allocation2 + $0x54] sm:$0xff]  ;;  %v934_v17 = vld [vmem:[#allocation2 + $0xc0] sm:$0xf]  ;;  %2203 = vmatpush.bf16.msrb.mxu3 %v4427_v4 }
  0x5b   : > { %v879_v28 = vsel %vm4859_vm5, %v628_v51, %v878_v18  ;;  %v693_v46 = vrot.slane %v691_v37, 7  ;;  %v759_v58 = vshrl.u32 %v498_v63, 16  ;;  %v762_v1 = vshll.u32 %v498_v63, 16  ;;  %v850_v63 = vld [vmem:[#allocation2 + $0x30] sm:$0xf]  ;;  %v4442_v35 = vld [vmem:[%s6098_s1 + $0x1c0] sm:$0xff] }
  0x5c   : > { %880 = vst [vmem:[#allocation2 + $0x60] sm:$0xf] %v879_v28  ;;  %v637_v42 = vsel %vm4844_vm4, %v629_v21, %v636_v8  ;;  %v704_v57 = vor.u32 %v702_v43, %v5264_v33  ;;  %v767_v56 = vshrl.u32 %v499_v49, 16  ;;  %v770_v6 = vshll.u32 %v499_v49, 16  ;;  %v4426_v21 = vld [vmem:[%s6098_s1 + $0x40] sm:$0xff]  ;;  %1465 = vmatpush.bf16.msrb.mxu2 %v4418_v19 }
  0x5d   : > { %1208 = vmatmul.bf16.gmra.mxu2 %v5250_v22  ;;  %v696_v54 = vor.u32 %v694_v38, %v693_v46  ;;  %v697_v50 = vrot.slane %v693_v46, 4  ;;  %881 = vst [vmem:[#allocation2 + $0x64] sm:$0xf] %v637_v42  ;;  %v407_v60 = vmul.f32 %v4805_v3, %v4489_v53  ;;  %v761_v52 = vrot.slane %v759_v58, 7  ;;  %v4403_v3 = vld [vmem:[%s6098_s1 + $0x8] sm:$0xff]  ;;  %v4402_v38 = vld [vmem:[%s6098_s1] sm:$0xff] }
  0x5e   : > { %v442_v62 = vadd.f32 %v4814_v9, %v406_v27  ;;  %v5297_v16 = vrot.slane %v767_v56, 7  ;;  %v834_v23 = vsel %vm5271_vm7, %v519_v5, %v833_v24  ;;  %1304 = vmatpush.bf16.msrb.mxu1 %v4403_v3  ;;  %2204 = vmatpush.bf16.msrb.mxu3 %v4426_v21  ;;  %v4434_v49 = vld [vmem:[%s6098_s1 + $0x100] sm:$0xff]  ;;  %v4399_v27 = vld [vmem:[#allocation2 + $0xb4] sm:$0xff]  ;;  %v536_v58 = vrot.slane %v5071_v12, 4 }
  0x5f   : > { %1228 = vmatmul.bf16.gmra.mxu3 %v4398_v20  ;;  %v907_v45 = vsel %vm4859_vm5, %v696_v54, %v906_v40  ;;  %v705_v61 = vsel %vm4844_vm4, %v697_v50, %v704_v57  ;;  %v443_v18 = vadd.f32 %v4814_v9, %v407_v60  ;;  %v764_v25 = vor.u32 %v762_v1, %v761_v52  ;;  %v4435_v20 = vld [vmem:[%s6098_s1 + $0x108] sm:$0xff]  ;;  %v840_v59 = vld [vmem:[#allocation2 + $0x20] sm:$0x1]  ;;  %v4465_v12 = vld [vmem:[%s6098_s1 + $0x178] sm:$0xff] }
  0x60   : > { %908 = vst [vmem:[#allocation2 + $0x90] sm:$0xf] %v907_v45  ;;  %v765_v14 = vrot.slane %v761_v52, 4  ;;  %v474_v51 = vpack.c.bf16 %v442_v62, %v442_v62  ;;  %v772_v9 = vor.u32 %v770_v6, %v5297_v16  ;;  %2393 = vmatpush.bf16.msrb.mxu0 %v4435_v20  ;;  %v5325_v53 = vld [vmem:[#allocation2 + $0x84] sm:$0xff]  ;;  %v1579_v56 = vld [vmem:[#allocation2] sm:$0xf]  ;;  %3028 = vmatpush.bf16.msra.mxu2 %v4457_v39 }
  0x61   : > { %1168 = vmatmul.bf16.gmra.mxu0 %v5262_v48  ;;  %909 = vst [vmem:[#allocation2 + $0x94] sm:$0xf] %v705_v61  ;;  %v475_v37 = vpack.c.bf16 %v443_v18, %v443_v18  ;;  %v935_v41 = vsel %vm4859_vm5, %v764_v25, %v934_v17  ;;  %v5334_v1 = vld [vmem:[#allocation2 + $0x24] sm:$0xff]  ;;  %v4449_v6 = vld [vmem:[%s6098_s1 + $0x1f8] sm:$0xff]  ;;  %v841_v61 = vsel %vm5271_vm7, %v536_v58, %v840_v59  ;;  %v1582_v52 = vld [vmem:[#allocation2 + $0xc] sm:$0xf] }
  0x62   : > { %835 = vst [vmem:[#allocation2 + $0x14] sm:$0x1] %v834_v23  ;;  %v555_v43 = vshrl.u32 %v474_v51, 16  ;;  %v558_v44 = vshll.u32 %v474_v51, 16  ;;  %v773_v5 = vsel %vm4844_vm4, %v765_v14, %v772_v9  ;;  %1305 = vmatpush.bf16.msrb.mxu1 %v4402_v38  ;;  %v4473_v60 = vld [vmem:[%s6098_s1 + $0x238] sm:$0xff]  ;;  %3218 = vmatpush.bf16.msra.mxu3 %v4465_v12  ;;  %v1637_v4 = vshrl.u32 %v1579_v56, 16 }
  0x63   : > { %1193 = vmatmul.bf16.gmra.mxu1 %v5275_v55  ;;  %936 = vst [vmem:[#allocation2 + $0xc0] sm:$0xf] %v935_v41  ;;  %v563_v8 = vshrl.u32 %v475_v37, 16  ;;  %v566_v28 = vshll.u32 %v475_v37, 16  ;;  %v1583_v62 = vld [vmem:[#allocation2 + $0x10] sm:$0xf] }
  0x64   : > { %937 = vst [vmem:[#allocation2 + $0xc4] sm:$0xf] %v773_v5  ;;  %v557_v46 = vrot.slane %v555_v43, 7  ;;  %2394 = vmatpush.bf16.msrb.mxu0 %v4434_v49  ;;  %v5336_v45 = vld [vmem:[#allocation2 + $0x60] sm:$0xff]  ;;  %v1640_v13 = vshll.u32 %v1579_v56, 16  ;;  %v1646_v3 = vshll.u32 %v1580_v32, 16 }
  0x65   : > { %v5320_v40 = vrot.slane %v563_v8, 7  ;;  %842 = vst [vmem:[#allocation2 + $0x20] sm:$0x1] %v841_v61  ;;  %v1650_v17 = vshrl.u32 %v1580_v32, 16  ;;  %v1661_v18 = vshrl.u32 %v1582_v52, 16  ;;  %v1664_v19 = vshll.u32 %v1582_v52, 16 }
  0x66   : > { %v560_v42 = vor.u32 %v558_v44, %v557_v46  ;;  %v561_v54 = vrot.slane %v557_v46, 4  ;;  %2577 = vmatpush.bf16.msra.mxu1 %v4449_v6  ;;  %v1670_v23 = vshll.u32 %v1583_v62, 16  ;;  %v1674_v25 = vshrl.u32 %v1583_v62, 16  ;;  %v1581_v20 = vld [vmem:[#allocation2 + $0x8] sm:$0x1] }
  0x67   : > { %v568_v50 = vor.u32 %v566_v28, %v5320_v40  ;;  %v1639_v14 = vrot.slane %v1637_v4, 4  ;;  %v1642_v51 = vrot.slane %v1640_v13, 5  ;;  %v1648_v21 = vrot.slane %v1646_v3, 5  ;;  %v1586_v61 = vld [vmem:[#allocation2 + $0x1c] sm:$0xf] }
  0x68   : > { %v851_v24 = vsel %vm4859_vm5, %v560_v42, %v850_v63  ;;  %3408 = vmatpush.bf16.msra.mxu0 %v4473_v60  ;;  %v1652_v9 = vrot.slane %v1650_v17, 4  ;;  %v5354_v37 = vld [vmem:[#allocation2 + $0x90] sm:$0xff]  ;;  %v1663_v38 = vrot.slane %v1661_v18, 4  ;;  %v1666_v41 = vrot.slane %v1664_v19, 5  ;;  %v1585_v60 = vld [vmem:[#allocation2 + $0x18] sm:$0xf] }
  0x69   : > { %v569_v57 = vsel %vm4844_vm4, %v561_v54, %v568_v50  ;;  %852 = vst [vmem:[#allocation2 + $0x30] sm:$0xf] %v851_v24  ;;  %v1672_v43 = vrot.slane %v1670_v23, 5  ;;  %v1676_v44 = vrot.slane %v1674_v25, 4  ;;  %v553_v5 = vrot.slane %v5222_v7, 4 }
  0x6a   : > { %853 = vst [vmem:[#allocation2 + $0x34] sm:$0xf] %v569_v57  ;;  %v1584_v28 = vld [vmem:[#allocation2 + $0x14] sm:$0x1]  ;;  %v1643_v46 = vor.u32 %v1642_v51, %v1639_v14  ;;  %v1653_v63 = vor.u32 %v1652_v9, %v1648_v21  ;;  %v1656_v49 = vshll.u32 %v1581_v20, 16  ;;  %v1667_v54 = vor.u32 %v1666_v41, %v1663_v38  ;;  %v4384_v57 = vld [vmem:[#allocation2] sm:$0xff] }
  0x6b   : > { %v4400_v8 = vld [vmem:[#allocation2 + $0xc0] sm:$0xff]  ;;  %v1677_v50 = vor.u32 %v1676_v44, %v1672_v43  ;;  %v847_v24 = vld [vmem:[#allocation2 + $0x2c] sm:$0x1]  ;;  %v1685_v13 = vshrl.u32 %v1585_v60, 16  ;;  %v1688_v17 = vshll.u32 %v1585_v60, 16  ;;  %v1694_v18 = vshll.u32 %v1586_v61, 16 }
  0x6c   : > { %v848_v7 = vsel %vm5271_vm7, %v553_v5, %v847_v24  ;;  %v1644_v58 = vrot.slane %v1643_v46, 4  ;;  %v1654_v59 = vrot.slane %v1653_v63, 4  ;;  %v1658_v39 = vrot.slane %v1656_v49, 5  ;;  %v1587_v5 = vld [vmem:[#allocation2 + $0x20] sm:$0x1]  ;;  %v4456_v49 = vld [vmem:[%s6098_s1 + $0xb0] sm:$0xff] }
  0x6d   : > { %1213 = vmatmul.bf16.gmra.mxu2 %v5325_v53  ;;  %849 = vst [vmem:[#allocation2 + $0x2c] sm:$0x1] %v848_v7  ;;  %v1668_v32 = vrot.slane %v1667_v54, 4  ;;  %v1678_v12 = vrot.slane %v1677_v50, 4  ;;  %v1698_v19 = vshrl.u32 %v1586_v61, 16  ;;  %v1687_v9 = vrot.slane %v1685_v13, 4 }
  0x6e   : > { %v1649_v52 = vsel %vm5363_vm10, %v1644_v58, %v1648_v21  ;;  %v1659_v62 = vsel %vm5363_vm10, %v1654_v59, %v1658_v39  ;;  %v1690_v20 = vrot.slane %v1688_v17, 5  ;;  %v1696_v21 = vrot.slane %v1694_v18, 5  ;;  %v854_v63 = vld [vmem:[#allocation2 + $0x38] sm:$0x1]  ;;  %v1588_v50 = vld [vmem:[#allocation2 + $0x24] sm:$0xf]  ;;  %3029 = vmatpush.bf16.msra.mxu2 %v4456_v49 }
  0x6f   : > { %1233 = vmatmul.bf16.gmra.mxu3 %v4399_v27  ;;  %v1680_v27 = vshll.u32 %v1584_v28, 16  ;;  %v1673_v4 = vsel %vm5363_vm10, %v1668_v32, %v1672_v43  ;;  %v2085_v23 = vunpack.c.l.b16 %v1649_v52  ;;  %v2086_v25 = vunpack.c.l.b16 %v1659_v62  ;;  %v4448_v24 = vld [vmem:[%s6098_s1 + $0x1f0] sm:$0xff] }
  0x70   : > { %v2087_v14 = vunpack.c.l.b16 %v1673_v4  ;;  %v1700_v38 = vrot.slane %v1698_v19, 4  ;;  %v570_v41 = vrot.slane %v5320_v40, 4  ;;  %v1704_v46 = vshll.u32 %v1587_v5, 16  ;;  %v4464_v40 = vld [vmem:[%s6098_s1 + $0x170] sm:$0xff]  ;;  %2578 = vmatpush.bf16.msra.mxu1 %v4448_v24 }
  0x71   : > { %1173 = vmatmul.bf16.gmra.mxu0 %v5334_v1  ;;  %v5358_v42 = vld [vmem:[#allocation2 + $0x30] sm:$0xff]  ;;  %v1682_v6 = vrot.slane %v1680_v27, 5  ;;  %v2117_v44 = vpack.c.b16 %v2086_v25, %v2085_v23  ;;  %v1589_v27 = vld [vmem:[#allocation2 + $0x28] sm:$0xf]  ;;  %3219 = vmatpush.bf16.msra.mxu3 %v4464_v40  ;;  %v1709_v39 = vshrl.u32 %v1588_v50, 16  ;;  %v1712_v32 = vshll.u32 %v1588_v50, 16 }
  0x72   : > { %v1701_v28 = vor.u32 %v1700_v38, %v1696_v21  ;;  %v855_v54 = vsel %vm5271_vm7, %v570_v41, %v854_v63  ;;  %v1706_v59 = vrot.slane %v1704_v46, 5  ;;  %v587_v18 = vrot.slane %v4848_v34, 4  ;;  %v1591_v41 = vld [vmem:[#allocation2 + $0x30] sm:$0xf]  ;;  %v1592_v34 = vld [vmem:[#allocation2 + $0x34] sm:$0xf] }
  0x73   : > { %1198 = vmatmul.bf16.gmra.mxu1 %v5336_v45  ;;  %v1683_v3 = vsel %vm5363_vm10, %v1678_v12, %v1682_v6  ;;  %856 = vst [vmem:[#allocation2 + $0x38] sm:$0x1] %v855_v54  ;;  %v1718_v12 = vshll.u32 %v1589_v27, 16  ;;  %v1722_v6 = vshrl.u32 %v1589_v27, 16  ;;  %v1711_v52 = vrot.slane %v1709_v39, 4 }
  0x74   : > { %v2088_v51 = vunpack.c.l.b16 %v1683_v3  ;;  %v1702_v58 = vrot.slane %v1701_v28, 4  ;;  %v1714_v62 = vrot.slane %v1712_v32, 5  ;;  %v1742_v28 = vshll.u32 %v1592_v34, 16  ;;  %v868_v39 = vld [vmem:[#allocation2 + $0x50] sm:$0x1]  ;;  %v4455_v32 = vld [vmem:[%s6098_s1 + $0xa8] sm:$0xff] }
  0x75   : > { %v1720_v4 = vrot.slane %v1718_v12, 5  ;;  %v1724_v13 = vrot.slane %v1722_v6, 4  ;;  %v1746_v46 = vshrl.u32 %v1592_v34, 16  ;;  %3030 = vmatpush.bf16.msra.mxu2 %v4455_v32 }
  0x76   : > { %v2118_v43 = vpack.c.b16 %v2088_v51, %v2087_v14  ;;  %v1707_v61 = vsel %vm5363_vm10, %v1702_v58, %v1706_v59  ;;  %v1715_v19 = vor.u32 %v1714_v62, %v1711_v52  ;;  %v861_v51 = vld [vmem:[#allocation2 + $0x44] sm:$0x1]  ;;  %v1744_v27 = vrot.slane %v1742_v28, 5  ;;  %v4447_v52 = vld [vmem:[%s6098_s1 + $0x1e8] sm:$0xff]  ;;  %v1594_v62 = vld [vmem:[#allocation2 + $0x3c] sm:$0xf] }
  0x77   : > { %v2090_v17 = vunpack.c.l.b16 %v1707_v61  ;;  %v1725_v23 = vor.u32 %v1724_v13, %v1720_v4  ;;  %v1748_v40 = vrot.slane %v1746_v46, 4  ;;  %v4463_v61 = vld [vmem:[%s6098_s1 + $0x168] sm:$0xff]  ;;  %2579 = vmatpush.bf16.msra.mxu1 %v4447_v52  ;;  %v875_v46 = vld [vmem:[#allocation2 + $0x5c] sm:$0x1] }
  0x78   : > { %3220 = vmatpush.bf16.msra.mxu3 %v4463_v61 }
  0x79   : > { %v1749_v58 = vor.u32 %v1748_v40, %v1744_v27 }
  0x7a   : > { %v1593_v24 = vld [vmem:[#allocation2 + $0x38] sm:$0x1] }
  0x7b   : > { %v1752_v59 = vshll.u32 %v1593_v24, 16  ;;  %v1750_v6 = vrot.slane %v1749_v58, 4 }
  0x7d   : > { %1218 = vmatmul.bf16.gmra.mxu2 %v5354_v37 }
  0x7f   : > { %1238 = vmatmul.bf16.gmra.mxu3 %v4400_v8  ;;  %v1691_v8 = vor.u32 %v1690_v20, %v1687_v9  ;;  %v862_v9 = vsel %vm5271_vm7, %v587_v18, %v861_v51  ;;  %v1716_v20 = vrot.slane %v1715_v19, 4 }
  0x80   : > { %863 = vst [vmem:[#allocation2 + $0x44] sm:$0x1] %v862_v9 }
  0x81   : > { %1178 = vmatmul.bf16.gmra.mxu0 %v5358_v42  ;;  %v1692_v7 = vrot.slane %v1691_v8, 4  ;;  %v1736_v8 = vshll.u32 %v1591_v41, 16 }
  0x83   : > { %1306 = vmatmul.bf16.vlgmr.msrb.gmra.mxu1 %v4384_v57  ;;  %v4472_v57 = vld [vmem:[%s6098_s1 + $0x230] sm:$0xff]  ;;  %v1697_v60 = vsel %vm5363_vm10, %v1692_v7, %v1696_v21  ;;  %v1726_v21 = vrot.slane %v1725_v23, 4  ;;  %v1738_v50 = vrot.slane %v1736_v8, 5  ;;  %v4471_v23 = vld [vmem:[%s6098_s1 + $0x228] sm:$0xff] }
  0x84   : > { %3409 = vmatpush.bf16.msra.mxu0 %v4472_v57  ;;  %v2089_v3 = vunpack.c.l.b16 %v1697_v60  ;;  %v604_v57 = vrot.slane %v5008_v10, 4  ;;  %v1754_v60 = vrot.slane %v1752_v59, 5 }
  0x86   : > { %v5398_v14 = vpack.c.b16 %v2090_v17, %v2089_v3  ;;  %v869_v12 = vsel %vm5271_vm7, %v604_v57, %v868_v39  ;;  %v1755_v3 = vsel %vm5363_vm10, %v1750_v6, %v1754_v60  ;;  %v1757_v17 = vshrl.u32 %v1594_v62, 16 }
  0x87   : > { %870 = vst [vmem:[#allocation2 + $0x50] sm:$0x1] %v869_v12 }
  0x88   : > { %3410 = vmatpush.bf16.msra.mxu0 %v4471_v23  ;;  %v1759_v51 = vrot.slane %v1757_v17, 4 }
  0x8d   : > { %1466 = vmatmul.bf16.vlgmr.msrb.gmra.mxu2 %v5262_v48 }
  0x8e   : > { %v1599_v52 = vld [vmem:[#allocation2 + $0x50] sm:$0x1] }
  0x8f   : > { %2205 = vmatmul.bf16.vlgmr.msrb.gmra.mxu3 %v2117_v44  ;;  %v1721_v44 = vsel %vm5363_vm10, %v1716_v20, %v1720_v4  ;;  %v1595_v4 = vld [vmem:[#allocation2 + $0x40] sm:$0xf] }
  0x90   : > { %v2091_v63 = vunpack.c.l.b16 %v1721_v44  ;;  %v1766_v18 = vshll.u32 %v1595_v4, 16  ;;  %v1770_v19 = vshrl.u32 %v1595_v4, 16  ;;  %v4684_v44 = vld [vmem:[#allocation2 + $0x3c] sm:$0xff] }
  0x91   : > { %2395 = vmatmul.bf16.vlgmr.msrb.gmra.mxu0 %v2118_v43 }
  0x92   : > { %v1768_v20 = vrot.slane %v1766_v18, 5  ;;  %v4454_v18 = vld [vmem:[%s6098_s1 + $0xa0] sm:$0xff] }
  0x93   : > { %1311 = vmatmul.bf16.gmra.mxu1 %v5189_v2  ;;  %v1590_v2 = vld [vmem:[#allocation2 + $0x2c] sm:$0x1]  ;;  %3031 = vmatpush.bf16.msra.mxu2 %v4454_v18 }
  0x94   : > { %v1728_v25 = vshll.u32 %v1590_v2, 16  ;;  %v1760_v2 = vshll.u32 %v1594_v62, 16 }
  0x96   : > { %v1730_v38 = vrot.slane %v1728_v25, 5  ;;  %v2094_v25 = vunpack.c.l.b16 %v1755_v3  ;;  %v1762_v9 = vrot.slane %v1760_v2, 5  ;;  %v882_v2 = vld [vmem:[#allocation2 + $0x68] sm:$0x1] }
  0x98   : > { %v1731_v5 = vsel %vm5363_vm10, %v1726_v21, %v1730_v38  ;;  %v1772_v21 = vrot.slane %v1770_v19, 4  ;;  %v621_v38 = vrot.slane %v5137_v30, 4  ;;  %v1597_v30 = vld [vmem:[#allocation2 + $0x48] sm:$0xf] }
  0x99   : > { %v2092_v49 = vunpack.c.l.b16 %v1731_v5  ;;  %v1781_v40 = vshrl.u32 %v1597_v30, 16  ;;  %v1784_v24 = vshll.u32 %v1597_v30, 16 }
  0x9a   : > { %v1773_v8 = vor.u32 %v1772_v21, %v1768_v20  ;;  %v1600_v21 = vld [vmem:[#allocation2 + $0x54] sm:$0xf] }
  0x9b   : > { %v1783_v32 = vrot.slane %v1781_v40, 4  ;;  %v1786_v12 = vrot.slane %v1784_v24, 5 }
  0x9d   : > { %1471 = vmatmul.bf16.gmra.mxu2 %v5334_v1  ;;  %v1787_v62 = vor.u32 %v1786_v12, %v1783_v32  ;;  %v655_v12 = vrot.slane %v4897_v0, 4 }
  0x9f   : > { %2210 = vmatmul.bf16.gmra.mxu3 %v2118_v43  ;;  %v1733_v43 = vshrl.u32 %v1591_v41, 16  ;;  %v1596_v41 = vld [vmem:[#allocation2 + $0x44] sm:$0x1] }
  0xa0   : > { %v1776_v28 = vshll.u32 %v1596_v41, 16  ;;  %v4446_v41 = vld [vmem:[%s6098_s1 + $0x1e0] sm:$0xff] }
  0xa1   : > { %2400 = vmatmul.bf16.gmra.mxu0 %v5398_v14  ;;  %v1735_v54 = vrot.slane %v1733_v43, 4  ;;  %v1763_v43 = vor.u32 %v1762_v9, %v1759_v51  ;;  %v4462_v9 = vld [vmem:[%s6098_s1 + $0x160] sm:$0xff]  ;;  %2580 = vmatpush.bf16.msra.mxu1 %v4446_v41 }
  0xa2   : > { %3221 = vmatpush.bf16.msra.mxu3 %v4462_v9 }
  0xa3   : > { %1316 = vmatmul.bf16.gmra.mxu1 %v5262_v48  ;;  %v5410_v48 = vpack.c.b16 %v2092_v49, %v2091_v63  ;;  %v1739_v7 = vor.u32 %v1738_v50, %v1735_v54  ;;  %v876_v63 = vsel %vm5271_vm7, %v621_v38, %v875_v46  ;;  %v1598_v49 = vld [vmem:[#allocation2 + $0x4c] sm:$0xf]  ;;  %v1764_v54 = vrot.slane %v1763_v43, 4  ;;  %v1601_v38 = vld [vmem:[#allocation2 + $0x58] sm:$0xf] }
  0xa4   : > { %877 = vst [vmem:[#allocation2 + $0x5c] sm:$0x1] %v876_v63  ;;  %v1774_v50 = vrot.slane %v1773_v8, 4  ;;  %v1790_v57 = vshll.u32 %v1598_v49, 16  ;;  %v1808_v46 = vshll.u32 %v1600_v21, 16  ;;  %v1814_v63 = vshll.u32 %v1601_v38, 16 }
  0xa5   : > { %v1740_v10 = vrot.slane %v1739_v7, 4  ;;  %v1794_v7 = vshrl.u32 %v1598_v49, 16  ;;  %v1769_v58 = vsel %vm5363_vm10, %v1764_v54, %v1768_v20  ;;  %v1818_v30 = vshrl.u32 %v1601_v38, 16  ;;  %v4470_v54 = vld [vmem:[%s6098_s1 + $0x220] sm:$0xff] }
  0xa6   : > { %v2095_v60 = vunpack.c.l.b16 %v1769_v58  ;;  %3411 = vmatpush.bf16.msra.mxu0 %v4470_v54 }
  0xa7   : > { %v1745_v13 = vsel %vm5363_vm10, %v1740_v10, %v1744_v27  ;;  %v1778_v27 = vrot.slane %v1776_v28, 5  ;;  %v1792_v10 = vrot.slane %v1790_v57, 5  ;;  %v1796_v6 = vrot.slane %v1794_v7, 4 }
  0xa8   : > { %v5434_v34 = vpop.f32.mrf.mxu1  ;;  %v1805_v28 = vshrl.u32 %v1600_v21, 16  ;;  %v1810_v57 = vrot.slane %v1808_v46, 5  ;;  %v1816_v7 = vrot.slane %v1814_v63, 5  ;;  %v1820_v58 = vrot.slane %v1818_v30, 4 }
  0xa9   : > { %v1779_v59 = vsel %vm5363_vm10, %v1774_v50, %v1778_v27  ;;  %v1797_v4 = vor.u32 %v1796_v6, %v1792_v10 }
  0xaa   : > { %v2096_v61 = vunpack.c.l.b16 %v1779_v59  ;;  %v1807_v24 = vrot.slane %v1805_v28, 4 }
  0xab   : > { %v1602_v32 = vld [vmem:[#allocation2 + $0x5c] sm:$0x1] }
  0xac   : > { %v5451_v3 = vpack.c.b16 %v2096_v61, %v2095_v60  ;;  %v1811_v6 = vor.u32 %v1810_v57, %v1807_v24  ;;  %v1821_v60 = vor.u32 %v1820_v58, %v1816_v7  ;;  %v1824_v61 = vshll.u32 %v1602_v32, 16 }
  0xad   : > { %1476 = vmatmul.bf16.gmra.mxu2 %v5358_v42  ;;  %v672_v57 = vrot.slane %v5029_v36, 4 }
  0xae   : > { %v1812_v0 = vrot.slane %v1811_v6, 4  ;;  %v1826_v18 = vrot.slane %v1824_v61, 5  ;;  %v896_v61 = vld [vmem:[#allocation2 + $0x80] sm:$0x1] }
  0xaf   : > { %2215 = vmatmul.bf16.gmra.mxu3 %v5398_v14  ;;  %v897_v36 = vsel %vm5271_vm7, %v672_v57, %v896_v61 }
  0xb0   : > { %v5447_v39 = vpop.f32.mrf.mxu1  ;;  %898 = vst [vmem:[#allocation2 + $0x80] sm:$0x1] %v897_v36 }
  0xb1   : > { %2405 = vmatmul.bf16.gmra.mxu0 %v5410_v48 }
  0xb3   : > { %1321 = vmatmul.bf16.gmra.mxu1 %v5334_v1  ;;  %v2093_v1 = vunpack.c.l.b16 %v1745_v13  ;;  %v1800_v13 = vshll.u32 %v1599_v52, 16 }
  0xb5   : > { %v5436_v5 = vpack.c.b16 %v2094_v25, %v2093_v1  ;;  %v1788_v1 = vrot.slane %v1787_v62, 4  ;;  %v1798_v25 = vrot.slane %v1797_v4, 4  ;;  %v1802_v51 = vrot.slane %v1800_v13, 5 }
  0xb7   : > { %v1793_v43 = vsel %vm5363_vm10, %v1788_v1, %v1792_v10  ;;  %v1803_v8 = vsel %vm5363_vm10, %v1798_v25, %v1802_v51  ;;  %v1603_v1 = vld [vmem:[#allocation2 + $0x60] sm:$0xf]  ;;  %v1604_v25 = vld [vmem:[#allocation2 + $0x64] sm:$0xf]  ;;  %v1817_v51 = vsel %vm5363_vm10, %v1812_v0, %v1816_v7 }
  0xb8   : > { %v2098_v27 = vunpack.c.l.b16 %v1803_v8  ;;  %v1829_v38 = vshrl.u32 %v1603_v1, 16  ;;  %v1832_v41 = vshll.u32 %v1603_v1, 16  ;;  %v1842_v8 = vshrl.u32 %v1604_v25, 16 }
  0xb9   : > { %v2099_v63 = vunpack.c.l.b16 %v1817_v51 }
  0xba   : > { %v1831_v54 = vrot.slane %v1829_v38, 4  ;;  %v1844_v24 = vrot.slane %v1842_v8, 4  ;;  %v1607_v38 = vld [vmem:[#allocation2 + $0x70] sm:$0xf] }
  0xbd   : > { %1481 = vmatmul.bf16.gmra.mxu2 %v4684_v44 }
  0xbf   : > { %2220 = vmatmul.bf16.gmra.mxu3 %v5410_v48 }
  0xc1   : > { %2410 = vmatmul.bf16.gmra.mxu0 %v5436_v5 }
  0xc3   : > { %1326 = vmatmul.bf16.gmra.mxu1 %v5358_v42  ;;  %v638_v42 = vrot.slane %v5254_v26, 4 }
  0xc5   : > { %v883_v19 = vsel %vm5271_vm7, %v638_v42, %v882_v2  ;;  %v889_v42 = vld [vmem:[#allocation2 + $0x74] sm:$0x1]  ;;  %v1822_v2 = vrot.slane %v1821_v60, 4 }
  0xc6   : > { %884 = vst [vmem:[#allocation2 + $0x68] sm:$0x1] %v883_v19  ;;  %v890_v62 = vsel %vm5271_vm7, %v655_v12, %v889_v42  ;;  %v4453_v42 = vld [vmem:[%s6098_s1 + $0x98] sm:$0xff] }
  0xc7   : > { %891 = vst [vmem:[#allocation2 + $0x74] sm:$0x1] %v890_v62  ;;  %v1827_v9 = vsel %vm5363_vm10, %v1822_v2, %v1826_v18  ;;  %3032 = vmatpush.bf16.msra.mxu2 %v4453_v42  ;;  %v4461_v2 = vld [vmem:[%s6098_s1 + $0x158] sm:$0xff] }
  0xc8   : > { %3222 = vmatpush.bf16.msra.mxu3 %v4461_v2  ;;  %v689_v2 = vrot.slane %v5156_v29, 4 }
  0xcd   : > { %1486 = vmatmul.bf16.gmra.mxu2 %v5204_v31  ;;  %v1605_v7 = vld [vmem:[#allocation2 + $0x68] sm:$0x1] }
  0xce   : > { %v5453_v17 = vpop.f32.mrf.mxu0  ;;  %v1848_v60 = vshll.u32 %v1605_v7, 16 }
  0xcf   : > { %2225 = vmatmul.bf16.gmra.mxu3 %v5436_v5 }
  0xd0   : > { %v5461_v26 = vpop.f32.mrf.mxu2  ;;  %v5463_v23 = vpop.f32.mrf.mxu1  ;;  %v1850_v51 = vrot.slane %v1848_v60, 5 }
  0xd1   : > { %2415 = vmatmul.bf16.gmra.mxu0 %v5451_v3 }
  0xd2   : > { %v5469_v20 = vpop.f32.mrf.mxu3 }
  0xd3   : > { %1331 = vmatmul.bf16.gmra.mxu1 %v4684_v44  ;;  %v2097_v44 = vunpack.c.l.b16 %v1793_v43  ;;  %v1838_v43 = vshll.u32 %v1604_v25, 16 }
  0xd5   : > { %v5491_v10 = vpack.c.b16 %v2098_v27, %v2097_v44  ;;  %v1834_v44 = vrot.slane %v1832_v41, 5  ;;  %v1840_v27 = vrot.slane %v1838_v43, 5  ;;  %v4445_v41 = vld [vmem:[%s6098_s1 + $0x1d8] sm:$0xff] }
  0xd6   : > { %v5478_v49 = vpop.f32.mrf.mxu0  ;;  %2581 = vmatpush.bf16.msra.mxu1 %v4445_v41 }
  0xd7   : > { %v1835_v12 = vor.u32 %v1834_v44, %v1831_v54  ;;  %v1845_v6 = vor.u32 %v1844_v24, %v1840_v27  ;;  %v1862_v44 = vshll.u32 %v1607_v38, 16  ;;  %v1866_v24 = vshrl.u32 %v1607_v38, 16 }
  0xd8   : > { %v5483_v50 = vpop.f32.mrf.mxu2  ;;  %v5485_v40 = vpop.f32.mrf.mxu1 }
  0xd9   : > { %v1836_v1 = vrot.slane %v1835_v12, 4  ;;  %v1846_v25 = vrot.slane %v1845_v6, 4  ;;  %v1868_v36 = vrot.slane %v1866_v24, 4 }
  0xda   : > { %v5487_v59 = vpop.f32.mrf.mxu3 }
  0xdb   : > { %6114 = vst [vmem:[#allocation3_spill] sm:$0xff] %v5487_v59  ;;  %v1851_v54 = vsel %vm5363_vm10, %v1846_v25, %v1850_v51  ;;  %v5560_v25 = vld [vmem:[#allocation2 + $0x6c] sm:$0xff] }
  0xdc   : > { %v2102_v6 = vunpack.c.l.b16 %v1851_v54 }
  0xdd   : > { %1491 = vmatmul.bf16.gmra.mxu2 %v5275_v55 }
  0xde   : > { %v5493_v52 = vpop.f32.mrf.mxu0 }
  0xdf   : > { %2230 = vmatmul.bf16.gmra.mxu3 %v5451_v3 }
  0xe0   : > { %v5498_v4 = vpop.f32.mrf.mxu2  ;;  %v5500_v13 = vpop.f32.mrf.mxu1 }
  0xe1   : > { %2420 = vmatmul.bf16.gmra.mxu0 %v5491_v10 }
  0xe2   : > { %v5503_v19 = vpop.f32.mrf.mxu3 }
  0xe3   : > { %6115 = vst [vmem:[#allocation4_spill] sm:$0xff] %v5503_v19  ;;  %1336 = vmatmul.bf16.gmra.mxu1 %v5204_v31  ;;  %v2100_v31 = vunpack.c.l.b16 %v1827_v9  ;;  %v1606_v9 = vld [vmem:[#allocation2 + $0x6c] sm:$0xf] }
  0xe4   : > { %v1853_v43 = vshrl.u32 %v1606_v9, 16  ;;  %v1856_v8 = vshll.u32 %v1606_v9, 16 }
  0xe5   : > { %v5520_v58 = vpack.c.b16 %v2100_v31, %v2099_v63  ;;  %v1841_v31 = vsel %vm5363_vm10, %v1836_v1, %v1840_v27  ;;  %v1864_v27 = vrot.slane %v1862_v44, 5  ;;  %v1608_v1 = vld [vmem:[#allocation2 + $0x74] sm:$0x1] }
  0xe6   : > { %v5510_v21 = vpop.f32.mrf.mxu0  ;;  %v2101_v12 = vunpack.c.l.b16 %v1841_v31  ;;  %v1855_v60 = vrot.slane %v1853_v43, 4  ;;  %v1858_v61 = vrot.slane %v1856_v8, 5  ;;  %v1872_v31 = vshll.u32 %v1608_v1, 16  ;;  %v903_v43 = vld [vmem:[#allocation2 + $0x8c] sm:$0x1] }
  0xe7   : > { %v1869_v41 = vor.u32 %v1868_v36, %v1864_v27  ;;  %v904_v8 = vsel %vm5271_vm7, %v689_v2, %v903_v43 }
  0xe8   : > { %v5512_v28 = vpop.f32.mrf.mxu2  ;;  %v5514_v46 = vpop.f32.mrf.mxu1  ;;  %v5563_v51 = vpack.c.b16 %v2102_v6, %v2101_v12  ;;  %v1859_v9 = vor.u32 %v1858_v61, %v1855_v60  ;;  %905 = vst [vmem:[#allocation2 + $0x8c] sm:$0x1] %v904_v8  ;;  %v1874_v60 = vrot.slane %v1872_v31, 5  ;;  %v1610_v61 = vld [vmem:[#allocation2 + $0x7c] sm:$0xf] }
  0xe9   : > { %v1870_v6 = vrot.slane %v1869_v41, 4  ;;  %v1886_v43 = vshll.u32 %v1610_v61, 16  ;;  %v1890_v8 = vshrl.u32 %v1610_v61, 16 }
  0xea   : > { %v5516_v30 = vpop.f32.mrf.mxu3  ;;  %v1860_v24 = vrot.slane %v1859_v9, 4 }
  0xeb   : > { %6116 = vst [vmem:[#allocation5_spill] sm:$0xff] %v5516_v30  ;;  %v1892_v30 = vrot.slane %v1890_v8, 4 }
  0xec   : > { %v1865_v2 = vsel %vm5363_vm10, %v1860_v24, %v1864_v27  ;;  %v1611_v27 = vld [vmem:[#allocation2 + $0x80] sm:$0x1]  ;;  %v706_v24 = vrot.slane %v5264_v33, 4 }
  0xed   : > { %1496 = vmatmul.bf16.gmra.mxu2 %v5336_v45 }
  0xee   : > { %v5522_v32 = vpop.f32.mrf.mxu0 }
  0xef   : > { %2235 = vmatmul.bf16.gmra.mxu3 %v5491_v10 }
  0xf0   : > { %v5530_v62 = vpop.f32.mrf.mxu2  ;;  %v5532_v0 = vpop.f32.mrf.mxu1 }
  0xf1   : > { %2425 = vmatmul.bf16.gmra.mxu0 %v5520_v58 }
  0xf2   : > { %v5538_v18 = vpop.f32.mrf.mxu3 }
  0xf3   : > { %6117 = vst [vmem:[#allocation6_spill] sm:$0xff] %v5538_v18  ;;  %1341 = vmatmul.bf16.gmra.mxu1 %v5275_v55  ;;  %v4469_v55 = vld [vmem:[%s6098_s1 + $0x218] sm:$0xff] }
  0xf4   : > { %3412 = vmatpush.bf16.msra.mxu0 %v4469_v55  ;;  %v1609_v55 = vld [vmem:[#allocation2 + $0x78] sm:$0xf] }
  0xf5   : > { %v1877_v36 = vshrl.u32 %v1609_v55, 16  ;;  %v1880_v1 = vshll.u32 %v1609_v55, 16  ;;  %v1888_v55 = vrot.slane %v1886_v43, 5 }
  0xf6   : > { %v5544_v63 = vpop.f32.mrf.mxu0 }
  0xf7   : > { %v1879_v31 = vrot.slane %v1877_v36, 4  ;;  %v910_v36 = vld [vmem:[#allocation2 + $0x98] sm:$0x1] }
  0xf8   : > { %v5553_v57 = vpop.f32.mrf.mxu2  ;;  %v5555_v7 = vpop.f32.mrf.mxu1 }
  0xfa   : > { %v5557_v42 = vpop.f32.mrf.mxu3 }
  0xfb   : > { %6118 = vst [vmem:[#allocation7_spill] sm:$0xff] %v5557_v42 }
  0xfd   : > { %1501 = vmatmul.bf16.gmra.mxu2 %v5560_v25 }
  0xfe   : > { %v5565_v38 = vpop.f32.mrf.mxu0 }
  0xff   : > { %2240 = vmatmul.bf16.gmra.mxu3 %v5520_v58 }
 0x100   : > { %v5570_v54 = vpop.f32.mrf.mxu2  ;;  %v1307_v29 = vpop.f32.mrf.mxu1 }
 0x101   : > { %2430 = vmatmul.bf16.gmra.mxu0 %v5563_v51  ;;  %v1308_v44 = vadd.f32 %v1307_v29, %v5453_v17  ;;  %v1875_v17 = vsel %vm5363_vm10, %v1870_v6, %v1874_v60  ;;  %v2103_v29 = vunpack.c.l.b16 %v1865_v2  ;;  %v1893_v60 = vor.u32 %v1892_v30, %v1888_v55 }
 0x102   : > { %v5574_v12 = vpop.f32.mrf.mxu3  ;;  %v2104_v18 = vunpack.c.l.b16 %v1875_v17  ;;  %v1896_v2 = vshll.u32 %v1611_v27, 16  ;;  %v1612_v17 = vld [vmem:[#allocation2 + $0x84] sm:$0xf] }
 0x103   : > { %6119 = vst [vmem:[#allocation8_spill] sm:$0xff] %v5574_v12  ;;  %1346 = vmatmul.bf16.gmra.mxu1 %v5336_v45  ;;  %v1882_v12 = vrot.slane %v1880_v1, 5  ;;  %v911_v1 = vsel %vm5271_vm7, %v706_v24, %v910_v36  ;;  %v1901_v24 = vshrl.u32 %v1612_v17, 16 }
 0x104   : > { %v5590_v6 = vpack.c.b16 %v2104_v18, %v2103_v29  ;;  %912 = vst [vmem:[#allocation2 + $0x98] sm:$0x1] %v911_v1  ;;  %v1894_v18 = vrot.slane %v1893_v60, 4  ;;  %v1898_v8 = vrot.slane %v1896_v2, 5  ;;  %v4460_v29 = vld [vmem:[%s6098_s1 + $0x150] sm:$0xff] }
 0x105   : > { %v1883_v61 = vor.u32 %v1882_v12, %v1879_v31  ;;  %v1613_v31 = vld [vmem:[#allocation2 + $0x88] sm:$0xf]  ;;  %3223 = vmatpush.bf16.msra.mxu3 %v4460_v29 }
 0x106   : > { %v5579_v42 = vpop.f32.mrf.mxu0  ;;  %v1899_v60 = vsel %vm5363_vm10, %v1894_v18, %v1898_v8  ;;  %v1910_v2 = vshll.u32 %v1613_v31, 16  ;;  %v1914_v36 = vshrl.u32 %v1613_v31, 16 }
 0x107   : > { %v1884_v12 = vrot.slane %v1883_v61, 4  ;;  %v1904_v61 = vshll.u32 %v1612_v17, 16 }
 0x108   : > { %v5583_v9 = vpop.f32.mrf.mxu2  ;;  %v1309_v41 = vpop.f32.mrf.mxu1  ;;  %v1912_v8 = vrot.slane %v1910_v2, 5 }
 0x109   : > { %v1310_v45 = vadd.f32 %v1309_v41, %v5478_v49  ;;  %v4452_v49 = vld [vmem:[%s6098_s1 + $0x90] sm:$0xff] }
 0x10a   : > { %v5586_v19 = vpop.f32.mrf.mxu3  ;;  %3033 = vmatpush.bf16.msra.mxu2 %v4452_v49 }
 0x10b   : > { %6120 = vst [vmem:[#allocation9_spill] sm:$0xff] %v5586_v19 }
 0x10d   : > { %1506 = vmatmul.bf16.gmra.mxu2 %v5250_v22 }
 0x10e   : > { %v2396_v59 = vpop.f32.mrf.mxu0 }
 0x10f   : > { %2245 = vmatmul.bf16.gmra.mxu3 %v5563_v51 }
 0x110   : > { %v1467_v43 = vpop.f32.mrf.mxu2  ;;  %v1312_v33 = vpop.f32.mrf.mxu1 }
 0x111   : > { %2435 = vmatmul.bf16.gmra.mxu0 %v5590_v6  ;;  %v1547_v22 = vadd.f32 %v1467_v43, %v1308_v44  ;;  %v1313_v30 = vadd.f32 %v1312_v33, %v5493_v52  ;;  %v4444_v44 = vld [vmem:[%s6098_s1 + $0x1d0] sm:$0xff]  ;;  %v1889_v52 = vsel %vm5363_vm10, %v1884_v12, %v1888_v55  ;;  %v1903_v55 = vrot.slane %v1901_v24, 4 }
 0x112   : > { %v2206_v41 = vpop.f32.mrf.mxu3  ;;  %2582 = vmatpush.bf16.msra.mxu1 %v4444_v44  ;;  %v2105_v33 = vunpack.c.l.b16 %v1889_v52  ;;  %v1906_v12 = vrot.slane %v1904_v61, 5 }
 0x113   : > { %v2286_v27 = vadd.f32 %v2206_v41, %v1547_v22  ;;  %1351 = vmatmul.bf16.gmra.mxu1 %v5560_v25  ;;  %v4468_v25 = vld [vmem:[%s6098_s1 + $0x210] sm:$0xff]  ;;  %v2106_v22 = vunpack.c.l.b16 %v1899_v60  ;;  %v1916_v41 = vrot.slane %v1914_v36, 4 }
 0x114   : > { %3413 = vmatpush.bf16.msra.mxu0 %v4468_v25 }
 0x115   : > { %v5611_v49 = vadd.f32 %v2396_v59, %v2286_v27  ;;  %v1614_v59 = vld [vmem:[#allocation2 + $0x8c] sm:$0x1]  ;;  %v723_v27 = vrot.slane %v4910_v11, 4  ;;  %v5619_v19 = vpack.c.b16 %v2106_v22, %v2105_v33  ;;  %v1917_v52 = vor.u32 %v1916_v41, %v1912_v8 }
 0x116   : > { %v2398_v1 = vpop.f32.mrf.mxu0  ;;  %v1920_v60 = vshll.u32 %v1614_v59, 16 }
 0x117   : > { %6121 = vst [vmem:[#allocation10_spill] sm:$0xff] %v5611_v49  ;;  %v1907_v49 = vor.u32 %v1906_v12, %v1903_v55  ;;  %v4686_v12 = vld [vmem:[#allocation2 + $0x78] sm:$0xff] }
 0x118   : > { %v1469_v43 = vpop.f32.mrf.mxu2  ;;  %v1314_v29 = vpop.f32.mrf.mxu1  ;;  %v1922_v33 = vrot.slane %v1920_v60, 5 }
 0x119   : > { %v1548_v17 = vadd.f32 %v1469_v43, %v1310_v45  ;;  %v1315_v18 = vadd.f32 %v1314_v29, %v5510_v21  ;;  %v917_v45 = vld [vmem:[#allocation2 + $0xa4] sm:$0x1]  ;;  %v1908_v11 = vrot.slane %v1907_v49, 4  ;;  %v1918_v43 = vrot.slane %v1917_v52, 4  ;;  %v1616_v29 = vld [vmem:[#allocation2 + $0x94] sm:$0xf] }
 0x11a   : > { %v2208_v31 = vpop.f32.mrf.mxu3  ;;  %v918_v21 = vsel %vm5271_vm7, %v723_v27, %v917_v45  ;;  %v1934_v59 = vshll.u32 %v1616_v29, 16 }
 0x11b   : > { %v2287_v44 = vadd.f32 %v2208_v31, %v1548_v17  ;;  %919 = vst [vmem:[#allocation2 + $0xa4] sm:$0x1] %v918_v21  ;;  %v1913_v17 = vsel %vm5363_vm10, %v1908_v11, %v1912_v8  ;;  %v1923_v49 = vsel %vm5363_vm10, %v1918_v43, %v1922_v33  ;;  %v740_v43 = vrot.slane %v5039_v47, 4 }
 0x11c   : > { %v2107_v52 = vunpack.c.l.b16 %v1913_v17  ;;  %v2108_v60 = vunpack.c.l.b16 %v1923_v49  ;;  %v1936_v8 = vrot.slane %v1934_v59, 5 }
 0x11d   : > { %1511 = vmatmul.bf16.gmra.mxu2 %v5325_v53  ;;  %v5621_v24 = vadd.f32 %v2398_v1, %v2287_v44  ;;  %v1615_v1 = vld [vmem:[#allocation2 + $0x90] sm:$0xf] }
 0x11e   : > { %v2401_v61 = vpop.f32.mrf.mxu0  ;;  %v1925_v41 = vshrl.u32 %v1615_v1, 16  ;;  %v1928_v31 = vshll.u32 %v1615_v1, 16 }
 0x11f   : > { %2250 = vmatmul.bf16.gmra.mxu3 %v5590_v6 }
 0x120   : > { %v1472_v2 = vpop.f32.mrf.mxu2  ;;  %v1317_v36 = vpop.f32.mrf.mxu1  ;;  %v1927_v21 = vrot.slane %v1925_v41, 4 }
 0x121   : > { %2440 = vmatmul.bf16.gmra.mxu0 %v5619_v19  ;;  %v1549_v53 = vadd.f32 %v1472_v2, %v1313_v30  ;;  %v1318_v25 = vadd.f32 %v1317_v36, %v5522_v32  ;;  %v1938_v30 = vshrl.u32 %v1616_v29, 16  ;;  %v1930_v2 = vrot.slane %v1928_v31, 5 }
 0x122   : > { %v2211_v22 = vpop.f32.mrf.mxu3 }
 0x123   : > { %v2288_v55 = vadd.f32 %v2211_v22, %v1549_v53  ;;  %1356 = vmatmul.bf16.gmra.mxu1 %v4686_v12  ;;  %v1940_v11 = vrot.slane %v1938_v30, 4  ;;  %v1617_v22 = vld [vmem:[#allocation2 + $0x98] sm:$0x1]  ;;  %v1931_v29 = vor.u32 %v1930_v2, %v1927_v21  ;;  %v1619_v21 = vld [vmem:[#allocation2 + $0xa0] sm:$0xf] }
 0x124   : > { %v1944_v12 = vshll.u32 %v1617_v22, 16 }
 0x125   : > { %v5632_v27 = vadd.f32 %v2401_v61, %v2288_v55  ;;  %v5637_v61 = vpack.c.b16 %v2108_v60, %v2107_v52  ;;  %v1941_v55 = vor.u32 %v1940_v11, %v1936_v8  ;;  %v1618_v52 = vld [vmem:[#allocation2 + $0x9c] sm:$0xf]  ;;  %v4459_v60 = vld [vmem:[%s6098_s1 + $0x148] sm:$0xff] }
 0x126   : > { %v2403_v32 = vpop.f32.mrf.mxu0  ;;  %3224 = vmatpush.bf16.msra.mxu3 %v4459_v60  ;;  %v1949_v11 = vshrl.u32 %v1618_v52, 16  ;;  %v757_v60 = vrot.slane %v5187_v15, 4 }
 0x128   : > { %v1474_v44 = vpop.f32.mrf.mxu2  ;;  %v1319_v45 = vpop.f32.mrf.mxu1 }
 0x129   : > { %v1550_v36 = vadd.f32 %v1474_v44, %v1315_v18  ;;  %v1320_v53 = vadd.f32 %v1319_v45, %v5544_v63  ;;  %v924_v18 = vld [vmem:[#allocation2 + $0xb0] sm:$0x1]  ;;  %v4451_v63 = vld [vmem:[%s6098_s1 + $0x88] sm:$0xff]  ;;  %v1946_v44 = vrot.slane %v1944_v12, 5 }
 0x12a   : > { %v2213_v1 = vpop.f32.mrf.mxu3  ;;  %v925_v47 = vsel %vm5271_vm7, %v740_v43, %v924_v18  ;;  %3034 = vmatpush.bf16.msra.mxu2 %v4451_v63  ;;  %v1958_v43 = vshll.u32 %v1619_v21, 16  ;;  %v4467_v12 = vld [vmem:[%s6098_s1 + $0x208] sm:$0xff] }
 0x12b   : > { %v2289_v33 = vadd.f32 %v2213_v1, %v1550_v36  ;;  %926 = vst [vmem:[#allocation2 + $0xb0] sm:$0x1] %v925_v47  ;;  %v4687_v36 = vld [vmem:[#allocation2 + $0x84] sm:$0xff]  ;;  %v1952_v1 = vshll.u32 %v1618_v52, 16  ;;  %3414 = vmatpush.bf16.msra.mxu0 %v4467_v12 }
 0x12d   : > { %1516 = vmatmul.bf16.gmra.mxu2 %v5354_v37  ;;  %v5639_v17 = vadd.f32 %v2403_v32, %v2289_v33  ;;  %v1932_v37 = vrot.slane %v1931_v29, 4  ;;  %v1942_v32 = vrot.slane %v1941_v55, 4  ;;  %v1962_v33 = vshrl.u32 %v1619_v21, 16 }
 0x12e   : > { %v2406_v41 = vpop.f32.mrf.mxu0 }
 0x12f   : > { %6122 = vst [vmem:[#allocation11_spill] sm:$0xff] %v5639_v17  ;;  %2255 = vmatmul.bf16.gmra.mxu3 %v5619_v19  ;;  %v1947_v22 = vsel %vm5363_vm10, %v1942_v32, %v1946_v44  ;;  %v1960_v32 = vrot.slane %v1958_v43, 5  ;;  %v1964_v44 = vrot.slane %v1962_v33, 4 }
 0x130   : > { %v1477_v31 = vpop.f32.mrf.mxu2  ;;  %v1322_v49 = vpop.f32.mrf.mxu1  ;;  %v2110_v47 = vunpack.c.l.b16 %v1947_v22 }
 0x131   : > { %2445 = vmatmul.bf16.gmra.mxu0 %v5637_v61  ;;  %v1551_v59 = vadd.f32 %v1477_v31, %v1318_v25  ;;  %v1323_v30 = vadd.f32 %v1322_v49, %v5565_v38  ;;  %v4443_v25 = vld [vmem:[%s6098_s1 + $0x1c8] sm:$0xff]  ;;  %v1937_v38 = vsel %vm5363_vm10, %v1932_v37, %v1936_v8  ;;  %v1951_v8 = vrot.slane %v1949_v11, 4 }
 0x132   : > { %v2216_v45 = vpop.f32.mrf.mxu3  ;;  %2583 = vmatpush.bf16.msra.mxu1 %v4443_v25  ;;  %v2109_v63 = vunpack.c.l.b16 %v1937_v38  ;;  %v1954_v49 = vrot.slane %v1952_v1, 5  ;;  %v1965_v25 = vor.u32 %v1964_v44, %v1960_v32 }
 0x133   : > { %v2290_v2 = vadd.f32 %v2216_v45, %v1551_v59  ;;  %1361 = vmatmul.bf16.gmra.mxu1 %v4687_v36 }
 0x134   : > { %v5666_v21 = vpack.c.b16 %v2110_v47, %v2109_v63  ;;  %v1955_v36 = vor.u32 %v1954_v49, %v1951_v8  ;;  %v1966_v12 = vrot.slane %v1965_v25, 4  ;;  %v1622_v8 = vld [vmem:[#allocation2 + $0xac] sm:$0xf] }
 0x135   : > { %v5659_v29 = vadd.f32 %v2406_v41, %v2290_v2  ;;  %v1620_v41 = vld [vmem:[#allocation2 + $0xa4] sm:$0x1]  ;;  %v5668_v2 = vld [vmem:[#allocation2 + $0x9c] sm:$0xff] }
 0x136   : > { %v2408_v55 = vpop.f32.mrf.mxu0  ;;  %6124 = vst [vmem:[#allocation13_spill] sm:$0xff] %v5666_v21  ;;  %v1968_v38 = vshll.u32 %v1620_v41, 16  ;;  %v1956_v33 = vrot.slane %v1955_v36, 4  ;;  %2584 = vmatpush.bf16.msra.mxu1 %v4442_v35 }
 0x137   : > { %6123 = vst [vmem:[#allocation12_spill] sm:$0xff] %v5659_v29 }
 0x138   : > { %v1479_v18 = vpop.f32.mrf.mxu2  ;;  %v1324_v31 = vpop.f32.mrf.mxu1  ;;  %v1961_v49 = vsel %vm5363_vm10, %v1956_v33, %v1960_v32  ;;  %v774_v33 = vrot.slane %v5297_v16, 4  ;;  %v4450_v16 = vld [vmem:[%s6098_s1 + $0x80] sm:$0xff] }
 0x139   : > { %v1552_v37 = vadd.f32 %v1479_v18, %v1320_v53  ;;  %v1325_v59 = vadd.f32 %v1324_v31, %v5579_v42  ;;  %v931_v42 = vld [vmem:[#allocation2 + $0xbc] sm:$0x1]  ;;  %v1970_v18 = vrot.slane %v1968_v38, 5  ;;  %v1621_v31 = vld [vmem:[#allocation2 + $0xa8] sm:$0xf]  ;;  %3035 = vmatpush.bf16.msra.mxu2 %v4450_v16 }
 0x13a   : > { %v2218_v52 = vpop.f32.mrf.mxu3  ;;  %v932_v1 = vsel %vm5271_vm7, %v757_v60, %v931_v42  ;;  %v1973_v41 = vshrl.u32 %v1621_v31, 16  ;;  %v1982_v60 = vshll.u32 %v1622_v8, 16  ;;  %v2111_v42 = vunpack.c.l.b16 %v1961_v49 }
 0x13b   : > { %v2291_v45 = vadd.f32 %v2218_v52, %v1552_v37  ;;  %933 = vst [vmem:[#allocation2 + $0xbc] sm:$0x1] %v932_v1  ;;  %v1971_v37 = vsel %vm5363_vm10, %v1966_v12, %v1970_v18  ;;  %v5684_v18 = vld [vmem:[#allocation2 + $0xa8] sm:$0xff] }
 0x13c   : > { %v2112_v1 = vunpack.c.l.b16 %v1971_v37 }
 0x13d   : > { %1521 = vmatmul.bf16.gmra.mxu2 %v5668_v2  ;;  %v5671_v11 = vadd.f32 %v2408_v55, %v2291_v45  ;;  %v4689_v55 = vld [vmem:[#allocation2 + $0x90] sm:$0xff]  ;;  %v1986_v45 = vshrl.u32 %v1622_v8, 16 }
 0x13e   : > { %v2411_v53 = vpop.f32.mrf.mxu0 }
 0x13f   : > { %6125 = vst [vmem:[#allocation14_spill] sm:$0xff] %v5671_v11  ;;  %2260 = vmatmul.bf16.gmra.mxu3 %v5637_v61  ;;  %v1988_v32 = vrot.slane %v1986_v45, 4 }
 0x140   : > { %v1482_v15 = vpop.f32.mrf.mxu2  ;;  %v1327_v22 = vpop.f32.mrf.mxu1 }
 0x141   : > { %2450 = vmatmul.bf16.gmra.mxu0 %v5666_v21  ;;  %v1553_v43 = vadd.f32 %v1482_v15, %v1323_v30  ;;  %v1976_v30 = vshll.u32 %v1621_v31, 16 }
 0x142   : > { %v2221_v63 = vpop.f32.mrf.mxu3 }
 0x143   : > { %v2292_v47 = vadd.f32 %v2221_v63, %v1553_v43  ;;  %1366 = vmatmul.bf16.gmra.mxu1 %v4689_v55  ;;  %v1975_v43 = vrot.slane %v1973_v41, 4  ;;  %v1978_v63 = vrot.slane %v1976_v30, 5  ;;  %v1984_v55 = vrot.slane %v1982_v60, 5  ;;  %v938_v41 = vld [vmem:[#allocation2 + $0xc8] sm:$0x1] }
 0x144   : > { %v1328_v30 = vadd.f32 %v1327_v22, %v5434_v34  ;;  %v939_v60 = vsel %vm5271_vm7, %v774_v33, %v938_v41  ;;  %v4458_v34 = vld [vmem:[%s6098_s1 + $0x140] sm:$0xff] }
 0x145   : > { %v5681_v44 = vadd.f32 %v2411_v53, %v2292_v47  ;;  %v1623_v53 = vld [vmem:[#allocation2 + $0xb0] sm:$0x1]  ;;  %v5687_v47 = vpack.c.b16 %v2112_v1, %v2111_v42  ;;  %v1979_v8 = vor.u32 %v1978_v63, %v1975_v43  ;;  %v1989_v49 = vor.u32 %v1988_v32, %v1984_v55  ;;  %940 = vst [vmem:[#allocation2 + $0xc8] sm:$0x1] %v939_v60  ;;  %v1625_v42 = vld [vmem:[#allocation2 + $0xb8] sm:$0xf] }
 0x146   : > { %v2413_v52 = vpop.f32.mrf.mxu0  ;;  %v1992_v37 = vshll.u32 %v1623_v53, 16  ;;  %3225 = vmatpush.bf16.msra.mxu3 %v4458_v34  ;;  %v2010_v53 = vshrl.u32 %v1625_v42, 16 }
 0x147   : > { %6126 = vst [vmem:[#allocation15_spill] sm:$0xff] %v5681_v44  ;;  %v1980_v1 = vrot.slane %v1979_v8, 4 }
 0x148   : > { %v1484_v36 = vpop.f32.mrf.mxu2  ;;  %v1329_v25 = vpop.f32.mrf.mxu1  ;;  %6127 = vst [vmem:[#allocation16_spill] sm:$0xff] %v5687_v47  ;;  %v1994_v43 = vrot.slane %v1992_v37, 5 }
 0x149   : > { %v1554_v38 = vadd.f32 %v1484_v36, %v1325_v59  ;;  %v1985_v8 = vsel %vm5363_vm10, %v1980_v1, %v1984_v55  ;;  %v1330_v37 = vadd.f32 %v1329_v25, %v5447_v39  ;;  %v1626_v55 = vld [vmem:[#allocation2 + $0xbc] sm:$0x1] }
 0x14a   : > { %v2223_v15 = vpop.f32.mrf.mxu3  ;;  %v2113_v34 = vunpack.c.l.b16 %v1985_v8  ;;  %v2016_v35 = vshll.u32 %v1626_v55, 16 }
 0x14b   : > { %v2293_v12 = vadd.f32 %v2223_v15, %v1554_v38  ;;  %v1624_v38 = vld [vmem:[#allocation2 + $0xb4] sm:$0xf]  ;;  %v1990_v15 = vrot.slane %v1989_v49, 4 }
 0x14c   : > { %v1997_v32 = vshrl.u32 %v1624_v38, 16  ;;  %v2000_v33 = vshll.u32 %v1624_v38, 16 }
 0x14d   : > { %1526 = vmatmul.bf16.gmra.mxu2 %v5684_v18  ;;  %v5689_v31 = vadd.f32 %v2413_v52, %v2293_v12  ;;  %v2006_v12 = vshll.u32 %v1625_v42, 16  ;;  %v1995_v49 = vsel %vm5363_vm10, %v1990_v15, %v1994_v43 }
 0x14e   : > { %v2416_v59 = vpop.f32.mrf.mxu0 }
 0x14f   : > { %6128 = vst [vmem:[#allocation17_spill] sm:$0xff] %v5689_v31  ;;  %2265 = vmatmul.bf16.gmra.mxu3 %v5666_v21  ;;  %v2008_v38 = vrot.slane %v2006_v12, 5  ;;  %v4692_v12 = vld [vmem:[#allocation2 + $0x4] sm:$0xf]  ;;  %v4697_v31 = vld [vmem:[#allocation2 + $0x20] sm:$0x1] }
 0x150   : > { %v1487_v45 = vpop.f32.mrf.mxu2  ;;  %v1332_v36 = vpop.f32.mrf.mxu1  ;;  %v2792_v44 = vrot.slane %v4697_v31, 5 }
 0x151   : > { %2455 = vmatmul.bf16.gmra.mxu0 %v5687_v47  ;;  %v1555_v52 = vadd.f32 %v1487_v45, %v1328_v30  ;;  %v1999_v45 = vrot.slane %v1997_v32, 4 }
 0x152   : > { %v2226_v22 = vpop.f32.mrf.mxu3 }
 0x153   : > { %v2294_v63 = vadd.f32 %v2226_v22, %v1555_v52  ;;  %1371 = vmatmul.bf16.gmra.mxu1 %v5668_v2  ;;  %v4466_v2 = vld [vmem:[%s6098_s1 + $0x200] sm:$0xff]  ;;  %v2002_v52 = vrot.slane %v2000_v33, 5  ;;  %v2114_v22 = vunpack.c.l.b16 %v1995_v49  ;;  %v1333_v33 = vadd.f32 %v1332_v36, %v5463_v23 }
 0x154   : > { %3415 = vmatpush.bf16.msra.mxu0 %v4466_v2 }
 0x155   : > { %v5706_v41 = vadd.f32 %v2416_v59, %v2294_v63  ;;  %v2012_v59 = vrot.slane %v2010_v53, 4  ;;  %v2003_v15 = vor.u32 %v2002_v52, %v1999_v45  ;;  %v5719_v39 = vpack.c.b16 %v2114_v22, %v2113_v34  ;;  %v1627_v45 = vld [vmem:[#allocation2 + $0xc0] sm:$0xf]  ;;  %v1628_v34 = vld [vmem:[#allocation2 + $0xc4] sm:$0xf] }
 0x156   : > { %v2418_v30 = vpop.f32.mrf.mxu0  ;;  %v2775_v53 = vrot.slane %v4692_v12, 5  ;;  %v2021_v55 = vshrl.u32 %v1627_v45, 16  ;;  %v2030_v12 = vshll.u32 %v1628_v34, 16 }
 0x157   : > { %6129 = vst [vmem:[#allocation18_spill] sm:$0xff] %v5706_v41  ;;  %v2013_v43 = vor.u32 %v2012_v59, %v2008_v38  ;;  %v5716_v41 = vld [vmem:[#allocation2 + $0xb4] sm:$0xff]  ;;  %v2004_v2 = vrot.slane %v2003_v15, 4  ;;  %v4693_v59 = vld [vmem:[#allocation2 + $0x10] sm:$0xf] }
 0x158   : > { %v1489_v16 = vpop.f32.mrf.mxu2  ;;  %v1334_v60 = vpop.f32.mrf.mxu1  ;;  %v2032_v29 = vrot.slane %v2030_v12, 5  ;;  %v1629_v12 = vld [vmem:[#allocation2 + $0xc8] sm:$0x1] }
 0x159   : > { %v1556_v42 = vadd.f32 %v1489_v16, %v1330_v37  ;;  %v2014_v37 = vrot.slane %v2013_v43, 4  ;;  %v2018_v16 = vrot.slane %v2016_v35, 5  ;;  %v2009_v43 = vsel %vm5363_vm10, %v2004_v2, %v2008_v38 }
 0x15a   : > { %v2228_v1 = vpop.f32.mrf.mxu3  ;;  %v1335_v11 = vadd.f32 %v1334_v60, %v5485_v40  ;;  %v2115_v38 = vunpack.c.l.b16 %v2009_v43  ;;  %v2700_v40 = vld [vmem:[#allocation2 + $0x18] sm:$0xe] }
 0x15b   : > { %v2295_v63 = vadd.f32 %v2228_v1, %v1556_v42  ;;  %v5728_v42 = vld [vmem:[#allocation2 + $0x1c] sm:$0xf]  ;;  %v2777_v1 = vrot.slane %v2775_v53, 4  ;;  %v2019_v35 = vsel %vm5363_vm10, %v2014_v37, %v2018_v16  ;;  %v2698_v37 = vld [vmem:[#allocation2] sm:$0xe]  ;;  %v4220_v21 = vrot.slane %v2700_v40, 9 }
 0x15c   : > { %v2116_v2 = vunpack.c.l.b16 %v2019_v35  ;;  %v2699_v16 = vld [vmem:[#allocation2 + $0xc] sm:$0xe] }
 0x15d   : > { %1531 = vmatmul.bf16.gmra.mxu2 %v5716_v41  ;;  %v5721_v25 = vadd.f32 %v2418_v30, %v2295_v63  ;;  %v2782_v30 = vrot.slane %v4693_v59, 5  ;;  %v4695_v63 = vld [vmem:[#allocation2 + $0x8] sm:$0x1] }
 0x15e   : > { %v2421_v32 = vpop.f32.mrf.mxu0  ;;  %v2778_v15 = vrot.slane %v4695_v63, 5 }
 0x15f   : > { %6130 = vst [vmem:[#allocation19_spill] sm:$0xff] %v5721_v25  ;;  %2270 = vmatmul.bf16.gmra.mxu3 %v5687_v47  ;;  %v2784_v23 = vrot.slane %v2782_v30, 4  ;;  %v4696_v25 = vld [vmem:[#allocation2 + $0x14] sm:$0x1]  ;;  %v2023_v47 = vrot.slane %v2021_v55, 4 }
 0x160   : > { %v1492_v8 = vpop.f32.mrf.mxu2  ;;  %v5725_v49 = vpop.f32.mrf.mxu1  ;;  %v2779_v43 = vsel %vm5741_vm13, %v2777_v1, %v2778_v15 }
 0x161   : > { %2460 = vmatmul.bf16.gmra.mxu0 %v5719_v39  ;;  %v1557_v52 = vadd.f32 %v1492_v8, %v1333_v33  ;;  %v2024_v33 = vshll.u32 %v1627_v45, 16  ;;  %v2034_v8 = vshrl.u32 %v1628_v34, 16 }
 0x162   : > { %v2231_v36 = vpop.f32.mrf.mxu3 }
 0x163   : > { %v2296_v22 = vadd.f32 %v2231_v36, %v1557_v52  ;;  %1376 = vmatmul.bf16.gmra.mxu1 %v5684_v18  ;;  %v2785_v52 = vrot.slane %v4696_v25, 5  ;;  %v6132_v18 = vrot.slane %v5728_v42, 5 }
 0x165   : > { %v5736_v59 = vadd.f32 %v2421_v32, %v2296_v22  ;;  %v2791_v36 = vrot.slane %v6132_v18, 4  ;;  %v4218_v32 = vrot.slane %v2698_v37, 9  ;;  %v4219_v22 = vrot.slane %v2699_v16, 9 }
 0x166   : > { %v2423_v63 = vpop.f32.mrf.mxu0  ;;  %v2036_v18 = vrot.slane %v2034_v8, 4  ;;  %v2917_v37 = vunpack.c.l.b16 %v2779_v43 }
 0x167   : > { %6131 = vst [vmem:[#allocation20_spill] sm:$0xff] %v5736_v59  ;;  %v2026_v59 = vrot.slane %v2024_v33, 5  ;;  %v2776_v55 = vsel %vm5741_vm13, %v4218_v32, %v2775_v53  ;;  %v2783_v35 = vsel %vm5741_vm13, %v4219_v22, %v2782_v30  ;;  %v2793_v53 = vsel %vm5741_vm13, %v2791_v36, %v2792_v44  ;;  %v4698_v32 = vld [vmem:[#allocation2 + $0xc0] sm:$0xff] }
 0x168   : > { %v1494_v45 = vpop.f32.mrf.mxu2  ;;  %v1339_v34 = vpop.f32.mrf.mxu1  ;;  %v2916_v8 = vunpack.c.l.b16 %v2776_v55  ;;  %v2918_v16 = vunpack.c.l.b16 %v2783_v35  ;;  %v2921_v30 = vunpack.c.l.b16 %v2793_v53  ;;  %v1338_v44 = vadd.f32 %v5725_v49, %v5500_v13 }
 0x169   : > { %v1558_v25 = vadd.f32 %v1494_v45, %v1335_v11  ;;  %v2786_v11 = vsel %vm5741_vm13, %v2784_v23, %v2785_v52  ;;  %v5753_v45 = vpack.c.b16 %v2116_v2, %v2115_v38  ;;  %v2027_v1 = vor.u32 %v2026_v59, %v2023_v47 }
 0x16a   : > { %v2233_v60 = vpop.f32.mrf.mxu3  ;;  %v2919_v17 = vunpack.c.l.b16 %v2786_v11  ;;  %v2948_v15 = vpack.c.b16 %v2917_v37, %v2916_v8  ;;  %v2037_v52 = vor.u32 %v2036_v18, %v2032_v29  ;;  %v6135_v38 = vrot.slane %v5728_v42, 5  ;;  %v4401_v37 = vld [vmem:[#allocation2 + $0xcc] sm:$0xff] }
 0x16b   : > { %v2297_v33 = vadd.f32 %v2233_v60, %v1558_v25  ;;  %v2040_v25 = vshll.u32 %v1629_v12, 16  ;;  %v2028_v40 = vrot.slane %v2027_v1, 4  ;;  %v1340_v11 = vadd.f32 %v1339_v34, %v5514_v46 }
 0x16c   : > { %v5759_v60 = vpack.c.b16 %v2919_v17, %v2918_v16  ;;  %v2790_v2 = vsel %vm5741_vm13, %v4220_v21, %v6135_v38  ;;  %v2038_v55 = vrot.slane %v2037_v52, 4 }
 0x16d   : > { %1536 = vmatmul.bf16.gmra.mxu2 %v4698_v32  ;;  %v5757_v22 = vadd.f32 %v2423_v63, %v2297_v33  ;;  %v2920_v47 = vunpack.c.l.b16 %v2790_v2  ;;  %v2042_v42 = vrot.slane %v2040_v25, 5  ;;  %v2033_v49 = vsel %vm5363_vm10, %v2028_v40, %v2032_v29 }
 0x16e   : > { %v2426_v23 = vpop.f32.mrf.mxu0  ;;  %v2335_v16 = vunpack.c.l.b16 %v2033_v49 }
 0x16f   : > { %2275 = vmatmul.bf16.gmra.mxu3 %v5719_v39  ;;  %v5769_v18 = vpack.c.b16 %v2921_v30, %v2920_v47  ;;  %v2043_v35 = vsel %vm5363_vm10, %v2038_v55, %v2042_v42  ;;  %v4699_v42 = vld [vmem:[#allocation2 + $0x28] sm:$0xf] }
 0x170   : > { %v1497_v59 = vpop.f32.mrf.mxu2  ;;  %v1342_v36 = vpop.f32.mrf.mxu1  ;;  %v2336_v53 = vunpack.c.l.b16 %v2043_v35 }
 0x171   : > { %2465 = vmatmul.bf16.gmra.mxu0 %v5753_v45  ;;  %v1559_v63 = vadd.f32 %v1497_v59, %v1338_v44  ;;  %v1343_v29 = vadd.f32 %v1342_v36, %v5532_v0 }
 0x172   : > { %v2236_v17 = vpop.f32.mrf.mxu3 }
 0x173   : > { %v2298_v43 = vadd.f32 %v2236_v17, %v1559_v63  ;;  %1381 = vmatmul.bf16.gmra.mxu1 %v5716_v41  ;;  %v5779_v41 = vpack.c.b16 %v2336_v53, %v2335_v16 }
 0x175   : > { %v5772_v21 = vadd.f32 %v2426_v23, %v2298_v43  ;;  %v2796_v43 = vrot.slane %v4699_v42, 5 }
 0x176   : > { %v2428_v13 = vpop.f32.mrf.mxu0 }
 0x178   : > { %v1499_v33 = vpop.f32.mrf.mxu2  ;;  %v1344_v12 = vpop.f32.mrf.mxu1 }
 0x179   : > { %v1560_v8 = vadd.f32 %v1499_v33, %v1340_v11  ;;  %v1345_v47 = vadd.f32 %v1344_v12, %v5555_v7  ;;  %v2798_v12 = vrot.slane %v2796_v43, 4 }
 0x17a   : > { %v2238_v32 = vpop.f32.mrf.mxu3 }
 0x17b   : > { %v2299_v1 = vadd.f32 %v2238_v32, %v1560_v8  ;;  %v4700_v8 = vld [vmem:[#allocation2 + $0x2c] sm:$0x1] }
 0x17d   : > { %1541 = vmatmul.bf16.gmra.mxu2 %v4401_v37  ;;  %v5781_v30 = vadd.f32 %v2428_v13, %v2299_v1 }
 0x17e   : > { %v2431_v23 = vpop.f32.mrf.mxu0 }
 0x17f   : > { %2280 = vmatmul.bf16.gmra.mxu3 %v5753_v45 }
 0x180   : > { %v1502_v52 = vpop.f32.mrf.mxu2  ;;  %v1347_v46 = vpop.f32.mrf.mxu1 }
 0x181   : > { %2470 = vmatmul.bf16.gmra.mxu0 %v5779_v41  ;;  %v1561_v34 = vadd.f32 %v1502_v52, %v1343_v29  ;;  %v1348_v13 = vadd.f32 %v1347_v46, %v5461_v26 }
 0x182   : > { %v2241_v25 = vpop.f32.mrf.mxu3 }
 0x183   : > { %v2300_v38 = vadd.f32 %v2241_v25, %v1561_v34  ;;  %2585 = vmatmul.bf16.vlgmr.msra.gmra.mxu1 %v5398_v14  ;;  %v2701_v14 = vld [vmem:[#allocation2 + $0x24] sm:$0xe] }
 0x184   : > { %v4221_v33 = vrot.slane %v2701_v14, 9 }
 0x185   : > { %v5787_v2 = vadd.f32 %v2431_v23, %v2300_v38 }
 0x186   : > { %v2433_v44 = vpop.f32.mrf.mxu0  ;;  %v2797_v26 = vsel %vm5741_vm13, %v4221_v33, %v2796_v43 }
 0x187   : > { %v2922_v46 = vunpack.c.l.b16 %v2797_v26 }
 0x188   : > { %v1504_v59 = vpop.f32.mrf.mxu2  ;;  %v1349_v63 = vpop.f32.mrf.mxu1 }
 0x189   : > { %v1562_v17 = vadd.f32 %v1504_v59, %v1345_v47  ;;  %v1350_v1 = vadd.f32 %v1349_v63, %v5483_v50  ;;  %v4701_v59 = vld [vmem:[#allocation2 + $0x34] sm:$0xf]  ;;  %v2702_v50 = vld [vmem:[#allocation2 + $0x30] sm:$0xe] }
 0x18a   : > { %v2243_v0 = vpop.f32.mrf.mxu3  ;;  %v4222_v43 = vrot.slane %v2702_v50, 9 }
 0x18b   : > { %v2301_v36 = vadd.f32 %v2243_v0, %v1562_v17  ;;  %v2803_v17 = vrot.slane %v4701_v59, 5 }
 0x18d   : > { %3036 = vmatmul.bf16.vlgmr.msra.gmra.mxu2 %v2948_v15  ;;  %v5790_v40 = vadd.f32 %v2433_v44, %v2301_v36  ;;  %v2799_v15 = vrot.slane %v4700_v8, 5 }
 0x18e   : > { %v2436_v55 = vpop.f32.mrf.mxu0 }
 0x18f   : > { %3226 = vmatmul.bf16.vlgmr.msra.gmra.mxu3 %v5759_v60  ;;  %v2800_v32 = vsel %vm5741_vm13, %v2798_v12, %v2799_v15 }
 0x190   : > { %v1507_v49 = vpop.f32.mrf.mxu2  ;;  %v1352_v35 = vpop.f32.mrf.mxu1  ;;  %v2923_v34 = vunpack.c.l.b16 %v2800_v32 }
 0x191   : > { %3416 = vmatmul.bf16.vlgmr.msra.gmra.mxu0 %v5769_v18  ;;  %v1563_v7 = vadd.f32 %v1507_v49, %v1348_v13  ;;  %v1353_v0 = vadd.f32 %v1352_v35, %v5498_v4  ;;  %v4702_v13 = vld [vmem:[#allocation2 + $0x38] sm:$0x1]  ;;  %v2804_v4 = vsel %vm5741_vm13, %v4222_v43, %v2803_v17 }
 0x192   : > { %v2246_v11 = vpop.f32.mrf.mxu3  ;;  %v2806_v14 = vrot.slane %v4702_v13, 5 }
 0x193   : > { %v2302_v37 = vadd.f32 %v2246_v11, %v1563_v7  ;;  %2590 = vmatmul.bf16.gmra.mxu1 %v5410_v48  ;;  %v5804_v48 = vpack.c.b16 %v2923_v34, %v2922_v46 }
 0x195   : > { %v5796_v16 = vadd.f32 %v2436_v55, %v2302_v37  ;;  %v2924_v37 = vunpack.c.l.b16 %v2804_v4 }
 0x196   : > { %v2438_v53 = vpop.f32.mrf.mxu0 }
 0x198   : > { %v1509_v23 = vpop.f32.mrf.mxu2  ;;  %v1354_v29 = vpop.f32.mrf.mxu1 }
 0x199   : > { %v1564_v52 = vadd.f32 %v1509_v23, %v1350_v1  ;;  %v1355_v33 = vadd.f32 %v1354_v29, %v5512_v28  ;;  %v2703_v28 = vld [vmem:[#allocation2 + $0x3c] sm:$0xe] }
 0x19a   : > { %v2248_v25 = vpop.f32.mrf.mxu3  ;;  %v4223_v59 = vrot.slane %v2703_v28, 9 }
 0x19b   : > { %v2303_v38 = vadd.f32 %v2248_v25, %v1564_v52  ;;  %v4703_v52 = vld [vmem:[#allocation2 + $0x40] sm:$0xf] }
 0x19c   : > { %v2810_v46 = vrot.slane %v4703_v52, 5  ;;  %v4706_v52 = vld [vmem:[#allocation2 + $0x50] sm:$0x1] }
 0x19d   : > { %3041 = vmatmul.bf16.gmra.mxu2 %v5759_v60  ;;  %v5806_v44 = vadd.f32 %v2438_v53, %v2303_v38  ;;  %v2805_v60 = vrot.slane %v2803_v17, 4  ;;  %v4704_v17 = vld [vmem:[#allocation2 + $0x44] sm:$0x1] }
 0x19e   : > { %v2441_v47 = vpop.f32.mrf.mxu0 }
 0x19f   : > { %3231 = vmatmul.bf16.gmra.mxu3 %v5769_v18  ;;  %v2807_v35 = vsel %vm5741_vm13, %v2805_v60, %v2806_v14 }
 0x1a0   : > { %v1512_v63 = vpop.f32.mrf.mxu2  ;;  %v1357_v36 = vpop.f32.mrf.mxu1  ;;  %v2925_v53 = vunpack.c.l.b16 %v2807_v35 }
 0x1a1   : > { %3421 = vmatmul.bf16.gmra.mxu0 %v5804_v48  ;;  %v1565_v55 = vadd.f32 %v1512_v63, %v1353_v0  ;;  %v1358_v34 = vadd.f32 %v1357_v36, %v5530_v62  ;;  %v2813_v0 = vrot.slane %v4704_v17, 5  ;;  %v2811_v62 = vsel %vm5741_vm13, %v4223_v59, %v2810_v46 }
 0x1a2   : > { %v2251_v42 = vpop.f32.mrf.mxu3  ;;  %v2926_v14 = vunpack.c.l.b16 %v2811_v62 }
 0x1a3   : > { %v2304_v49 = vadd.f32 %v2251_v42, %v1565_v55  ;;  %2595 = vmatmul.bf16.gmra.mxu1 %v5436_v5  ;;  %v5820_v5 = vpack.c.b16 %v2925_v53, %v2924_v37 }
 0x1a5   : > { %v5812_v7 = vadd.f32 %v2441_v47, %v2304_v49 }
 0x1a6   : > { %v2443_v11 = vpop.f32.mrf.mxu0 }
 0x1a8   : > { %v1514_v12 = vpop.f32.mrf.mxu2  ;;  %v1359_v8 = vpop.f32.mrf.mxu1 }
 0x1a9   : > { %v1566_v15 = vadd.f32 %v1514_v12, %v1355_v33  ;;  %v1360_v42 = vadd.f32 %v1359_v8, %v5553_v57  ;;  %v4705_v12 = vld [vmem:[#allocation2 + $0x4c] sm:$0xf]  ;;  %v2704_v57 = vld [vmem:[#allocation2 + $0x48] sm:$0xe] }
 0x1aa   : > { %v2253_v26 = vpop.f32.mrf.mxu3 }
 0x1ab   : > { %v2305_v32 = vadd.f32 %v2253_v26, %v1566_v15  ;;  %v2817_v15 = vrot.slane %v4705_v12, 5 }
 0x1ad   : > { %3046 = vmatmul.bf16.gmra.mxu2 %v5769_v18  ;;  %v5822_v1 = vadd.f32 %v2443_v11, %v2305_v32  ;;  %v2812_v18 = vrot.slane %v2810_v46, 4  ;;  %v2820_v46 = vrot.slane %v4706_v52, 5 }
 0x1ae   : > { %v2446_v23 = vpop.f32.mrf.mxu0 }
 0x1af   : > { %3236 = vmatmul.bf16.gmra.mxu3 %v5804_v48  ;;  %v2814_v36 = vsel %vm5741_vm13, %v2812_v18, %v2813_v0 }
 0x1b0   : > { %v1517_v29 = vpop.f32.mrf.mxu2  ;;  %v1362_v25 = vpop.f32.mrf.mxu1  ;;  %v2927_v49 = vunpack.c.l.b16 %v2814_v36 }
 0x1b1   : > { %3426 = vmatmul.bf16.gmra.mxu0 %v5820_v5  ;;  %v1567_v38 = vadd.f32 %v1517_v29, %v1358_v34  ;;  %v1363_v37 = vadd.f32 %v1362_v25, %v5570_v54 }
 0x1b2   : > { %v2256_v47 = vpop.f32.mrf.mxu3 }
 0x1b3   : > { %v2306_v50 = vadd.f32 %v2256_v47, %v1567_v38  ;;  %2600 = vmatmul.bf16.gmra.mxu1 %v5451_v3  ;;  %v5836_v3 = vpack.c.b16 %v2927_v49, %v2926_v14 }
 0x1b5   : > { %v5828_v63 = vadd.f32 %v2446_v23, %v2306_v50  ;;  %v4224_v23 = vrot.slane %v2704_v57, 9 }
 0x1b6   : > { %v2448_v55 = vpop.f32.mrf.mxu0 }
 0x1b7   : > { %v2818_v54 = vsel %vm5741_vm13, %v4224_v23, %v2817_v15 }
 0x1b8   : > { %v1519_v43 = vpop.f32.mrf.mxu2  ;;  %v1364_v60 = vpop.f32.mrf.mxu1  ;;  %v2928_v17 = vunpack.c.l.b16 %v2818_v54 }
 0x1b9   : > { %v1568_v13 = vadd.f32 %v1519_v43, %v1360_v42  ;;  %v1365_v38 = vadd.f32 %v1364_v60, %v5583_v9  ;;  %v4707_v42 = vld [vmem:[#allocation2 + $0x58] sm:$0xf]  ;;  %v2705_v9 = vld [vmem:[#allocation2 + $0x54] sm:$0xe] }
 0x1ba   : > { %v2258_v11 = vpop.f32.mrf.mxu3  ;;  %v2824_v43 = vrot.slane %v4707_v42, 5 }
 0x1bb   : > { %v2307_v4 = vadd.f32 %v2258_v11, %v1568_v13 }
 0x1bd   : > { %3051 = vmatmul.bf16.gmra.mxu2 %v5804_v48  ;;  %v5838_v35 = vadd.f32 %v2448_v55, %v2307_v4  ;;  %v2819_v48 = vrot.slane %v2817_v15, 4  ;;  %v4225_v4 = vrot.slane %v2705_v9, 9 }
 0x1be   : > { %v2451_v33 = vpop.f32.mrf.mxu0 }
 0x1bf   : > { %3241 = vmatmul.bf16.gmra.mxu3 %v5820_v5  ;;  %v2821_v25 = vsel %vm5741_vm13, %v2819_v48, %v2820_v46 }
 0x1c0   : > { %v1522_v8 = vpop.f32.mrf.mxu2  ;;  %v1367_v53 = vpop.f32.mrf.mxu1  ;;  %v2929_v0 = vunpack.c.l.b16 %v2821_v25 }
 0x1c1   : > { %3431 = vmatmul.bf16.gmra.mxu0 %v5836_v3  ;;  %v1569_v26 = vadd.f32 %v1522_v8, %v1363_v37  ;;  %v1368_v13 = vadd.f32 %v1367_v53, %v5469_v20  ;;  %v2825_v20 = vsel %vm5741_vm13, %v4225_v4, %v2824_v43  ;;  %v6136_v53 = vld [vmem:[#allocation3_spill] sm:$0xff]  ;;  %v6138_v4 = vld [vmem:[#allocation5_spill] sm:$0xff] }
 0x1c2   : > { %v2261_v32 = vpop.f32.mrf.mxu3  ;;  %v2930_v52 = vunpack.c.l.b16 %v2825_v20 }
 0x1c3   : > { %v2308_v34 = vadd.f32 %v2261_v32, %v1569_v26  ;;  %2605 = vmatmul.bf16.gmra.mxu1 %v5491_v10  ;;  %v5852_v10 = vpack.c.b16 %v2929_v0, %v2928_v17 }
 0x1c5   : > { %v5844_v28 = vadd.f32 %v2451_v33, %v2308_v34  ;;  %v4708_v33 = vld [vmem:[#allocation2 + $0x5c] sm:$0x1] }
 0x1c6   : > { %v2453_v29 = vpop.f32.mrf.mxu0  ;;  %v2827_v12 = vrot.slane %v4708_v33, 5 }
 0x1c8   : > { %v1524_v47 = vpop.f32.mrf.mxu2  ;;  %v1369_v59 = vpop.f32.mrf.mxu1 }
 0x1c9   : > { %v1570_v18 = vadd.f32 %v1524_v47, %v1365_v38  ;;  %v1370_v26 = vadd.f32 %v1369_v59, %v6136_v53  ;;  %v4709_v38 = vld [vmem:[#allocation2 + $0x64] sm:$0xf]  ;;  %v2706_v59 = vld [vmem:[#allocation2 + $0x60] sm:$0xe] }
 0x1ca   : > { %v2263_v50 = vpop.f32.mrf.mxu3  ;;  %v2831_v47 = vrot.slane %v4709_v38, 5  ;;  %v4226_v42 = vrot.slane %v2706_v59, 9 }
 0x1cb   : > { %v2309_v55 = vadd.f32 %v2263_v50, %v1570_v18  ;;  %v6137_v18 = vld [vmem:[#allocation4_spill] sm:$0xff] }
 0x1cd   : > { %3056 = vmatmul.bf16.gmra.mxu2 %v5820_v5  ;;  %v5854_v62 = vadd.f32 %v2453_v29, %v2309_v55  ;;  %v2826_v5 = vrot.slane %v2824_v43, 4  ;;  %v4710_v43 = vld [vmem:[#allocation2 + $0x68] sm:$0x1] }
 0x1ce   : > { %v2456_v36 = vpop.f32.mrf.mxu0 }
 0x1cf   : > { %3246 = vmatmul.bf16.gmra.mxu3 %v5836_v3  ;;  %v2828_v8 = vsel %vm5741_vm13, %v2826_v5, %v2827_v12 }
 0x1d0   : > { %v1527_v60 = vpop.f32.mrf.mxu2  ;;  %v1372_v14 = vpop.f32.mrf.mxu1  ;;  %v2931_v46 = vunpack.c.l.b16 %v2828_v8 }
 0x1d1   : > { %3436 = vmatmul.bf16.gmra.mxu0 %v5852_v10  ;;  %v1571_v49 = vadd.f32 %v1527_v60, %v1368_v13  ;;  %v1373_v17 = vadd.f32 %v1372_v14, %v6137_v18  ;;  %v2834_v13 = vrot.slane %v4710_v43, 5  ;;  %v2832_v14 = vsel %vm5741_vm13, %v4226_v42, %v2831_v47 }
 0x1d2   : > { %v2266_v11 = vpop.f32.mrf.mxu3 }
 0x1d3   : > { %v2310_v15 = vadd.f32 %v2266_v11, %v1571_v49  ;;  %2610 = vmatmul.bf16.gmra.mxu1 %v5520_v58  ;;  %v5868_v58 = vpack.c.b16 %v2931_v46, %v2930_v52  ;;  %v6139_v46 = vld [vmem:[#allocation6_spill] sm:$0xff] }
 0x1d5   : > { %v5860_v37 = vadd.f32 %v2456_v36, %v2310_v15 }
 0x1d6   : > { %v2458_v57 = vpop.f32.mrf.mxu0 }
 0x1d8   : > { %v1529_v32 = vpop.f32.mrf.mxu2  ;;  %v1374_v23 = vpop.f32.mrf.mxu1 }
 0x1d9   : > { %v1572_v48 = vadd.f32 %v1529_v32, %v1370_v26  ;;  %v1375_v5 = vadd.f32 %v1374_v23, %v6138_v4  ;;  %v2707_v23 = vld [vmem:[#allocation2 + $0x6c] sm:$0xe] }
 0x1da   : > { %v2268_v34 = vpop.f32.mrf.mxu3  ;;  %v4227_v18 = vrot.slane %v2707_v23, 9  ;;  %v4714_v23 = vld [vmem:[#allocation2 + $0x80] sm:$0x1] }
 0x1db   : > { %v2311_v29 = vadd.f32 %v2268_v34, %v1572_v48  ;;  %v4711_v48 = vld [vmem:[#allocation2 + $0x70] sm:$0xf] }
 0x1dc   : > { %v2838_v52 = vrot.slane %v4711_v48, 5 }
 0x1dd   : > { %3061 = vmatmul.bf16.gmra.mxu2 %v5836_v3  ;;  %v5870_v54 = vadd.f32 %v2458_v57, %v2311_v29  ;;  %v2833_v3 = vrot.slane %v2831_v47, 4  ;;  %v2932_v57 = vunpack.c.l.b16 %v2832_v14 }
 0x1de   : > { %v2461_v25 = vpop.f32.mrf.mxu0 }
 0x1df   : > { %3251 = vmatmul.bf16.gmra.mxu3 %v5852_v10  ;;  %v2835_v11 = vsel %vm5741_vm13, %v2833_v3, %v2834_v13  ;;  %v6140_v3 = vld [vmem:[#allocation7_spill] sm:$0xff] }
 0x1e0   : > { %v1532_v0 = vpop.f32.mrf.mxu2  ;;  %v1377_v50 = vpop.f32.mrf.mxu1  ;;  %v2933_v20 = vunpack.c.l.b16 %v2835_v11 }
 0x1e1   : > { %3441 = vmatmul.bf16.gmra.mxu0 %v5868_v58  ;;  %v1573_v55 = vadd.f32 %v1532_v0, %v1373_v17  ;;  %v1378_v34 = vadd.f32 %v1377_v50, %v6139_v46  ;;  %v4712_v17 = vld [vmem:[#allocation2 + $0x74] sm:$0x1]  ;;  %v2839_v50 = vsel %vm5741_vm13, %v4227_v18, %v2838_v52 }
 0x1e2   : > { %v2271_v36 = vpop.f32.mrf.mxu3  ;;  %v2841_v59 = vrot.slane %v4712_v17, 5  ;;  %v2934_v14 = vunpack.c.l.b16 %v2839_v50  ;;  %v6142_v17 = vld [vmem:[#allocation9_spill] sm:$0xff] }
 0x1e3   : > { %v2312_v9 = vadd.f32 %v2271_v36, %v1573_v55  ;;  %2615 = vmatmul.bf16.gmra.mxu1 %v5563_v51  ;;  %v5884_v51 = vpack.c.b16 %v2933_v20, %v2932_v57  ;;  %v4713_v57 = vld [vmem:[#allocation2 + $0x7c] sm:$0xf] }
 0x1e4   : > { %v2845_v20 = vrot.slane %v4713_v57, 5 }
 0x1e5   : > { %v5876_v60 = vadd.f32 %v2461_v25, %v2312_v9 }
 0x1e6   : > { %v2463_v49 = vpop.f32.mrf.mxu0 }
 0x1e8   : > { %v1534_v33 = vpop.f32.mrf.mxu2  ;;  %v1379_v12 = vpop.f32.mrf.mxu1 }
 0x1e9   : > { %v1574_v15 = vadd.f32 %v1534_v33, %v1375_v5  ;;  %v1380_v43 = vadd.f32 %v1379_v12, %v6140_v3  ;;  %v2708_v12 = vld [vmem:[#allocation2 + $0x78] sm:$0xe] }
 0x1ea   : > { %v2273_v8 = vpop.f32.mrf.mxu3 }
 0x1eb   : > { %v2313_v53 = vadd.f32 %v2273_v8, %v1574_v15  ;;  %v6141_v8 = vld [vmem:[#allocation8_spill] sm:$0xff] }
 0x1ed   : > { %3066 = vmatmul.bf16.gmra.mxu2 %v5852_v10  ;;  %v5886_v26 = vadd.f32 %v2463_v49, %v2313_v53  ;;  %v2840_v10 = vrot.slane %v2838_v52, 4 }
 0x1ee   : > { %v2466_v32 = vpop.f32.mrf.mxu0 }
 0x1ef   : > { %3256 = vmatmul.bf16.gmra.mxu3 %v5868_v58  ;;  %v2842_v42 = vsel %vm5741_vm13, %v2840_v10, %v2841_v59 }
 0x1f0   : > { %v1537_v29 = vpop.f32.mrf.mxu2  ;;  %v1382_v25 = vpop.f32.mrf.mxu1  ;;  %v2935_v11 = vunpack.c.l.b16 %v2842_v42 }
 0x1f1   : > { %3446 = vmatmul.bf16.gmra.mxu0 %v5884_v51  ;;  %v1575_v38 = vadd.f32 %v1537_v29, %v1378_v34  ;;  %v1383_v53 = vadd.f32 %v1382_v25, %v6141_v8  ;;  %v4228_v34 = vrot.slane %v2708_v12, 9  ;;  %v2848_v29 = vrot.slane %v4714_v23, 5 }
 0x1f2   : > { %v2276_v47 = vpop.f32.mrf.mxu3 }
 0x1f3   : > { %v2314_v0 = vadd.f32 %v2276_v47, %v1575_v38  ;;  %2620 = vmatmul.bf16.gmra.mxu1 %v5590_v6  ;;  %v5900_v6 = vpack.c.b16 %v2935_v11, %v2934_v14  ;;  %v2846_v25 = vsel %vm5741_vm13, %v4228_v34, %v2845_v20  ;;  %v4715_v11 = vld [vmem:[#allocation2 + $0x88] sm:$0xf] }
 0x1f4   : > { %v2936_v42 = vunpack.c.l.b16 %v2846_v25 }
 0x1f5   : > { %v5892_v55 = vadd.f32 %v2466_v32, %v2314_v0 }
 0x1f6   : > { %v2468_v36 = vpop.f32.mrf.mxu0 }
 0x1f8   : > { %v1539_v13 = vpop.f32.mrf.mxu2  ;;  %v1384_v9 = vpop.f32.mrf.mxu1 }
 0x1f9   : > { %v1576_v49 = vadd.f32 %v1539_v13, %v1380_v43  ;;  %v1385_v59 = vadd.f32 %v1384_v9, %v6142_v17  ;;  %v2709_v9 = vld [vmem:[#allocation2 + $0x84] sm:$0xe] }
 0x1fa   : > { %v2278_v4 = vpop.f32.mrf.mxu3  ;;  %v4229_v12 = vrot.slane %v2709_v9, 9 }
 0x1fb   : > { %v2315_v5 = vadd.f32 %v2278_v4, %v1576_v49  ;;  %v2852_v4 = vrot.slane %v4715_v11, 5 }
 0x1fd   : > { %3071 = vmatmul.bf16.gmra.mxu2 %v5868_v58  ;;  %v5902_v33 = vadd.f32 %v2468_v36, %v2315_v5  ;;  %v2847_v58 = vrot.slane %v2845_v20, 4  ;;  %v6143_v5 = vld [vmem:[#allocation10_spill] sm:$0xff]  ;;  %v2853_v23 = vsel %vm5741_vm13, %v4229_v12, %v2852_v4 }
 0x1fe   : > { %v2471_v15 = vpop.f32.mrf.mxu0  ;;  %v2938_v17 = vunpack.c.l.b16 %v2853_v23 }
 0x1ff   : > { %3261 = vmatmul.bf16.gmra.mxu3 %v5884_v51  ;;  %v2849_v10 = vsel %vm5741_vm13, %v2847_v58, %v2848_v29 }
 0x200   : > { %v1542_v32 = vpop.f32.mrf.mxu2  ;;  %v2586_v48 = vpop.f32.mrf.mxu1  ;;  %v2937_v3 = vunpack.c.l.b16 %v2849_v10 }
 0x201   : > { %3451 = vmatmul.bf16.gmra.mxu0 %v5900_v6  ;;  %v1577_v52 = vadd.f32 %v1542_v32, %v1383_v53  ;;  %v4716_v32 = vld [vmem:[#allocation2 + $0x8c] sm:$0x1] }
 0x202   : > { %v2281_v46 = vpop.f32.mrf.mxu3 }
 0x203   : > { %v2316_v38 = vadd.f32 %v2281_v46, %v1577_v52  ;;  %2625 = vmatmul.bf16.gmra.mxu1 %v5619_v19  ;;  %v5916_v19 = vpack.c.b16 %v2937_v3, %v2936_v42  ;;  %v2855_v52 = vrot.slane %v4716_v32, 5 }
 0x205   : > { %v5908_v47 = vadd.f32 %v2471_v15, %v2316_v38  ;;  %v2666_v15 = vadd.f32 %v2586_v48, %v6143_v5  ;;  %v5927_v48 = vld [vmem:[%s6099_s2] ss:$0 sm:$0xff] }
 0x206   : > { %v2473_v18 = vpop.f32.mrf.mxu0 }
 0x208   : > { %v1544_v0 = vpop.f32.mrf.mxu2  ;;  %v2588_v36 = vpop.f32.mrf.mxu1 }
 0x209   : > { %v1578_v50 = vadd.f32 %v1544_v0, %v1385_v59  ;;  %v2667_v38 = vadd.f32 %v2588_v36, %v5621_v24 }
 0x20a   : > { %v2283_v43 = vpop.f32.mrf.mxu3 }
 0x20b   : > { %v2317_v13 = vadd.f32 %v2283_v43, %v1578_v50 }
 0x20d   : > { %3076 = vmatmul.bf16.gmra.mxu2 %v5884_v51  ;;  %v5918_v49 = vadd.f32 %v2473_v18, %v2317_v13  ;;  %v2854_v51 = vrot.slane %v2852_v4, 4  ;;  %v2710_v4 = vld [vmem:[#allocation2 + $0x90] sm:$0xe] }
 0x20e   : > { %v3417_v14 = vpop.f32.mrf.mxu0 }
 0x20f   : > { %3266 = vmatmul.bf16.gmra.mxu3 %v5900_v6  ;;  %v2856_v29 = vsel %vm5741_vm13, %v2854_v51, %v2855_v52 }
 0x210   : > { %v3037_v57 = vpop.f32.mrf.mxu2  ;;  %v2591_v20 = vpop.f32.mrf.mxu1 }
 0x211   : > { %3456 = vmatmul.bf16.gmra.mxu0 %v5916_v19  ;;  %v3117_v8 = vadd.f32 %v3037_v57, %v2666_v15  ;;  %v2668_v36 = vadd.f32 %v2591_v20, %v5632_v27  ;;  %v4718_v20 = vld [vmem:[#allocation2 + $0x98] sm:$0x1] }
 0x212   : > { %v3227_v53 = vpop.f32.mrf.mxu3  ;;  %v2862_v12 = vrot.slane %v4718_v20, 5  ;;  %v2711_v20 = vld [vmem:[#allocation2 + $0x9c] sm:$0xe] }
 0x213   : > { %v3307_v46 = vadd.f32 %v3227_v53, %v3117_v8  ;;  %2630 = vmatmul.bf16.gmra.mxu1 %v5637_v61  ;;  %v2939_v61 = vunpack.c.l.b16 %v2856_v29  ;;  %v4230_v53 = vrot.slane %v2710_v4, 9 }
 0x215   : > { %v3497_v34 = vadd.f32 %v3417_v14, %v3307_v46  ;;  %v5936_v3 = vpack.c.b16 %v2939_v61, %v2938_v17  ;;  %v4717_v14 = vld [vmem:[#allocation2 + $0x94] sm:$0xf]  ;;  %v6145_v17 = vld [vmem:[#allocation11_spill] sm:$0xff] }
 0x216   : > { %v3419_v58 = vpop.f32.mrf.mxu0  ;;  %v2859_v11 = vrot.slane %v4717_v14, 5 }
 0x217   : > { %v3532_v59 = vadd.f32 %v5927_v48, %v3497_v34  ;;  %v6144_v34 = vld [vmem:[#allocation13_spill] sm:$0xff] }
 0x218   : > { %v3039_v18 = vpop.f32.mrf.mxu2  ;;  %v2593_v25 = vpop.f32.mrf.mxu1  ;;  %v2861_v27 = vrot.slane %v2859_v11, 4 }
 0x219   : > { %v3118_v10 = vadd.f32 %v3039_v18, %v2667_v38  ;;  %v3564_v43 = vmax.f32 %v3532_v59, 0.0  ;;  %v2860_v38 = vsel %vm5741_vm13, %v4230_v53, %v2859_v11  ;;  %v2669_v61 = vadd.f32 %v2593_v25, %v6145_v17  ;;  %v6146_v53 = vld [vmem:[#allocation12_spill] sm:$0xff] }
 0x21a   : > { %v3229_v0 = vpop.f32.mrf.mxu3  ;;  %v2863_v18 = vsel %vm5741_vm13, %v2861_v27, %v2862_v12 }
 0x21b   : > { %v3308_v50 = vadd.f32 %v3229_v0, %v3118_v10  ;;  %v3633_v57 = vmul.f32 %v3564_v43, %v3564_v43  ;;  %v2941_v14 = vunpack.c.l.b16 %v2863_v18 }
 0x21d   : > { %v3498_v42 = vadd.f32 %v3419_v58, %v3308_v50  ;;  %3081 = vmatmul.bf16.gmra.mxu2 %v5900_v6 }
 0x21e   : > { %v3422_v13 = vpop.f32.mrf.mxu0 }
 0x21f   : > { %v3533_v24 = vadd.f32 %v5927_v48, %v3498_v42  ;;  %3271 = vmatmul.bf16.gmra.mxu3 %v5916_v19 }
 0x220   : > { %v3042_v5 = vpop.f32.mrf.mxu2  ;;  %v2596_v15 = vpop.f32.mrf.mxu1 }
 0x221   : > { %v3565_v9 = vmax.f32 %v3533_v24, 0.0  ;;  %3461 = vmatmul.bf16.gmra.mxu0 %v5936_v3  ;;  %v3119_v6 = vadd.f32 %v3042_v5, %v2668_v36  ;;  %v2670_v27 = vadd.f32 %v2596_v15, %v6146_v53  ;;  %v6147_v15 = vld [vmem:[#allocation16_spill] sm:$0xff] }
 0x222   : > { %v3232_v8 = vpop.f32.mrf.mxu3 }
 0x223   : > { %v3596_v51 = vadd.f32 %v3565_v9, %v3564_v43  ;;  %v3634_v32 = vmul.f32 %v3565_v9, %v3565_v9  ;;  %v4541_v52 = vpack.c.bf16 %v3565_v9, %v3564_v43  ;;  %v3309_v46 = vadd.f32 %v3232_v8, %v3119_v6  ;;  %2635 = vmatmul.bf16.gmra.mxu1 %v6144_v34 }
 0x224   : > { %v2940_v43 = vunpack.c.l.b16 %v2860_v38 }
 0x225   : > { %v3665_v58 = vadd.f32 %v3634_v32, %v3633_v57  ;;  %4542 = vst [vmem:[%s5947_s11] sm:$0xff] %v4541_v52   ;;  %v3499_v23 = vadd.f32 %v3422_v13, %v3309_v46  ;;  %v4719_v57 = vld [vmem:[#allocation2 + $0xa0] sm:$0xf]  ;;  %v4231_v46 = vrot.slane %v2711_v20, 9 }
 0x226   : > { %v3424_v29 = vpop.f32.mrf.mxu0  ;;  %v5958_v11 = vpack.c.b16 %v2941_v14, %v2940_v43  ;;  %v2866_v8 = vrot.slane %v4719_v57, 5 }
 0x227   : > { %v3534_v10 = vadd.f32 %v5927_v48, %v3499_v23 }
 0x228   : > { %v3044_v59 = vpop.f32.mrf.mxu2  ;;  %v2598_v0 = vpop.f32.mrf.mxu1  ;;  %v2868_v34 = vrot.slane %v2866_v8, 4 }
 0x229   : > { %v3566_v50 = vmax.f32 %v3534_v10, 0.0  ;;  %v3120_v42 = vadd.f32 %v3044_v59, %v2669_v61 }
 0x22a   : > { %v3234_v24 = vpop.f32.mrf.mxu3 }
 0x22b   : > { %v3597_v36 = vadd.f32 %v3596_v51, %v3566_v50  ;;  %v3635_v13 = vmul.f32 %v3566_v50, %v3566_v50  ;;  %v3310_v4 = vadd.f32 %v3234_v24, %v3120_v42  ;;  %v2867_v42 = vsel %vm5741_vm13, %v4231_v46, %v2866_v8  ;;  %v6148_v24 = vld [vmem:[#allocation14_spill] sm:$0xff]  ;;  %v6149_v46 = vld [vmem:[#allocation15_spill] sm:$0xff] }
 0x22c   : > { %v2942_v57 = vunpack.c.l.b16 %v2867_v42 }
 0x22d   : > { %v3666_v5 = vadd.f32 %v3665_v58, %v3635_v13  ;;  %v3500_v9 = vadd.f32 %v3424_v29, %v3310_v4  ;;  %3086 = vmatmul.bf16.gmra.mxu2 %v5916_v19  ;;  %v4720_v58 = vld [vmem:[#allocation2 + $0xa4] sm:$0x1]  ;;  %v2671_v13 = vadd.f32 %v2598_v0, %v6148_v24 }
 0x22e   : > { %v3427_v6 = vpop.f32.mrf.mxu0  ;;  %v2869_v23 = vrot.slane %v4720_v58, 5  ;;  %v2712_v58 = vld [vmem:[#allocation2 + $0xa8] sm:$0xe] }
 0x22f   : > { %v3535_v25 = vadd.f32 %v5927_v48, %v3500_v9  ;;  %3276 = vmatmul.bf16.gmra.mxu3 %v5936_v3 }
 0x230   : > { %v3047_v12 = vpop.f32.mrf.mxu2  ;;  %v2601_v51 = vpop.f32.mrf.mxu1  ;;  %v2870_v43 = vsel %vm5741_vm13, %v2868_v34, %v2869_v23 }
 0x231   : > { %v3567_v32 = vmax.f32 %v3535_v25, 0.0  ;;  %3466 = vmatmul.bf16.gmra.mxu0 %v5958_v11  ;;  %v3121_v52 = vadd.f32 %v3047_v12, %v2670_v27  ;;  %v2943_v25 = vunpack.c.l.b16 %v2870_v43  ;;  %v2672_v34 = vadd.f32 %v2601_v51, %v6149_v46 }
 0x232   : > { %v3237_v19 = vpop.f32.mrf.mxu3 }
 0x233   : > { %v3598_v29 = vadd.f32 %v3597_v36, %v3567_v32  ;;  %v3636_v38 = vmul.f32 %v3567_v32, %v3567_v32  ;;  %v4546_v18 = vpack.c.bf16 %v3567_v32, %v3566_v50  ;;  %v3311_v10 = vadd.f32 %v3237_v19, %v3121_v52  ;;  %2640 = vmatmul.bf16.gmra.mxu1 %v6147_v15  ;;  %v4721_v52 = vld [vmem:[#allocation2 + $0xac] sm:$0xf] }
 0x234   : > { %v5973_v8 = vpack.c.b16 %v2943_v25, %v2942_v57  ;;  %v2873_v19 = vrot.slane %v4721_v52, 5  ;;  %v6150_v25 = vld [vmem:[#allocation17_spill] sm:$0xff] }
 0x235   : > { %v3667_v17 = vadd.f32 %v3666_v5, %v3636_v38  ;;  %4633 = vst [vmem:[%s5947_s11 + $0x8] sm:$0xff] %v4546_v18   ;;  %v3501_v61 = vadd.f32 %v3427_v6, %v3311_v10  ;;  %v4232_v10 = vrot.slane %v2712_v58, 9 }
 0x236   : > { %v3429_v59 = vpop.f32.mrf.mxu0  ;;  %v2875_v15 = vrot.slane %v2873_v19, 4 }
 0x237   : > { %v3536_v14 = vadd.f32 %v5927_v48, %v3501_v61 }
 0x238   : > { %v3049_v36 = vpop.f32.mrf.mxu2  ;;  %v2603_v4 = vpop.f32.mrf.mxu1 }
 0x239   : > { %v3568_v50 = vmax.f32 %v3536_v14, 0.0  ;;  %v3122_v9 = vadd.f32 %v3049_v36, %v2671_v13  ;;  %v2874_v36 = vsel %vm5741_vm13, %v4232_v10, %v2873_v19  ;;  %v2713_v10 = vld [vmem:[#allocation2 + $0xb4] sm:$0xe] }
 0x23a   : > { %v3239_v5 = vpop.f32.mrf.mxu3 }
 0x23b   : > { %v3599_v53 = vadd.f32 %v3598_v29, %v3568_v50  ;;  %v3637_v6 = vmul.f32 %v3568_v50, %v3568_v50  ;;  %v3312_v27 = vadd.f32 %v3239_v5, %v3122_v9  ;;  %v2673_v5 = vadd.f32 %v2603_v4, %v6150_v25 }
 0x23d   : > { %v3668_v20 = vadd.f32 %v3667_v17, %v3637_v6  ;;  %v3502_v12 = vadd.f32 %v3429_v59, %v3312_v27  ;;  %3091 = vmatmul.bf16.gmra.mxu2 %v5936_v3  ;;  %v4722_v17 = vld [vmem:[#allocation2 + $0xb0] sm:$0x1] }
 0x23e   : > { %v3432_v32 = vpop.f32.mrf.mxu0  ;;  %v2876_v61 = vrot.slane %v4722_v17, 5 }
 0x23f   : > { %v3537_v0 = vadd.f32 %v5927_v48, %v3502_v12  ;;  %3281 = vmatmul.bf16.gmra.mxu3 %v5958_v11  ;;  %v2944_v12 = vunpack.c.l.b16 %v2874_v36 }
 0x240   : > { %v3052_v23 = vpop.f32.mrf.mxu2  ;;  %v2606_v29 = vpop.f32.mrf.mxu1  ;;  %v2877_v9 = vsel %vm5741_vm13, %v2875_v15, %v2876_v61 }
 0x241   : > { %v3569_v38 = vmax.f32 %v3537_v0, 0.0  ;;  %3471 = vmatmul.bf16.gmra.mxu0 %v5973_v8  ;;  %v3123_v18 = vadd.f32 %v3052_v23, %v2672_v34  ;;  %v4723_v23 = vld [vmem:[#allocation2 + $0xb8] sm:$0xf] }
 0x242   : > { %v3242_v3 = vpop.f32.mrf.mxu3 }
 0x243   : > { %v3600_v59 = vadd.f32 %v3599_v53, %v3569_v38  ;;  %v3638_v42 = vmul.f32 %v3569_v38, %v3569_v38  ;;  %v4551_v43 = vpack.c.bf16 %v3569_v38, %v3568_v50  ;;  %v3313_v14 = vadd.f32 %v3242_v3, %v3123_v18  ;;  %2645 = vmatmul.bf16.gmra.mxu1 %v5719_v39  ;;  %v6151_v18 = vld [vmem:[#allocation18_spill] sm:$0xff] }
 0x244   : > { %v2945_v39 = vunpack.c.l.b16 %v2877_v9  ;;  %v2880_v38 = vrot.slane %v4723_v23, 5  ;;  %v2674_v3 = vadd.f32 %v2606_v29, %v6151_v18  ;;  %v1630_v29 = vld [vmem:[#allocation2 + $0xcc] sm:$0xf] }
 0x245   : > { %v3669_v51 = vadd.f32 %v3668_v20, %v3638_v42  ;;  %4634 = vst [vmem:[%s5947_s11 + $0x10] sm:$0xff] %v4551_v43   ;;  %v3503_v24 = vadd.f32 %v3432_v32, %v3313_v14  ;;  %v4233_v42 = vrot.slane %v2713_v10, 9  ;;  %v4724_v14 = vld [vmem:[#allocation2 + $0xbc] sm:$0x1] }
 0x246   : > { %v3434_v13 = vpop.f32.mrf.mxu0  ;;  %v5988_v19 = vpack.c.b16 %v2945_v39, %v2944_v12  ;;  %v2882_v43 = vrot.slane %v2880_v38, 4  ;;  %v2045_v39 = vshrl.u32 %v1630_v29, 16 }
 0x247   : > { %v3538_v57 = vadd.f32 %v5927_v48, %v3503_v24 }
 0x248   : > { %v3054_v53 = vpop.f32.mrf.mxu2  ;;  %v2608_v6 = vpop.f32.mrf.mxu1 }
 0x249   : > { %v3570_v50 = vmax.f32 %v3538_v57, 0.0  ;;  %v3124_v27 = vadd.f32 %v3054_v53, %v2673_v5  ;;  %v5996_v5 = vld [vmem:[#allocation2 + $0xd0] sm:$0xf] }
 0x24a   : > { %v3244_v20 = vpop.f32.mrf.mxu3 }
 0x24b   : > { %v3601_v52 = vadd.f32 %v3600_v59, %v3570_v50  ;;  %v3639_v32 = vmul.f32 %v3570_v50, %v3570_v50  ;;  %v3314_v0 = vadd.f32 %v3244_v20, %v3124_v27  ;;  %v2881_v27 = vsel %vm5741_vm13, %v4233_v42, %v2880_v38 }
 0x24c   : > { %v2048_v20 = vshll.u32 %v1630_v29, 16 }
 0x24d   : > { %v3670_v46 = vadd.f32 %v3669_v51, %v3639_v32  ;;  %v3504_v34 = vadd.f32 %v3434_v13, %v3314_v0  ;;  %3096 = vmatmul.bf16.gmra.mxu2 %v5958_v11  ;;  %v2883_v51 = vrot.slane %v4724_v14, 5 }
 0x24e   : > { %v3437_v58 = vpop.f32.mrf.mxu0  ;;  %v2050_v10 = vrot.slane %v2048_v20, 5 }
 0x24f   : > { %v3539_v4 = vadd.f32 %v5927_v48, %v3504_v34  ;;  %3286 = vmatmul.bf16.gmra.mxu3 %v5973_v8  ;;  %v2884_v12 = vsel %vm5741_vm13, %v2882_v43, %v2883_v51  ;;  %v2058_v34 = vshrl.u32 %v5996_v5, 16  ;;  %v6009_v51 = vld [vmem:[#allocation2 + $0xd4] sm:$0x1] }
 0x250   : > { %v3057_v15 = vpop.f32.mrf.mxu2  ;;  %v2611_v17 = vpop.f32.mrf.mxu1  ;;  %v2947_v18 = vunpack.c.l.b16 %v2884_v12  ;;  %v2714_v12 = vld [vmem:[#allocation2 + $0xc0] sm:$0xe] }
 0x251   : > { %v3571_v61 = vmax.f32 %v3539_v4, 0.0  ;;  %3476 = vmatmul.bf16.gmra.mxu0 %v5988_v19  ;;  %v3125_v59 = vadd.f32 %v3057_v15, %v2674_v3  ;;  %v2946_v4 = vunpack.c.l.b16 %v2881_v27  ;;  %v2047_v3 = vrot.slane %v2045_v39, 4  ;;  %v6153_v27 = vld [vmem:[#allocation20_spill] sm:$0xff] }
 0x252   : > { %v3247_v11 = vpop.f32.mrf.mxu3  ;;  %v2060_v42 = vrot.slane %v2058_v34, 4 }
 0x253   : > { %v3602_v24 = vadd.f32 %v3601_v52, %v3571_v61  ;;  %v3640_v13 = vmul.f32 %v3571_v61, %v3571_v61  ;;  %v4556_v36 = vpack.c.bf16 %v3571_v61, %v3570_v50  ;;  %v3315_v9 = vadd.f32 %v3247_v11, %v3125_v59  ;;  %2650 = vmatmul.bf16.gmra.mxu1 %v5753_v45  ;;  %v6152_v52 = vld [vmem:[#allocation19_spill] sm:$0xff] }
 0x254   : > { %v2675_v32 = vadd.f32 %v2608_v6, %v6152_v52  ;;  %v6007_v14 = vpack.c.b16 %v2947_v18, %v2946_v4  ;;  %v2051_v29 = vor.u32 %v2050_v10, %v2047_v3 }
 0x255   : > { %v3671_v57 = vadd.f32 %v3670_v46, %v3640_v13  ;;  %4635 = vst [vmem:[%s5947_s11 + $0x18] sm:$0xff] %v4556_v36   ;;  %v3505_v25 = vadd.f32 %v3437_v58, %v3315_v9  ;;  %v2054_v46 = vshll.u32 %v5996_v5, 16  ;;  %v4725_v36 = vld [vmem:[#allocation2 + $0xc4] sm:$0xf] }
 0x256   : > { %v3439_v53 = vpop.f32.mrf.mxu0  ;;  %v2887_v9 = vrot.slane %v4725_v36, 5 }
 0x257   : > { %v3540_v50 = vadd.f32 %v5927_v48, %v3505_v25  ;;  %v2056_v11 = vrot.slane %v2054_v46, 5  ;;  %v4726_v46 = vld [vmem:[#allocation2 + $0xc8] sm:$0x1] }
 0x258   : > { %v3059_v45 = vpop.f32.mrf.mxu2  ;;  %v2613_v0 = vpop.f32.mrf.mxu1  ;;  %v2890_v34 = vrot.slane %v4726_v46, 5 }
 0x259   : > { %v3572_v58 = vmax.f32 %v3540_v50, 0.0  ;;  %v3126_v23 = vadd.f32 %v3059_v45, %v2675_v32  ;;  %v4234_v32 = vrot.slane %v2714_v12, 9  ;;  %v2889_v45 = vrot.slane %v2887_v9, 4 }
 0x25a   : > { %v3249_v38 = vpop.f32.mrf.mxu3 }
 0x25b   : > { %v3603_v15 = vadd.f32 %v3602_v24, %v3572_v58  ;;  %v3641_v61 = vmul.f32 %v3572_v58, %v3572_v58  ;;  %v3316_v59 = vadd.f32 %v3249_v38, %v3126_v23  ;;  %v2676_v24 = vadd.f32 %v2611_v17, %v6153_v27 }
 0x25c   : > { %v2052_v23 = vrot.slane %v2051_v29, 4  ;;  %v2891_v36 = vsel %vm5741_vm13, %v2889_v45, %v2890_v34  ;;  %v2715_v34 = vld [vmem:[#allocation2 + $0xcc] sm:$0xe] }
 0x25d   : > { %v3672_v43 = vadd.f32 %v3671_v57, %v3641_v61  ;;  %v3506_v6 = vadd.f32 %v3439_v53, %v3316_v59  ;;  %3101 = vmatmul.bf16.gmra.mxu2 %v5973_v8  ;;  %v2061_v53 = vor.u32 %v2060_v42, %v2056_v11  ;;  %v2064_v8 = vshll.u32 %v6009_v51, 16 }
 0x25e   : > { %v3442_v13 = vpop.f32.mrf.mxu0  ;;  %v3167_v12 = vunpack.c.l.b16 %v2891_v36 }
 0x25f   : > { %v3541_v25 = vadd.f32 %v5927_v48, %v3506_v6  ;;  %3291 = vmatmul.bf16.gmra.mxu3 %v5988_v19  ;;  %v2062_v3 = vrot.slane %v2061_v53, 4  ;;  %v2066_v10 = vrot.slane %v2064_v8, 5  ;;  %v2888_v6 = vsel %vm5741_vm13, %v4234_v32, %v2887_v9 }
 0x260   : > { %v3062_v39 = vpop.f32.mrf.mxu2  ;;  %v2616_v57 = vpop.f32.mrf.mxu1  ;;  %v2894_v32 = vrot.slane %v5996_v5, 5 }
 0x261   : > { %v3573_v20 = vmax.f32 %v3541_v25, 0.0  ;;  %3481 = vmatmul.bf16.gmra.mxu0 %v6007_v14  ;;  %v3127_v50 = vadd.f32 %v3062_v39, %v2676_v24  ;;  %v3166_v24 = vunpack.c.l.b16 %v2888_v6  ;;  %v2678_v45 = vadd.f32 %v2616_v57, %v5772_v21 }
 0x262   : > { %v3252_v52 = vpop.f32.mrf.mxu3 }
 0x263   : > { %v3604_v17 = vadd.f32 %v3603_v15, %v3573_v20  ;;  %v3642_v4 = vmul.f32 %v3573_v20, %v3573_v20  ;;  %v4561_v18 = vpack.c.bf16 %v3573_v20, %v3572_v58  ;;  %v3317_v38 = vadd.f32 %v3252_v52, %v3127_v50  ;;  %2655 = vmatmul.bf16.gmra.mxu1 %v5779_v41 }
 0x264   : > { %v2677_v15 = vadd.f32 %v2613_v0, %v5757_v22  ;;  %v2057_v58 = vsel %vm5363_vm10, %v2052_v23, %v2056_v11  ;;  %v3168_v0 = vpack.c.b16 %v3167_v12, %v3166_v24 }
 0x265   : > { %v3673_v61 = vadd.f32 %v3672_v43, %v3642_v4  ;;  %4636 = vst [vmem:[%s5947_s11 + $0x20] sm:$0xff] %v4561_v18   ;;  %v3507_v59 = vadd.f32 %v3442_v13, %v3317_v38  ;;  %v2067_v43 = vsel %vm5363_vm10, %v2062_v3, %v2066_v10  ;;  %v2525_v39 = vunpack.c.l.b16 %v2057_v58 }
 0x266   : > { %v3444_v42 = vpop.f32.mrf.mxu0  ;;  %v2526_v50 = vunpack.c.l.b16 %v2067_v43  ;;  %v2896_v3 = vrot.slane %v2894_v32, 4  ;;  %v2897_v10 = vrot.slane %v6009_v51, 5 }
 0x267   : > { %v3542_v29 = vadd.f32 %v5927_v48, %v3507_v59 }
 0x268   : > { %v3064_v41 = vpop.f32.mrf.mxu2  ;;  %v2618_v25 = vpop.f32.mrf.mxu1  ;;  %v2527_v46 = vpack.c.b16 %v2526_v50, %v2525_v39 }
 0x269   : > { %v3574_v13 = vmax.f32 %v3542_v29, 0.0  ;;  %v3128_v27 = vadd.f32 %v3064_v41, %v2677_v15  ;;  %v2898_v29 = vsel %vm5741_vm13, %v2896_v3, %v2897_v10  ;;  %v2679_v58 = vadd.f32 %v2618_v25, %v5781_v30 }
 0x26a   : > { %v3254_v9 = vpop.f32.mrf.mxu3  ;;  %v3357_v24 = vunpack.c.l.b16 %v2898_v29 }
 0x26b   : > { %v3605_v53 = vadd.f32 %v3604_v17, %v3574_v13  ;;  %v3643_v8 = vmul.f32 %v3574_v13, %v3574_v13  ;;  %v3318_v20 = vadd.f32 %v3254_v9, %v3128_v27 }
 0x26d   : > { %v3674_v52 = vadd.f32 %v3673_v61, %v3643_v8  ;;  %v3508_v22 = vadd.f32 %v3444_v42, %v3318_v20  ;;  %3106 = vmatmul.bf16.gmra.mxu2 %v5988_v19  ;;  %v4235_v19 = vrot.slane %v2715_v34, 9 }
 0x26e   : > { %v3447_v11 = vpop.f32.mrf.mxu0 }
 0x26f   : > { %v3543_v56 = vadd.f32 %v5927_v48, %v3508_v22  ;;  %3296 = vmatmul.bf16.gmra.mxu3 %v6007_v14  ;;  %v2895_v36 = vsel %vm5741_vm13, %v4235_v19, %v2894_v32 }
 0x270   : > { %v3067_v23 = vpop.f32.mrf.mxu2  ;;  %v2621_v17 = vpop.f32.mrf.mxu1  ;;  %v3356_v27 = vunpack.c.l.b16 %v2895_v36 }
 0x271   : > { %v3575_v4 = vmax.f32 %v3543_v56, 0.0  ;;  %3486 = vmatmul.bf16.gmra.mxu0 %v3168_v0  ;;  %v3129_v18 = vadd.f32 %v3067_v23, %v2678_v45  ;;  %v2680_v30 = vadd.f32 %v2621_v17, %v5787_v2 }
 0x272   : > { %v3257_v38 = vpop.f32.mrf.mxu3  ;;  %v3358_v31 = vpack.c.b16 %v3357_v24, %v3356_v27 }
 0x273   : > { %v3606_v5 = vadd.f32 %v3605_v53, %v3575_v4  ;;  %v3644_v61 = vmul.f32 %v3575_v4, %v3575_v4  ;;  %v4566_v59 = vpack.c.bf16 %v3575_v4, %v3574_v13  ;;  %v3319_v42 = vadd.f32 %v3257_v38, %v3129_v18  ;;  %2660 = vmatmul.bf16.gmra.mxu1 %v2527_v46 }
 0x275   : > { %v3675_v21 = vadd.f32 %v3674_v52, %v3644_v61  ;;  %4637 = vst [vmem:[%s5947_s11 + $0x28] sm:$0xff] %v4566_v59   ;;  %v3509_v57 = vadd.f32 %v3447_v11, %v3319_v42 }
 0x276   : > { %v3449_v6 = vpop.f32.mrf.mxu0 }
 0x277   : > { %v3544_v15 = vadd.f32 %v5927_v48, %v3509_v57 }
 0x278   : > { %v3069_v51 = vpop.f32.mrf.mxu2  ;;  %v2623_v41 = vpop.f32.mrf.mxu1 }
 0x279   : > { %v3576_v43 = vmax.f32 %v3544_v15, 0.0  ;;  %v3130_v13 = vadd.f32 %v3069_v51, %v2679_v58  ;;  %v2681_v19 = vadd.f32 %v2623_v41, %v5790_v40 }
 0x27a   : > { %v3259_v12 = vpop.f32.mrf.mxu3 }
 0x27b   : > { %v3607_v9 = vadd.f32 %v3606_v5, %v3576_v43  ;;  %v3645_v39 = vmul.f32 %v3576_v43, %v3576_v43  ;;  %v3320_v53 = vadd.f32 %v3259_v12, %v3130_v13 }
 0x27d   : > { %v3676_v8 = vadd.f32 %v3675_v21, %v3645_v39  ;;  %v3510_v20 = vadd.f32 %v3449_v6, %v3320_v53  ;;  %3111 = vmatmul.bf16.gmra.mxu2 %v6007_v14 }
 0x27e   : > { %v3452_v50 = vpop.f32.mrf.mxu0 }
 0x27f   : > { %v3545_v52 = vadd.f32 %v5927_v48, %v3510_v20  ;;  %3301 = vmatmul.bf16.gmra.mxu3 %v3168_v0 }
 0x280   : > { %v3072_v25 = vpop.f32.mrf.mxu2  ;;  %v2626_v22 = vpop.f32.mrf.mxu1 }
 0x281   : > { %v3577_v11 = vmax.f32 %v3545_v52, 0.0  ;;  %3491 = vmatmul.bf16.gmra.mxu0 %v3358_v31  ;;  %v3131_v32 = vadd.f32 %v3072_v25, %v2680_v30  ;;  %v2682_v36 = vadd.f32 %v2626_v22, %v5796_v16 }
 0x282   : > { %v3262_v56 = vpop.f32.mrf.mxu3 }
 0x283   : > { %v3608_v45 = vadd.f32 %v3607_v9, %v3577_v11  ;;  %v3646_v46 = vmul.f32 %v3577_v11, %v3577_v11  ;;  %v4571_v34 = vpack.c.bf16 %v3577_v11, %v3576_v43  ;;  %v3321_v23 = vadd.f32 %v3262_v56, %v3131_v32 }
 0x285   : > { %v3677_v4 = vadd.f32 %v3676_v8, %v3646_v46  ;;  %4638 = vst [vmem:[%s5947_s11 + $0x30] sm:$0xff] %v4571_v34   ;;  %v3511_v14 = vadd.f32 %v3452_v50, %v3321_v23 }
 0x286   : > { %v3454_v18 = vpop.f32.mrf.mxu0 }
 0x287   : > { %v3546_v38 = vadd.f32 %v5927_v48, %v3511_v14 }
 0x288   : > { %v3074_v2 = vpop.f32.mrf.mxu2  ;;  %v2628_v0 = vpop.f32.mrf.mxu1 }
 0x289   : > { %v3578_v17 = vmax.f32 %v3546_v38, 0.0  ;;  %v3132_v3 = vadd.f32 %v3074_v2, %v2681_v19  ;;  %v2683_v53 = vadd.f32 %v2628_v0, %v5806_v44 }
 0x28a   : > { %v3264_v10 = vpop.f32.mrf.mxu3 }
 0x28b   : > { %v3609_v5 = vadd.f32 %v3608_v45, %v3578_v17  ;;  %v3647_v61 = vmul.f32 %v3578_v17, %v3578_v17  ;;  %v3322_v59 = vadd.f32 %v3264_v10, %v3132_v3 }
 0x28d   : > { %v3678_v42 = vadd.f32 %v3677_v4, %v3647_v61  ;;  %v3512_v21 = vadd.f32 %v3454_v18, %v3322_v59 }
 0x28e   : > { %v3457_v57 = vpop.f32.mrf.mxu0 }
 0x28f   : > { %v3547_v6 = vadd.f32 %v5927_v48, %v3512_v21 }
 0x290   : > { %v3077_v29 = vpop.f32.mrf.mxu2  ;;  %v2631_v15 = vpop.f32.mrf.mxu1 }
 0x291   : > { %v3579_v58 = vmax.f32 %v3547_v6, 0.0  ;;  %v3133_v40 = vadd.f32 %v3077_v29, %v2682_v36  ;;  %v2684_v45 = vadd.f32 %v2631_v15, %v5812_v7 }
 0x292   : > { %v3267_v51 = vpop.f32.mrf.mxu3 }
 0x293   : > { %v3610_v41 = vadd.f32 %v3609_v5, %v3579_v58  ;;  %v3648_v43 = vmul.f32 %v3579_v58, %v3579_v58  ;;  %v4576_v13 = vpack.c.bf16 %v3579_v58, %v3578_v17  ;;  %v3323_v27 = vadd.f32 %v3267_v51, %v3133_v40 }
 0x295   : > { %v3679_v24 = vadd.f32 %v3678_v42, %v3648_v43  ;;  %4639 = vst [vmem:[%s5947_s11 + $0x38] sm:$0xff] %v4576_v13   ;;  %v3513_v12 = vadd.f32 %v3457_v57, %v3323_v27 }
 0x296   : > { %v3459_v9 = vpop.f32.mrf.mxu0 }
 0x297   : > { %v3548_v39 = vadd.f32 %v5927_v48, %v3513_v12 }
 0x298   : > { %v3079_v8 = vpop.f32.mrf.mxu2  ;;  %v2633_v20 = vpop.f32.mrf.mxu1 }
 0x299   : > { %v3580_v16 = vmax.f32 %v3548_v39, 0.0  ;;  %v3134_v31 = vadd.f32 %v3079_v8, %v2683_v53  ;;  %v2685_v10 = vadd.f32 %v2633_v20, %v5822_v1 }
 0x29a   : > { %v3269_v50 = vpop.f32.mrf.mxu3 }
 0x29b   : > { %v3611_v52 = vadd.f32 %v3610_v41, %v3580_v16  ;;  %v3649_v30 = vmul.f32 %v3580_v16, %v3580_v16  ;;  %v3324_v25 = vadd.f32 %v3269_v50, %v3134_v31 }
 0x29d   : > { %v3680_v22 = vadd.f32 %v3679_v24, %v3649_v30  ;;  %v3514_v11 = vadd.f32 %v3459_v9, %v3324_v25 }
 0x29e   : > { %v3462_v32 = vpop.f32.mrf.mxu0 }
 0x29f   : > { %v3549_v56 = vadd.f32 %v5927_v48, %v3514_v11 }
 0x2a0   : > { %v3082_v46 = vpop.f32.mrf.mxu2  ;;  %v2636_v34 = vpop.f32.mrf.mxu1 }
 0x2a1   : > { %v3581_v23 = vmax.f32 %v3549_v56, 0.0  ;;  %v3135_v44 = vadd.f32 %v3082_v46, %v2684_v45  ;;  %v2686_v40 = vadd.f32 %v2636_v34, %v5828_v63 }
 0x2a2   : > { %v3272_v4 = vpop.f32.mrf.mxu3 }
 0x2a3   : > { %v3612_v14 = vadd.f32 %v3611_v52, %v3581_v23  ;;  %v3650_v18 = vmul.f32 %v3581_v23, %v3581_v23  ;;  %v4581_v38 = vpack.c.bf16 %v3581_v23, %v3580_v16  ;;  %v3325_v19 = vadd.f32 %v3272_v4, %v3135_v44 }
 0x2a5   : > { %v3681_v2 = vadd.f32 %v3680_v22, %v3650_v18  ;;  %4640 = vst [vmem:[%s5947_s11 + $0x40] sm:$0xff] %v4581_v38   ;;  %v3515_v0 = vadd.f32 %v3462_v32, %v3325_v19 }
 0x2a6   : > { %v3464_v17 = vpop.f32.mrf.mxu0 }
 0x2a7   : > { %v3550_v3 = vadd.f32 %v5927_v48, %v3515_v0 }
 0x2a8   : > { %v3084_v5 = vpop.f32.mrf.mxu2  ;;  %v2638_v61 = vpop.f32.mrf.mxu1 }
 0x2a9   : > { %v3582_v7 = vmax.f32 %v3550_v3, 0.0  ;;  %v3136_v59 = vadd.f32 %v3084_v5, %v2685_v10  ;;  %v2687_v16 = vadd.f32 %v2638_v61, %v5838_v35 }
 0x2aa   : > { %v3274_v42 = vpop.f32.mrf.mxu3 }
 0x2ab   : > { %v3613_v21 = vadd.f32 %v3612_v14, %v3582_v7  ;;  %v3651_v57 = vmul.f32 %v3582_v7, %v3582_v7  ;;  %v3326_v6 = vadd.f32 %v3274_v42, %v3136_v59 }
 0x2ad   : > { %v3682_v36 = vadd.f32 %v3681_v2, %v3651_v57  ;;  %v3516_v29 = vadd.f32 %v3464_v17, %v3326_v6 }
 0x2ae   : > { %v3467_v15 = vpop.f32.mrf.mxu0 }
 0x2af   : > { %v3551_v58 = vadd.f32 %v5927_v48, %v3516_v29 }
 0x2b0   : > { %v3087_v51 = vpop.f32.mrf.mxu2  ;;  %v2641_v41 = vpop.f32.mrf.mxu1 }
 0x2b1   : > { %v3583_v43 = vmax.f32 %v3551_v58, 0.0  ;;  %v3137_v1 = vadd.f32 %v3087_v51, %v2686_v40  ;;  %v2688_v34 = vadd.f32 %v2641_v41, %v5844_v28 }
 0x2b2   : > { %v3277_v13 = vpop.f32.mrf.mxu3 }
 0x2b3   : > { %v3614_v27 = vadd.f32 %v3613_v21, %v3583_v43  ;;  %v3652_v24 = vmul.f32 %v3583_v43, %v3583_v43  ;;  %v4586_v12 = vpack.c.bf16 %v3583_v43, %v3582_v7  ;;  %v3327_v9 = vadd.f32 %v3277_v13, %v3137_v1 }
 0x2b5   : > { %v3683_v39 = vadd.f32 %v3682_v36, %v3652_v24  ;;  %4641 = vst [vmem:[%s5947_s11 + $0x48] sm:$0xff] %v4586_v12   ;;  %v3517_v53 = vadd.f32 %v3467_v15, %v3327_v9 }
 0x2b6   : > { %v3469_v8 = vpop.f32.mrf.mxu0 }
 0x2b7   : > { %v3552_v20 = vadd.f32 %v5927_v48, %v3517_v53 }
 0x2b8   : > { %v3089_v31 = vpop.f32.mrf.mxu2  ;;  %v2643_v50 = vpop.f32.mrf.mxu1 }
 0x2b9   : > { %v3584_v63 = vmax.f32 %v3552_v20, 0.0  ;;  %v3138_v52 = vadd.f32 %v3089_v31, %v2687_v16  ;;  %v2689_v5 = vadd.f32 %v2643_v50, %v5854_v62 }
 0x2ba   : > { %v3279_v30 = vpop.f32.mrf.mxu3 }
 0x2bb   : > { %v3615_v25 = vadd.f32 %v3614_v27, %v3584_v63  ;;  %v3653_v22 = vmul.f32 %v3584_v63, %v3584_v63  ;;  %v3328_v11 = vadd.f32 %v3279_v30, %v3138_v52 }
 0x2bd   : > { %v3684_v32 = vadd.f32 %v3683_v39, %v3653_v22  ;;  %v3518_v56 = vadd.f32 %v3469_v8, %v3328_v11 }
 0x2be   : > { %v3472_v45 = vpop.f32.mrf.mxu0 }
 0x2bf   : > { %v3553_v46 = vadd.f32 %v5927_v48, %v3518_v56 }
 0x2c0   : > { %v3092_v23 = vpop.f32.mrf.mxu2  ;;  %v2646_v44 = vpop.f32.mrf.mxu1 }
 0x2c1   : > { %v3585_v4 = vmax.f32 %v3553_v46, 0.0  ;;  %v3139_v35 = vadd.f32 %v3092_v23, %v2688_v34  ;;  %v2690_v40 = vadd.f32 %v2646_v44, %v5860_v37 }
 0x2c2   : > { %v3282_v14 = vpop.f32.mrf.mxu3 }
 0x2c3   : > { %v3616_v18 = vadd.f32 %v3615_v25, %v3585_v4  ;;  %v3654_v38 = vmul.f32 %v3585_v4, %v3585_v4  ;;  %v4591_v19 = vpack.c.bf16 %v3585_v4, %v3584_v63  ;;  %v3329_v2 = vadd.f32 %v3282_v14, %v3139_v35 }
 0x2c5   : > { %v3685_v0 = vadd.f32 %v3684_v32, %v3654_v38  ;;  %4642 = vst [vmem:[%s5947_s11 + $0x50] sm:$0xff] %v4591_v19   ;;  %v3519_v17 = vadd.f32 %v3472_v45, %v3329_v2 }
 0x2c6   : > { %v3474_v3 = vpop.f32.mrf.mxu0 }
 0x2c7   : > { %v3554_v10 = vadd.f32 %v5927_v48, %v3519_v17 }
 0x2c8   : > { %v3094_v61 = vpop.f32.mrf.mxu2  ;;  %v2648_v7 = vpop.f32.mrf.mxu1 }
 0x2c9   : > { %v3586_v28 = vmax.f32 %v3554_v10, 0.0  ;;  %v3140_v59 = vadd.f32 %v3094_v61, %v2689_v5  ;;  %v2691_v20 = vadd.f32 %v2648_v7, %v5870_v54 }
 0x2ca   : > { %v3284_v42 = vpop.f32.mrf.mxu3 }
 0x2cb   : > { %v3617_v21 = vadd.f32 %v3616_v18, %v3586_v28  ;;  %v3655_v57 = vmul.f32 %v3586_v28, %v3586_v28  ;;  %v3330_v6 = vadd.f32 %v3284_v42, %v3140_v59 }
 0x2cd   : > { %v3686_v36 = vadd.f32 %v3685_v0, %v3655_v57  ;;  %v3520_v29 = vadd.f32 %v3474_v3, %v3330_v6 }
 0x2ce   : > { %v3477_v15 = vpop.f32.mrf.mxu0 }
 0x2cf   : > { %v3555_v58 = vadd.f32 %v5927_v48, %v3520_v29 }
 0x2d0   : > { %v3097_v51 = vpop.f32.mrf.mxu2  ;;  %v2651_v1 = vpop.f32.mrf.mxu1 }
 0x2d1   : > { %v3587_v41 = vmax.f32 %v3555_v58, 0.0  ;;  %v3141_v43 = vadd.f32 %v3097_v51, %v2690_v40  ;;  %v2692_v45 = vadd.f32 %v2651_v1, %v5876_v60 }
 0x2d2   : > { %v3287_v62 = vpop.f32.mrf.mxu3 }
 0x2d3   : > { %v3618_v13 = vadd.f32 %v3617_v21, %v3587_v41  ;;  %v3656_v27 = vmul.f32 %v3587_v41, %v3587_v41  ;;  %v4596_v24 = vpack.c.bf16 %v3587_v41, %v3586_v28  ;;  %v3331_v12 = vadd.f32 %v3287_v62, %v3141_v43 }
 0x2d5   : > { %v3687_v9 = vadd.f32 %v3686_v36, %v3656_v27  ;;  %4643 = vst [vmem:[%s5947_s11 + $0x58] sm:$0xff] %v4596_v24   ;;  %v3521_v39 = vadd.f32 %v3477_v15, %v3331_v12 }
 0x2d6   : > { %v3479_v53 = vpop.f32.mrf.mxu0 }
 0x2d7   : > { %v3556_v8 = vadd.f32 %v5927_v48, %v3521_v39 }
 0x2d8   : > { %v3099_v16 = vpop.f32.mrf.mxu2  ;;  %v2653_v25 = vpop.f32.mrf.mxu1 }
 0x2d9   : > { %v3588_v31 = vmax.f32 %v3556_v8, 0.0  ;;  %v3142_v37 = vadd.f32 %v3099_v16, %v2691_v20  ;;  %v2693_v17 = vadd.f32 %v2653_v25, %v5886_v26 }
 0x2da   : > { %v3289_v50 = vpop.f32.mrf.mxu3 }
 0x2db   : > { %v3619_v63 = vadd.f32 %v3618_v13, %v3588_v31  ;;  %v3657_v52 = vmul.f32 %v3588_v31, %v3588_v31  ;;  %v3332_v30 = vadd.f32 %v3289_v50, %v3142_v37  ;;  %v4727_v50 = vld [vmem:[%s6099_s2] ss:$0 sm:$0xff] }
 0x2dd   : > { %v3688_v22 = vadd.f32 %v3687_v9, %v3657_v52  ;;  %v3522_v11 = vadd.f32 %v3479_v53, %v3332_v30 }
 0x2de   : > { %v3482_v32 = vpop.f32.mrf.mxu0 }
 0x2df   : > { %v3557_v56 = vadd.f32 %v5927_v48, %v3522_v11 }
 0x2e0   : > { %v3102_v46 = vpop.f32.mrf.mxu2  ;;  %v2656_v2 = vpop.f32.mrf.mxu1 }
 0x2e1   : > { %v3589_v34 = vmax.f32 %v3557_v56, 0.0  ;;  %v3143_v23 = vadd.f32 %v3102_v46, %v2692_v45  ;;  %v2694_v6 = vadd.f32 %v2656_v2, %v5892_v55 }
 0x2e2   : > { %v3292_v54 = vpop.f32.mrf.mxu3 }
 0x2e3   : > { %v3620_v44 = vadd.f32 %v3619_v63, %v3589_v34  ;;  %v3658_v4 = vmul.f32 %v3589_v34, %v3589_v34  ;;  %v4601_v35 = vpack.c.bf16 %v3589_v34, %v3588_v31  ;;  %v3333_v14 = vadd.f32 %v3292_v54, %v3143_v23 }
 0x2e5   : > { %v3689_v18 = vadd.f32 %v3688_v22, %v3658_v4  ;;  %4644 = vst [vmem:[%s5947_s11 + $0x60] sm:$0xff] %v4601_v35   ;;  %v3523_v38 = vadd.f32 %v3482_v32, %v3333_v14 }
 0x2e6   : > { %v3484_v19 = vpop.f32.mrf.mxu0 }
 0x2e7   : > { %v3558_v0 = vadd.f32 %v5927_v48, %v3523_v38 }
 0x2e8   : > { %v3104_v3 = vpop.f32.mrf.mxu2  ;;  %v2658_v29 = vpop.f32.mrf.mxu1 }
 0x2e9   : > { %v3590_v10 = vmax.f32 %v3558_v0, 0.0  ;;  %v3144_v60 = vadd.f32 %v3104_v3, %v2693_v17  ;;  %v2695_v27 = vadd.f32 %v2658_v29, %v5902_v33 }
 0x2ea   : > { %v3294_v5 = vpop.f32.mrf.mxu3 }
 0x2eb   : > { %v3621_v61 = vadd.f32 %v3620_v44, %v3590_v10  ;;  %v3659_v7 = vmul.f32 %v3590_v10, %v3590_v10  ;;  %v3334_v28 = vadd.f32 %v3294_v5, %v3144_v60 }
 0x2ed   : > { %v3690_v59 = vadd.f32 %v3689_v18, %v3659_v7  ;;  %v3524_v42 = vadd.f32 %v3484_v19, %v3334_v28 }
 0x2ee   : > { %v3487_v21 = vpop.f32.mrf.mxu0 }
 0x2ef   : > { %v3559_v57 = vadd.f32 %v5927_v48, %v3524_v42 }
 0x2f0   : > { %v3107_v36 = vpop.f32.mrf.mxu2  ;;  %v2661_v53 = vpop.f32.mrf.mxu1 }
 0x2f1   : > { %v3591_v15 = vmax.f32 %v3559_v57, 0.0  ;;  %v3145_v58 = vadd.f32 %v3107_v36, %v2694_v6 }
 0x2f2   : > { %v3297_v26 = vpop.f32.mrf.mxu3 }
 0x2f3   : > { %v3622_v40 = vadd.f32 %v3621_v61, %v3591_v15  ;;  %v3660_v51 = vmul.f32 %v3591_v15, %v3591_v15  ;;  %v4606_v41 = vpack.c.bf16 %v3591_v15, %v3590_v10  ;;  %v3335_v43 = vadd.f32 %v3297_v26, %v3145_v58 }
 0x2f5   : > { %v3691_v62 = vadd.f32 %v3690_v59, %v3660_v51  ;;  %4645 = vst [vmem:[%s5947_s11 + $0x68] sm:$0xff] %v4606_v41   ;;  %v3525_v1 = vadd.f32 %v3487_v21, %v3335_v43 }
 0x2f6   : > { %v3489_v24 = vpop.f32.mrf.mxu0 }
 0x2f7   : > { %v3560_v13 = vadd.f32 %v5927_v48, %v3525_v1  ;;  %v2696_v48 = vadd.f32 %v2661_v53, %v5908_v47 }
 0x2f8   : > { %v3109_v12 = vpop.f32.mrf.mxu2  ;;  %v2663_v46 = vpop.f32.mrf.mxu1 }
 0x2f9   : > { %v3592_v9 = vmax.f32 %v3560_v13, 0.0  ;;  %v3146_v55 = vadd.f32 %v3109_v12, %v2695_v27  ;;  %v2697_v44 = vadd.f32 %v2663_v46, %v5918_v49 }
 0x2fa   : > { %v3299_v39 = vpop.f32.mrf.mxu3 }
 0x2fb   : > { %v3623_v8 = vadd.f32 %v3622_v40, %v3592_v9  ;;  %v3661_v20 = vmul.f32 %v3592_v9, %v3592_v9  ;;  %v3336_v16 = vadd.f32 %v3299_v39, %v3146_v55 }
 0x2fd   : > { %v3692_v31 = vadd.f32 %v3691_v62, %v3661_v20  ;;  %v3526_v37 = vadd.f32 %v3489_v24, %v3336_v16 }
 0x2fe   : > { %v3492_v25 = vpop.f32.mrf.mxu0 }
 0x2ff   : > { %v3561_v63 = vadd.f32 %v4727_v50, %v3526_v37 }
 0x300   : > { %v3112_v33 = vpop.f32.mrf.mxu2 }
 0x301   : > { %v3593_v52 = vmax.f32 %v3561_v63, 0.0  ;;  %v3147_v30 = vadd.f32 %v3112_v33, %v2696_v48 }
 0x302   : > { %v3302_v22 = vpop.f32.mrf.mxu3 }
 0x303   : > { %v3624_v11 = vadd.f32 %v3623_v8, %v3593_v52  ;;  %v3662_v32 = vmul.f32 %v3593_v52, %v3593_v52  ;;  %v4611_v56 = vpack.c.bf16 %v3593_v52, %v3592_v9  ;;  %v3337_v45 = vadd.f32 %v3302_v22, %v3147_v30 }
 0x305   : > { %v3693_v34 = vadd.f32 %v3692_v31, %v3662_v32  ;;  %4646 = vst [vmem:[%s5947_s11 + $0x70] sm:$0xff] %v4611_v56   ;;  %v3527_v23 = vadd.f32 %v3492_v25, %v3337_v45 }
 0x306   : > { %v3494_v2 = vpop.f32.mrf.mxu0 }
 0x307   : > { %v3562_v54 = vadd.f32 %v4727_v50, %v3527_v23 }
 0x308   : > { %v3114_v4 = vpop.f32.mrf.mxu2 }
 0x309   : > { %v3594_v35 = vmax.f32 %v3562_v54, 0.0  ;;  %v3148_v47 = vadd.f32 %v3114_v4, %v2697_v44 }
 0x30a   : > { %v3304_v14 = vpop.f32.mrf.mxu3 }
 0x30b   : > { %v3625_v18 = vadd.f32 %v3624_v11, %v3594_v35  ;;  %v3663_v38 = vmul.f32 %v3594_v35, %v3594_v35  ;;  %v3338_v19 = vadd.f32 %v3304_v14, %v3148_v47 }
 0x30d   : > { %v3694_v0 = vadd.f32 %v3693_v34, %v3663_v38  ;;  %v3528_v17 = vadd.f32 %v3494_v2, %v3338_v19 }
 0x30f   : > { %v3563_v3 = vadd.f32 %v4727_v50, %v3528_v17 }
 0x311   : > { %v3595_v10 = vmax.f32 %v3563_v3, 0.0 }
 0x313   : > { %v3626_v60 = vadd.f32 %v3625_v18, %v3595_v10  ;;  %v3664_v5 = vmul.f32 %v3595_v10, %v3595_v10  ;;  %v4616_v61 = vpack.c.bf16 %v3595_v10, %v3594_v35 }
 0x315   : > { %v3627_v7 = vrot.slane %v3626_v60, 4  ;;  %v3695_v28 = vadd.f32 %v3694_v0, %v3664_v5  ;;  %4647 = vst [vmem:[%s5947_s11 + $0x78] sm:$0xff] %v4616_v61  }
 0x317   : > { %v3628_v49 = vadd.f32 %v3627_v7, %v3626_v60  ;;  %v3696_v59 = vrot.slane %v3695_v28, 4 }
 0x319   : > { %v3629_v42 = vrot.slane %v3628_v49, 2  ;;  %v3697_v21 = vadd.f32 %v3696_v59, %v3695_v28 }
 0x31b   : > { %v3630_v57 = vadd.f32 %v3629_v42, %v3628_v49  ;;  %v3698_v6 = vrot.slane %v3697_v21, 2 }
 0x31d   : > { %v3631_v36 = vrot.slane %v3630_v57, 1  ;;  %v3699_v29 = vadd.f32 %v3698_v6, %v3697_v21 }
 0x31f   : > { %v3700_v15 = vrot.slane %v3699_v29, 1  ;;  %v3632_v58 = vadd.f32 %v3631_v36, %v3630_v57 }
 0x321   : > { %v3701_v26 = vadd.f32 %v3700_v15, %v3699_v29 }
 0x323   : > { %v3703_v40 = vsel %vm831_vm6, %v3632_v58, %v3701_v26 }
 0x324   : > { %3704 = vst [vmem:[%s276_s16] sm:$0x3] %v3703_v40 }
 0x325 PF: > { %s17_s21 = sadd.s32 1, %s4734_s21  }
 0x326   : > { %p14_p4 = scmp.ge.s32.totalorder %s17_s21, 4  }
 0x328   :  { %16 = sbr.rel (!%p14_p4) target bundleno = 1 (0x1), region = 94 }

// kernel: block_forward.5
= control target key start
LH: loop header
LB: loop body
LE: loop exit
PB: predicated region body
PF: predicated region fallthrough
CT: control target
= control target key end

     0   :  { %s3764_s12 = smov 0   ;;  %s4494_s0 = inlined_call_operand.vmem [shape: bf16[2,9,2,9,256], index: 0, kind: input, shape index: {}]   ;;  %s4495_s1 = inlined_call_operand.vmem [shape: bf16[8,256,128], index: 1, kind: input, shape index: {}]   ;;  %s4496_s2 = inlined_call_operand.vmem [shape: f32[1,128], index: 2, kind: input, shape index: {}]   ;;  %s4497_s3 = inlined_call_operand.vmem [shape: f32[2,8,8,128], index: 3, kind: output, shape index: {}]  }
   0x1 LB: > { %s2619_s13 = sadd.s32 4294967295, %s3742_s12   ;;  %p2623_p0 = scmp.ge.s32.totalorder %s3742_s12, 1  ;;  %s3742_s12 = sphi %s3764_s12, %s13_s12  }
   0x2   : > { %p137_p1 = scmp.lt.s32.totalorder %s3742_s12, 3 }
   0x4   : > { %p138_p2 = pnand %p2623_p0, %p137_p1 }
   0x5   : > { %p161_p3 = scmp.lt.s32.totalorder (!%p138_p2), %s2619_s13, 1 }
   0x6   : > { %141 = sbr.rel (%p138_p2) target bundleno = 433 (0x1b1), region = 32 }
   0xb   : > { %v3597_v0 = vld [vmem:[%s4495_s1 + $0xb8] sm:$0xff]  ;;  %v3596_v4 = vld [vmem:[%s4495_s1 + $0xb0] sm:$0xff]  ;;  %s4501_s13 = smov (!%p161_p3, %s2619_s13), 1  ;;  %v3595_v8 = vld [vmem:[%s4495_s1 + $0xa8] sm:$0xff]  ;;  %vm220_vm0 = vsmask.f32 3328 }
   0xc   : > { %v3605_v1 = vld [vmem:[%s4495_s1 + $0xf8] sm:$0xff]  ;;  %496 = vmatpush.bf16.msra.mxu0 %v3597_v0  ;;  %v3604_v5 = vld [vmem:[%s4495_s1 + $0xf0] sm:$0xff]  ;;  %s3726_s30 = smul.u32 288, %s4501_s13  ;;  %v3603_v9 = vld [vmem:[%s4495_s1 + $0xe8] sm:$0xff]  ;;  %vm221_vm1 = vsmask.f32 7440 }
   0xd   : > { %v3581_v2 = vld [vmem:[%s4495_s1 + $0x38] sm:$0xff]  ;;  %525 = vmatpush.bf16.msra.mxu1 %v3605_v1  ;;  %v3580_v6 = vld [vmem:[%s4495_s1 + $0x30] sm:$0xff]  ;;  %v3579_v10 = vld [vmem:[%s4495_s1 + $0x28] sm:$0xff] }
   0xe   : > { %v3589_v3 = vld [vmem:[%s4495_s1 + $0x78] sm:$0xff]  ;;  %690 = vmatpush.bf16.msra.mxu2 %v3581_v2  ;;  %v3588_v7 = vld [vmem:[%s4495_s1 + $0x70] sm:$0xff]  ;;  %v3587_v11 = vld [vmem:[%s4495_s1 + $0x68] sm:$0xff]  ;;  %s3814_s16 = scalar_lea.vmem %s4494_s0, %s3726_s30 }
   0xf   : > { %719 = vmatpush.bf16.msra.mxu3 %v3589_v3  ;;  %v3594_v12 = vld [vmem:[%s4495_s1 + $0xa0] sm:$0xff]  ;;  %v212_v18 = vld [vmem:[%s3814_s16 + $0x8] sm:$0x11]  ;;  %v3593_v26 = vld [vmem:[%s4495_s1 + $0x98] sm:$0xff] }
  0x10   : > { %497 = vmatpush.bf16.msra.mxu0 %v3596_v4  ;;  %v3602_v13 = vld [vmem:[%s4495_s1 + $0xe0] sm:$0xff]  ;;  %v213_v19 = vld [vmem:[%s3814_s16 + $0x28] sm:$0x11]  ;;  %v233_v25 = vshll.u32 %v212_v18, 16  ;;  %v3601_v27 = vld [vmem:[%s4495_s1 + $0xd8] sm:$0xff] }
  0x11   : > { %526 = vmatpush.bf16.msra.mxu1 %v3604_v5  ;;  %v3578_v14 = vld [vmem:[%s4495_s1 + $0x20] sm:$0xff]  ;;  %v247_v31 = vshll.u32 %v213_v19, 16  ;;  %v3577_v32 = vld [vmem:[%s4495_s1 + $0x18] sm:$0xff]  ;;  %v3592_v36 = vld [vmem:[%s4495_s1 + $0x90] sm:$0xff] }
  0x12   : > { %691 = vmatpush.bf16.msra.mxu2 %v3580_v6  ;;  %v3586_v15 = vld [vmem:[%s4495_s1 + $0x60] sm:$0xff]  ;;  %v3585_v33 = vld [vmem:[%s4495_s1 + $0x58] sm:$0xff]  ;;  %v3600_v37 = vld [vmem:[%s4495_s1 + $0xd0] sm:$0xff]  ;;  %v235_v40 = vrot.slane %v233_v25, 5 }
  0x13   : > { %720 = vmatpush.bf16.msra.mxu3 %v3588_v7  ;;  %v172_v16 = vld [vmem:[%s3814_s16] sm:$0xff]  ;;  %v3576_v38 = vld [vmem:[%s4495_s1 + $0x10] sm:$0xff]  ;;  %v249_v42 = vrot.slane %v247_v31, 5  ;;  %vm3859_vm2 = vmor %vm220_vm0, %vm221_vm1 }
  0x14   : > { %498 = vmatpush.bf16.msra.mxu0 %v3595_v8  ;;  %v173_v17 = vld [vmem:[%s3814_s16 + $0x20] sm:$0xff]  ;;  %v224_v20 = vshrl.u32 %v172_v16, 16  ;;  %v227_v21 = vshll.u32 %v172_v16, 16  ;;  %v3584_v44 = vld [vmem:[%s4495_s1 + $0x50] sm:$0xff]  ;;  %v3591_v49 = vld [vmem:[%s4495_s1 + $0x88] sm:$0xff] }
  0x15   : > { %527 = vmatpush.bf16.msra.mxu1 %v3603_v9  ;;  %v238_v22 = vshrl.u32 %v173_v17, 16  ;;  %v241_v23 = vshll.u32 %v173_v17, 16  ;;  %v174_v43 = vld [vmem:[%s3814_s16 + $0x40] sm:$0xff]  ;;  %v3599_v50 = vld [vmem:[%s4495_s1 + $0xc8] sm:$0xff]  ;;  %v3620_v31 = vld [vmem:[%s4495_s1 + $0x130] sm:$0xff] }
  0x16   : > { %692 = vmatpush.bf16.msra.mxu2 %v3579_v10  ;;  %v226_v24 = vrot.slane %v224_v20, 4  ;;  %v229_v28 = vrot.slane %v227_v21, 5  ;;  %v175_v46 = vld [vmem:[%s3814_s16 + $0x60] sm:$0xff]  ;;  %v252_v47 = vshrl.u32 %v174_v43, 16  ;;  %v255_v48 = vshll.u32 %v174_v43, 16  ;;  %v3575_v55 = vld [vmem:[%s4495_s1 + $0x8] sm:$0xff] }
  0x17   : > { %721 = vmatpush.bf16.msra.mxu3 %v3587_v11  ;;  %v240_v29 = vrot.slane %v238_v22, 4  ;;  %v243_v30 = vrot.slane %v241_v23, 5  ;;  %v266_v53 = vshrl.u32 %v175_v46, 16  ;;  %v269_v54 = vshll.u32 %v175_v46, 16  ;;  %v3583_v56 = vld [vmem:[%s4495_s1 + $0x48] sm:$0xff]  ;;  %v3590_v57 = vld [vmem:[%s4495_s1 + $0x80] sm:$0xff] }
  0x18   : > { %499 = vmatpush.bf16.msra.mxu0 %v3594_v12  ;;  %v230_v34 = vor.u32 %v229_v28, %v226_v24  ;;  %v3598_v58 = vld [vmem:[%s4495_s1 + $0xc0] sm:$0xff]  ;;  %v254_v4 = vrot.slane %v252_v47, 4  ;;  %v257_v5 = vrot.slane %v255_v48, 5  ;;  %v214_v9 = vld [vmem:[%s3814_s16 + $0x48] sm:$0x11]  ;;  %v3637_v11 = vld [vmem:[%s4495_s1 + $0x1b8] sm:$0xff] }
  0x19   : > { %528 = vmatpush.bf16.msra.mxu1 %v3602_v13  ;;  %v244_v35 = vor.u32 %v243_v30, %v240_v29  ;;  %v2725_v59 = vld [vmem:[%s3814_s16] sm:$0xf]  ;;  %v3566_v2 = vld [vmem:[%s3814_s16 + $0x4] sm:$0xf]  ;;  %v268_v6 = vrot.slane %v266_v53, 4  ;;  %v271_v7 = vrot.slane %v269_v54, 5 }
  0x1a   : > { %693 = vmatpush.bf16.msra.mxu2 %v3578_v14  ;;  %v231_v39 = vrot.slane %v230_v34, 4  ;;  %v3574_v60 = vld [vmem:[%s4495_s1] sm:$0xff]  ;;  %v215_v10 = vld [vmem:[%s3814_s16 + $0x68] sm:$0x11]  ;;  %v3645_v12 = vld [vmem:[%s4495_s1 + $0x1f8] sm:$0xff]  ;;  %v258_v17 = vor.u32 %v257_v5, %v254_v4  ;;  %v261_v18 = vshll.u32 %v214_v9, 16 }
  0x1b   : > { %722 = vmatpush.bf16.msra.mxu3 %v3586_v15  ;;  %v245_v41 = vrot.slane %v244_v35, 4  ;;  %v3567_v1 = vld [vmem:[%s3814_s16 + $0x1c] sm:$0xf0]  ;;  %v2727_v3 = vld [vmem:[%s3814_s16 + $0x20] sm:$0xf0]  ;;  %v272_v19 = vor.u32 %v271_v7, %v268_v6  ;;  %v275_v20 = vshll.u32 %v215_v10, 16 }
  0x1c   : > { %500 = vmatpush.bf16.msra.mxu0 %v3593_v26  ;;  %v236_v51 = vsel %vm3859_vm2, %v231_v39, %v235_v40  ;;  %v3582_v8 = vld [vmem:[%s4495_s1 + $0x40] sm:$0xff]  ;;  %v2726_v15 = vor.u32 %v3567_v1, %v2725_v59  ;;  %v2730_v16 = vor.u32 %v3566_v2, %v2727_v3  ;;  %v3621_v21 = vld [vmem:[%s4495_s1 + $0x138] sm:$0xff]  ;;  %v3636_v23 = vld [vmem:[%s4495_s1 + $0x1b0] sm:$0xff]  ;;  %v263_v28 = vrot.slane %v261_v18, 5 }
  0x1d   : > { %529 = vmatpush.bf16.msra.mxu1 %v3601_v27  ;;  %v250_v52 = vsel %vm3859_vm2, %v245_v41, %v249_v42  ;;  %v368_v61 = vunpack.c.l.b16 %v236_v51  ;;  %v369_v63 = vunpack.c.h.b16 %v236_v51  ;;  %v3629_v22 = vld [vmem:[%s4495_s1 + $0x178] sm:$0xff]  ;;  %v3644_v24 = vld [vmem:[%s4495_s1 + $0x1f0] sm:$0xff]  ;;  %v176_v25 = vld [vmem:[%s3814_s16 + $0x80] sm:$0xff]  ;;  %v3918_v27 = vrot.slane %v258_v17, 4 }
  0x1e   : > { %694 = vmatpush.bf16.msra.mxu2 %v3577_v32  ;;  %v370_v62 = vunpack.c.l.b16 %v250_v52  ;;  %v371_v0 = vunpack.c.h.b16 %v250_v52  ;;  %v177_v26 = vld [vmem:[%s3814_s16 + $0xa0] sm:$0xff]  ;;  %v273_v29 = vrot.slane %v272_v19, 4  ;;  %v277_v30 = vrot.slane %v275_v20, 5  ;;  %v3628_v32 = vld [vmem:[%s4495_s1 + $0x170] sm:$0xff]  ;;  %v3643_v34 = vld [vmem:[%s4495_s1 + $0x1e8] sm:$0xff] }
  0x1f   : > { %723 = vmatpush.bf16.msra.mxu3 %v3585_v33  ;;  %v3635_v33 = vld [vmem:[%s4495_s1 + $0x1a8] sm:$0xff]  ;;  %v280_v35 = vshrl.u32 %v176_v25, 16  ;;  %v264_v39 = vsel %vm3859_vm2, %v3918_v27, %v263_v28  ;;  %v3634_v43 = vld [vmem:[%s4495_s1 + $0x1a0] sm:$0xff]  ;;  %v3633_v2 = vld [vmem:[%s4495_s1 + $0x198] sm:$0xff] }
  0x20   : > { %501 = vmatpush.bf16.msra.mxu0 %v3592_v36  ;;  %v384_v13 = vpack.c.b16 %v370_v62, %v368_v61  ;;  %v385_v14 = vpack.c.b16 %v371_v0, %v369_v63  ;;  %v283_v36 = vshll.u32 %v176_v25, 16  ;;  %v278_v40 = vsel %vm3859_vm2, %v273_v29, %v277_v30  ;;  %v3619_v41 = vld [vmem:[%s4495_s1 + $0x128] sm:$0xff]  ;;  %v2735_v59 = vld [vmem:[%s3814_s16 + $0x60] sm:$0xf0]  ;;  %v3641_v3 = vld [vmem:[%s4495_s1 + $0x1d8] sm:$0xff] }
  0x21   : > { %530 = vmatpush.bf16.msra.mxu1 %v3600_v37  ;;  %v294_v37 = vshrl.u32 %v177_v26, 16  ;;  %v3627_v42 = vld [vmem:[%s4495_s1 + $0x168] sm:$0xff]  ;;  %v282_v46 = vrot.slane %v280_v35, 4  ;;  %v374_v51 = vunpack.c.l.b16 %v278_v40  ;;  %v373_v52 = vunpack.c.h.b16 %v264_v39  ;;  %v3626_v61 = vld [vmem:[%s4495_s1 + $0x160] sm:$0xff]  ;;  %v3625_v9 = vld [vmem:[%s4495_s1 + $0x158] sm:$0xff] }
  0x22   : > { %695 = vmatpush.bf16.msra.mxu2 %v3576_v38  ;;  %v297_v38 = vshll.u32 %v177_v26, 16  ;;  %v285_v47 = vrot.slane %v283_v36, 5  ;;  %v375_v53 = vunpack.c.h.b16 %v278_v40  ;;  %v216_v54 = vld [vmem:[%s3814_s16 + $0x88] sm:$0x11]  ;;  %v179_v17 = vld [vmem:[%s3814_s16 + $0xe0] sm:$0xff]  ;;  %v3616_v18 = vld [vmem:[%s4495_s1 + $0x110] sm:$0xff] }
  0x23   : > { %724 = vmatpush.bf16.msra.mxu3 %v3584_v44  ;;  %v3642_v44 = vld [vmem:[%s4495_s1 + $0x1e0] sm:$0xff]  ;;  %v296_v48 = vrot.slane %v294_v37, 4  ;;  %v289_v63 = vshll.u32 %v216_v54, 16  ;;  %v3624_v19 = vld [vmem:[%s4495_s1 + $0x150] sm:$0xff]  ;;  %v322_v26 = vshrl.u32 %v179_v17, 16  ;;  %v325_v28 = vshll.u32 %v179_v17, 16 }
  0x24   : > { %502 = vmatpush.bf16.msra.mxu0 %v3591_v49  ;;  %v299_v49 = vrot.slane %v297_v38, 5  ;;  %v286_v62 = vor.u32 %v285_v47, %v282_v46  ;;  %v387_v5 = vpack.c.b16 %v375_v53, %v373_v52  ;;  %v3615_v29 = vld [vmem:[%s4495_s1 + $0x108] sm:$0xff]  ;;  %v3630_v35 = vld [vmem:[%s4495_s1 + $0x180] sm:$0xff] }
  0x25   : > { %531 = vmatpush.bf16.msra.mxu1 %v3599_v50  ;;  %v372_v50 = vunpack.c.l.b16 %v264_v39  ;;  %v3623_v30 = vld [vmem:[%s4495_s1 + $0x148] sm:$0xff]  ;;  %v3638_v36 = vld [vmem:[%s4495_s1 + $0x1c0] sm:$0xff] }
  0x26   : > { %696 = vmatpush.bf16.msra.mxu2 %v3575_v55  ;;  %v217_v55 = vld [vmem:[%s3814_s16 + $0xa8] sm:$0x11]  ;;  %v300_v0 = vor.u32 %v299_v49, %v296_v48  ;;  %v287_v10 = vrot.slane %v286_v62, 4  ;;  %v2741_v37 = vld [vmem:[%s3814_s16 + $0x80] sm:$0xf]  ;;  %v3677_v62 = vld [vmem:[%s4495_s1 + $0x2b8] sm:$0xff] }
  0x27   : > { %725 = vmatpush.bf16.msra.mxu3 %v3583_v56  ;;  %v2733_v56 = vld [vmem:[%s3814_s16 + $0x40] sm:$0xf]  ;;  %v303_v1 = vshll.u32 %v217_v55, 16  ;;  %v386_v4 = vpack.c.b16 %v374_v51, %v372_v50  ;;  %v218_v38 = vld [vmem:[%s3814_s16 + $0xc8] sm:$0x11] }
  0x28   : > { %503 = vmatpush.bf16.msra.mxu0 %v3590_v57  ;;  %v3569_v57 = vld [vmem:[%s3814_s16 + $0x5c] sm:$0xf0]  ;;  %v219_v46 = vld [vmem:[%s3814_s16 + $0xe8] sm:$0x11]  ;;  %v2743_v47 = vld [vmem:[%s3814_s16 + $0xa0] sm:$0xf0] }
  0x29   : > { %532 = vmatpush.bf16.msra.mxu1 %v3598_v58  ;;  %v3568_v58 = vld [vmem:[%s3814_s16 + $0x44] sm:$0xf]  ;;  %v2734_v6 = vor.u32 %v3569_v57, %v2733_v56  ;;  %v317_v51 = vshll.u32 %v218_v38, 16  ;;  %v331_v55 = vshll.u32 %v219_v46, 16  ;;  %v3667_v46 = vld [vmem:[%s4495_s1 + $0x268] sm:$0xff] }
  0x2a   : > { %697 = vmatpush.bf16.msra.mxu2 %v3574_v60  ;;  %v3618_v60 = vld [vmem:[%s4495_s1 + $0x120] sm:$0xff]  ;;  %v2738_v7 = vor.u32 %v3568_v58, %v2735_v59 }
  0x2b   : > { %726 = vmatpush.bf16.msra.mxu3 %v3582_v8  ;;  %504 = vmatmul.bf16.vlgmr.msra.gmra.mxu0 %v384_v13  ;;  %v3617_v8 = vld [vmem:[%s4495_s1 + $0x118] sm:$0xff]  ;;  %v305_v13 = vrot.slane %v303_v1, 5  ;;  %v3614_v48 = vld [vmem:[%s4495_s1 + $0x100] sm:$0xff]  ;;  %v319_v59 = vrot.slane %v317_v51, 5  ;;  %v2955_v1 = vld [vmem:[%s3814_s16 + $0x10] sm:$0xff] }
  0x2c   : > { %533 = vmatmul.bf16.vlgmr.msra.gmra.mxu1 %v385_v14  ;;  %926 = vmatpush.bf16.msrb.mxu0 %v3621_v21  ;;  %v3632_v14 = vld [vmem:[%s4495_s1 + $0x190] sm:$0xff]  ;;  %v3622_v49 = vld [vmem:[%s4495_s1 + $0x140] sm:$0xff] }
  0x2d   : > { %698 = vmatmul.bf16.vlgmr.msra.gmra.mxu2 %v2726_v15  ;;  %955 = vmatpush.bf16.msrb.mxu1 %v3629_v22  ;;  %v3640_v15 = vld [vmem:[%s4495_s1 + $0x1d0] sm:$0xff]  ;;  %v3631_v22 = vld [vmem:[%s4495_s1 + $0x188] sm:$0xff]  ;;  %v3666_v51 = vld [vmem:[%s4495_s1 + $0x260] sm:$0xff] }
  0x2e   : > { %1281 = vmatpush.bf16.msrb.mxu2 %v3637_v11  ;;  %727 = vmatmul.bf16.vlgmr.msra.gmra.mxu3 %v2730_v16  ;;  %v291_v11 = vrot.slane %v289_v63, 5  ;;  %v178_v16 = vld [vmem:[%s3814_s16 + $0xc0] sm:$0xff]  ;;  %v3685_v63 = vld [vmem:[%s4495_s1 + $0x2f8] sm:$0xff] }
  0x2f   : > { %1310 = vmatpush.bf16.msrb.mxu3 %v3645_v12  ;;  %v301_v12 = vrot.slane %v300_v0, 4  ;;  %v311_v25 = vshll.u32 %v178_v16, 16  ;;  %v3661_v0 = vld [vmem:[%s4495_s1 + $0x238] sm:$0xff] }
  0x30   : > { %927 = vmatpush.bf16.msrb.mxu0 %v3620_v31  ;;  %v292_v20 = vsel %vm3859_vm2, %v287_v10, %v291_v11  ;;  %v1009_v10 = vshrl.u32 %v2955_v1, 16  ;;  %v1012_v11 = vshll.u32 %v2955_v1, 16 }
  0x31   : > { %956 = vmatpush.bf16.msrb.mxu1 %v3628_v32  ;;  %v306_v21 = vsel %vm3859_vm2, %v301_v12, %v305_v13  ;;  %v376_v31 = vunpack.c.l.b16 %v292_v20  ;;  %v313_v40 = vrot.slane %v311_v25, 5  ;;  %v3572_v25 = vld [vmem:[%s3814_s16 + $0xc4] sm:$0xf] }
  0x32   : > { %1282 = vmatpush.bf16.msrb.mxu2 %v3636_v23  ;;  %v3639_v23 = vld [vmem:[%s4495_s1 + $0x1c8] sm:$0xff]  ;;  %v378_v32 = vunpack.c.l.b16 %v306_v21 }
  0x33   : > { %1311 = vmatpush.bf16.msrb.mxu3 %v3644_v24  ;;  %v308_v24 = vshrl.u32 %v178_v16, 16 }
  0x34   : > { %928 = vmatpush.bf16.msrb.mxu0 %v3619_v41  ;;  %v324_v41 = vrot.slane %v322_v26, 4  ;;  %v388_v50 = vpack.c.b16 %v378_v32, %v376_v31  ;;  %v2751_v26 = vld [vmem:[%s3814_s16 + $0xe0] sm:$0xf0] }
  0x35   : > { %957 = vmatpush.bf16.msrb.mxu1 %v3627_v42  ;;  %v310_v39 = vrot.slane %v308_v24, 4  ;;  %v327_v42 = vrot.slane %v325_v28, 5  ;;  %v2958_v28 = vld [vmem:[%s3814_s16 + $0x38] sm:$0x11] }
  0x36   : > { %1283 = vmatpush.bf16.msrb.mxu2 %v3635_v33  ;;  %v377_v33 = vunpack.c.h.b16 %v292_v20  ;;  %v2956_v20 = vld [vmem:[%s3814_s16 + $0x18] sm:$0x11] }
  0x37   : > { %1312 = vmatpush.bf16.msrb.mxu3 %v3643_v34  ;;  %v379_v34 = vunpack.c.h.b16 %v306_v21  ;;  %v314_v53 = vor.u32 %v313_v40, %v310_v39  ;;  %v328_v54 = vor.u32 %v327_v42, %v324_v41  ;;  %v1011_v21 = vrot.slane %v1009_v10, 4  ;;  %v3675_v41 = vld [vmem:[%s4495_s1 + $0x2a8] sm:$0xff] }
  0x38   : > { %929 = vmatpush.bf16.msrb.mxu0 %v3618_v60  ;;  %v1018_v32 = vshll.u32 %v2956_v20, 16  ;;  %v3683_v42 = vld [vmem:[%s4495_s1 + $0x2e8] sm:$0xff]  ;;  %v3657_v20 = vld [vmem:[%s4495_s1 + $0x218] sm:$0xff] }
  0x39   : > { %958 = vmatpush.bf16.msrb.mxu1 %v3626_v61  ;;  %v389_v52 = vpack.c.b16 %v379_v34, %v377_v33  ;;  %v315_v58 = vrot.slane %v314_v53, 4  ;;  %v329_v60 = vrot.slane %v328_v54, 4  ;;  %v333_v61 = vrot.slane %v331_v55, 5 }
  0x3a   : > { %1284 = vmatpush.bf16.msrb.mxu2 %v3634_v43  ;;  %v3571_v43 = vld [vmem:[%s3814_s16 + $0x9c] sm:$0xf0]  ;;  %v2754_v33 = vor.u32 %v3572_v25, %v2751_v26  ;;  %v3665_v25 = vld [vmem:[%s4495_s1 + $0x258] sm:$0xff]  ;;  %v3672_v26 = vld [vmem:[%s4495_s1 + $0x290] sm:$0xff] }
  0x3b   : > { %1313 = vmatpush.bf16.msrb.mxu3 %v3642_v44  ;;  %509 = vmatmul.bf16.gmra.mxu0 %v386_v4  ;;  %v3570_v44 = vld [vmem:[%s3814_s16 + $0x84] sm:$0xf]  ;;  %v2742_v56 = vor.u32 %v3571_v43, %v2741_v37  ;;  %v3676_v4 = vld [vmem:[%s4495_s1 + $0x2b0] sm:$0xff]  ;;  %v1020_v37 = vrot.slane %v1018_v32, 5  ;;  %v3659_v43 = vld [vmem:[%s4495_s1 + $0x228] sm:$0xff] }
  0x3c   : > { %538 = vmatmul.bf16.gmra.mxu1 %v387_v5  ;;  %930 = vmatpush.bf16.msrb.mxu0 %v3617_v8  ;;  %v2746_v57 = vor.u32 %v3570_v44, %v2743_v47  ;;  %v3684_v5 = vld [vmem:[%s4495_s1 + $0x2f0] sm:$0xff] }
  0x3d   : > { %703 = vmatmul.bf16.gmra.mxu2 %v2734_v6  ;;  %959 = vmatpush.bf16.msrb.mxu1 %v3625_v9  ;;  %v320_v6 = vsel %vm3859_vm2, %v315_v58, %v319_v59  ;;  %v3660_v8 = vld [vmem:[%s4495_s1 + $0x230] sm:$0xff] }
  0x3e   : > { %1285 = vmatpush.bf16.msrb.mxu2 %v3633_v2  ;;  %732 = vmatmul.bf16.gmra.mxu3 %v2738_v7  ;;  %v2957_v2 = vld [vmem:[%s3814_s16 + $0x30] sm:$0xff]  ;;  %v334_v7 = vsel %vm3859_vm2, %v329_v60, %v333_v61  ;;  %v381_v16 = vunpack.c.h.b16 %v320_v6 }
  0x3f   : > { %1314 = vmatpush.bf16.msrb.mxu3 %v3641_v3  ;;  %v3669_v3 = vld [vmem:[%s4495_s1 + $0x278] sm:$0xff]  ;;  %v3668_v9 = vld [vmem:[%s4495_s1 + $0x270] sm:$0xff]  ;;  %v1023_v12 = vshrl.u32 %v2957_v2, 16  ;;  %v1026_v13 = vshll.u32 %v2957_v2, 16  ;;  %v383_v17 = vunpack.c.h.b16 %v334_v7 }
  0x40   : > { %931 = vmatpush.bf16.msrb.mxu0 %v3616_v18  ;;  %v2749_v18 = vld [vmem:[%s3814_s16 + $0xc0] sm:$0xf]  ;;  %v2959_v44 = vld [vmem:[%s3814_s16 + $0x50] sm:$0xff] }
  0x41   : > { %960 = vmatpush.bf16.msrb.mxu1 %v3624_v19  ;;  %v3573_v19 = vld [vmem:[%s3814_s16 + $0xdc] sm:$0xf0]  ;;  %v1028_v24 = vrot.slane %v1026_v13, 5  ;;  %v2961_v47 = vld [vmem:[%s3814_s16 + $0x70] sm:$0xff]  ;;  %v1037_v54 = vshrl.u32 %v2959_v44, 16  ;;  %v1040_v55 = vshll.u32 %v2959_v44, 16 }
  0x42   : > { %1286 = vmatpush.bf16.msrb.mxu2 %v3632_v14  ;;  %v380_v14 = vunpack.c.l.b16 %v320_v6  ;;  %v2750_v31 = vor.u32 %v3573_v19, %v2749_v18  ;;  %v2861_v58 = vld [vmem:[%s3814_s16 + $0x10] sm:$0xf]  ;;  %v3606_v60 = vld [vmem:[%s3814_s16 + $0x14] sm:$0xf]  ;;  %v2960_v6 = vld [vmem:[%s3814_s16 + $0x58] sm:$0x11] }
  0x43   : > { %1315 = vmatpush.bf16.msrb.mxu3 %v3640_v15  ;;  %v382_v15 = vunpack.c.l.b16 %v334_v7  ;;  %v3607_v59 = vld [vmem:[%s3814_s16 + $0x2c] sm:$0xf0]  ;;  %v2863_v61 = vld [vmem:[%s3814_s16 + $0x30] sm:$0xf0]  ;;  %v1039_v2 = vrot.slane %v1037_v54, 4  ;;  %v1046_v13 = vshll.u32 %v2960_v6, 16 }
  0x44   : > { %932 = vmatpush.bf16.msrb.mxu0 %v3615_v29  ;;  %v2962_v7 = vld [vmem:[%s3814_s16 + $0x78] sm:$0x11]  ;;  %v3670_v6 = vld [vmem:[%s4495_s1 + $0x280] sm:$0xff] }
  0x45   : > { %961 = vmatpush.bf16.msrb.mxu1 %v3623_v30  ;;  %v390_v29 = vpack.c.b16 %v382_v15, %v380_v14  ;;  %v391_v30 = vpack.c.b16 %v383_v17, %v381_v16  ;;  %v1060_v15 = vshll.u32 %v2962_v7, 16  ;;  %v2963_v16 = vld [vmem:[%s3814_s16 + $0x90] sm:$0xff]  ;;  %v3673_v18 = vld [vmem:[%s4495_s1 + $0x298] sm:$0xff]  ;;  %v3678_v7 = vld [vmem:[%s4495_s1 + $0x2c0] sm:$0xff] }
  0x46   : > { %1287 = vmatpush.bf16.msrb.mxu2 %v3631_v22  ;;  %v1014_v22 = vrot.slane %v1012_v11, 5  ;;  %v2965_v17 = vld [vmem:[%s3814_s16 + $0xb0] sm:$0xff]  ;;  %v3681_v19 = vld [vmem:[%s4495_s1 + $0x2d8] sm:$0xff] }
  0x47   : > { %1316 = vmatpush.bf16.msrb.mxu3 %v3639_v23  ;;  %v1025_v23 = vrot.slane %v1023_v12, 4  ;;  %v1082_v32 = vshll.u32 %v2965_v17, 16 }
  0x48   : > { %933 = vmatpush.bf16.msrb.mxu0 %v3614_v48  ;;  %v1015_v34 = vor.u32 %v1014_v22, %v1011_v21  ;;  %v3674_v48 = vld [vmem:[%s4495_s1 + $0x2a0] sm:$0xff]  ;;  %v1048_v22 = vrot.slane %v1046_v13, 5 }
  0x49   : > { %962 = vmatpush.bf16.msrb.mxu1 %v3622_v49  ;;  %v3682_v49 = vld [vmem:[%s4495_s1 + $0x2e0] sm:$0xff]  ;;  %v1084_v44 = vrot.slane %v1082_v32, 5 }
  0x4a   : > { %1288 = vmatpush.bf16.msrb.mxu2 %v3630_v35  ;;  %v1029_v35 = vor.u32 %v1028_v24, %v1025_v23  ;;  %v1016_v38 = vrot.slane %v1015_v34, 4  ;;  %v1062_v24 = vrot.slane %v1060_v15, 5  ;;  %v3664_v34 = vld [vmem:[%s4495_s1 + $0x250] sm:$0xff] }
  0x4b   : > { %1317 = vmatpush.bf16.msrb.mxu3 %v3638_v36  ;;  %514 = vmatmul.bf16.gmra.mxu0 %v388_v50  ;;  %v1032_v36 = vshll.u32 %v2958_v28, 16  ;;  %v3658_v50 = vld [vmem:[%s4495_s1 + $0x220] sm:$0xff]  ;;  %v3680_v28 = vld [vmem:[%s4495_s1 + $0x2d0] sm:$0xff] }
  0x4c   : > { %543 = vmatmul.bf16.gmra.mxu1 %v389_v52  ;;  %1525 = vmatpush.bf16.msra.mxu0 %v3661_v0  ;;  %v1030_v39 = vrot.slane %v1029_v35, 4  ;;  %v1021_v52 = vsel %vm3859_vm2, %v1016_v38, %v1020_v37  ;;  %v2869_v37 = vld [vmem:[%s3814_s16 + $0x50] sm:$0xf] }
  0x4d   : > { %708 = vmatmul.bf16.gmra.mxu2 %v2742_v56  ;;  %1554 = vmatpush.bf16.msra.mxu1 %v3669_v3  ;;  %v1034_v40 = vrot.slane %v1032_v36, 5  ;;  %v1051_v56 = vshrl.u32 %v2961_v47, 16  ;;  %v1154_v0 = vunpack.c.h.b16 %v1021_v52  ;;  %v1042_v3 = vrot.slane %v1040_v55, 5  ;;  %v3609_v38 = vld [vmem:[%s3814_s16 + $0x6c] sm:$0xf0] }
  0x4e   : > { %737 = vmatmul.bf16.gmra.mxu3 %v2746_v57  ;;  %1880 = vmatpush.bf16.msra.mxu2 %v3677_v62  ;;  %v1054_v57 = vshll.u32 %v2961_v47, 16  ;;  %v1153_v62 = vunpack.c.l.b16 %v1021_v52  ;;  %v2870_v52 = vor.u32 %v3609_v38, %v2869_v37 }
  0x4f   : > { %1909 = vmatpush.bf16.msra.mxu3 %v3685_v63  ;;  %v1035_v53 = vsel %vm3859_vm2, %v1030_v39, %v1034_v40  ;;  %v1043_v12 = vor.u32 %v1042_v3, %v1039_v2  ;;  %v3608_v39 = vld [vmem:[%s3814_s16 + $0x54] sm:$0xf]  ;;  %v3655_v2 = vld [vmem:[%s4495_s1 + $0x208] sm:$0xff] }
  0x50   : > { %1526 = vmatpush.bf16.msra.mxu0 %v3660_v8  ;;  %v1155_v63 = vunpack.c.l.b16 %v1035_v53  ;;  %v1156_v1 = vunpack.c.h.b16 %v1035_v53  ;;  %v2862_v8 = vor.u32 %v3607_v59, %v2861_v58  ;;  %v2871_v40 = vld [vmem:[%s3814_s16 + $0x70] sm:$0xf0] }
  0x51   : > { %1555 = vmatpush.bf16.msra.mxu1 %v3668_v9  ;;  %v2866_v9 = vor.u32 %v3606_v60, %v2863_v61  ;;  %v1044_v21 = vrot.slane %v1043_v12, 4  ;;  %v2874_v53 = vor.u32 %v3608_v39, %v2871_v40  ;;  %v2967_v3 = vld [vmem:[%s3814_s16 + $0xd0] sm:$0xff] }
  0x52   : > { %1881 = vmatpush.bf16.msra.mxu2 %v3676_v4  ;;  %v1053_v4 = vrot.slane %v1051_v56, 4  ;;  %v1169_v10 = vpack.c.b16 %v1155_v63, %v1153_v62  ;;  %v1170_v11 = vpack.c.b16 %v1156_v1, %v1154_v0  ;;  %v3671_v0 = vld [vmem:[%s4495_s1 + $0x288] sm:$0xff]  ;;  %v1093_v12 = vshrl.u32 %v2967_v3, 16 }
  0x53   : > { %1910 = vmatpush.bf16.msra.mxu3 %v3684_v5  ;;  %v1056_v5 = vrot.slane %v1054_v57, 5  ;;  %v1049_v35 = vsel %vm3859_vm2, %v1044_v21, %v1048_v22  ;;  %v3679_v1 = vld [vmem:[%s4495_s1 + $0x2c8] sm:$0xff]  ;;  %v1096_v13 = vshll.u32 %v2967_v3, 16 }
  0x54   : > { %1527 = vmatpush.bf16.msra.mxu0 %v3659_v43 }
  0x55   : > { %1556 = vmatpush.bf16.msra.mxu1 %v3667_v46  ;;  %v1057_v14 = vor.u32 %v1056_v5, %v1053_v4  ;;  %v1157_v46 = vunpack.c.l.b16 %v1049_v35  ;;  %v2969_v4 = vld [vmem:[%s3814_s16 + $0xf0] sm:$0xff]  ;;  %v3663_v5 = vld [vmem:[%s4495_s1 + $0x248] sm:$0xff] }
  0x56   : > { %1882 = vmatpush.bf16.msra.mxu2 %v3675_v41  ;;  %v1110_v15 = vshll.u32 %v2969_v4, 16 }
  0x57   : > { %1911 = vmatpush.bf16.msra.mxu3 %v3683_v42  ;;  %v1058_v23 = vrot.slane %v1057_v14, 4  ;;  %v1107_v14 = vshrl.u32 %v2969_v4, 16 }
  0x58   : > { %1528 = vmatpush.bf16.msra.mxu0 %v3658_v50  ;;  %v2964_v50 = vld [vmem:[%s3814_s16 + $0x98] sm:$0x11] }
  0x59   : > { %1557 = vmatpush.bf16.msra.mxu1 %v3666_v51  ;;  %v1063_v36 = vsel %vm3859_vm2, %v1058_v23, %v1062_v24  ;;  %v2966_v51 = vld [vmem:[%s3814_s16 + $0xb8] sm:$0x11]  ;;  %v1074_v55 = vshll.u32 %v2964_v50, 16  ;;  %v2879_v23 = vld [vmem:[%s3814_s16 + $0xb0] sm:$0xf0]  ;;  %v1095_v24 = vrot.slane %v1093_v12, 4 }
  0x5a   : > { %1883 = vmatpush.bf16.msra.mxu2 %v3674_v48  ;;  %v1159_v47 = vunpack.c.l.b16 %v1063_v36  ;;  %v1158_v48 = vunpack.c.h.b16 %v1049_v35  ;;  %v1088_v57 = vshll.u32 %v2966_v51, 16  ;;  %v3701_v51 = vld [vmem:[%s4495_s1 + $0x338] sm:$0xff] }
  0x5b   : > { %519 = vmatmul.bf16.gmra.mxu0 %v390_v29  ;;  %1912 = vmatpush.bf16.msra.mxu3 %v3682_v49  ;;  %v1065_v29 = vshrl.u32 %v2963_v16, 16  ;;  %v1160_v49 = vunpack.c.h.b16 %v1063_v36  ;;  %v1076_v61 = vrot.slane %v1074_v55, 5  ;;  %v3613_v55 = vld [vmem:[%s3814_s16 + $0xec] sm:$0xf0] }
  0x5c   : > { %548 = vmatmul.bf16.gmra.mxu1 %v391_v30  ;;  %v1068_v30 = vshll.u32 %v2963_v16, 16  ;;  %1529 = vmatpush.bf16.msra.mxu0 %v3657_v20  ;;  %v1171_v58 = vpack.c.b16 %v1159_v47, %v1157_v46  ;;  %v1090_v63 = vrot.slane %v1088_v57, 5  ;;  %v2877_v16 = vld [vmem:[%s3814_s16 + $0x90] sm:$0xf]  ;;  %v3203_v46 = vld [vmem:[%s3814_s16 + $0x20] sm:$0xff] }
  0x5d   : > { %713 = vmatmul.bf16.gmra.mxu2 %v2750_v31  ;;  %v1079_v31 = vshrl.u32 %v2965_v17, 16  ;;  %1558 = vmatpush.bf16.msra.mxu1 %v3665_v25  ;;  %v1067_v41 = vrot.slane %v1065_v29, 4  ;;  %v1172_v59 = vpack.c.b16 %v1160_v49, %v1158_v48  ;;  %v3611_v17 = vld [vmem:[%s3814_s16 + $0xac] sm:$0xf0]  ;;  %v1098_v25 = vrot.slane %v1096_v13, 5 }
  0x5e   : > { %742 = vmatmul.bf16.gmra.mxu3 %v2754_v33  ;;  %1884 = vmatpush.bf16.msra.mxu2 %v3673_v18  ;;  %v3656_v33 = vld [vmem:[%s4495_s1 + $0x210] sm:$0xff]  ;;  %v1070_v42 = vrot.slane %v1068_v30, 5  ;;  %v2968_v29 = vld [vmem:[%s3814_s16 + $0xd8] sm:$0x11]  ;;  %v1608_v49 = vshrl.u32 %v3203_v46, 16  ;;  %v1611_v50 = vshll.u32 %v3203_v46, 16 }
  0x5f   : > { %1913 = vmatpush.bf16.msra.mxu3 %v3681_v19  ;;  %v1081_v43 = vrot.slane %v1079_v31, 4  ;;  %v3610_v18 = vld [vmem:[%s3814_s16 + $0x94] sm:$0xf]  ;;  %v2970_v30 = vld [vmem:[%s3814_s16 + $0xf8] sm:$0x11]  ;;  %v2878_v31 = vor.u32 %v3611_v17, %v2877_v16  ;;  %v1099_v35 = vor.u32 %v1098_v25, %v1095_v24  ;;  %v1102_v36 = vshll.u32 %v2968_v29, 16 }
  0x60   : > { %1530 = vmatpush.bf16.msra.mxu0 %v3656_v33  ;;  %v1071_v54 = vor.u32 %v1070_v42, %v1067_v41  ;;  %v2882_v32 = vor.u32 %v3610_v18, %v2879_v23  ;;  %v1116_v38 = vshll.u32 %v2970_v30, 16  ;;  %v3715_v16 = vld [vmem:[%s4495_s1 + $0x3a8] sm:$0xff]  ;;  %v3209_v18 = vld [vmem:[%s3814_s16 + $0x80] sm:$0xff] }
  0x61   : > { %1559 = vmatpush.bf16.msra.mxu1 %v3664_v34  ;;  %v1085_v56 = vor.u32 %v1084_v44, %v1081_v43  ;;  %v1100_v39 = vrot.slane %v1099_v35, 4  ;;  %v1104_v40 = vrot.slane %v1102_v36, 5  ;;  %v3717_v43 = vld [vmem:[%s4495_s1 + $0x3b8] sm:$0xff]  ;;  %v3723_v17 = vld [vmem:[%s4495_s1 + $0x3e8] sm:$0xff]  ;;  %v1650_v23 = vshrl.u32 %v3209_v18, 16  ;;  %v3714_v30 = vld [vmem:[%s4495_s1 + $0x3a0] sm:$0xff] }
  0x62   : > { %1885 = vmatpush.bf16.msra.mxu2 %v3672_v26  ;;  %v1072_v60 = vrot.slane %v1071_v54, 4  ;;  %v1109_v26 = vrot.slane %v1107_v14, 4  ;;  %v1118_v42 = vrot.slane %v1116_v38, 5  ;;  %v3725_v44 = vld [vmem:[%s4495_s1 + $0x3f8] sm:$0xff]  ;;  %v2885_v54 = vld [vmem:[%s3814_s16 + $0xd0] sm:$0xf] }
  0x63   : > { %1914 = vmatpush.bf16.msra.mxu3 %v3680_v28  ;;  %v1086_v62 = vrot.slane %v1085_v56, 4  ;;  %v1112_v28 = vrot.slane %v1110_v15, 5  ;;  %v1105_v47 = vsel %vm3859_vm2, %v1100_v39, %v1104_v40  ;;  %v2886_v3 = vor.u32 %v3613_v55, %v2885_v54  ;;  %v3207_v15 = vld [vmem:[%s3814_s16 + $0x60] sm:$0xff]  ;;  %v3707_v29 = vld [vmem:[%s4495_s1 + $0x368] sm:$0xff] }
  0x64   : > { %1531 = vmatpush.bf16.msra.mxu0 %v3655_v2  ;;  %v1165_v56 = vunpack.c.l.b16 %v1105_v47  ;;  %v3206_v2 = vld [vmem:[%s3814_s16 + $0x48] sm:$0x11]  ;;  %v1653_v24 = vshll.u32 %v3209_v18, 16  ;;  %v3109_v25 = vld [vmem:[%s3814_s16 + $0x20] sm:$0xf]  ;;  %v1652_v40 = vrot.slane %v1650_v23, 4 }
  0x65   : > { %1560 = vmatpush.bf16.msra.mxu1 %v3663_v5  ;;  %v1113_v37 = vor.u32 %v1112_v28, %v1109_v26  ;;  %v3647_v26 = vld [vmem:[%s3814_s16 + $0x3c] sm:$0xf0]  ;;  %v3699_v28 = vld [vmem:[%s4495_s1 + $0x328] sm:$0xff]  ;;  %v3111_v36 = vld [vmem:[%s3814_s16 + $0x40] sm:$0xf0] }
  0x66   : > { %1886 = vmatpush.bf16.msra.mxu2 %v3671_v0  ;;  %v1613_v0 = vrot.slane %v1611_v50, 5  ;;  %v3722_v35 = vld [vmem:[%s4495_s1 + $0x3e0] sm:$0xff]  ;;  %v3208_v39 = vld [vmem:[%s3814_s16 + $0x68] sm:$0x11]  ;;  %v3712_v18 = vld [vmem:[%s4495_s1 + $0x390] sm:$0xff] }
  0x67   : > { %1915 = vmatpush.bf16.msra.mxu3 %v3679_v1  ;;  %v1114_v41 = vrot.slane %v1113_v37, 4  ;;  %v3204_v1 = vld [vmem:[%s3814_s16 + $0x28] sm:$0x11]  ;;  %v3698_v55 = vld [vmem:[%s4495_s1 + $0x320] sm:$0xff] }
  0x69   : > { %v1119_v48 = vsel %vm3859_vm2, %v1114_v41, %v1118_v42  ;;  %v1655_v41 = vrot.slane %v1653_v24, 5  ;;  %v3210_v42 = vld [vmem:[%s3814_s16 + $0x88] sm:$0x11]  ;;  %v3720_v24 = vld [vmem:[%s4495_s1 + $0x3d0] sm:$0xff] }
  0x6a   : > { %1887 = vmatpush.bf16.msra.mxu2 %v3670_v6  ;;  %v1167_v57 = vunpack.c.l.b16 %v1119_v48 }
  0x6b   : > { %934 = vmatmul.bf16.vlgmr.msrb.gmra.mxu0 %v2862_v8  ;;  %v1077_v8 = vsel %vm3859_vm2, %v1072_v60, %v1076_v61  ;;  %1916 = vmatpush.bf16.msra.mxu3 %v3678_v7  ;;  %v2887_v60 = vld [vmem:[%s3814_s16 + $0xf0] sm:$0xf0]  ;;  %v1166_v61 = vunpack.c.h.b16 %v1105_v47  ;;  %v1645_v47 = vshll.u32 %v3208_v39, 16 }
  0x6c   : > { %963 = vmatmul.bf16.vlgmr.msrb.gmra.mxu1 %v2866_v9  ;;  %v1091_v9 = vsel %vm3859_vm2, %v1086_v62, %v1090_v63  ;;  %v1161_v19 = vunpack.c.l.b16 %v1077_v8  ;;  %v1162_v21 = vunpack.c.h.b16 %v1077_v8  ;;  %v1168_v62 = vunpack.c.h.b16 %v1119_v48 }
  0x6d   : > { %1289 = vmatmul.bf16.vlgmr.msrb.gmra.mxu2 %v1169_v10  ;;  %v3654_v10 = vld [vmem:[%s4495_s1 + $0x200] sm:$0xff]  ;;  %v1163_v20 = vunpack.c.l.b16 %v1091_v9  ;;  %v1164_v22 = vunpack.c.h.b16 %v1091_v9  ;;  %v1610_v63 = vrot.slane %v1608_v49, 4  ;;  %v1175_v5 = vpack.c.b16 %v1167_v57, %v1165_v56 }
  0x6e   : > { %1318 = vmatmul.bf16.vlgmr.msrb.gmra.mxu3 %v1170_v11  ;;  %v3662_v11 = vld [vmem:[%s4495_s1 + $0x240] sm:$0xff]  ;;  %1532 = vmatpush.bf16.msra.mxu0 %v3654_v10  ;;  %v1176_v6 = vpack.c.b16 %v1168_v62, %v1166_v61  ;;  %v1617_v8 = vshll.u32 %v3204_v1, 16  ;;  %v1631_v9 = vshll.u32 %v3206_v2, 16  ;;  %v3700_v10 = vld [vmem:[%s4495_s1 + $0x330] sm:$0xff]  ;;  %v3713_v62 = vld [vmem:[%s4495_s1 + $0x398] sm:$0xff] }
  0x6f   : > { %1561 = vmatpush.bf16.msra.mxu1 %v3662_v11  ;;  %v1173_v33 = vpack.c.b16 %v1163_v20, %v1161_v19  ;;  %v1174_v34 = vpack.c.b16 %v1164_v22, %v1162_v21  ;;  %2479 = vmatpush.bf16.msrb.mxu2 %v3717_v43  ;;  %v1614_v7 = vor.u32 %v1613_v0, %v1610_v63  ;;  %v3708_v11 = vld [vmem:[%s4495_s1 + $0x370] sm:$0xff]  ;;  %v1636_v19 = vshrl.u32 %v3207_v15, 16  ;;  %v3706_v56 = vld [vmem:[%s4495_s1 + $0x360] sm:$0xff]  ;;  %v3721_v63 = vld [vmem:[%s4495_s1 + $0x3d8] sm:$0xff] }
  0x70   : > { %2508 = vmatpush.bf16.msrb.mxu3 %v3725_v44  ;;  %v1619_v13 = vrot.slane %v1617_v8, 5  ;;  %v1633_v14 = vrot.slane %v1631_v9, 5  ;;  %v1639_v20 = vshll.u32 %v3207_v15, 16  ;;  %v3110_v43 = vor.u32 %v3647_v26, %v3109_v25  ;;  %v3211_v61 = vld [vmem:[%s3814_s16 + $0xa0] sm:$0xff] }
  0x71   : > { %v1615_v12 = vrot.slane %v1614_v7, 4  ;;  %v3213_v0 = vld [vmem:[%s3814_s16 + $0xc0] sm:$0xff] }
  0x72   : > { %2124 = vmatpush.bf16.msrb.mxu0 %v3701_v51  ;;  %v1634_v22 = vsel %vm3859_vm2, %v3918_v27, %v1633_v14  ;;  %v3649_v14 = vld [vmem:[%s3814_s16 + $0x7c] sm:$0xf0]  ;;  %v3119_v25 = vld [vmem:[%s3814_s16 + $0x80] sm:$0xf0] }
  0x73   : > { %v1620_v21 = vsel %vm3859_vm2, %v1615_v12, %v1619_v13  ;;  %v1755_v38 = vunpack.c.h.b16 %v1634_v22  ;;  %v3117_v13 = vld [vmem:[%s3814_s16 + $0x60] sm:$0xf] }
  0x74   : > { %v1752_v27 = vunpack.c.l.b16 %v1620_v21  ;;  %v1753_v37 = vunpack.c.h.b16 %v1620_v21 }
  0x76   : > { %2125 = vmatpush.bf16.msrb.mxu0 %v3700_v10  ;;  %v1769_v51 = vpack.c.b16 %v1755_v38, %v1753_v37  ;;  %v1678_v10 = vshrl.u32 %v3213_v0, 16 }
  0x7a   : > { %2126 = vmatpush.bf16.msrb.mxu0 %v3699_v28 }
  0x7b   : > { %939 = vmatmul.bf16.gmra.mxu0 %v2870_v52  ;;  %v3709_v52 = vld [vmem:[%s4495_s1 + $0x378] sm:$0xff] }
  0x7c   : > { %968 = vmatmul.bf16.gmra.mxu1 %v2874_v53  ;;  %v3716_v53 = vld [vmem:[%s4495_s1 + $0x3b0] sm:$0xff] }
  0x7d   : > { %1294 = vmatmul.bf16.gmra.mxu2 %v1171_v58  ;;  %v3724_v58 = vld [vmem:[%s4495_s1 + $0x3f0] sm:$0xff]  ;;  %2153 = vmatpush.bf16.msrb.mxu1 %v3709_v52  ;;  %v1656_v52 = vor.u32 %v1655_v41, %v1652_v40 }
  0x7e   : > { %1323 = vmatmul.bf16.gmra.mxu3 %v1172_v59  ;;  %v3612_v59 = vld [vmem:[%s3814_s16 + $0xd4] sm:$0xf]  ;;  %2480 = vmatpush.bf16.msrb.mxu2 %v3716_v53  ;;  %v1659_v53 = vshll.u32 %v3210_v42, 16 }
  0x7f   : > { %2509 = vmatpush.bf16.msrb.mxu3 %v3724_v58  ;;  %v2890_v4 = vor.u32 %v3612_v59, %v2887_v60  ;;  %v1647_v58 = vrot.slane %v1645_v47, 5  ;;  %v1657_v59 = vrot.slane %v1656_v52, 4  ;;  %2127 = vmatpush.bf16.msrb.mxu0 %v3698_v55  ;;  %v3711_v55 = vld [vmem:[%s4495_s1 + $0x388] sm:$0xff] }
  0x80   : > { %v1661_v60 = vrot.slane %v1659_v53, 5 }
  0x81   : > { %2154 = vmatpush.bf16.msrb.mxu1 %v3708_v11  ;;  %v1681_v11 = vshll.u32 %v3213_v0, 16 }
  0x82   : > { %2481 = vmatpush.bf16.msrb.mxu2 %v3715_v16  ;;  %v1662_v9 = vsel %vm3859_vm2, %v1657_v59, %v1661_v60  ;;  %v3697_v16 = vld [vmem:[%s4495_s1 + $0x318] sm:$0xff] }
  0x83   : > { %2510 = vmatpush.bf16.msrb.mxu3 %v3723_v17  ;;  %v3705_v17 = vld [vmem:[%s4495_s1 + $0x358] sm:$0xff]  ;;  %v1758_v21 = vunpack.c.l.b16 %v1662_v9  ;;  %v1759_v28 = vunpack.c.h.b16 %v1662_v9  ;;  %2128 = vmatpush.bf16.msrb.mxu0 %v3697_v16  ;;  %v3695_v9 = vld [vmem:[%s4495_s1 + $0x308] sm:$0xff] }
  0x85   : > { %2155 = vmatpush.bf16.msrb.mxu1 %v3707_v29  ;;  %v3212_v29 = vld [vmem:[%s3814_s16 + $0xa8] sm:$0x11] }
  0x86   : > { %2482 = vmatpush.bf16.msrb.mxu2 %v3714_v30  ;;  %v1680_v30 = vrot.slane %v1678_v10, 4  ;;  %v1673_v38 = vshll.u32 %v3212_v29, 16  ;;  %v3703_v10 = vld [vmem:[%s4495_s1 + $0x348] sm:$0xff] }
  0x87   : > { %2511 = vmatpush.bf16.msrb.mxu3 %v3722_v35 }
  0x89   : > { %2156 = vmatpush.bf16.msrb.mxu1 %v3706_v56  ;;  %v3719_v56 = vld [vmem:[%s4495_s1 + $0x3c8] sm:$0xff] }
  0x8a   : > { %2483 = vmatpush.bf16.msrb.mxu2 %v3713_v62 }
  0x8b   : > { %944 = vmatmul.bf16.gmra.mxu0 %v2878_v31  ;;  %v3646_v31 = vld [vmem:[%s3814_s16 + $0x24] sm:$0xf]  ;;  %2512 = vmatpush.bf16.msrb.mxu3 %v3721_v63 }
  0x8c   : > { %973 = vmatmul.bf16.gmra.mxu1 %v2882_v32  ;;  %v1754_v32 = vunpack.c.l.b16 %v1634_v22  ;;  %v3114_v44 = vor.u32 %v3646_v31, %v3111_v36  ;;  %v1683_v31 = vrot.slane %v1681_v11, 5  ;;  %v3710_v11 = vld [vmem:[%s4495_s1 + $0x380] sm:$0xff] }
  0x8d   : > { %1299 = vmatmul.bf16.gmra.mxu2 %v1173_v33  ;;  %v1638_v33 = vrot.slane %v1636_v19, 4  ;;  %v3648_v19 = vld [vmem:[%s3814_s16 + $0x64] sm:$0xf]  ;;  %2157 = vmatpush.bf16.msrb.mxu1 %v3705_v17 }
  0x8e   : > { %1328 = vmatmul.bf16.gmra.mxu3 %v1174_v34  ;;  %v1641_v34 = vrot.slane %v1639_v20, 5  ;;  %v1768_v50 = vpack.c.b16 %v1754_v32, %v1752_v27  ;;  %v3214_v27 = vld [vmem:[%s3814_s16 + $0xc8] sm:$0x11]  ;;  %2484 = vmatpush.bf16.msrb.mxu2 %v3712_v18  ;;  %v3118_v32 = vor.u32 %v3649_v14, %v3117_v13  ;;  %v3122_v35 = vor.u32 %v3648_v19, %v3119_v25  ;;  %v3718_v18 = vld [vmem:[%s4495_s1 + $0x3c0] sm:$0xff] }
  0x8f   : > { %2513 = vmatpush.bf16.msrb.mxu3 %v3720_v24  ;;  %v3127_v19 = vld [vmem:[%s3814_s16 + $0xc0] sm:$0xf0]  ;;  %v3218_v25 = vld [vmem:[%s3814_s16 + $0x108] sm:$0x11] }
  0x90   : > { %v1642_v46 = vor.u32 %v1641_v34, %v1638_v33 }
  0x92   : > { %v1643_v57 = vrot.slane %v1642_v46, 4  ;;  %2485 = vmatpush.bf16.msrb.mxu2 %v3711_v55 }
  0x93   : > { %2514 = vmatpush.bf16.msrb.mxu3 %v3719_v56 }
  0x96   : > { %2486 = vmatpush.bf16.msrb.mxu2 %v3710_v11  ;;  %v3452_v11 = vld [vmem:[%s3814_s16 + $0x38] sm:$0x11] }
  0x97   : > { %2515 = vmatpush.bf16.msrb.mxu3 %v3718_v18 }
  0x9b   : > { %949 = vmatmul.bf16.gmra.mxu0 %v2886_v3  ;;  %v1648_v3 = vsel %vm3859_vm2, %v1643_v57, %v1647_v58  ;;  %v3217_v57 = vld [vmem:[%s3814_s16 + $0x100] sm:$0xff] }
  0x9c   : > { %978 = vmatmul.bf16.gmra.mxu1 %v2890_v4  ;;  %v1664_v4 = vshrl.u32 %v3211_v61, 16  ;;  %v1756_v20 = vunpack.c.l.b16 %v1648_v3  ;;  %v1757_v26 = vunpack.c.h.b16 %v1648_v3  ;;  %v1706_v3 = vshrl.u32 %v3217_v57, 16 }
  0x9d   : > { %1304 = vmatmul.bf16.gmra.mxu2 %v1175_v5  ;;  %v1667_v5 = vshll.u32 %v3211_v61, 16 }
  0x9e   : > { %1333 = vmatmul.bf16.gmra.mxu3 %v1176_v6  ;;  %v1666_v22 = vrot.slane %v1664_v4, 4  ;;  %v1770_v36 = vpack.c.b16 %v1758_v21, %v1756_v20  ;;  %v1771_v42 = vpack.c.b16 %v1759_v28, %v1757_v26  ;;  %v1709_v4 = vshll.u32 %v3217_v57, 16 }
  0x9f   : > { %v1669_v23 = vrot.slane %v1667_v5, 5 }
  0xa0   : > { %v1711_v24 = vrot.slane %v1709_v4, 5 }
  0xa1   : > { %v1670_v37 = vor.u32 %v1669_v23, %v1666_v22  ;;  %v3216_v22 = vld [vmem:[%s3814_s16 + $0xe8] sm:$0x11]  ;;  %v1708_v23 = vrot.slane %v1706_v3, 4 }
  0xa8   : > { %v505_v48 = vpop.f32.mrf.mxu0 }
  0xa9   : > { %v534_v49 = vpop.f32.mrf.mxu1 }
  0xaa   : > { %v535_v54 = vadd.f32 %v534_v49, %v505_v48  ;;  %v3696_v48 = vld [vmem:[%s4495_s1 + $0x310] sm:$0xff] }
  0xab   : > { %1533 = vmatmul.bf16.vlgmr.msra.gmra.mxu0 %v3110_v43  ;;  %v1684_v43 = vor.u32 %v1683_v31, %v1680_v30  ;;  %v3704_v49 = vld [vmem:[%s4495_s1 + $0x350] sm:$0xff] }
  0xac   : > { %1562 = vmatmul.bf16.vlgmr.msra.gmra.mxu1 %v3114_v44  ;;  %v1687_v44 = vshll.u32 %v3214_v27, 16  ;;  %2129 = vmatpush.bf16.msrb.mxu0 %v3696_v48 }
  0xad   : > { %1888 = vmatmul.bf16.vlgmr.msra.gmra.mxu2 %v1768_v50  ;;  %v1671_v50 = vrot.slane %v1670_v37, 4  ;;  %v1685_v52 = vrot.slane %v1684_v43, 4  ;;  %2158 = vmatpush.bf16.msrb.mxu1 %v3704_v49  ;;  %v3451_v49 = vld [vmem:[%s3814_s16 + $0x30] sm:$0xff] }
  0xae   : > { %1917 = vmatmul.bf16.vlgmr.msra.gmra.mxu3 %v1769_v51  ;;  %v1675_v51 = vrot.slane %v1673_v38, 5  ;;  %v1689_v53 = vrot.slane %v1687_v44, 5  ;;  %v2210_v55 = vshll.u32 %v3451_v49, 16 }
  0xb0   : > { %v699_v1 = vpop.f32.mrf.mxu2  ;;  %v507_v7 = vpop.f32.mrf.mxu0  ;;  %v1676_v60 = vsel %vm3859_vm2, %v1671_v50, %v1675_v51  ;;  %2130 = vmatpush.bf16.msrb.mxu0 %v3695_v9  ;;  %v3453_v50 = vld [vmem:[%s3814_s16 + $0x50] sm:$0xff] }
  0xb1   : > { %v728_v2 = vpop.f32.mrf.mxu3  ;;  %v700_v6 = vadd.f32 %v699_v1, %v535_v54  ;;  %v536_v8 = vpop.f32.mrf.mxu1  ;;  %v3215_v54 = vld [vmem:[%s3814_s16 + $0xe0] sm:$0xff]  ;;  %v1760_v13 = vunpack.c.l.b16 %v1676_v60  ;;  %v1761_v20 = vunpack.c.h.b16 %v1676_v60  ;;  %2159 = vmatpush.bf16.msrb.mxu1 %v3703_v10  ;;  %v2221_v60 = vshrl.u32 %v3453_v50, 16 }
  0xb2   : > { %v537_v12 = vadd.f32 %v536_v8, %v507_v7  ;;  %v1692_v61 = vshrl.u32 %v3215_v54, 16  ;;  %v1695_v62 = vshll.u32 %v3215_v54, 16  ;;  %v3651_v7 = vld [vmem:[%s3814_s16 + $0xbc] sm:$0xf0]  ;;  %v2207_v54 = vshrl.u32 %v3451_v49, 16 }
  0xb3   : > { %v4251_v15 = vadd.f32 %v728_v2, %v700_v6  ;;  %v1690_v2 = vsel %vm3859_vm2, %v1685_v52, %v1689_v53  ;;  %v3125_v6 = vld [vmem:[%s3814_s16 + $0xa0] sm:$0xf] }
  0xb4   : > { %v1762_v14 = vunpack.c.l.b16 %v1690_v2  ;;  %v1694_v16 = vrot.slane %v1692_v61, 4  ;;  %v1697_v17 = vrot.slane %v1695_v62, 5  ;;  %v1763_v21 = vunpack.c.h.b16 %v1690_v2  ;;  %v3652_v2 = vld [vmem:[%s3814_s16 + $0xe4] sm:$0xf] }
  0xb5   : > { %v3126_v26 = vor.u32 %v3651_v7, %v3125_v6  ;;  %v2224_v61 = vshll.u32 %v3453_v50, 16  ;;  %v2212_v6 = vrot.slane %v2210_v55, 5  ;;  %v3135_v7 = vld [vmem:[%s3814_s16 + $0x100] sm:$0xf0]  ;;  %v3686_v55 = vld [vmem:[%s3814_s16 + $0x34] sm:$0xf] }
  0xb6   : > { %v1772_v31 = vpack.c.b16 %v1762_v14, %v1760_v13  ;;  %v1698_v27 = vor.u32 %v1697_v17, %v1694_v16  ;;  %v1773_v38 = vpack.c.b16 %v1763_v21, %v1761_v20  ;;  %v3454_v14 = vld [vmem:[%s3814_s16 + $0x58] sm:$0x11] }
  0xb7   : > { %v2226_v13 = vrot.slane %v2224_v61, 5 }
  0xb8   : > { %v701_v33 = vpop.f32.mrf.mxu2  ;;  %v510_v40 = vpop.f32.mrf.mxu0  ;;  %v1699_v43 = vrot.slane %v1698_v27, 4 }
  0xb9   : > { %v730_v34 = vpop.f32.mrf.mxu3  ;;  %v702_v39 = vadd.f32 %v701_v33, %v537_v12  ;;  %v539_v41 = vpop.f32.mrf.mxu1  ;;  %v3650_v12 = vld [vmem:[%s3814_s16 + $0xa4] sm:$0xf] }
  0xba   : > { %v540_v46 = vadd.f32 %v539_v41, %v510_v40  ;;  %v3130_v30 = vor.u32 %v3650_v12, %v3127_v19  ;;  %v3694_v33 = vld [vmem:[%s4495_s1 + $0x300] sm:$0xff]  ;;  %v1715_v40 = vshll.u32 %v3218_v25, 16  ;;  %v2223_v12 = vrot.slane %v2221_v60, 4  ;;  %v3359_v60 = vld [vmem:[%s3814_s16 + $0x50] sm:$0xf0] }
  0xbb   : > { %v4269_v47 = vadd.f32 %v730_v34, %v702_v39  ;;  %1538 = vmatmul.bf16.gmra.mxu0 %v3118_v32  ;;  %v1701_v32 = vshll.u32 %v3216_v22, 16  ;;  %v3702_v34 = vld [vmem:[%s4495_s1 + $0x340] sm:$0xff]  ;;  %v1712_v39 = vor.u32 %v1711_v24, %v1708_v23  ;;  %v3138_v19 = vor.u32 %v3652_v2, %v3135_v7 }
  0xbc   : > { %1567 = vmatmul.bf16.gmra.mxu1 %v3122_v35  ;;  %2131 = vmatpush.bf16.msrb.mxu0 %v3694_v33  ;;  %v1717_v48 = vrot.slane %v1715_v40, 5  ;;  %v2216_v22 = vshll.u32 %v3452_v11, 16  ;;  %v3362_v7 = vor.u32 %v3686_v55, %v3359_v60 }
  0xbd   : > { %1893 = vmatmul.bf16.gmra.mxu2 %v1770_v36  ;;  %2160 = vmatpush.bf16.msrb.mxu1 %v3702_v34  ;;  %v1703_v44 = vrot.slane %v1701_v32, 5 }
  0xbe   : > { %1922 = vmatmul.bf16.gmra.mxu3 %v1771_v42  ;;  %v2218_v32 = vrot.slane %v2216_v22, 5 }
  0xbf   : > { %v1704_v53 = vsel %vm3859_vm2, %v1699_v43, %v1703_v44 }
  0xc0   : > { %v704_v58 = vpop.f32.mrf.mxu2  ;;  %v512_v0 = vpop.f32.mrf.mxu0  ;;  %v1764_v3 = vunpack.c.l.b16 %v1704_v53  ;;  %v1765_v9 = vunpack.c.h.b16 %v1704_v53  ;;  %v3357_v53 = vld [vmem:[%s3814_s16 + $0x30] sm:$0xf] }
  0xc1   : > { %v733_v59 = vpop.f32.mrf.mxu3  ;;  %v705_v63 = vadd.f32 %v704_v58, %v540_v46  ;;  %v541_v1 = vpop.f32.mrf.mxu1  ;;  %v1713_v46 = vrot.slane %v1712_v39, 4 }
  0xc2   : > { %v542_v5 = vadd.f32 %v541_v1, %v512_v0  ;;  %v3133_v0 = vld [vmem:[%s3814_s16 + $0xe0] sm:$0xf] }
  0xc3   : > { %v4291_v8 = vadd.f32 %v733_v59, %v705_v63  ;;  %v1718_v59 = vsel %vm3859_vm2, %v1713_v46, %v1717_v48  ;;  %v3653_v1 = vld [vmem:[%s3814_s16 + $0xfc] sm:$0xf0] }
  0xc4   : > { %v1766_v4 = vunpack.c.l.b16 %v1718_v59  ;;  %v1767_v10 = vunpack.c.h.b16 %v1718_v59  ;;  %v3134_v16 = vor.u32 %v3653_v1, %v3133_v0  ;;  %v3456_v0 = vld [vmem:[%s3814_s16 + $0x78] sm:$0x11] }
  0xc5   : > { %v2244_v11 = vshll.u32 %v3456_v0, 16 }
  0xc6   : > { %v1774_v20 = vpack.c.b16 %v1766_v4, %v1764_v3  ;;  %v3458_v3 = vld [vmem:[%s3814_s16 + $0x98] sm:$0x11] }
  0xc8   : > { %v706_v28 = vpop.f32.mrf.mxu2  ;;  %v515_v36 = vpop.f32.mrf.mxu0 }
  0xc9   : > { %v735_v29 = vpop.f32.mrf.mxu3  ;;  %v707_v35 = vadd.f32 %v706_v28, %v542_v5  ;;  %v544_v37 = vpop.f32.mrf.mxu1  ;;  %v2209_v5 = vrot.slane %v2207_v54, 4  ;;  %v2227_v28 = vor.u32 %v2226_v13, %v2223_v12  ;;  %v3687_v54 = vld [vmem:[%s3814_s16 + $0x4c] sm:$0xf0] }
  0xca   : > { %v545_v41 = vadd.f32 %v544_v37, %v515_v36  ;;  %v3457_v36 = vld [vmem:[%s3814_s16 + $0x90] sm:$0xff]  ;;  %v3358_v4 = vor.u32 %v3687_v54, %v3357_v53 }
  0xcb   : > { %v4315_v42 = vadd.f32 %v735_v29, %v707_v35  ;;  %1543 = vmatmul.bf16.gmra.mxu0 %v3126_v26  ;;  %v2213_v21 = vor.u32 %v2212_v6, %v2209_v5  ;;  %v1775_v26 = vpack.c.b16 %v1767_v10, %v1765_v9  ;;  %v2230_v29 = vshll.u32 %v3454_v14, 16  ;;  %v3455_v35 = vld [vmem:[%s3814_s16 + $0x70] sm:$0xff] }
  0xcc   : > { %1572 = vmatmul.bf16.gmra.mxu1 %v3130_v30  ;;  %v2228_v33 = vrot.slane %v2227_v28, 4  ;;  %v2235_v40 = vshrl.u32 %v3455_v35, 16  ;;  %v2249_v49 = vshrl.u32 %v3457_v36, 16  ;;  %v2252_v50 = vshll.u32 %v3457_v36, 16  ;;  %v3461_v28 = vld [vmem:[%s3814_s16 + $0xd0] sm:$0xff] }
  0xcd   : > { %1898 = vmatmul.bf16.gmra.mxu2 %v1772_v31  ;;  %v2214_v27 = vrot.slane %v2213_v21, 4  ;;  %v2232_v34 = vrot.slane %v2230_v29, 5 }
  0xce   : > { %1927 = vmatmul.bf16.gmra.mxu3 %v1773_v38  ;;  %v2251_v1 = vrot.slane %v2249_v49, 4  ;;  %v2254_v2 = vrot.slane %v2252_v50, 5  ;;  %v3688_v49 = vld [vmem:[%s3814_s16 + $0x74] sm:$0xf] }
  0xcf   : > { %v2219_v39 = vsel %vm3859_vm2, %v2214_v27, %v2218_v32  ;;  %v2233_v48 = vsel %vm3859_vm2, %v2228_v33, %v2232_v34  ;;  %v3367_v50 = vld [vmem:[%s3814_s16 + $0x90] sm:$0xf0] }
  0xd0   : > { %v709_v51 = vpop.f32.mrf.mxu2  ;;  %v517_v57 = vpop.f32.mrf.mxu0  ;;  %v2352_v61 = vunpack.c.h.b16 %v2219_v39  ;;  %v3370_v0 = vor.u32 %v3688_v49, %v3367_v50  ;;  %v3464_v50 = vld [vmem:[%s3814_s16 + $0xf8] sm:$0x11] }
  0xd1   : > { %v738_v52 = vpop.f32.mrf.mxu3  ;;  %v710_v56 = vadd.f32 %v709_v51, %v545_v41  ;;  %v546_v58 = vpop.f32.mrf.mxu1  ;;  %v2238_v41 = vshll.u32 %v3455_v35, 16 }
  0xd2   : > { %v547_v62 = vadd.f32 %v546_v58, %v517_v57  ;;  %v2353_v57 = vunpack.c.l.b16 %v2233_v48  ;;  %v2237_v58 = vrot.slane %v2235_v40, 4 }
  0xd3   : > { %v4323_v63 = vadd.f32 %v738_v52, %v710_v56  ;;  %v2351_v56 = vunpack.c.l.b16 %v2219_v39  ;;  %v2240_v59 = vrot.slane %v2238_v41, 5  ;;  %v2280_v39 = vshll.u32 %v3461_v28, 16 }
  0xd5   : > { %v2367_v9 = vpack.c.b16 %v2353_v57, %v2351_v56  ;;  %v2241_v10 = vor.u32 %v2240_v59, %v2237_v58  ;;  %v3460_v56 = vld [vmem:[%s3814_s16 + $0xb8] sm:$0x11]  ;;  %v2282_v58 = vrot.slane %v2280_v39, 5  ;;  %v3375_v39 = vld [vmem:[%s3814_s16 + $0xd0] sm:$0xf0] }
  0xd6   : > { %v3462_v59 = vld [vmem:[%s3814_s16 + $0xd8] sm:$0x11] }
  0xd7   : > { %v2242_v22 = vrot.slane %v2241_v10, 4  ;;  %v2286_v10 = vshll.u32 %v3462_v59, 16 }
  0xd8   : > { %v711_v17 = vpop.f32.mrf.mxu2  ;;  %v520_v24 = vpop.f32.mrf.mxu0 }
  0xd9   : > { %v740_v18 = vpop.f32.mrf.mxu3  ;;  %v712_v23 = vadd.f32 %v711_v17, %v547_v62  ;;  %v549_v25 = vpop.f32.mrf.mxu1  ;;  %v2354_v62 = vunpack.c.h.b16 %v2233_v48  ;;  %v2255_v17 = vor.u32 %v2254_v2, %v2251_v1 }
  0xda   : > { %v550_v30 = vadd.f32 %v549_v25, %v520_v24 }
  0xdb   : > { %v4331_v31 = vadd.f32 %v740_v18, %v712_v23  ;;  %1548 = vmatmul.bf16.gmra.mxu0 %v3134_v16  ;;  %v2368_v16 = vpack.c.b16 %v2354_v62, %v2352_v61  ;;  %v2258_v18 = vshll.u32 %v3458_v3, 16  ;;  %v2246_v23 = vrot.slane %v2244_v11, 5 }
  0xdc   : > { %1577 = vmatmul.bf16.gmra.mxu1 %v3138_v19  ;;  %v2256_v24 = vrot.slane %v2255_v17, 4  ;;  %v2288_v17 = vrot.slane %v2286_v10, 5 }
  0xdd   : > { %1903 = vmatmul.bf16.gmra.mxu2 %v1774_v20  ;;  %v2260_v25 = vrot.slane %v2258_v18, 5  ;;  %v2247_v27 = vsel %vm3859_vm2, %v2242_v22, %v2246_v23  ;;  %v3463_v18 = vld [vmem:[%s3814_s16 + $0xf0] sm:$0xff] }
  0xde   : > { %1932 = vmatmul.bf16.gmra.mxu3 %v1775_v26  ;;  %v3459_v26 = vld [vmem:[%s3814_s16 + $0xb0] sm:$0xff] }
  0xdf   : > { %v2261_v34 = vsel %vm3859_vm2, %v2256_v24, %v2260_v25  ;;  %v2263_v35 = vshrl.u32 %v3459_v26, 16  ;;  %v2266_v36 = vshll.u32 %v3459_v26, 16  ;;  %v2291_v26 = vshrl.u32 %v3463_v18, 16 }
  0xe0   : > { %v714_v37 = vpop.f32.mrf.mxu2  ;;  %v522_v44 = vpop.f32.mrf.mxu0  ;;  %v2357_v48 = vunpack.c.l.b16 %v2261_v34  ;;  %v2358_v53 = vunpack.c.h.b16 %v2261_v34  ;;  %v3373_v34 = vld [vmem:[%s3814_s16 + $0xb0] sm:$0xf] }
  0xe1   : > { %v743_v38 = vpop.f32.mrf.mxu3  ;;  %v715_v43 = vadd.f32 %v714_v37, %v550_v30  ;;  %v551_v46 = vpop.f32.mrf.mxu1  ;;  %v2265_v54 = vrot.slane %v2263_v35, 4  ;;  %v2268_v55 = vrot.slane %v2266_v36, 5  ;;  %v3691_v35 = vld [vmem:[%s3814_s16 + $0xcc] sm:$0xf0] }
  0xe2   : > { %v552_v51 = vadd.f32 %v551_v46, %v522_v44  ;;  %v3689_v44 = vld [vmem:[%s3814_s16 + $0x8c] sm:$0xf0]  ;;  %v2355_v46 = vunpack.c.l.b16 %v2247_v27 }
  0xe3   : > { %v4339_v52 = vadd.f32 %v743_v38, %v715_v43  ;;  %v2277_v38 = vshrl.u32 %v3461_v28, 16  ;;  %v3365_v43 = vld [vmem:[%s3814_s16 + $0x70] sm:$0xf]  ;;  %v2294_v28 = vshll.u32 %v3463_v18, 16 }
  0xe4   : > { %v3366_v62 = vor.u32 %v3689_v44, %v3365_v43  ;;  %v2369_v1 = vpack.c.b16 %v2357_v48, %v2355_v46  ;;  %v2293_v44 = vrot.slane %v2291_v26, 4 }
  0xe5   : > { %v2279_v57 = vrot.slane %v2277_v38, 4  ;;  %v3690_v38 = vld [vmem:[%s3814_s16 + $0xb4] sm:$0xf]  ;;  %v2296_v46 = vrot.slane %v2294_v28, 5 }
  0xe8   : > { %v716_v5 = vpop.f32.mrf.mxu2  ;;  %v935_v13 = vpop.f32.mrf.mxu0 }
  0xe9   : > { %v745_v6 = vpop.f32.mrf.mxu3  ;;  %v717_v12 = vadd.f32 %v716_v5, %v552_v51  ;;  %v964_v14 = vpop.f32.mrf.mxu1  ;;  %v2356_v51 = vunpack.c.h.b16 %v2247_v27  ;;  %v2269_v5 = vor.u32 %v2268_v55, %v2265_v54  ;;  %v3374_v55 = vor.u32 %v3691_v35, %v3373_v34 }
  0xea   : > { %v965_v19 = vadd.f32 %v964_v14, %v935_v13 }
  0xeb   : > { %v4347_v20 = vadd.f32 %v745_v6, %v717_v12  ;;  %2132 = vmatmul.bf16.vlgmr.msrb.gmra.mxu0 %v3358_v4  ;;  %v2370_v4 = vpack.c.b16 %v2358_v53, %v2356_v51  ;;  %v2272_v6 = vshll.u32 %v3460_v56, 16  ;;  %v2270_v13 = vrot.slane %v2269_v5, 4  ;;  %v3466_v51 = vld [vmem:[%s3814_s16 + $0x118] sm:$0x11] }
  0xec   : > { %v984_v21 = vadd.f32 %v965_v19, %v4251_v15  ;;  %2161 = vmatmul.bf16.vlgmr.msrb.gmra.mxu1 %v3362_v7  ;;  %v3465_v19 = vld [vmem:[%s3814_s16 + $0x110] sm:$0xff]  ;;  %v3378_v56 = vor.u32 %v3690_v38, %v3375_v39 }
  0xed   : > { %2487 = vmatmul.bf16.vlgmr.msrb.gmra.mxu2 %v2367_v9  ;;  %v2283_v9 = vor.u32 %v2282_v58, %v2279_v57  ;;  %v2274_v14 = vrot.slane %v2272_v6, 5  ;;  %v2305_v27 = vshrl.u32 %v3465_v19, 16 }
  0xee   : > { %2516 = vmatmul.bf16.vlgmr.msrb.gmra.mxu3 %v2368_v16 }
  0xef   : > { %v2284_v16 = vrot.slane %v2283_v9, 4  ;;  %v2307_v48 = vrot.slane %v2305_v27, 4 }
  0xf0   : > { %v1290_v29 = vpop.f32.mrf.mxu2  ;;  %v937_v15 = vpop.f32.mrf.mxu0 }
  0xf1   : > { %v1319_v30 = vpop.f32.mrf.mxu3  ;;  %v966_v33 = vpop.f32.mrf.mxu1 }
  0xf2   : > { %v1320_v32 = vadd.f32 %v1319_v30, %v1290_v29  ;;  %v967_v37 = vadd.f32 %v966_v33, %v937_v15  ;;  %v2289_v30 = vsel %vm3859_vm2, %v2284_v16, %v2288_v17 }
  0xf3   : > { %v2362_v43 = vunpack.c.h.b16 %v2289_v30 }
  0xf4   : > { %v4356_v40 = vadd.f32 %v1320_v32, %v984_v21  ;;  %v985_v41 = vadd.f32 %v967_v37, %v4269_v47  ;;  %v2308_v32 = vshll.u32 %v3465_v19, 16 }
  0xf6   : > { %v2310_v49 = vrot.slane %v2308_v32, 5 }
  0xf8   : > { %v1292_v60 = vpop.f32.mrf.mxu2  ;;  %v940_v2 = vpop.f32.mrf.mxu0 }
  0xf9   : > { %v1321_v61 = vpop.f32.mrf.mxu3  ;;  %v969_v3 = vpop.f32.mrf.mxu1 }
  0xfa   : > { %v1322_v47 = vadd.f32 %v1321_v61, %v1292_v60  ;;  %v970_v7 = vadd.f32 %v969_v3, %v940_v2  ;;  %v2297_v61 = vor.u32 %v2296_v46, %v2293_v44 }
  0xfb   : > { %2137 = vmatmul.bf16.gmra.mxu0 %v3366_v62 }
  0xfc   : > { %v4365_v11 = vadd.f32 %v1322_v47, %v985_v41  ;;  %v986_v12 = vadd.f32 %v970_v7, %v4291_v8  ;;  %2166 = vmatmul.bf16.gmra.mxu1 %v3370_v0  ;;  %v2275_v8 = vsel %vm3859_vm2, %v2270_v13, %v2274_v14  ;;  %v2361_v41 = vunpack.c.l.b16 %v2289_v30 }
  0xfd   : > { %2492 = vmatmul.bf16.gmra.mxu2 %v2369_v1  ;;  %v2359_v36 = vunpack.c.l.b16 %v2275_v8  ;;  %v2360_v37 = vunpack.c.h.b16 %v2275_v8  ;;  %v2300_v0 = vshll.u32 %v3464_v50, 16  ;;  %v2311_v1 = vor.u32 %v2310_v49, %v2307_v48 }
  0xfe   : > { %2521 = vmatmul.bf16.gmra.mxu3 %v2370_v4  ;;  %v2314_v47 = vshll.u32 %v3466_v51, 16  ;;  %v2298_v4 = vrot.slane %v2297_v61, 4 }
  0xff   : > { %v2371_v59 = vpack.c.b16 %v2361_v41, %v2359_v36  ;;  %v2372_v60 = vpack.c.b16 %v2362_v43, %v2360_v37  ;;  %v2302_v5 = vrot.slane %v2300_v0, 5  ;;  %v2312_v6 = vrot.slane %v2311_v1, 4 }
 0x100   : > { %v1295_v21 = vpop.f32.mrf.mxu2  ;;  %v942_v24 = vpop.f32.mrf.mxu0  ;;  %v2316_v7 = vrot.slane %v2314_v47, 5 }
 0x101   : > { %v1324_v22 = vpop.f32.mrf.mxu3  ;;  %v971_v25 = vpop.f32.mrf.mxu1 }
 0x102   : > { %v1325_v23 = vadd.f32 %v1324_v22, %v1295_v21  ;;  %v972_v29 = vadd.f32 %v971_v25, %v942_v24  ;;  %v2317_v17 = vsel %vm3859_vm2, %v2312_v6, %v2316_v7  ;;  %v3381_v21 = vld [vmem:[%s3814_s16 + $0xf0] sm:$0xf]  ;;  %v3383_v24 = vld [vmem:[%s3814_s16 + $0x110] sm:$0xf0] }
 0x103   : > { %v3693_v22 = vld [vmem:[%s3814_s16 + $0x10c] sm:$0xf0]  ;;  %v2365_v8 = vunpack.c.l.b16 %v2317_v17  ;;  %v2366_v28 = vunpack.c.h.b16 %v2317_v17 }
 0x104   : > { %v4374_v15 = vadd.f32 %v1325_v23, %v986_v12  ;;  %v987_v33 = vadd.f32 %v972_v29, %v4315_v42  ;;  %v3692_v23 = vld [vmem:[%s3814_s16 + $0xf4] sm:$0xf]  ;;  %v3382_v27 = vor.u32 %v3693_v22, %v3381_v21  ;;  %s3565_s16 = sshll.u32 %s4501_s13, 6 }
 0x105   : > { %v3386_v32 = vor.u32 %v3692_v23, %v3383_v24  ;;  %s4449_s10 = scalar_lea.vmem %s4497_s3, %s3565_s16 }
 0x108   : > { %v1297_v53 = vpop.f32.mrf.mxu2  ;;  %v945_v42 = vpop.f32.mrf.mxu0 }
 0x109   : > { %v1326_v54 = vpop.f32.mrf.mxu3  ;;  %v974_v58 = vpop.f32.mrf.mxu1 }
 0x10a   : > { %v1327_v57 = vadd.f32 %v1326_v54, %v1297_v53  ;;  %v975_v62 = vadd.f32 %v974_v58, %v945_v42 }
 0x10b   : > { %2142 = vmatmul.bf16.gmra.mxu0 %v3374_v55 }
 0x10c   : > { %v4383_v2 = vadd.f32 %v1327_v57, %v987_v33  ;;  %v988_v3 = vadd.f32 %v975_v62, %v4323_v63  ;;  %2171 = vmatmul.bf16.gmra.mxu1 %v3378_v56  ;;  %v2303_v63 = vsel %vm3859_vm2, %v2298_v4, %v2302_v5 }
 0x10d   : > { %2497 = vmatmul.bf16.gmra.mxu2 %v2371_v59  ;;  %v2363_v25 = vunpack.c.l.b16 %v2303_v63  ;;  %v2364_v26 = vunpack.c.h.b16 %v2303_v63 }
 0x10e   : > { %2526 = vmatmul.bf16.gmra.mxu3 %v2372_v60 }
 0x10f   : > { %v2373_v35 = vpack.c.b16 %v2365_v8, %v2363_v25  ;;  %v2374_v36 = vpack.c.b16 %v2366_v28, %v2364_v26 }
 0x110   : > { %v1300_v9 = vpop.f32.mrf.mxu2  ;;  %v947_v13 = vpop.f32.mrf.mxu0 }
 0x111   : > { %v1329_v10 = vpop.f32.mrf.mxu3  ;;  %v976_v14 = vpop.f32.mrf.mxu1 }
 0x112   : > { %v1330_v12 = vadd.f32 %v1329_v10, %v1300_v9  ;;  %v977_v16 = vadd.f32 %v976_v14, %v947_v13 }
 0x114   : > { %v4390_v18 = vadd.f32 %v1330_v12, %v988_v3  ;;  %v989_v19 = vadd.f32 %v977_v16, %v4331_v31 }
 0x118   : > { %v1302_v29 = vpop.f32.mrf.mxu2  ;;  %v950_v34 = vpop.f32.mrf.mxu0 }
 0x119   : > { %v1331_v30 = vpop.f32.mrf.mxu3  ;;  %v979_v45 = vpop.f32.mrf.mxu1 }
 0x11a   : > { %v1332_v33 = vadd.f32 %v1331_v30, %v1302_v29  ;;  %v980_v37 = vadd.f32 %v979_v45, %v950_v34 }
 0x11b   : > { %2147 = vmatmul.bf16.gmra.mxu0 %v3382_v27 }
 0x11c   : > { %v4397_v38 = vadd.f32 %v1332_v33, %v989_v19  ;;  %v990_v31 = vadd.f32 %v980_v37, %v4339_v52  ;;  %2176 = vmatmul.bf16.gmra.mxu1 %v3386_v32  ;;  %v4444_v37 = vld [vmem:[%s4496_s2] ss:$0 sm:$0xff] }
 0x11d   : > { %2502 = vmatmul.bf16.gmra.mxu2 %v2373_v35 }
 0x11e   : > { %2531 = vmatmul.bf16.gmra.mxu3 %v2374_v36 }
 0x120   : > { %v1305_v39 = vpop.f32.mrf.mxu2  ;;  %v952_v44 = vpop.f32.mrf.mxu0 }
 0x121   : > { %v1334_v41 = vpop.f32.mrf.mxu3  ;;  %v981_v46 = vpop.f32.mrf.mxu1 }
 0x122   : > { %v1335_v43 = vadd.f32 %v1334_v41, %v1305_v39  ;;  %v982_v48 = vadd.f32 %v981_v46, %v952_v44 }
 0x124   : > { %v4400_v49 = vadd.f32 %v1335_v43, %v990_v31  ;;  %v991_v50 = vadd.f32 %v982_v48, %v4347_v20 }
 0x128   : > { %v1307_v51 = vpop.f32.mrf.mxu2  ;;  %v1534_v55 = vpop.f32.mrf.mxu0 }
 0x129   : > { %v1336_v53 = vpop.f32.mrf.mxu3  ;;  %v1563_v56 = vpop.f32.mrf.mxu1 }
 0x12a   : > { %v1337_v54 = vadd.f32 %v1336_v53, %v1307_v51  ;;  %v1564_v8 = vadd.f32 %v1563_v56, %v1534_v55 }
 0x12c   : > { %v4403_v52 = vadd.f32 %v1337_v54, %v991_v50  ;;  %v1583_v30 = vadd.f32 %v1564_v8, %v4356_v40 }
 0x130   : > { %v1889_v57 = vpop.f32.mrf.mxu2  ;;  %v1536_v58 = vpop.f32.mrf.mxu0 }
 0x131   : > { %v1918_v42 = vpop.f32.mrf.mxu3  ;;  %v1565_v59 = vpop.f32.mrf.mxu1 }
 0x132   : > { %v1919_v29 = vadd.f32 %v1918_v42, %v1889_v57  ;;  %v1566_v45 = vadd.f32 %v1565_v59, %v1536_v58 }
 0x134   : > { %v1938_v32 = vadd.f32 %v1919_v29, %v1583_v30  ;;  %v1584_v40 = vadd.f32 %v1566_v45, %v4365_v11 }
 0x138   : > { %v1891_v60 = vpop.f32.mrf.mxu2  ;;  %v1539_v62 = vpop.f32.mrf.mxu0 }
 0x139   : > { %v1920_v61 = vpop.f32.mrf.mxu3  ;;  %v1568_v0 = vpop.f32.mrf.mxu1 }
 0x13a   : > { %v1921_v41 = vadd.f32 %v1920_v61, %v1891_v60  ;;  %v1569_v53 = vadd.f32 %v1568_v0, %v1539_v62 }
 0x13c   : > { %v1939_v48 = vadd.f32 %v1921_v41, %v1584_v40  ;;  %v1585_v59 = vadd.f32 %v1569_v53, %v4374_v15 }
 0x140   : > { %v1894_v1 = vpop.f32.mrf.mxu2  ;;  %v1541_v3 = vpop.f32.mrf.mxu0 }
 0x141   : > { %v1923_v47 = vpop.f32.mrf.mxu3  ;;  %v1570_v4 = vpop.f32.mrf.mxu1 }
 0x142   : > { %v1924_v42 = vadd.f32 %v1923_v47, %v1894_v1 }
 0x144   : > { %v1940_v61 = vadd.f32 %v1924_v42, %v1585_v59 }
 0x148   : > { %v4405_v20 = vpop.f32.mrf.mxu2  ;;  %v4407_v6 = vpop.f32.mrf.mxu0 }
 0x149   : > { %v1925_v5 = vpop.f32.mrf.mxu3  ;;  %v4409_v7 = vpop.f32.mrf.mxu1 }
 0x150   : > { %v4411_v9 = vpop.f32.mrf.mxu2  ;;  %v4415_v12 = vpop.f32.mrf.mxu0 }
 0x151   : > { %v4413_v10 = vpop.f32.mrf.mxu3  ;;  %v4417_v13 = vpop.f32.mrf.mxu1 }
 0x158   : > { %v4419_v14 = vpop.f32.mrf.mxu2  ;;  %v4423_v63 = vpop.f32.mrf.mxu0 }
 0x159   : > { %v4421_v16 = vpop.f32.mrf.mxu3  ;;  %v4425_v17 = vpop.f32.mrf.mxu1 }
 0x160   : > { %v4427_v19 = vpop.f32.mrf.mxu2  ;;  %v4431_v22 = vpop.f32.mrf.mxu0 }
 0x161   : > { %v4429_v21 = vpop.f32.mrf.mxu3  ;;  %v4433_v23 = vpop.f32.mrf.mxu1 }
 0x168   : > { %v4435_v24 = vpop.f32.mrf.mxu2  ;;  %v2133_v26 = vpop.f32.mrf.mxu0 }
 0x169   : > { %v4437_v25 = vpop.f32.mrf.mxu3  ;;  %v2162_v28 = vpop.f32.mrf.mxu1 }
 0x16a   : > { %v2163_v27 = vadd.f32 %v2162_v28, %v2133_v26  ;;  %v1571_v28 = vadd.f32 %v1570_v4, %v1541_v3  ;;  %v1574_v3 = vadd.f32 %v4409_v7, %v4407_v6  ;;  %v1576_v6 = vadd.f32 %v4417_v13, %v4415_v12 }
 0x16b   : > { %v1579_v12 = vadd.f32 %v4425_v17, %v4423_v63  ;;  %v1581_v63 = vadd.f32 %v4433_v23, %v4431_v22 }
 0x16c   : > { %v2182_v35 = vadd.f32 %v2163_v27, %v1938_v32  ;;  %v1926_v27 = vadd.f32 %v1925_v5, %v4405_v20  ;;  %v1586_v1 = vadd.f32 %v1571_v28, %v4383_v2  ;;  %v1929_v20 = vadd.f32 %v4413_v10, %v4411_v9 }
 0x16d   : > { %v1587_v2 = vadd.f32 %v1574_v3, %v4390_v18  ;;  %v1931_v9 = vadd.f32 %v4421_v16, %v4419_v14  ;;  %v1588_v18 = vadd.f32 %v1576_v6, %v4397_v38  ;;  %v1934_v14 = vadd.f32 %v4429_v21, %v4427_v19 }
 0x16e   : > { %v1589_v38 = vadd.f32 %v1579_v12, %v4400_v49  ;;  %v1936_v19 = vadd.f32 %v4437_v25, %v4435_v24  ;;  %v1590_v21 = vadd.f32 %v1581_v63, %v4403_v52 }
 0x170   : > { %v2488_v33 = vpop.f32.mrf.mxu2  ;;  %v2135_v31 = vpop.f32.mrf.mxu0 }
 0x171   : > { %v2517_v34 = vpop.f32.mrf.mxu3  ;;  %v2164_v39 = vpop.f32.mrf.mxu1 }
 0x172   : > { %v2518_v36 = vadd.f32 %v2517_v34, %v2488_v33  ;;  %v2165_v46 = vadd.f32 %v2164_v39, %v2135_v31  ;;  %v1941_v33 = vadd.f32 %v1926_v27, %v1586_v1 }
 0x174   : > { %v2537_v43 = vadd.f32 %v2518_v36, %v2182_v35  ;;  %v2183_v54 = vadd.f32 %v2165_v46, %v1939_v48 }
 0x176   : > { %v2548_v44 = vadd.f32 %v4444_v37, %v2537_v43  ;;  %v1942_v43 = vadd.f32 %v1929_v20, %v1587_v2 }
 0x178   : > { %2556 = vst [vmem:[%s4449_s10] sm:$0xff] %v2548_v44  ;;  %v2490_v50 = vpop.f32.mrf.mxu2  ;;  %v2138_v56 = vpop.f32.mrf.mxu0 }
 0x179   : > { %v2519_v51 = vpop.f32.mrf.mxu3  ;;  %v2167_v57 = vpop.f32.mrf.mxu1 }
 0x17a   : > { %v2520_v55 = vadd.f32 %v2519_v51, %v2490_v50  ;;  %v2168_v11 = vadd.f32 %v2167_v57, %v2138_v56 }
 0x17c   : > { %v2538_v58 = vadd.f32 %v2520_v55, %v2183_v54  ;;  %v2184_v29 = vadd.f32 %v2168_v11, %v1940_v61  ;;  %v1943_v54 = vadd.f32 %v1931_v9, %v1588_v18  ;;  %v1944_v11 = vadd.f32 %v1934_v14, %v1589_v38 }
 0x17e   : > { %v2549_v60 = vadd.f32 %v4444_v37, %v2538_v58 }
 0x180   : > { %2557 = vst [vmem:[%s4449_s10 + $0x8] sm:$0xff] %v2549_v60  ;;  %v2493_v8 = vpop.f32.mrf.mxu2  ;;  %v2140_v62 = vpop.f32.mrf.mxu0 }
 0x181   : > { %v2522_v26 = vpop.f32.mrf.mxu3  ;;  %v2169_v0 = vpop.f32.mrf.mxu1 }
 0x182   : > { %v2523_v30 = vadd.f32 %v2522_v26, %v2493_v8  ;;  %v2170_v47 = vadd.f32 %v2169_v0, %v2140_v62  ;;  %v1945_v0 = vadd.f32 %v1936_v19, %v1590_v21 }
 0x184   : > { %v2539_v32 = vadd.f32 %v2523_v30, %v2184_v29  ;;  %v2185_v4 = vadd.f32 %v2170_v47, %v1941_v33 }
 0x186   : > { %v2550_v15 = vadd.f32 %v4444_v37, %v2539_v32 }
 0x188   : > { %2558 = vst [vmem:[%s4449_s10 + $0x10] sm:$0xff] %v2550_v15  ;;  %v2495_v34 = vpop.f32.mrf.mxu2  ;;  %v2143_v36 = vpop.f32.mrf.mxu0 }
 0x189   : > { %v2524_v45 = vpop.f32.mrf.mxu3  ;;  %v2172_v31 = vpop.f32.mrf.mxu1 }
 0x18a   : > { %v2525_v35 = vadd.f32 %v2524_v45, %v2495_v34  ;;  %v2173_v41 = vadd.f32 %v2172_v31, %v2143_v36 }
 0x18c   : > { %v2540_v5 = vadd.f32 %v2525_v35, %v2185_v4  ;;  %v2186_v7 = vadd.f32 %v2173_v41, %v1942_v43 }
 0x18e   : > { %v2551_v39 = vadd.f32 %v4444_v37, %v2540_v5 }
 0x190   : > { %2559 = vst [vmem:[%s4449_s10 + $0x18] sm:$0xff] %v2551_v39  ;;  %v2498_v40 = vpop.f32.mrf.mxu2  ;;  %v2145_v48 = vpop.f32.mrf.mxu0 }
 0x191   : > { %v2527_v44 = vpop.f32.mrf.mxu3  ;;  %v2174_v50 = vpop.f32.mrf.mxu1 }
 0x192   : > { %v2528_v46 = vadd.f32 %v2527_v44, %v2498_v40  ;;  %v2175_v53 = vadd.f32 %v2174_v50, %v2145_v48 }
 0x194   : > { %v2541_v10 = vadd.f32 %v2528_v46, %v2186_v7  ;;  %v2187_v13 = vadd.f32 %v2175_v53, %v1943_v54 }
 0x196   : > { %v2552_v51 = vadd.f32 %v4444_v37, %v2541_v10 }
 0x198   : > { %2560 = vst [vmem:[%s4449_s10 + $0x20] sm:$0xff] %v2552_v51  ;;  %v2500_v55 = vpop.f32.mrf.mxu2  ;;  %v2148_v42 = vpop.f32.mrf.mxu0 }
 0x199   : > { %v2529_v56 = vpop.f32.mrf.mxu3  ;;  %v2177_v58 = vpop.f32.mrf.mxu1 }
 0x19a   : > { %v2530_v57 = vadd.f32 %v2529_v56, %v2500_v55  ;;  %v2178_v60 = vadd.f32 %v2177_v58, %v2148_v42 }
 0x19c   : > { %v2542_v16 = vadd.f32 %v2530_v57, %v2187_v13  ;;  %v2188_v17 = vadd.f32 %v2178_v60, %v1944_v11 }
 0x19e   : > { %v2553_v59 = vadd.f32 %v4444_v37, %v2542_v16 }
 0x1a0   : > { %2561 = vst [vmem:[%s4449_s10 + $0x28] sm:$0xff] %v2553_v59  ;;  %v2503_v61 = vpop.f32.mrf.mxu2  ;;  %v2150_v28 = vpop.f32.mrf.mxu0 }
 0x1a1   : > { %v2532_v8 = vpop.f32.mrf.mxu3  ;;  %v2179_v29 = vpop.f32.mrf.mxu1 }
 0x1a2   : > { %v2533_v26 = vadd.f32 %v2532_v8, %v2503_v61  ;;  %v2180_v62 = vadd.f32 %v2179_v29, %v2150_v28 }
 0x1a4   : > { %v2543_v49 = vadd.f32 %v2533_v26, %v2188_v17  ;;  %v2189_v1 = vadd.f32 %v2180_v62, %v1945_v0 }
 0x1a6   : > { %v2554_v30 = vadd.f32 %v4444_v37, %v2543_v49 }
 0x1a8   : > { %2562 = vst [vmem:[%s4449_s10 + $0x30] sm:$0xff] %v2554_v30  ;;  %v2505_v27 = vpop.f32.mrf.mxu2 }
 0x1a9   : > { %v2534_v32 = vpop.f32.mrf.mxu3 }
 0x1aa   : > { %v2535_v22 = vadd.f32 %v2534_v32, %v2505_v27 }
 0x1ac   : > { %v2544_v23 = vadd.f32 %v2535_v22, %v2189_v1 }
 0x1ae   : > { %v2555_v15 = vadd.f32 %v4444_v37, %v2544_v23 }
 0x1b0   : > { %2563 = vst [vmem:[%s4449_s10 + $0x38] sm:$0xff] %v2555_v15 }
 0x1b1 PF: > { %s13_s12 = sadd.s32 1, %s3742_s12  }
 0x1b2   : > { %p10_p4 = scmp.ge.s32.totalorder %s13_s12, 4  }
 0x1b4   :  { %12 = sbr.rel (!%p10_p4) target bundleno = 1 (0x1), region = 72 }

</bundles_post_ra>
